<compile_context>
chip_gen: v7x
topology: tpu7x:2x2x1
jax: 0.10.0
libtpu: 0.0.40
codegen_flags: <defaults>
</compile_context>

<pallas_src>
import jax
import jax.numpy as jnp
from jax import lax
from jax.experimental import pallas as pl
from jax.experimental.pallas import tpu as pltpu


# ---------------------------------------------------------------------------
# Shared in-kernel helpers.
# ---------------------------------------------------------------------------
def _input_projection(x_ref, wih_ref, bih_ref, gi_scr):
    """Hoisted input projection for all timesteps / directions / gates.

    x_ref:   (T*B, Ein)            (time-major flattened)
    wih_ref: (NDIR, 3, Ein, H)     bf16
    bih_ref: (NDIR, 3, 1, H)       f32
    gi_scr:  (NDIR, 3, T*B, H)     f32 VMEM scratch
    """
    ndir = wih_ref.shape[0]
    xb = x_ref[...].astype(jnp.bfloat16)
    for d in range(ndir):
        for g in range(3):
            gi_scr[d, g] = (
                jnp.dot(xb, wih_ref[d, g], preferred_element_type=jnp.float32)
                + bih_ref[d, g]
            )


def _gru_cell(h, gi, whh_ref, bhh_ref, d):
    """One GRU cell update (PyTorch semantics). h: (B, H) f32, gi: 3x (B, H) f32."""
    hb = h.astype(jnp.bfloat16)
    gh = [
        jnp.dot(hb, whh_ref[d, g], preferred_element_type=jnp.float32)
        + bhh_ref[d, g]
        for g in range(3)
    ]
    r = jax.nn.sigmoid(gi[0] + gh[0])
    z = jax.nn.sigmoid(gi[1] + gh[1])
    n = jnp.tanh(gi[2] + r * gh[2])          # b_hn already inside gh[2] -> r*(Whn h + bhn)
    return (1.0 - z) * n + z * h


# ---------------------------------------------------------------------------
# Fused bidirectional GRU layer kernel (writes full (T, B, NDIR*H) sequence).
# ---------------------------------------------------------------------------
def bigru_layer_kernel(x_ref, wih_ref, whh_ref, bih_ref, bhh_ref, out_ref, gi_scr):
    ndir = wih_ref.shape[0]
    H = whh_ref.shape[-1]
    T, B = out_ref.shape[0], out_ref.shape[1]

    _input_projection(x_ref, wih_ref, bih_ref, gi_scr)

    def step(t, carry):
        hs = list(carry)
        new = []
        for d in range(ndir):
            tt = t if d == 0 else (T - 1) - t          # backward dir walks reversed time
            row = pl.multiple_of(tt * B, B)
            gi = [gi_scr[d, g, pl.ds(row, B), :] for g in range(3)]
            h_new = _gru_cell(hs[d], gi, whh_ref, bhh_ref, d)
            out_ref[tt, :, d * H:(d + 1) * H] = h_new.astype(out_ref.dtype)
            new.append(h_new)
        return tuple(new)

    h0 = tuple(jnp.zeros((B, H), jnp.float32) for _ in range(ndir))
    lax.fori_loop(0, T, step, h0, unroll=True)


def bigru_layer(x_flat, wih, whh, bih, bhh, T, B):
    TB, Ein = x_flat.shape
    ndir = whh.shape[0]
    H = whh.shape[-1]
    return pl.pallas_call(
        bigru_layer_kernel,
        out_shape=jax.ShapeDtypeStruct((T, B, ndir * H), jnp.float32),
        grid_spec=pltpu.PrefetchScalarGridSpec(
            num_scalar_prefetch=0,
            grid=(1,),
            in_specs=[
                pl.BlockSpec((TB, Ein), lambda i: (0, 0)),
                pl.BlockSpec((ndir, 3, Ein, H), lambda i: (0, 0, 0, 0)),
                pl.BlockSpec((ndir, 3, H, H), lambda i: (0, 0, 0, 0)),
                pl.BlockSpec((ndir, 3, 1, H), lambda i: (0, 0, 0, 0)),
                pl.BlockSpec((ndir, 3, 1, H), lambda i: (0, 0, 0, 0)),
            ],
            out_specs=pl.BlockSpec((T, B, ndir * H), lambda i: (0, 0, 0)),
            scratch_shapes=[pltpu.VMEM((ndir, 3, TB, H), jnp.float32)],
        ),
        compiler_params=pltpu.CompilerParams(dimension_semantics=("arbitrary",)),
    )(x_flat, wih, whh, bih, bhh)


# ---------------------------------------------------------------------------
# Last GRU layer fused with max-over-time + Linear head -> (B, num_classes).
# The FC weight is split per direction so no (B, 2H) concat is ever formed:
#   logits = max_fwd @ Wf + max_bwd @ Wb + b.
# ---------------------------------------------------------------------------
def bigru_head_kernel(x_ref, wih_ref, whh_ref, bih_ref, bhh_ref,
                      fcw_ref, fcb_ref, o_ref, gi_scr):
    ndir = wih_ref.shape[0]
    H = whh_ref.shape[-1]
    B, C = o_ref.shape
    T = x_ref.shape[0] // B

    _input_projection(x_ref, wih_ref, bih_ref, gi_scr)

    def step(t, carry):
        hs, ms = list(carry[0]), list(carry[1])
        for d in range(ndir):
            tt = t if d == 0 else (T - 1) - t
            row = pl.multiple_of(tt * B, B)
            gi = [gi_scr[d, g, pl.ds(row, B), :] for g in range(3)]
            h_new = _gru_cell(hs[d], gi, whh_ref, bhh_ref, d)
            hs[d] = h_new
            ms[d] = jnp.maximum(ms[d], h_new)      # running max over time
        return (tuple(hs), tuple(ms))

    h0 = tuple(jnp.zeros((B, H), jnp.float32) for _ in range(ndir))
    m0 = tuple(jnp.full((B, H), -jnp.inf, jnp.float32) for _ in range(ndir))
    _, ms = lax.fori_loop(0, T, step, (h0, m0), unroll=True)

    acc = jnp.zeros((B, C), jnp.float32)
    for d in range(ndir):
        acc = acc + jnp.dot(ms[d].astype(jnp.bfloat16), fcw_ref[d],
                            preferred_element_type=jnp.float32)
    o_ref[...] = (acc + fcb_ref[...]).astype(o_ref.dtype)


def bigru_head(x_flat, wih, whh, bih, bhh, fcw, fcb, T, B):
    TB, Ein = x_flat.shape
    ndir = whh.shape[0]
    H = whh.shape[-1]
    C = fcw.shape[-1]
    return pl.pallas_call(
        bigru_head_kernel,
        out_shape=jax.ShapeDtypeStruct((B, C), jnp.float32),
        grid_spec=pltpu.PrefetchScalarGridSpec(
            num_scalar_prefetch=0,
            grid=(1,),
            in_specs=[
                pl.BlockSpec((TB, Ein), lambda i: (0, 0)),
                pl.BlockSpec((ndir, 3, Ein, H), lambda i: (0, 0, 0, 0)),
                pl.BlockSpec((ndir, 3, H, H), lambda i: (0, 0, 0, 0)),
                pl.BlockSpec((ndir, 3, 1, H), lambda i: (0, 0, 0, 0)),
                pl.BlockSpec((ndir, 3, 1, H), lambda i: (0, 0, 0, 0)),
                pl.BlockSpec((ndir, H, C), lambda i: (0, 0, 0)),
                pl.BlockSpec((1, C), lambda i: (0, 0)),
            ],
            out_specs=pl.BlockSpec((B, C), lambda i: (0, 0)),
            scratch_shapes=[pltpu.VMEM((ndir, 3, TB, H), jnp.float32)],
        ),
        compiler_params=pltpu.CompilerParams(dimension_semantics=("arbitrary",)),
    )(x_flat, wih, whh, bih, bhh, fcw, fcb)


# ---------------------------------------------------------------------------
# Full forward pass. Embedding gather stays as JAX glue (as in the PyTorch
# module's nn.Embedding lookup); it is gathered directly in time-major order so
# no activation transpose is ever materialized.
# ---------------------------------------------------------------------------
def salary_rnn_forward(params, x_ids):
    B, T = x_ids.shape
    emb_t = jnp.take(params["emb"], x_ids.T, axis=0)   # (T, B, E), time-major gather
    h = emb_t.reshape(T * B, -1)                        # (T*B, E) -- free view

    layers = params["layers"]
    for p in layers[:-1]:
        out = bigru_layer(h, p["wih"], p["whh"], p["bih"], p["bhh"], T, B)
        h = out.reshape(T * B, -1)                      # (T*B, NDIR*H) -- free view

    p = layers[-1]
    return bigru_head(h, p["wih"], p["whh"], p["bih"], p["bhh"],
                      params["fcw"], params["fcb"], T, B)


# ---------------------------------------------------------------------------
# Deterministic parameter init (mirrors nn.Embedding / nn.GRU / nn.Linear).
# Matmul weights are stored bf16 (f32 accumulation in-kernel); biases f32.
# ---------------------------------------------------------------------------
def init_params(key, vocab_size, emb_size, hidden_size, num_layers,
                num_classes, bidirectional):
    ndir = 2 if bidirectional else 1
    H = hidden_size
    params = {"layers": []}

    key, k_emb = jax.random.split(key)
    params["emb"] = jax.random.normal(k_emb, (vocab_size, emb_size), jnp.float32)

    stdv = float(1.0 / (H ** 0.5))
    for layer in range(num_layers):
        in_size = emb_size if layer == 0 else H * ndir
        key, k1, k2, k3, k4 = jax.random.split(key, 5)
        wih = jax.random.uniform(k1, (ndir, 3, in_size, H), jnp.float32, -stdv, stdv)
        whh = jax.random.uniform(k2, (ndir, 3, H, H), jnp.float32, -stdv, stdv)
        bih = jax.random.uniform(k3, (ndir, 3, 1, H), jnp.float32, -stdv, stdv)
        bhh = jax.random.uniform(k4, (ndir, 3, 1, H), jnp.float32, -stdv, stdv)
        params["layers"].append({
            "wih": wih.astype(jnp.bfloat16),   # per-gate (in_size, H) -> lane-aligned
            "whh": whh.astype(jnp.bfloat16),   # per-gate (H, H)
            "bih": bih,
            "bhh": bhh,
        })

    fc_in = H * ndir
    bound = float(1.0 / (fc_in ** 0.5))
    key, k5, k6 = jax.random.split(key, 3)
    fcw = jax.random.uniform(k5, (ndir, H, num_classes), jnp.float32, -bound, bound)
    fcb = jax.random.uniform(k6, (1, num_classes), jnp.float32, -bound, bound)
    params["fcw"] = fcw.astype(jnp.bfloat16)   # fc weight split per direction
    params["fcb"] = fcb
    return params


if __name__ == "__main__":
    vocab_size, emb_size, hidden_size = 50, 16, 32
    num_layers, num_classes, bidirectional = 2, 4, True
    B, T = 2, 8

    key = jax.random.PRNGKey(0)
    key, k_params, k_x = jax.random.split(key, 3)
    params = init_params(k_params, vocab_size, emb_size, hidden_size,
                         num_layers, num_classes, bidirectional)
    x_ids = jax.random.randint(k_x, (B, T), 0, vocab_size, dtype=jnp.int32)

    fwd = jax.jit(salary_rnn_forward)
    out = fwd(params, x_ids)
    out = jax.block_until_ready(out)
    assert out.shape == (B, num_classes), out.shape
    print("KERNEL_OK")
</pallas_src>

<mosaic_0001>
module attributes {stable_mosaic.version = 11 : i64} {
  func.func @bigru_head_kernel(%arg0: i32, %arg1: memref<16x64xf32, #tpu.memory_space<vmem>>, %arg2: memref<2x3x64x32xbf16, #tpu.memory_space<vmem>>, %arg3: memref<2x3x32x32xbf16, #tpu.memory_space<vmem>>, %arg4: memref<2x3x1x32xf32, #tpu.memory_space<vmem>>, %arg5: memref<2x3x1x32xf32, #tpu.memory_space<vmem>>, %arg6: memref<2x32x4xbf16, #tpu.memory_space<vmem>>, %arg7: memref<1x4xf32, #tpu.memory_space<vmem>>, %arg8: memref<2x4xf32, #tpu.memory_space<vmem>>, %arg9: memref<2x3x16x32xf32, #tpu.memory_space<vmem>>) attributes {dimension_semantics = [#tpu.dimension_semantics<arbitrary>], iteration_bounds = array<i64: 1>, scalar_prefetch = 0 : i64, scratch_operands = 1 : i64, tpu.core_type = #tpu.core_type<tc>, window_params = [{pipeline_mode = #tpu.pipeline_mode<synchronous>, transform_indices = @transform_0, window_bounds = array<i64: 16, 64>}, {pipeline_mode = #tpu.pipeline_mode<synchronous>, transform_indices = @transform_1, window_bounds = array<i64: 2, 3, 64, 32>}, {pipeline_mode = #tpu.pipeline_mode<synchronous>, transform_indices = @transform_2, window_bounds = array<i64: 2, 3, 32, 32>}, {pipeline_mode = #tpu.pipeline_mode<synchronous>, transform_indices = @transform_3, window_bounds = array<i64: 2, 3, 1, 32>}, {pipeline_mode = #tpu.pipeline_mode<synchronous>, transform_indices = @transform_4, window_bounds = array<i64: 2, 3, 1, 32>}, {pipeline_mode = #tpu.pipeline_mode<synchronous>, transform_indices = @transform_5, window_bounds = array<i64: 2, 32, 4>}, {pipeline_mode = #tpu.pipeline_mode<synchronous>, transform_indices = @transform_6, window_bounds = array<i64: 1, 4>}, {pipeline_mode = #tpu.pipeline_mode<synchronous>, transform_indices = @transform_7, window_bounds = array<i64: 2, 4>}]} {
    %c0 = arith.constant 0 : index
    %c0_0 = arith.constant 0 : index
    %0 = vector.load %arg1[%c0, %c0_0] : memref<16x64xf32, #tpu.memory_space<vmem>>, vector<16x64xf32>
    %1 = arith.truncf %0 : vector<16x64xf32> to vector<16x64xbf16>
    %c0_1 = arith.constant 0 : index
    %c0_2 = arith.constant 0 : index
    %c0_3 = arith.constant 0 : index
    %c0_4 = arith.constant 0 : index
    %2 = vector.load %arg2[%c0_1, %c0_2, %c0_3, %c0_4] : memref<2x3x64x32xbf16, #tpu.memory_space<vmem>>, vector<1x1x64x32xbf16>
    %3 = vector.shape_cast %2 : vector<1x1x64x32xbf16> to vector<64x32xbf16>
    %cst = arith.constant dense<0.000000e+00> : vector<16x32xf32>
    %4 = tpu.matmul %1, %3, %cst {dimension_numbers = #tpu.dot_dimension_numbers<[1], [0], [0], [1], [0, 0, 1, 1], [], []>} : vector<16x64xbf16>, vector<64x32xbf16>, vector<16x32xf32> -> vector<16x32xf32>
    %c0_5 = arith.constant 0 : index
    %c0_6 = arith.constant 0 : index
    %c0_7 = arith.constant 0 : index
    %c0_8 = arith.constant 0 : index
    %5 = vector.load %arg4[%c0_5, %c0_6, %c0_7, %c0_8] : memref<2x3x1x32xf32, #tpu.memory_space<vmem>>, vector<1x1x1x32xf32>
    %6 = vector.shape_cast %5 : vector<1x1x1x32xf32> to vector<1x32xf32>
    %7 = vector.broadcast %6 : vector<1x32xf32> to vector<16x32xf32>
    %8 = arith.addf %4, %7 : vector<16x32xf32>
    %c0_9 = arith.constant 0 : index
    %c0_10 = arith.constant 0 : index
    %c0_11 = arith.constant 0 : index
    %c0_12 = arith.constant 0 : index
    %9 = vector.load %arg9[%c0_9, %c0_10, %c0_11, %c0_12] : memref<2x3x16x32xf32, #tpu.memory_space<vmem>>, vector<1x1x16x32xf32>
    %10 = vector.shape_cast %9 : vector<1x1x16x32xf32> to vector<16x32xf32>
    %11 = vector.shape_cast %8 : vector<16x32xf32> to vector<1x1x16x32xf32>
    tpu.vector_store %arg9[%c0_9, %c0_10, %c0_11, %c0_12], %11 {strides = array<i32>} : memref<2x3x16x32xf32, #tpu.memory_space<vmem>>, vector<1x1x16x32xf32>,
    %c0_13 = arith.constant 0 : index
    %c1 = arith.constant 1 : index
    %c0_14 = arith.constant 0 : index
    %c0_15 = arith.constant 0 : index
    %12 = vector.load %arg2[%c0_13, %c1, %c0_14, %c0_15] : memref<2x3x64x32xbf16, #tpu.memory_space<vmem>>, vector<1x1x64x32xbf16>
    %13 = vector.shape_cast %12 : vector<1x1x64x32xbf16> to vector<64x32xbf16>
    %cst_16 = arith.constant dense<0.000000e+00> : vector<16x32xf32>
    %14 = tpu.matmul %1, %13, %cst_16 {dimension_numbers = #tpu.dot_dimension_numbers<[1], [0], [0], [1], [0, 0, 1, 1], [], []>} : vector<16x64xbf16>, vector<64x32xbf16>, vector<16x32xf32> -> vector<16x32xf32>
    %c0_17 = arith.constant 0 : index
    %c1_18 = arith.constant 1 : index
    %c0_19 = arith.constant 0 : index
    %c0_20 = arith.constant 0 : index
    %15 = vector.load %arg4[%c0_17, %c1_18, %c0_19, %c0_20] : memref<2x3x1x32xf32, #tpu.memory_space<vmem>>, vector<1x1x1x32xf32>
    %16 = vector.shape_cast %15 : vector<1x1x1x32xf32> to vector<1x32xf32>
    %17 = vector.broadcast %16 : vector<1x32xf32> to vector<16x32xf32>
    %18 = arith.addf %14, %17 : vector<16x32xf32>
    %c0_21 = arith.constant 0 : index
    %c1_22 = arith.constant 1 : index
    %c0_23 = arith.constant 0 : index
    %c0_24 = arith.constant 0 : index
    %19 = vector.load %arg9[%c0_21, %c1_22, %c0_23, %c0_24] : memref<2x3x16x32xf32, #tpu.memory_space<vmem>>, vector<1x1x16x32xf32>
    %20 = vector.shape_cast %19 : vector<1x1x16x32xf32> to vector<16x32xf32>
    %21 = vector.shape_cast %18 : vector<16x32xf32> to vector<1x1x16x32xf32>
    tpu.vector_store %arg9[%c0_21, %c1_22, %c0_23, %c0_24], %21 {strides = array<i32>} : memref<2x3x16x32xf32, #tpu.memory_space<vmem>>, vector<1x1x16x32xf32>,
    %c0_25 = arith.constant 0 : index
    %c2 = arith.constant 2 : index
    %c0_26 = arith.constant 0 : index
    %c0_27 = arith.constant 0 : index
    %22 = vector.load %arg2[%c0_25, %c2, %c0_26, %c0_27] : memref<2x3x64x32xbf16, #tpu.memory_space<vmem>>, vector<1x1x64x32xbf16>
    %23 = vector.shape_cast %22 : vector<1x1x64x32xbf16> to vector<64x32xbf16>
    %cst_28 = arith.constant dense<0.000000e+00> : vector<16x32xf32>
    %24 = tpu.matmul %1, %23, %cst_28 {dimension_numbers = #tpu.dot_dimension_numbers<[1], [0], [0], [1], [0, 0, 1, 1], [], []>} : vector<16x64xbf16>, vector<64x32xbf16>, vector<16x32xf32> -> vector<16x32xf32>
    %c0_29 = arith.constant 0 : index
    %c2_30 = arith.constant 2 : index
    %c0_31 = arith.constant 0 : index
    %c0_32 = arith.constant 0 : index
    %25 = vector.load %arg4[%c0_29, %c2_30, %c0_31, %c0_32] : memref<2x3x1x32xf32, #tpu.memory_space<vmem>>, vector<1x1x1x32xf32>
    %26 = vector.shape_cast %25 : vector<1x1x1x32xf32> to vector<1x32xf32>
    %27 = vector.broadcast %26 : vector<1x32xf32> to vector<16x32xf32>
    %28 = arith.addf %24, %27 : vector<16x32xf32>
    %c0_33 = arith.constant 0 : index
    %c2_34 = arith.constant 2 : index
    %c0_35 = arith.constant 0 : index
    %c0_36 = arith.constant 0 : index
    %29 = vector.load %arg9[%c0_33, %c2_34, %c0_35, %c0_36] : memref<2x3x16x32xf32, #tpu.memory_space<vmem>>, vector<1x1x16x32xf32>
    %30 = vector.shape_cast %29 : vector<1x1x16x32xf32> to vector<16x32xf32>
    %31 = vector.shape_cast %28 : vector<16x32xf32> to vector<1x1x16x32xf32>
    tpu.vector_store %arg9[%c0_33, %c2_34, %c0_35, %c0_36], %31 {strides = array<i32>} : memref<2x3x16x32xf32, #tpu.memory_space<vmem>>, vector<1x1x16x32xf32>,
    %c1_37 = arith.constant 1 : index
    %c0_38 = arith.constant 0 : index
    %c0_39 = arith.constant 0 : index
    %c0_40 = arith.constant 0 : index
    %32 = vector.load %arg2[%c1_37, %c0_38, %c0_39, %c0_40] : memref<2x3x64x32xbf16, #tpu.memory_space<vmem>>, vector<1x1x64x32xbf16>
    %33 = vector.shape_cast %32 : vector<1x1x64x32xbf16> to vector<64x32xbf16>
    %cst_41 = arith.constant dense<0.000000e+00> : vector<16x32xf32>
    %34 = tpu.matmul %1, %33, %cst_41 {dimension_numbers = #tpu.dot_dimension_numbers<[1], [0], [0], [1], [0, 0, 1, 1], [], []>} : vector<16x64xbf16>, vector<64x32xbf16>, vector<16x32xf32> -> vector<16x32xf32>
    %c1_42 = arith.constant 1 : index
    %c0_43 = arith.constant 0 : index
    %c0_44 = arith.constant 0 : index
    %c0_45 = arith.constant 0 : index
    %35 = vector.load %arg4[%c1_42, %c0_43, %c0_44, %c0_45] : memref<2x3x1x32xf32, #tpu.memory_space<vmem>>, vector<1x1x1x32xf32>
    %36 = vector.shape_cast %35 : vector<1x1x1x32xf32> to vector<1x32xf32>
    %37 = vector.broadcast %36 : vector<1x32xf32> to vector<16x32xf32>
    %38 = arith.addf %34, %37 : vector<16x32xf32>
    %c1_46 = arith.constant 1 : index
    %c0_47 = arith.constant 0 : index
    %c0_48 = arith.constant 0 : index
    %c0_49 = arith.constant 0 : index
    %39 = vector.load %arg9[%c1_46, %c0_47, %c0_48, %c0_49] : memref<2x3x16x32xf32, #tpu.memory_space<vmem>>, vector<1x1x16x32xf32>
    %40 = vector.shape_cast %39 : vector<1x1x16x32xf32> to vector<16x32xf32>
    %41 = vector.shape_cast %38 : vector<16x32xf32> to vector<1x1x16x32xf32>
    tpu.vector_store %arg9[%c1_46, %c0_47, %c0_48, %c0_49], %41 {strides = array<i32>} : memref<2x3x16x32xf32, #tpu.memory_space<vmem>>, vector<1x1x16x32xf32>,
    %c1_50 = arith.constant 1 : index
    %c1_51 = arith.constant 1 : index
    %c0_52 = arith.constant 0 : index
    %c0_53 = arith.constant 0 : index
    %42 = vector.load %arg2[%c1_50, %c1_51, %c0_52, %c0_53] : memref<2x3x64x32xbf16, #tpu.memory_space<vmem>>, vector<1x1x64x32xbf16>
    %43 = vector.shape_cast %42 : vector<1x1x64x32xbf16> to vector<64x32xbf16>
    %cst_54 = arith.constant dense<0.000000e+00> : vector<16x32xf32>
    %44 = tpu.matmul %1, %43, %cst_54 {dimension_numbers = #tpu.dot_dimension_numbers<[1], [0], [0], [1], [0, 0, 1, 1], [], []>} : vector<16x64xbf16>, vector<64x32xbf16>, vector<16x32xf32> -> vector<16x32xf32>
    %c1_55 = arith.constant 1 : index
    %c1_56 = arith.constant 1 : index
    %c0_57 = arith.constant 0 : index
    %c0_58 = arith.constant 0 : index
    %45 = vector.load %arg4[%c1_55, %c1_56, %c0_57, %c0_58] : memref<2x3x1x32xf32, #tpu.memory_space<vmem>>, vector<1x1x1x32xf32>
    %46 = vector.shape_cast %45 : vector<1x1x1x32xf32> to vector<1x32xf32>
    %47 = vector.broadcast %46 : vector<1x32xf32> to vector<16x32xf32>
    %48 = arith.addf %44, %47 : vector<16x32xf32>
    %c1_59 = arith.constant 1 : index
    %c1_60 = arith.constant 1 : index
    %c0_61 = arith.constant 0 : index
    %c0_62 = arith.constant 0 : index
    %49 = vector.load %arg9[%c1_59, %c1_60, %c0_61, %c0_62] : memref<2x3x16x32xf32, #tpu.memory_space<vmem>>, vector<1x1x16x32xf32>
    %50 = vector.shape_cast %49 : vector<1x1x16x32xf32> to vector<16x32xf32>
    %51 = vector.shape_cast %48 : vector<16x32xf32> to vector<1x1x16x32xf32>
    tpu.vector_store %arg9[%c1_59, %c1_60, %c0_61, %c0_62], %51 {strides = array<i32>} : memref<2x3x16x32xf32, #tpu.memory_space<vmem>>, vector<1x1x16x32xf32>,
    %c1_63 = arith.constant 1 : index
    %c2_64 = arith.constant 2 : index
    %c0_65 = arith.constant 0 : index
    %c0_66 = arith.constant 0 : index
    %52 = vector.load %arg2[%c1_63, %c2_64, %c0_65, %c0_66] : memref<2x3x64x32xbf16, #tpu.memory_space<vmem>>, vector<1x1x64x32xbf16>
    %53 = vector.shape_cast %52 : vector<1x1x64x32xbf16> to vector<64x32xbf16>
    %cst_67 = arith.constant dense<0.000000e+00> : vector<16x32xf32>
    %54 = tpu.matmul %1, %53, %cst_67 {dimension_numbers = #tpu.dot_dimension_numbers<[1], [0], [0], [1], [0, 0, 1, 1], [], []>} : vector<16x64xbf16>, vector<64x32xbf16>, vector<16x32xf32> -> vector<16x32xf32>
    %c1_68 = arith.constant 1 : index
    %c2_69 = arith.constant 2 : index
    %c0_70 = arith.constant 0 : index
    %c0_71 = arith.constant 0 : index
    %55 = vector.load %arg4[%c1_68, %c2_69, %c0_70, %c0_71] : memref<2x3x1x32xf32, #tpu.memory_space<vmem>>, vector<1x1x1x32xf32>
    %56 = vector.shape_cast %55 : vector<1x1x1x32xf32> to vector<1x32xf32>
    %57 = vector.broadcast %56 : vector<1x32xf32> to vector<16x32xf32>
    %58 = arith.addf %54, %57 : vector<16x32xf32>
    %c1_72 = arith.constant 1 : index
    %c2_73 = arith.constant 2 : index
    %c0_74 = arith.constant 0 : index
    %c0_75 = arith.constant 0 : index
    %59 = vector.load %arg9[%c1_72, %c2_73, %c0_74, %c0_75] : memref<2x3x16x32xf32, #tpu.memory_space<vmem>>, vector<1x1x16x32xf32>
    %60 = vector.shape_cast %59 : vector<1x1x16x32xf32> to vector<16x32xf32>
    %61 = vector.shape_cast %58 : vector<16x32xf32> to vector<1x1x16x32xf32>
    tpu.vector_store %arg9[%c1_72, %c2_73, %c0_74, %c0_75], %61 {strides = array<i32>} : memref<2x3x16x32xf32, #tpu.memory_space<vmem>>, vector<1x1x16x32xf32>,
    %cst_76 = arith.constant 0.000000e+00 : f32
    %62 = vector.broadcast %cst_76 : f32 to vector<2x32xf32>
    %cst_77 = arith.constant 0.000000e+00 : f32
    %63 = vector.broadcast %cst_77 : f32 to vector<2x32xf32>
    %cst_78 = arith.constant 0xFF800000 : f32
    %64 = vector.broadcast %cst_78 : f32 to vector<2x32xf32>
    %cst_79 = arith.constant 0xFF800000 : f32
    %65 = vector.broadcast %cst_79 : f32 to vector<2x32xf32>
    %c0_i32 = arith.constant 0 : i32
    %c2_i32 = arith.constant 2 : i32
    %66 = arith.muli %c0_i32, %c2_i32 : i32
    %67 = tpu.assume_multiple %66, 2 : i32
    %c0_80 = arith.constant 0 : index
    %c0_81 = arith.constant 0 : index
    %68 = arith.index_cast %67 : i32 to index
    %c0_82 = arith.constant 0 : index
    %69 = vector.load %arg9[%c0_80, %c0_81, %68, %c0_82] : memref<2x3x16x32xf32, #tpu.memory_space<vmem>>, vector<1x1x2x32xf32>
    %70 = vector.shape_cast %69 : vector<1x1x2x32xf32> to vector<2x32xf32>
    %c0_83 = arith.constant 0 : index
    %c1_84 = arith.constant 1 : index
    %71 = arith.index_cast %67 : i32 to index
    %c0_85 = arith.constant 0 : index
    %72 = vector.load %arg9[%c0_83, %c1_84, %71, %c0_85] : memref<2x3x16x32xf32, #tpu.memory_space<vmem>>, vector<1x1x2x32xf32>
    %73 = vector.shape_cast %72 : vector<1x1x2x32xf32> to vector<2x32xf32>
    %c0_86 = arith.constant 0 : index
    %c2_87 = arith.constant 2 : index
    %74 = arith.index_cast %67 : i32 to index
    %c0_88 = arith.constant 0 : index
    %75 = vector.load %arg9[%c0_86, %c2_87, %74, %c0_88] : memref<2x3x16x32xf32, #tpu.memory_space<vmem>>, vector<1x1x2x32xf32>
    %76 = vector.shape_cast %75 : vector<1x1x2x32xf32> to vector<2x32xf32>
    %77 = arith.truncf %62 : vector<2x32xf32> to vector<2x32xbf16>
    %c0_89 = arith.constant 0 : index
    %c0_90 = arith.constant 0 : index
    %c0_91 = arith.constant 0 : index
    %c0_92 = arith.constant 0 : index
    %78 = vector.load %arg3[%c0_89, %c0_90, %c0_91, %c0_92] : memref<2x3x32x32xbf16, #tpu.memory_space<vmem>>, vector<1x1x32x32xbf16>
    %79 = vector.shape_cast %78 : vector<1x1x32x32xbf16> to vector<32x32xbf16>
    %cst_93 = arith.constant dense<0.000000e+00> : vector<2x32xf32>
    %80 = tpu.matmul %77, %79, %cst_93 {dimension_numbers = #tpu.dot_dimension_numbers<[1], [0], [0], [1], [0, 0, 1, 1], [], []>} : vector<2x32xbf16>, vector<32x32xbf16>, vector<2x32xf32> -> vector<2x32xf32>
    %c0_94 = arith.constant 0 : index
    %c0_95 = arith.constant 0 : index
    %c0_96 = arith.constant 0 : index
    %c0_97 = arith.constant 0 : index
    %81 = vector.load %arg5[%c0_94, %c0_95, %c0_96, %c0_97] : memref<2x3x1x32xf32, #tpu.memory_space<vmem>>, vector<1x1x1x32xf32>
    %82 = vector.shape_cast %81 : vector<1x1x1x32xf32> to vector<1x32xf32>
    %83 = vector.broadcast %82 : vector<1x32xf32> to vector<2x32xf32>
    %84 = arith.addf %80, %83 : vector<2x32xf32>
    %c0_98 = arith.constant 0 : index
    %c1_99 = arith.constant 1 : index
    %c0_100 = arith.constant 0 : index
    %c0_101 = arith.constant 0 : index
    %85 = vector.load %arg3[%c0_98, %c1_99, %c0_100, %c0_101] : memref<2x3x32x32xbf16, #tpu.memory_space<vmem>>, vector<1x1x32x32xbf16>
    %86 = vector.shape_cast %85 : vector<1x1x32x32xbf16> to vector<32x32xbf16>
    %cst_102 = arith.constant dense<0.000000e+00> : vector<2x32xf32>
    %87 = tpu.matmul %77, %86, %cst_102 {dimension_numbers = #tpu.dot_dimension_numbers<[1], [0], [0], [1], [0, 0, 1, 1], [], []>} : vector<2x32xbf16>, vector<32x32xbf16>, vector<2x32xf32> -> vector<2x32xf32>
    %c0_103 = arith.constant 0 : index
    %c1_104 = arith.constant 1 : index
    %c0_105 = arith.constant 0 : index
    %c0_106 = arith.constant 0 : index
    %88 = vector.load %arg5[%c0_103, %c1_104, %c0_105, %c0_106] : memref<2x3x1x32xf32, #tpu.memory_space<vmem>>, vector<1x1x1x32xf32>
    %89 = vector.shape_cast %88 : vector<1x1x1x32xf32> to vector<1x32xf32>
    %90 = vector.broadcast %89 : vector<1x32xf32> to vector<2x32xf32>
    %91 = arith.addf %87, %90 : vector<2x32xf32>
    %c0_107 = arith.constant 0 : index
    %c2_108 = arith.constant 2 : index
    %c0_109 = arith.constant 0 : index
    %c0_110 = arith.constant 0 : index
    %92 = vector.load %arg3[%c0_107, %c2_108, %c0_109, %c0_110] : memref<2x3x32x32xbf16, #tpu.memory_space<vmem>>, vector<1x1x32x32xbf16>
    %93 = vector.shape_cast %92 : vector<1x1x32x32xbf16> to vector<32x32xbf16>
    %cst_111 = arith.constant dense<0.000000e+00> : vector<2x32xf32>
    %94 = tpu.matmul %77, %93, %cst_111 {dimension_numbers = #tpu.dot_dimension_numbers<[1], [0], [0], [1], [0, 0, 1, 1], [], []>} : vector<2x32xbf16>, vector<32x32xbf16>, vector<2x32xf32> -> vector<2x32xf32>
    %c0_112 = arith.constant 0 : index
    %c2_113 = arith.constant 2 : index
    %c0_114 = arith.constant 0 : index
    %c0_115 = arith.constant 0 : index
    %95 = vector.load %arg5[%c0_112, %c2_113, %c0_114, %c0_115] : memref<2x3x1x32xf32, #tpu.memory_space<vmem>>, vector<1x1x1x32xf32>
    %96 = vector.shape_cast %95 : vector<1x1x1x32xf32> to vector<1x32xf32>
    %97 = vector.broadcast %96 : vector<1x32xf32> to vector<2x32xf32>
    %98 = arith.addf %94, %97 : vector<2x32xf32>
    %99 = arith.addf %70, %84 : vector<2x32xf32>
    %100 = arith.negf %99 : vector<2x32xf32>
    %101 = math.exp %100 : vector<2x32xf32>
    %cst_116 = arith.constant 1.000000e+00 : f32
    %102 = vector.broadcast %cst_116 : f32 to vector<2x32xf32>
    %103 = arith.addf %102, %101 : vector<2x32xf32>
    %104 = arith.divf %102, %103 : vector<2x32xf32>
    %105 = arith.addf %73, %91 : vector<2x32xf32>
    %106 = arith.negf %105 : vector<2x32xf32>
    %107 = math.exp %106 : vector<2x32xf32>
    %cst_117 = arith.constant 1.000000e+00 : f32
    %108 = vector.broadcast %cst_117 : f32 to vector<2x32xf32>
    %109 = arith.addf %108, %107 : vector<2x32xf32>
    %110 = arith.divf %108, %109 : vector<2x32xf32>
    %111 = arith.mulf %104, %98 : vector<2x32xf32>
    %112 = arith.addf %76, %111 : vector<2x32xf32>
    %113 = math.tanh %112 : vector<2x32xf32>
    %cst_118 = arith.constant 1.000000e+00 : f32
    %114 = vector.broadcast %cst_118 : f32 to vector<2x32xf32>
    %115 = arith.subf %114, %110 : vector<2x32xf32>
    %116 = arith.mulf %115, %113 : vector<2x32xf32>
    %117 = arith.mulf %110, %62 : vector<2x32xf32>
    %118 = arith.addf %116, %117 : vector<2x32xf32>
    %119 = arith.maximumf %64, %118 : vector<2x32xf32>
    %c7_i32 = arith.constant 7 : i32
    %120 = arith.subi %c7_i32, %c0_i32 : i32
    %c2_i32_119 = arith.constant 2 : i32
    %121 = arith.muli %120, %c2_i32_119 : i32
    %122 = tpu.assume_multiple %121, 2 : i32
    %c1_120 = arith.constant 1 : index
    %c0_121 = arith.constant 0 : index
    %123 = arith.index_cast %122 : i32 to index
    %c0_122 = arith.constant 0 : index
    %124 = vector.load %arg9[%c1_120, %c0_121, %123, %c0_122] : memref<2x3x16x32xf32, #tpu.memory_space<vmem>>, vector<1x1x2x32xf32>
    %125 = vector.shape_cast %124 : vector<1x1x2x32xf32> to vector<2x32xf32>
    %c1_123 = arith.constant 1 : index
    %c1_124 = arith.constant 1 : index
    %126 = arith.index_cast %122 : i32 to index
    %c0_125 = arith.constant 0 : index
    %127 = vector.load %arg9[%c1_123, %c1_124, %126, %c0_125] : memref<2x3x16x32xf32, #tpu.memory_space<vmem>>, vector<1x1x2x32xf32>
    %128 = vector.shape_cast %127 : vector<1x1x2x32xf32> to vector<2x32xf32>
    %c1_126 = arith.constant 1 : index
    %c2_127 = arith.constant 2 : index
    %129 = arith.index_cast %122 : i32 to index
    %c0_128 = arith.constant 0 : index
    %130 = vector.load %arg9[%c1_126, %c2_127, %129, %c0_128] : memref<2x3x16x32xf32, #tpu.memory_space<vmem>>, vector<1x1x2x32xf32>
    %131 = vector.shape_cast %130 : vector<1x1x2x32xf32> to vector<2x32xf32>
    %132 = arith.truncf %63 : vector<2x32xf32> to vector<2x32xbf16>
    %c1_129 = arith.constant 1 : index
    %c0_130 = arith.constant 0 : index
    %c0_131 = arith.constant 0 : index
    %c0_132 = arith.constant 0 : index
    %133 = vector.load %arg3[%c1_129, %c0_130, %c0_131, %c0_132] : memref<2x3x32x32xbf16, #tpu.memory_space<vmem>>, vector<1x1x32x32xbf16>
    %134 = vector.shape_cast %133 : vector<1x1x32x32xbf16> to vector<32x32xbf16>
    %cst_133 = arith.constant dense<0.000000e+00> : vector<2x32xf32>
    %135 = tpu.matmul %132, %134, %cst_133 {dimension_numbers = #tpu.dot_dimension_numbers<[1], [0], [0], [1], [0, 0, 1, 1], [], []>} : vector<2x32xbf16>, vector<32x32xbf16>, vector<2x32xf32> -> vector<2x32xf32>
    %c1_134 = arith.constant 1 : index
    %c0_135 = arith.constant 0 : index
    %c0_136 = arith.constant 0 : index
    %c0_137 = arith.constant 0 : index
    %136 = vector.load %arg5[%c1_134, %c0_135, %c0_136, %c0_137] : memref<2x3x1x32xf32, #tpu.memory_space<vmem>>, vector<1x1x1x32xf32>
    %137 = vector.shape_cast %136 : vector<1x1x1x32xf32> to vector<1x32xf32>
    %138 = vector.broadcast %137 : vector<1x32xf32> to vector<2x32xf32>
    %139 = arith.addf %135, %138 : vector<2x32xf32>
    %c1_138 = arith.constant 1 : index
    %c1_139 = arith.constant 1 : index
    %c0_140 = arith.constant 0 : index
    %c0_141 = arith.constant 0 : index
    %140 = vector.load %arg3[%c1_138, %c1_139, %c0_140, %c0_141] : memref<2x3x32x32xbf16, #tpu.memory_space<vmem>>, vector<1x1x32x32xbf16>
    %141 = vector.shape_cast %140 : vector<1x1x32x32xbf16> to vector<32x32xbf16>
    %cst_142 = arith.constant dense<0.000000e+00> : vector<2x32xf32>
    %142 = tpu.matmul %132, %141, %cst_142 {dimension_numbers = #tpu.dot_dimension_numbers<[1], [0], [0], [1], [0, 0, 1, 1], [], []>} : vector<2x32xbf16>, vector<32x32xbf16>, vector<2x32xf32> -> vector<2x32xf32>
    %c1_143 = arith.constant 1 : index
    %c1_144 = arith.constant 1 : index
    %c0_145 = arith.constant 0 : index
    %c0_146 = arith.constant 0 : index
    %143 = vector.load %arg5[%c1_143, %c1_144, %c0_145, %c0_146] : memref<2x3x1x32xf32, #tpu.memory_space<vmem>>, vector<1x1x1x32xf32>
    %144 = vector.shape_cast %143 : vector<1x1x1x32xf32> to vector<1x32xf32>
    %145 = vector.broadcast %144 : vector<1x32xf32> to vector<2x32xf32>
    %146 = arith.addf %142, %145 : vector<2x32xf32>
    %c1_147 = arith.constant 1 : index
    %c2_148 = arith.constant 2 : index
    %c0_149 = arith.constant 0 : index
    %c0_150 = arith.constant 0 : index
    %147 = vector.load %arg3[%c1_147, %c2_148, %c0_149, %c0_150] : memref<2x3x32x32xbf16, #tpu.memory_space<vmem>>, vector<1x1x32x32xbf16>
    %148 = vector.shape_cast %147 : vector<1x1x32x32xbf16> to vector<32x32xbf16>
    %cst_151 = arith.constant dense<0.000000e+00> : vector<2x32xf32>
    %149 = tpu.matmul %132, %148, %cst_151 {dimension_numbers = #tpu.dot_dimension_numbers<[1], [0], [0], [1], [0, 0, 1, 1], [], []>} : vector<2x32xbf16>, vector<32x32xbf16>, vector<2x32xf32> -> vector<2x32xf32>
    %c1_152 = arith.constant 1 : index
    %c2_153 = arith.constant 2 : index
    %c0_154 = arith.constant 0 : index
    %c0_155 = arith.constant 0 : index
    %150 = vector.load %arg5[%c1_152, %c2_153, %c0_154, %c0_155] : memref<2x3x1x32xf32, #tpu.memory_space<vmem>>, vector<1x1x1x32xf32>
    %151 = vector.shape_cast %150 : vector<1x1x1x32xf32> to vector<1x32xf32>
    %152 = vector.broadcast %151 : vector<1x32xf32> to vector<2x32xf32>
    %153 = arith.addf %149, %152 : vector<2x32xf32>
    %154 = arith.addf %125, %139 : vector<2x32xf32>
    %155 = arith.negf %154 : vector<2x32xf32>
    %156 = math.exp %155 : vector<2x32xf32>
    %cst_156 = arith.constant 1.000000e+00 : f32
    %157 = vector.broadcast %cst_156 : f32 to vector<2x32xf32>
    %158 = arith.addf %157, %156 : vector<2x32xf32>
    %159 = arith.divf %157, %158 : vector<2x32xf32>
    %160 = arith.addf %128, %146 : vector<2x32xf32>
    %161 = arith.negf %160 : vector<2x32xf32>
    %162 = math.exp %161 : vector<2x32xf32>
    %cst_157 = arith.constant 1.000000e+00 : f32
    %163 = vector.broadcast %cst_157 : f32 to vector<2x32xf32>
    %164 = arith.addf %163, %162 : vector<2x32xf32>
    %165 = arith.divf %163, %164 : vector<2x32xf32>
    %166 = arith.mulf %159, %153 : vector<2x32xf32>
    %167 = arith.addf %131, %166 : vector<2x32xf32>
    %168 = math.tanh %167 : vector<2x32xf32>
    %cst_158 = arith.constant 1.000000e+00 : f32
    %169 = vector.broadcast %cst_158 : f32 to vector<2x32xf32>
    %170 = arith.subf %169, %165 : vector<2x32xf32>
    %171 = arith.mulf %170, %168 : vector<2x32xf32>
    %172 = arith.mulf %165, %63 : vector<2x32xf32>
    %173 = arith.addf %171, %172 : vector<2x32xf32>
    %174 = arith.maximumf %65, %173 : vector<2x32xf32>
    %c1_i32 = arith.constant 1 : i32
    %c2_i32_159 = arith.constant 2 : i32
    %175 = arith.muli %c1_i32, %c2_i32_159 : i32
    %176 = tpu.assume_multiple %175, 2 : i32
    %c0_160 = arith.constant 0 : index
    %c0_161 = arith.constant 0 : index
    %177 = arith.index_cast %176 : i32 to index
    %c0_162 = arith.constant 0 : index
    %178 = vector.load %arg9[%c0_160, %c0_161, %177, %c0_162] : memref<2x3x16x32xf32, #tpu.memory_space<vmem>>, vector<1x1x2x32xf32>
    %179 = vector.shape_cast %178 : vector<1x1x2x32xf32> to vector<2x32xf32>
    %c0_163 = arith.constant 0 : index
    %c1_164 = arith.constant 1 : index
    %180 = arith.index_cast %176 : i32 to index
    %c0_165 = arith.constant 0 : index
    %181 = vector.load %arg9[%c0_163, %c1_164, %180, %c0_165] : memref<2x3x16x32xf32, #tpu.memory_space<vmem>>, vector<1x1x2x32xf32>
    %182 = vector.shape_cast %181 : vector<1x1x2x32xf32> to vector<2x32xf32>
    %c0_166 = arith.constant 0 : index
    %c2_167 = arith.constant 2 : index
    %183 = arith.index_cast %176 : i32 to index
    %c0_168 = arith.constant 0 : index
    %184 = vector.load %arg9[%c0_166, %c2_167, %183, %c0_168] : memref<2x3x16x32xf32, #tpu.memory_space<vmem>>, vector<1x1x2x32xf32>
    %185 = vector.shape_cast %184 : vector<1x1x2x32xf32> to vector<2x32xf32>
    %186 = arith.truncf %118 : vector<2x32xf32> to vector<2x32xbf16>
    %c0_169 = arith.constant 0 : index
    %c0_170 = arith.constant 0 : index
    %c0_171 = arith.constant 0 : index
    %c0_172 = arith.constant 0 : index
    %187 = vector.load %arg3[%c0_169, %c0_170, %c0_171, %c0_172] : memref<2x3x32x32xbf16, #tpu.memory_space<vmem>>, vector<1x1x32x32xbf16>
    %188 = vector.shape_cast %187 : vector<1x1x32x32xbf16> to vector<32x32xbf16>
    %cst_173 = arith.constant dense<0.000000e+00> : vector<2x32xf32>
    %189 = tpu.matmul %186, %188, %cst_173 {dimension_numbers = #tpu.dot_dimension_numbers<[1], [0], [0], [1], [0, 0, 1, 1], [], []>} : vector<2x32xbf16>, vector<32x32xbf16>, vector<2x32xf32> -> vector<2x32xf32>
    %c0_174 = arith.constant 0 : index
    %c0_175 = arith.constant 0 : index
    %c0_176 = arith.constant 0 : index
    %c0_177 = arith.constant 0 : index
    %190 = vector.load %arg5[%c0_174, %c0_175, %c0_176, %c0_177] : memref<2x3x1x32xf32, #tpu.memory_space<vmem>>, vector<1x1x1x32xf32>
    %191 = vector.shape_cast %190 : vector<1x1x1x32xf32> to vector<1x32xf32>
    %192 = vector.broadcast %191 : vector<1x32xf32> to vector<2x32xf32>
    %193 = arith.addf %189, %192 : vector<2x32xf32>
    %c0_178 = arith.constant 0 : index
    %c1_179 = arith.constant 1 : index
    %c0_180 = arith.constant 0 : index
    %c0_181 = arith.constant 0 : index
    %194 = vector.load %arg3[%c0_178, %c1_179, %c0_180, %c0_181] : memref<2x3x32x32xbf16, #tpu.memory_space<vmem>>, vector<1x1x32x32xbf16>
    %195 = vector.shape_cast %194 : vector<1x1x32x32xbf16> to vector<32x32xbf16>
    %cst_182 = arith.constant dense<0.000000e+00> : vector<2x32xf32>
    %196 = tpu.matmul %186, %195, %cst_182 {dimension_numbers = #tpu.dot_dimension_numbers<[1], [0], [0], [1], [0, 0, 1, 1], [], []>} : vector<2x32xbf16>, vector<32x32xbf16>, vector<2x32xf32> -> vector<2x32xf32>
    %c0_183 = arith.constant 0 : index
    %c1_184 = arith.constant 1 : index
    %c0_185 = arith.constant 0 : index
    %c0_186 = arith.constant 0 : index
    %197 = vector.load %arg5[%c0_183, %c1_184, %c0_185, %c0_186] : memref<2x3x1x32xf32, #tpu.memory_space<vmem>>, vector<1x1x1x32xf32>
    %198 = vector.shape_cast %197 : vector<1x1x1x32xf32> to vector<1x32xf32>
    %199 = vector.broadcast %198 : vector<1x32xf32> to vector<2x32xf32>
    %200 = arith.addf %196, %199 : vector<2x32xf32>
    %c0_187 = arith.constant 0 : index
    %c2_188 = arith.constant 2 : index
    %c0_189 = arith.constant 0 : index
    %c0_190 = arith.constant 0 : index
    %201 = vector.load %arg3[%c0_187, %c2_188, %c0_189, %c0_190] : memref<2x3x32x32xbf16, #tpu.memory_space<vmem>>, vector<1x1x32x32xbf16>
    %202 = vector.shape_cast %201 : vector<1x1x32x32xbf16> to vector<32x32xbf16>
    %cst_191 = arith.constant dense<0.000000e+00> : vector<2x32xf32>
    %203 = tpu.matmul %186, %202, %cst_191 {dimension_numbers = #tpu.dot_dimension_numbers<[1], [0], [0], [1], [0, 0, 1, 1], [], []>} : vector<2x32xbf16>, vector<32x32xbf16>, vector<2x32xf32> -> vector<2x32xf32>
    %c0_192 = arith.constant 0 : index
    %c2_193 = arith.constant 2 : index
    %c0_194 = arith.constant 0 : index
    %c0_195 = arith.constant 0 : index
    %204 = vector.load %arg5[%c0_192, %c2_193, %c0_194, %c0_195] : memref<2x3x1x32xf32, #tpu.memory_space<vmem>>, vector<1x1x1x32xf32>
    %205 = vector.shape_cast %204 : vector<1x1x1x32xf32> to vector<1x32xf32>
    %206 = vector.broadcast %205 : vector<1x32xf32> to vector<2x32xf32>
    %207 = arith.addf %203, %206 : vector<2x32xf32>
    %208 = arith.addf %179, %193 : vector<2x32xf32>
    %209 = arith.negf %208 : vector<2x32xf32>
    %210 = math.exp %209 : vector<2x32xf32>
    %cst_196 = arith.constant 1.000000e+00 : f32
    %211 = vector.broadcast %cst_196 : f32 to vector<2x32xf32>
    %212 = arith.addf %211, %210 : vector<2x32xf32>
    %213 = arith.divf %211, %212 : vector<2x32xf32>
    %214 = arith.addf %182, %200 : vector<2x32xf32>
    %215 = arith.negf %214 : vector<2x32xf32>
    %216 = math.exp %215 : vector<2x32xf32>
    %cst_197 = arith.constant 1.000000e+00 : f32
    %217 = vector.broadcast %cst_197 : f32 to vector<2x32xf32>
    %218 = arith.addf %217, %216 : vector<2x32xf32>
    %219 = arith.divf %217, %218 : vector<2x32xf32>
    %220 = arith.mulf %213, %207 : vector<2x32xf32>
    %221 = arith.addf %185, %220 : vector<2x32xf32>
    %222 = math.tanh %221 : vector<2x32xf32>
    %cst_198 = arith.constant 1.000000e+00 : f32
    %223 = vector.broadcast %cst_198 : f32 to vector<2x32xf32>
    %224 = arith.subf %223, %219 : vector<2x32xf32>
    %225 = arith.mulf %224, %222 : vector<2x32xf32>
    %226 = arith.mulf %219, %118 : vector<2x32xf32>
    %227 = arith.addf %225, %226 : vector<2x32xf32>
    %228 = arith.maximumf %119, %227 : vector<2x32xf32>
    %c7_i32_199 = arith.constant 7 : i32
    %229 = arith.subi %c7_i32_199, %c1_i32 : i32
    %c2_i32_200 = arith.constant 2 : i32
    %230 = arith.muli %229, %c2_i32_200 : i32
    %231 = tpu.assume_multiple %230, 2 : i32
    %c1_201 = arith.constant 1 : index
    %c0_202 = arith.constant 0 : index
    %232 = arith.index_cast %231 : i32 to index
    %c0_203 = arith.constant 0 : index
    %233 = vector.load %arg9[%c1_201, %c0_202, %232, %c0_203] : memref<2x3x16x32xf32, #tpu.memory_space<vmem>>, vector<1x1x2x32xf32>
    %234 = vector.shape_cast %233 : vector<1x1x2x32xf32> to vector<2x32xf32>
    %c1_204 = arith.constant 1 : index
    %c1_205 = arith.constant 1 : index
    %235 = arith.index_cast %231 : i32 to index
    %c0_206 = arith.constant 0 : index
    %236 = vector.load %arg9[%c1_204, %c1_205, %235, %c0_206] : memref<2x3x16x32xf32, #tpu.memory_space<vmem>>, vector<1x1x2x32xf32>
    %237 = vector.shape_cast %236 : vector<1x1x2x32xf32> to vector<2x32xf32>
    %c1_207 = arith.constant 1 : index
    %c2_208 = arith.constant 2 : index
    %238 = arith.index_cast %231 : i32 to index
    %c0_209 = arith.constant 0 : index
    %239 = vector.load %arg9[%c1_207, %c2_208, %238, %c0_209] : memref<2x3x16x32xf32, #tpu.memory_space<vmem>>, vector<1x1x2x32xf32>
    %240 = vector.shape_cast %239 : vector<1x1x2x32xf32> to vector<2x32xf32>
    %241 = arith.truncf %173 : vector<2x32xf32> to vector<2x32xbf16>
    %c1_210 = arith.constant 1 : index
    %c0_211 = arith.constant 0 : index
    %c0_212 = arith.constant 0 : index
    %c0_213 = arith.constant 0 : index
    %242 = vector.load %arg3[%c1_210, %c0_211, %c0_212, %c0_213] : memref<2x3x32x32xbf16, #tpu.memory_space<vmem>>, vector<1x1x32x32xbf16>
    %243 = vector.shape_cast %242 : vector<1x1x32x32xbf16> to vector<32x32xbf16>
    %cst_214 = arith.constant dense<0.000000e+00> : vector<2x32xf32>
    %244 = tpu.matmul %241, %243, %cst_214 {dimension_numbers = #tpu.dot_dimension_numbers<[1], [0], [0], [1], [0, 0, 1, 1], [], []>} : vector<2x32xbf16>, vector<32x32xbf16>, vector<2x32xf32> -> vector<2x32xf32>
    %c1_215 = arith.constant 1 : index
    %c0_216 = arith.constant 0 : index
    %c0_217 = arith.constant 0 : index
    %c0_218 = arith.constant 0 : index
    %245 = vector.load %arg5[%c1_215, %c0_216, %c0_217, %c0_218] : memref<2x3x1x32xf32, #tpu.memory_space<vmem>>, vector<1x1x1x32xf32>
    %246 = vector.shape_cast %245 : vector<1x1x1x32xf32> to vector<1x32xf32>
    %247 = vector.broadcast %246 : vector<1x32xf32> to vector<2x32xf32>
    %248 = arith.addf %244, %247 : vector<2x32xf32>
    %c1_219 = arith.constant 1 : index
    %c1_220 = arith.constant 1 : index
    %c0_221 = arith.constant 0 : index
    %c0_222 = arith.constant 0 : index
    %249 = vector.load %arg3[%c1_219, %c1_220, %c0_221, %c0_222] : memref<2x3x32x32xbf16, #tpu.memory_space<vmem>>, vector<1x1x32x32xbf16>
    %250 = vector.shape_cast %249 : vector<1x1x32x32xbf16> to vector<32x32xbf16>
    %cst_223 = arith.constant dense<0.000000e+00> : vector<2x32xf32>
    %251 = tpu.matmul %241, %250, %cst_223 {dimension_numbers = #tpu.dot_dimension_numbers<[1], [0], [0], [1], [0, 0, 1, 1], [], []>} : vector<2x32xbf16>, vector<32x32xbf16>, vector<2x32xf32> -> vector<2x32xf32>
    %c1_224 = arith.constant 1 : index
    %c1_225 = arith.constant 1 : index
    %c0_226 = arith.constant 0 : index
    %c0_227 = arith.constant 0 : index
    %252 = vector.load %arg5[%c1_224, %c1_225, %c0_226, %c0_227] : memref<2x3x1x32xf32, #tpu.memory_space<vmem>>, vector<1x1x1x32xf32>
    %253 = vector.shape_cast %252 : vector<1x1x1x32xf32> to vector<1x32xf32>
    %254 = vector.broadcast %253 : vector<1x32xf32> to vector<2x32xf32>
    %255 = arith.addf %251, %254 : vector<2x32xf32>
    %c1_228 = arith.constant 1 : index
    %c2_229 = arith.constant 2 : index
    %c0_230 = arith.constant 0 : index
    %c0_231 = arith.constant 0 : index
    %256 = vector.load %arg3[%c1_228, %c2_229, %c0_230, %c0_231] : memref<2x3x32x32xbf16, #tpu.memory_space<vmem>>, vector<1x1x32x32xbf16>
    %257 = vector.shape_cast %256 : vector<1x1x32x32xbf16> to vector<32x32xbf16>
    %cst_232 = arith.constant dense<0.000000e+00> : vector<2x32xf32>
    %258 = tpu.matmul %241, %257, %cst_232 {dimension_numbers = #tpu.dot_dimension_numbers<[1], [0], [0], [1], [0, 0, 1, 1], [], []>} : vector<2x32xbf16>, vector<32x32xbf16>, vector<2x32xf32> -> vector<2x32xf32>
    %c1_233 = arith.constant 1 : index
    %c2_234 = arith.constant 2 : index
    %c0_235 = arith.constant 0 : index
    %c0_236 = arith.constant 0 : index
    %259 = vector.load %arg5[%c1_233, %c2_234, %c0_235, %c0_236] : memref<2x3x1x32xf32, #tpu.memory_space<vmem>>, vector<1x1x1x32xf32>
    %260 = vector.shape_cast %259 : vector<1x1x1x32xf32> to vector<1x32xf32>
    %261 = vector.broadcast %260 : vector<1x32xf32> to vector<2x32xf32>
    %262 = arith.addf %258, %261 : vector<2x32xf32>
    %263 = arith.addf %234, %248 : vector<2x32xf32>
    %264 = arith.negf %263 : vector<2x32xf32>
    %265 = math.exp %264 : vector<2x32xf32>
    %cst_237 = arith.constant 1.000000e+00 : f32
    %266 = vector.broadcast %cst_237 : f32 to vector<2x32xf32>
    %267 = arith.addf %266, %265 : vector<2x32xf32>
    %268 = arith.divf %266, %267 : vector<2x32xf32>
    %269 = arith.addf %237, %255 : vector<2x32xf32>
    %270 = arith.negf %269 : vector<2x32xf32>
    %271 = math.exp %270 : vector<2x32xf32>
    %cst_238 = arith.constant 1.000000e+00 : f32
    %272 = vector.broadcast %cst_238 : f32 to vector<2x32xf32>
    %273 = arith.addf %272, %271 : vector<2x32xf32>
    %274 = arith.divf %272, %273 : vector<2x32xf32>
    %275 = arith.mulf %268, %262 : vector<2x32xf32>
    %276 = arith.addf %240, %275 : vector<2x32xf32>
    %277 = math.tanh %276 : vector<2x32xf32>
    %cst_239 = arith.constant 1.000000e+00 : f32
    %278 = vector.broadcast %cst_239 : f32 to vector<2x32xf32>
    %279 = arith.subf %278, %274 : vector<2x32xf32>
    %280 = arith.mulf %279, %277 : vector<2x32xf32>
    %281 = arith.mulf %274, %173 : vector<2x32xf32>
    %282 = arith.addf %280, %281 : vector<2x32xf32>
    %283 = arith.maximumf %174, %282 : vector<2x32xf32>
    %c2_i32_240 = arith.constant 2 : i32
    %c2_i32_241 = arith.constant 2 : i32
    %284 = arith.muli %c2_i32_240, %c2_i32_241 : i32
    %285 = tpu.assume_multiple %284, 2 : i32
    %c0_242 = arith.constant 0 : index
    %c0_243 = arith.constant 0 : index
    %286 = arith.index_cast %285 : i32 to index
    %c0_244 = arith.constant 0 : index
    %287 = vector.load %arg9[%c0_242, %c0_243, %286, %c0_244] : memref<2x3x16x32xf32, #tpu.memory_space<vmem>>, vector<1x1x2x32xf32>
    %288 = vector.shape_cast %287 : vector<1x1x2x32xf32> to vector<2x32xf32>
    %c0_245 = arith.constant 0 : index
    %c1_246 = arith.constant 1 : index
    %289 = arith.index_cast %285 : i32 to index
    %c0_247 = arith.constant 0 : index
    %290 = vector.load %arg9[%c0_245, %c1_246, %289, %c0_247] : memref<2x3x16x32xf32, #tpu.memory_space<vmem>>, vector<1x1x2x32xf32>
    %291 = vector.shape_cast %290 : vector<1x1x2x32xf32> to vector<2x32xf32>
    %c0_248 = arith.constant 0 : index
    %c2_249 = arith.constant 2 : index
    %292 = arith.index_cast %285 : i32 to index
    %c0_250 = arith.constant 0 : index
    %293 = vector.load %arg9[%c0_248, %c2_249, %292, %c0_250] : memref<2x3x16x32xf32, #tpu.memory_space<vmem>>, vector<1x1x2x32xf32>
    %294 = vector.shape_cast %293 : vector<1x1x2x32xf32> to vector<2x32xf32>
    %295 = arith.truncf %227 : vector<2x32xf32> to vector<2x32xbf16>
    %c0_251 = arith.constant 0 : index
    %c0_252 = arith.constant 0 : index
    %c0_253 = arith.constant 0 : index
    %c0_254 = arith.constant 0 : index
    %296 = vector.load %arg3[%c0_251, %c0_252, %c0_253, %c0_254] : memref<2x3x32x32xbf16, #tpu.memory_space<vmem>>, vector<1x1x32x32xbf16>
    %297 = vector.shape_cast %296 : vector<1x1x32x32xbf16> to vector<32x32xbf16>
    %cst_255 = arith.constant dense<0.000000e+00> : vector<2x32xf32>
    %298 = tpu.matmul %295, %297, %cst_255 {dimension_numbers = #tpu.dot_dimension_numbers<[1], [0], [0], [1], [0, 0, 1, 1], [], []>} : vector<2x32xbf16>, vector<32x32xbf16>, vector<2x32xf32> -> vector<2x32xf32>
    %c0_256 = arith.constant 0 : index
    %c0_257 = arith.constant 0 : index
    %c0_258 = arith.constant 0 : index
    %c0_259 = arith.constant 0 : index
    %299 = vector.load %arg5[%c0_256, %c0_257, %c0_258, %c0_259] : memref<2x3x1x32xf32, #tpu.memory_space<vmem>>, vector<1x1x1x32xf32>
    %300 = vector.shape_cast %299 : vector<1x1x1x32xf32> to vector<1x32xf32>
    %301 = vector.broadcast %300 : vector<1x32xf32> to vector<2x32xf32>
    %302 = arith.addf %298, %301 : vector<2x32xf32>
    %c0_260 = arith.constant 0 : index
    %c1_261 = arith.constant 1 : index
    %c0_262 = arith.constant 0 : index
    %c0_263 = arith.constant 0 : index
    %303 = vector.load %arg3[%c0_260, %c1_261, %c0_262, %c0_263] : memref<2x3x32x32xbf16, #tpu.memory_space<vmem>>, vector<1x1x32x32xbf16>
    %304 = vector.shape_cast %303 : vector<1x1x32x32xbf16> to vector<32x32xbf16>
    %cst_264 = arith.constant dense<0.000000e+00> : vector<2x32xf32>
    %305 = tpu.matmul %295, %304, %cst_264 {dimension_numbers = #tpu.dot_dimension_numbers<[1], [0], [0], [1], [0, 0, 1, 1], [], []>} : vector<2x32xbf16>, vector<32x32xbf16>, vector<2x32xf32> -> vector<2x32xf32>
    %c0_265 = arith.constant 0 : index
    %c1_266 = arith.constant 1 : index
    %c0_267 = arith.constant 0 : index
    %c0_268 = arith.constant 0 : index
    %306 = vector.load %arg5[%c0_265, %c1_266, %c0_267, %c0_268] : memref<2x3x1x32xf32, #tpu.memory_space<vmem>>, vector<1x1x1x32xf32>
    %307 = vector.shape_cast %306 : vector<1x1x1x32xf32> to vector<1x32xf32>
    %308 = vector.broadcast %307 : vector<1x32xf32> to vector<2x32xf32>
    %309 = arith.addf %305, %308 : vector<2x32xf32>
    %c0_269 = arith.constant 0 : index
    %c2_270 = arith.constant 2 : index
    %c0_271 = arith.constant 0 : index
    %c0_272 = arith.constant 0 : index
    %310 = vector.load %arg3[%c0_269, %c2_270, %c0_271, %c0_272] : memref<2x3x32x32xbf16, #tpu.memory_space<vmem>>, vector<1x1x32x32xbf16>
    %311 = vector.shape_cast %310 : vector<1x1x32x32xbf16> to vector<32x32xbf16>
    %cst_273 = arith.constant dense<0.000000e+00> : vector<2x32xf32>
    %312 = tpu.matmul %295, %311, %cst_273 {dimension_numbers = #tpu.dot_dimension_numbers<[1], [0], [0], [1], [0, 0, 1, 1], [], []>} : vector<2x32xbf16>, vector<32x32xbf16>, vector<2x32xf32> -> vector<2x32xf32>
    %c0_274 = arith.constant 0 : index
    %c2_275 = arith.constant 2 : index
    %c0_276 = arith.constant 0 : index
    %c0_277 = arith.constant 0 : index
    %313 = vector.load %arg5[%c0_274, %c2_275, %c0_276, %c0_277] : memref<2x3x1x32xf32, #tpu.memory_space<vmem>>, vector<1x1x1x32xf32>
    %314 = vector.shape_cast %313 : vector<1x1x1x32xf32> to vector<1x32xf32>
    %315 = vector.broadcast %314 : vector<1x32xf32> to vector<2x32xf32>
    %316 = arith.addf %312, %315 : vector<2x32xf32>
    %317 = arith.addf %288, %302 : vector<2x32xf32>
    %318 = arith.negf %317 : vector<2x32xf32>
    %319 = math.exp %318 : vector<2x32xf32>
    %cst_278 = arith.constant 1.000000e+00 : f32
    %320 = vector.broadcast %cst_278 : f32 to vector<2x32xf32>
    %321 = arith.addf %320, %319 : vector<2x32xf32>
    %322 = arith.divf %320, %321 : vector<2x32xf32>
    %323 = arith.addf %291, %309 : vector<2x32xf32>
    %324 = arith.negf %323 : vector<2x32xf32>
    %325 = math.exp %324 : vector<2x32xf32>
    %cst_279 = arith.constant 1.000000e+00 : f32
    %326 = vector.broadcast %cst_279 : f32 to vector<2x32xf32>
    %327 = arith.addf %326, %325 : vector<2x32xf32>
    %328 = arith.divf %326, %327 : vector<2x32xf32>
    %329 = arith.mulf %322, %316 : vector<2x32xf32>
    %330 = arith.addf %294, %329 : vector<2x32xf32>
    %331 = math.tanh %330 : vector<2x32xf32>
    %cst_280 = arith.constant 1.000000e+00 : f32
    %332 = vector.broadcast %cst_280 : f32 to vector<2x32xf32>
    %333 = arith.subf %332, %328 : vector<2x32xf32>
    %334 = arith.mulf %333, %331 : vector<2x32xf32>
    %335 = arith.mulf %328, %227 : vector<2x32xf32>
    %336 = arith.addf %334, %335 : vector<2x32xf32>
    %337 = arith.maximumf %228, %336 : vector<2x32xf32>
    %c7_i32_281 = arith.constant 7 : i32
    %338 = arith.subi %c7_i32_281, %c2_i32_240 : i32
    %c2_i32_282 = arith.constant 2 : i32
    %339 = arith.muli %338, %c2_i32_282 : i32
    %340 = tpu.assume_multiple %339, 2 : i32
    %c1_283 = arith.constant 1 : index
    %c0_284 = arith.constant 0 : index
    %341 = arith.index_cast %340 : i32 to index
    %c0_285 = arith.constant 0 : index
    %342 = vector.load %arg9[%c1_283, %c0_284, %341, %c0_285] : memref<2x3x16x32xf32, #tpu.memory_space<vmem>>, vector<1x1x2x32xf32>
    %343 = vector.shape_cast %342 : vector<1x1x2x32xf32> to vector<2x32xf32>
    %c1_286 = arith.constant 1 : index
    %c1_287 = arith.constant 1 : index
    %344 = arith.index_cast %340 : i32 to index
    %c0_288 = arith.constant 0 : index
    %345 = vector.load %arg9[%c1_286, %c1_287, %344, %c0_288] : memref<2x3x16x32xf32, #tpu.memory_space<vmem>>, vector<1x1x2x32xf32>
    %346 = vector.shape_cast %345 : vector<1x1x2x32xf32> to vector<2x32xf32>
    %c1_289 = arith.constant 1 : index
    %c2_290 = arith.constant 2 : index
    %347 = arith.index_cast %340 : i32 to index
    %c0_291 = arith.constant 0 : index
    %348 = vector.load %arg9[%c1_289, %c2_290, %347, %c0_291] : memref<2x3x16x32xf32, #tpu.memory_space<vmem>>, vector<1x1x2x32xf32>
    %349 = vector.shape_cast %348 : vector<1x1x2x32xf32> to vector<2x32xf32>
    %350 = arith.truncf %282 : vector<2x32xf32> to vector<2x32xbf16>
    %c1_292 = arith.constant 1 : index
    %c0_293 = arith.constant 0 : index
    %c0_294 = arith.constant 0 : index
    %c0_295 = arith.constant 0 : index
    %351 = vector.load %arg3[%c1_292, %c0_293, %c0_294, %c0_295] : memref<2x3x32x32xbf16, #tpu.memory_space<vmem>>, vector<1x1x32x32xbf16>
    %352 = vector.shape_cast %351 : vector<1x1x32x32xbf16> to vector<32x32xbf16>
    %cst_296 = arith.constant dense<0.000000e+00> : vector<2x32xf32>
    %353 = tpu.matmul %350, %352, %cst_296 {dimension_numbers = #tpu.dot_dimension_numbers<[1], [0], [0], [1], [0, 0, 1, 1], [], []>} : vector<2x32xbf16>, vector<32x32xbf16>, vector<2x32xf32> -> vector<2x32xf32>
    %c1_297 = arith.constant 1 : index
    %c0_298 = arith.constant 0 : index
    %c0_299 = arith.constant 0 : index
    %c0_300 = arith.constant 0 : index
    %354 = vector.load %arg5[%c1_297, %c0_298, %c0_299, %c0_300] : memref<2x3x1x32xf32, #tpu.memory_space<vmem>>, vector<1x1x1x32xf32>
    %355 = vector.shape_cast %354 : vector<1x1x1x32xf32> to vector<1x32xf32>
    %356 = vector.broadcast %355 : vector<1x32xf32> to vector<2x32xf32>
    %357 = arith.addf %353, %356 : vector<2x32xf32>
    %c1_301 = arith.constant 1 : index
    %c1_302 = arith.constant 1 : index
    %c0_303 = arith.constant 0 : index
    %c0_304 = arith.constant 0 : index
    %358 = vector.load %arg3[%c1_301, %c1_302, %c0_303, %c0_304] : memref<2x3x32x32xbf16, #tpu.memory_space<vmem>>, vector<1x1x32x32xbf16>
    %359 = vector.shape_cast %358 : vector<1x1x32x32xbf16> to vector<32x32xbf16>
    %cst_305 = arith.constant dense<0.000000e+00> : vector<2x32xf32>
    %360 = tpu.matmul %350, %359, %cst_305 {dimension_numbers = #tpu.dot_dimension_numbers<[1], [0], [0], [1], [0, 0, 1, 1], [], []>} : vector<2x32xbf16>, vector<32x32xbf16>, vector<2x32xf32> -> vector<2x32xf32>
    %c1_306 = arith.constant 1 : index
    %c1_307 = arith.constant 1 : index
    %c0_308 = arith.constant 0 : index
    %c0_309 = arith.constant 0 : index
    %361 = vector.load %arg5[%c1_306, %c1_307, %c0_308, %c0_309] : memref<2x3x1x32xf32, #tpu.memory_space<vmem>>, vector<1x1x1x32xf32>
    %362 = vector.shape_cast %361 : vector<1x1x1x32xf32> to vector<1x32xf32>
    %363 = vector.broadcast %362 : vector<1x32xf32> to vector<2x32xf32>
    %364 = arith.addf %360, %363 : vector<2x32xf32>
    %c1_310 = arith.constant 1 : index
    %c2_311 = arith.constant 2 : index
    %c0_312 = arith.constant 0 : index
    %c0_313 = arith.constant 0 : index
    %365 = vector.load %arg3[%c1_310, %c2_311, %c0_312, %c0_313] : memref<2x3x32x32xbf16, #tpu.memory_space<vmem>>, vector<1x1x32x32xbf16>
    %366 = vector.shape_cast %365 : vector<1x1x32x32xbf16> to vector<32x32xbf16>
    %cst_314 = arith.constant dense<0.000000e+00> : vector<2x32xf32>
    %367 = tpu.matmul %350, %366, %cst_314 {dimension_numbers = #tpu.dot_dimension_numbers<[1], [0], [0], [1], [0, 0, 1, 1], [], []>} : vector<2x32xbf16>, vector<32x32xbf16>, vector<2x32xf32> -> vector<2x32xf32>
    %c1_315 = arith.constant 1 : index
    %c2_316 = arith.constant 2 : index
    %c0_317 = arith.constant 0 : index
    %c0_318 = arith.constant 0 : index
    %368 = vector.load %arg5[%c1_315, %c2_316, %c0_317, %c0_318] : memref<2x3x1x32xf32, #tpu.memory_space<vmem>>, vector<1x1x1x32xf32>
    %369 = vector.shape_cast %368 : vector<1x1x1x32xf32> to vector<1x32xf32>
    %370 = vector.broadcast %369 : vector<1x32xf32> to vector<2x32xf32>
    %371 = arith.addf %367, %370 : vector<2x32xf32>
    %372 = arith.addf %343, %357 : vector<2x32xf32>
    %373 = arith.negf %372 : vector<2x32xf32>
    %374 = math.exp %373 : vector<2x32xf32>
    %cst_319 = arith.constant 1.000000e+00 : f32
    %375 = vector.broadcast %cst_319 : f32 to vector<2x32xf32>
    %376 = arith.addf %375, %374 : vector<2x32xf32>
    %377 = arith.divf %375, %376 : vector<2x32xf32>
    %378 = arith.addf %346, %364 : vector<2x32xf32>
    %379 = arith.negf %378 : vector<2x32xf32>
    %380 = math.exp %379 : vector<2x32xf32>
    %cst_320 = arith.constant 1.000000e+00 : f32
    %381 = vector.broadcast %cst_320 : f32 to vector<2x32xf32>
    %382 = arith.addf %381, %380 : vector<2x32xf32>
    %383 = arith.divf %381, %382 : vector<2x32xf32>
    %384 = arith.mulf %377, %371 : vector<2x32xf32>
    %385 = arith.addf %349, %384 : vector<2x32xf32>
    %386 = math.tanh %385 : vector<2x32xf32>
    %cst_321 = arith.constant 1.000000e+00 : f32
    %387 = vector.broadcast %cst_321 : f32 to vector<2x32xf32>
    %388 = arith.subf %387, %383 : vector<2x32xf32>
    %389 = arith.mulf %388, %386 : vector<2x32xf32>
    %390 = arith.mulf %383, %282 : vector<2x32xf32>
    %391 = arith.addf %389, %390 : vector<2x32xf32>
    %392 = arith.maximumf %283, %391 : vector<2x32xf32>
    %c3_i32 = arith.constant 3 : i32
    %c2_i32_322 = arith.constant 2 : i32
    %393 = arith.muli %c3_i32, %c2_i32_322 : i32
    %394 = tpu.assume_multiple %393, 2 : i32
    %c0_323 = arith.constant 0 : index
    %c0_324 = arith.constant 0 : index
    %395 = arith.index_cast %394 : i32 to index
    %c0_325 = arith.constant 0 : index
    %396 = vector.load %arg9[%c0_323, %c0_324, %395, %c0_325] : memref<2x3x16x32xf32, #tpu.memory_space<vmem>>, vector<1x1x2x32xf32>
    %397 = vector.shape_cast %396 : vector<1x1x2x32xf32> to vector<2x32xf32>
    %c0_326 = arith.constant 0 : index
    %c1_327 = arith.constant 1 : index
    %398 = arith.index_cast %394 : i32 to index
    %c0_328 = arith.constant 0 : index
    %399 = vector.load %arg9[%c0_326, %c1_327, %398, %c0_328] : memref<2x3x16x32xf32, #tpu.memory_space<vmem>>, vector<1x1x2x32xf32>
    %400 = vector.shape_cast %399 : vector<1x1x2x32xf32> to vector<2x32xf32>
    %c0_329 = arith.constant 0 : index
    %c2_330 = arith.constant 2 : index
    %401 = arith.index_cast %394 : i32 to index
    %c0_331 = arith.constant 0 : index
    %402 = vector.load %arg9[%c0_329, %c2_330, %401, %c0_331] : memref<2x3x16x32xf32, #tpu.memory_space<vmem>>, vector<1x1x2x32xf32>
    %403 = vector.shape_cast %402 : vector<1x1x2x32xf32> to vector<2x32xf32>
    %404 = arith.truncf %336 : vector<2x32xf32> to vector<2x32xbf16>
    %c0_332 = arith.constant 0 : index
    %c0_333 = arith.constant 0 : index
    %c0_334 = arith.constant 0 : index
    %c0_335 = arith.constant 0 : index
    %405 = vector.load %arg3[%c0_332, %c0_333, %c0_334, %c0_335] : memref<2x3x32x32xbf16, #tpu.memory_space<vmem>>, vector<1x1x32x32xbf16>
    %406 = vector.shape_cast %405 : vector<1x1x32x32xbf16> to vector<32x32xbf16>
    %cst_336 = arith.constant dense<0.000000e+00> : vector<2x32xf32>
    %407 = tpu.matmul %404, %406, %cst_336 {dimension_numbers = #tpu.dot_dimension_numbers<[1], [0], [0], [1], [0, 0, 1, 1], [], []>} : vector<2x32xbf16>, vector<32x32xbf16>, vector<2x32xf32> -> vector<2x32xf32>
    %c0_337 = arith.constant 0 : index
    %c0_338 = arith.constant 0 : index
    %c0_339 = arith.constant 0 : index
    %c0_340 = arith.constant 0 : index
    %408 = vector.load %arg5[%c0_337, %c0_338, %c0_339, %c0_340] : memref<2x3x1x32xf32, #tpu.memory_space<vmem>>, vector<1x1x1x32xf32>
    %409 = vector.shape_cast %408 : vector<1x1x1x32xf32> to vector<1x32xf32>
    %410 = vector.broadcast %409 : vector<1x32xf32> to vector<2x32xf32>
    %411 = arith.addf %407, %410 : vector<2x32xf32>
    %c0_341 = arith.constant 0 : index
    %c1_342 = arith.constant 1 : index
    %c0_343 = arith.constant 0 : index
    %c0_344 = arith.constant 0 : index
    %412 = vector.load %arg3[%c0_341, %c1_342, %c0_343, %c0_344] : memref<2x3x32x32xbf16, #tpu.memory_space<vmem>>, vector<1x1x32x32xbf16>
    %413 = vector.shape_cast %412 : vector<1x1x32x32xbf16> to vector<32x32xbf16>
    %cst_345 = arith.constant dense<0.000000e+00> : vector<2x32xf32>
    %414 = tpu.matmul %404, %413, %cst_345 {dimension_numbers = #tpu.dot_dimension_numbers<[1], [0], [0], [1], [0, 0, 1, 1], [], []>} : vector<2x32xbf16>, vector<32x32xbf16>, vector<2x32xf32> -> vector<2x32xf32>
    %c0_346 = arith.constant 0 : index
    %c1_347 = arith.constant 1 : index
    %c0_348 = arith.constant 0 : index
    %c0_349 = arith.constant 0 : index
    %415 = vector.load %arg5[%c0_346, %c1_347, %c0_348, %c0_349] : memref<2x3x1x32xf32, #tpu.memory_space<vmem>>, vector<1x1x1x32xf32>
    %416 = vector.shape_cast %415 : vector<1x1x1x32xf32> to vector<1x32xf32>
    %417 = vector.broadcast %416 : vector<1x32xf32> to vector<2x32xf32>
    %418 = arith.addf %414, %417 : vector<2x32xf32>
    %c0_350 = arith.constant 0 : index
    %c2_351 = arith.constant 2 : index
    %c0_352 = arith.constant 0 : index
    %c0_353 = arith.constant 0 : index
    %419 = vector.load %arg3[%c0_350, %c2_351, %c0_352, %c0_353] : memref<2x3x32x32xbf16, #tpu.memory_space<vmem>>, vector<1x1x32x32xbf16>
    %420 = vector.shape_cast %419 : vector<1x1x32x32xbf16> to vector<32x32xbf16>
    %cst_354 = arith.constant dense<0.000000e+00> : vector<2x32xf32>
    %421 = tpu.matmul %404, %420, %cst_354 {dimension_numbers = #tpu.dot_dimension_numbers<[1], [0], [0], [1], [0, 0, 1, 1], [], []>} : vector<2x32xbf16>, vector<32x32xbf16>, vector<2x32xf32> -> vector<2x32xf32>
    %c0_355 = arith.constant 0 : index
    %c2_356 = arith.constant 2 : index
    %c0_357 = arith.constant 0 : index
    %c0_358 = arith.constant 0 : index
    %422 = vector.load %arg5[%c0_355, %c2_356, %c0_357, %c0_358] : memref<2x3x1x32xf32, #tpu.memory_space<vmem>>, vector<1x1x1x32xf32>
    %423 = vector.shape_cast %422 : vector<1x1x1x32xf32> to vector<1x32xf32>
    %424 = vector.broadcast %423 : vector<1x32xf32> to vector<2x32xf32>
    %425 = arith.addf %421, %424 : vector<2x32xf32>
    %426 = arith.addf %397, %411 : vector<2x32xf32>
    %427 = arith.negf %426 : vector<2x32xf32>
    %428 = math.exp %427 : vector<2x32xf32>
    %cst_359 = arith.constant 1.000000e+00 : f32
    %429 = vector.broadcast %cst_359 : f32 to vector<2x32xf32>
    %430 = arith.addf %429, %428 : vector<2x32xf32>
    %431 = arith.divf %429, %430 : vector<2x32xf32>
    %432 = arith.addf %400, %418 : vector<2x32xf32>
    %433 = arith.negf %432 : vector<2x32xf32>
    %434 = math.exp %433 : vector<2x32xf32>
    %cst_360 = arith.constant 1.000000e+00 : f32
    %435 = vector.broadcast %cst_360 : f32 to vector<2x32xf32>
    %436 = arith.addf %435, %434 : vector<2x32xf32>
    %437 = arith.divf %435, %436 : vector<2x32xf32>
    %438 = arith.mulf %431, %425 : vector<2x32xf32>
    %439 = arith.addf %403, %438 : vector<2x32xf32>
    %440 = math.tanh %439 : vector<2x32xf32>
    %cst_361 = arith.constant 1.000000e+00 : f32
    %441 = vector.broadcast %cst_361 : f32 to vector<2x32xf32>
    %442 = arith.subf %441, %437 : vector<2x32xf32>
    %443 = arith.mulf %442, %440 : vector<2x32xf32>
    %444 = arith.mulf %437, %336 : vector<2x32xf32>
    %445 = arith.addf %443, %444 : vector<2x32xf32>
    %446 = arith.maximumf %337, %445 : vector<2x32xf32>
    %c7_i32_362 = arith.constant 7 : i32
    %447 = arith.subi %c7_i32_362, %c3_i32 : i32
    %c2_i32_363 = arith.constant 2 : i32
    %448 = arith.muli %447, %c2_i32_363 : i32
    %449 = tpu.assume_multiple %448, 2 : i32
    %c1_364 = arith.constant 1 : index
    %c0_365 = arith.constant 0 : index
    %450 = arith.index_cast %449 : i32 to index
    %c0_366 = arith.constant 0 : index
    %451 = vector.load %arg9[%c1_364, %c0_365, %450, %c0_366] : memref<2x3x16x32xf32, #tpu.memory_space<vmem>>, vector<1x1x2x32xf32>
    %452 = vector.shape_cast %451 : vector<1x1x2x32xf32> to vector<2x32xf32>
    %c1_367 = arith.constant 1 : index
    %c1_368 = arith.constant 1 : index
    %453 = arith.index_cast %449 : i32 to index
    %c0_369 = arith.constant 0 : index
    %454 = vector.load %arg9[%c1_367, %c1_368, %453, %c0_369] : memref<2x3x16x32xf32, #tpu.memory_space<vmem>>, vector<1x1x2x32xf32>
    %455 = vector.shape_cast %454 : vector<1x1x2x32xf32> to vector<2x32xf32>
    %c1_370 = arith.constant 1 : index
    %c2_371 = arith.constant 2 : index
    %456 = arith.index_cast %449 : i32 to index
    %c0_372 = arith.constant 0 : index
    %457 = vector.load %arg9[%c1_370, %c2_371, %456, %c0_372] : memref<2x3x16x32xf32, #tpu.memory_space<vmem>>, vector<1x1x2x32xf32>
    %458 = vector.shape_cast %457 : vector<1x1x2x32xf32> to vector<2x32xf32>
    %459 = arith.truncf %391 : vector<2x32xf32> to vector<2x32xbf16>
    %c1_373 = arith.constant 1 : index
    %c0_374 = arith.constant 0 : index
    %c0_375 = arith.constant 0 : index
    %c0_376 = arith.constant 0 : index
    %460 = vector.load %arg3[%c1_373, %c0_374, %c0_375, %c0_376] : memref<2x3x32x32xbf16, #tpu.memory_space<vmem>>, vector<1x1x32x32xbf16>
    %461 = vector.shape_cast %460 : vector<1x1x32x32xbf16> to vector<32x32xbf16>
    %cst_377 = arith.constant dense<0.000000e+00> : vector<2x32xf32>
    %462 = tpu.matmul %459, %461, %cst_377 {dimension_numbers = #tpu.dot_dimension_numbers<[1], [0], [0], [1], [0, 0, 1, 1], [], []>} : vector<2x32xbf16>, vector<32x32xbf16>, vector<2x32xf32> -> vector<2x32xf32>
    %c1_378 = arith.constant 1 : index
    %c0_379 = arith.constant 0 : index
    %c0_380 = arith.constant 0 : index
    %c0_381 = arith.constant 0 : index
    %463 = vector.load %arg5[%c1_378, %c0_379, %c0_380, %c0_381] : memref<2x3x1x32xf32, #tpu.memory_space<vmem>>, vector<1x1x1x32xf32>
    %464 = vector.shape_cast %463 : vector<1x1x1x32xf32> to vector<1x32xf32>
    %465 = vector.broadcast %464 : vector<1x32xf32> to vector<2x32xf32>
    %466 = arith.addf %462, %465 : vector<2x32xf32>
    %c1_382 = arith.constant 1 : index
    %c1_383 = arith.constant 1 : index
    %c0_384 = arith.constant 0 : index
    %c0_385 = arith.constant 0 : index
    %467 = vector.load %arg3[%c1_382, %c1_383, %c0_384, %c0_385] : memref<2x3x32x32xbf16, #tpu.memory_space<vmem>>, vector<1x1x32x32xbf16>
    %468 = vector.shape_cast %467 : vector<1x1x32x32xbf16> to vector<32x32xbf16>
    %cst_386 = arith.constant dense<0.000000e+00> : vector<2x32xf32>
    %469 = tpu.matmul %459, %468, %cst_386 {dimension_numbers = #tpu.dot_dimension_numbers<[1], [0], [0], [1], [0, 0, 1, 1], [], []>} : vector<2x32xbf16>, vector<32x32xbf16>, vector<2x32xf32> -> vector<2x32xf32>
    %c1_387 = arith.constant 1 : index
    %c1_388 = arith.constant 1 : index
    %c0_389 = arith.constant 0 : index
    %c0_390 = arith.constant 0 : index
    %470 = vector.load %arg5[%c1_387, %c1_388, %c0_389, %c0_390] : memref<2x3x1x32xf32, #tpu.memory_space<vmem>>, vector<1x1x1x32xf32>
    %471 = vector.shape_cast %470 : vector<1x1x1x32xf32> to vector<1x32xf32>
    %472 = vector.broadcast %471 : vector<1x32xf32> to vector<2x32xf32>
    %473 = arith.addf %469, %472 : vector<2x32xf32>
    %c1_391 = arith.constant 1 : index
    %c2_392 = arith.constant 2 : index
    %c0_393 = arith.constant 0 : index
    %c0_394 = arith.constant 0 : index
    %474 = vector.load %arg3[%c1_391, %c2_392, %c0_393, %c0_394] : memref<2x3x32x32xbf16, #tpu.memory_space<vmem>>, vector<1x1x32x32xbf16>
    %475 = vector.shape_cast %474 : vector<1x1x32x32xbf16> to vector<32x32xbf16>
    %cst_395 = arith.constant dense<0.000000e+00> : vector<2x32xf32>
    %476 = tpu.matmul %459, %475, %cst_395 {dimension_numbers = #tpu.dot_dimension_numbers<[1], [0], [0], [1], [0, 0, 1, 1], [], []>} : vector<2x32xbf16>, vector<32x32xbf16>, vector<2x32xf32> -> vector<2x32xf32>
    %c1_396 = arith.constant 1 : index
    %c2_397 = arith.constant 2 : index
    %c0_398 = arith.constant 0 : index
    %c0_399 = arith.constant 0 : index
    %477 = vector.load %arg5[%c1_396, %c2_397, %c0_398, %c0_399] : memref<2x3x1x32xf32, #tpu.memory_space<vmem>>, vector<1x1x1x32xf32>
    %478 = vector.shape_cast %477 : vector<1x1x1x32xf32> to vector<1x32xf32>
    %479 = vector.broadcast %478 : vector<1x32xf32> to vector<2x32xf32>
    %480 = arith.addf %476, %479 : vector<2x32xf32>
    %481 = arith.addf %452, %466 : vector<2x32xf32>
    %482 = arith.negf %481 : vector<2x32xf32>
    %483 = math.exp %482 : vector<2x32xf32>
    %cst_400 = arith.constant 1.000000e+00 : f32
    %484 = vector.broadcast %cst_400 : f32 to vector<2x32xf32>
    %485 = arith.addf %484, %483 : vector<2x32xf32>
    %486 = arith.divf %484, %485 : vector<2x32xf32>
    %487 = arith.addf %455, %473 : vector<2x32xf32>
    %488 = arith.negf %487 : vector<2x32xf32>
    %489 = math.exp %488 : vector<2x32xf32>
    %cst_401 = arith.constant 1.000000e+00 : f32
    %490 = vector.broadcast %cst_401 : f32 to vector<2x32xf32>
    %491 = arith.addf %490, %489 : vector<2x32xf32>
    %492 = arith.divf %490, %491 : vector<2x32xf32>
    %493 = arith.mulf %486, %480 : vector<2x32xf32>
    %494 = arith.addf %458, %493 : vector<2x32xf32>
    %495 = math.tanh %494 : vector<2x32xf32>
    %cst_402 = arith.constant 1.000000e+00 : f32
    %496 = vector.broadcast %cst_402 : f32 to vector<2x32xf32>
    %497 = arith.subf %496, %492 : vector<2x32xf32>
    %498 = arith.mulf %497, %495 : vector<2x32xf32>
    %499 = arith.mulf %492, %391 : vector<2x32xf32>
    %500 = arith.addf %498, %499 : vector<2x32xf32>
    %501 = arith.maximumf %392, %500 : vector<2x32xf32>
    %c4_i32 = arith.constant 4 : i32
    %c2_i32_403 = arith.constant 2 : i32
    %502 = arith.muli %c4_i32, %c2_i32_403 : i32
    %503 = tpu.assume_multiple %502, 2 : i32
    %c0_404 = arith.constant 0 : index
    %c0_405 = arith.constant 0 : index
    %504 = arith.index_cast %503 : i32 to index
    %c0_406 = arith.constant 0 : index
    %505 = vector.load %arg9[%c0_404, %c0_405, %504, %c0_406] : memref<2x3x16x32xf32, #tpu.memory_space<vmem>>, vector<1x1x2x32xf32>
    %506 = vector.shape_cast %505 : vector<1x1x2x32xf32> to vector<2x32xf32>
    %c0_407 = arith.constant 0 : index
    %c1_408 = arith.constant 1 : index
    %507 = arith.index_cast %503 : i32 to index
    %c0_409 = arith.constant 0 : index
    %508 = vector.load %arg9[%c0_407, %c1_408, %507, %c0_409] : memref<2x3x16x32xf32, #tpu.memory_space<vmem>>, vector<1x1x2x32xf32>
    %509 = vector.shape_cast %508 : vector<1x1x2x32xf32> to vector<2x32xf32>
    %c0_410 = arith.constant 0 : index
    %c2_411 = arith.constant 2 : index
    %510 = arith.index_cast %503 : i32 to index
    %c0_412 = arith.constant 0 : index
    %511 = vector.load %arg9[%c0_410, %c2_411, %510, %c0_412] : memref<2x3x16x32xf32, #tpu.memory_space<vmem>>, vector<1x1x2x32xf32>
    %512 = vector.shape_cast %511 : vector<1x1x2x32xf32> to vector<2x32xf32>
    %513 = arith.truncf %445 : vector<2x32xf32> to vector<2x32xbf16>
    %c0_413 = arith.constant 0 : index
    %c0_414 = arith.constant 0 : index
    %c0_415 = arith.constant 0 : index
    %c0_416 = arith.constant 0 : index
    %514 = vector.load %arg3[%c0_413, %c0_414, %c0_415, %c0_416] : memref<2x3x32x32xbf16, #tpu.memory_space<vmem>>, vector<1x1x32x32xbf16>
    %515 = vector.shape_cast %514 : vector<1x1x32x32xbf16> to vector<32x32xbf16>
    %cst_417 = arith.constant dense<0.000000e+00> : vector<2x32xf32>
    %516 = tpu.matmul %513, %515, %cst_417 {dimension_numbers = #tpu.dot_dimension_numbers<[1], [0], [0], [1], [0, 0, 1, 1], [], []>} : vector<2x32xbf16>, vector<32x32xbf16>, vector<2x32xf32> -> vector<2x32xf32>
    %c0_418 = arith.constant 0 : index
    %c0_419 = arith.constant 0 : index
    %c0_420 = arith.constant 0 : index
    %c0_421 = arith.constant 0 : index
    %517 = vector.load %arg5[%c0_418, %c0_419, %c0_420, %c0_421] : memref<2x3x1x32xf32, #tpu.memory_space<vmem>>, vector<1x1x1x32xf32>
    %518 = vector.shape_cast %517 : vector<1x1x1x32xf32> to vector<1x32xf32>
    %519 = vector.broadcast %518 : vector<1x32xf32> to vector<2x32xf32>
    %520 = arith.addf %516, %519 : vector<2x32xf32>
    %c0_422 = arith.constant 0 : index
    %c1_423 = arith.constant 1 : index
    %c0_424 = arith.constant 0 : index
    %c0_425 = arith.constant 0 : index
    %521 = vector.load %arg3[%c0_422, %c1_423, %c0_424, %c0_425] : memref<2x3x32x32xbf16, #tpu.memory_space<vmem>>, vector<1x1x32x32xbf16>
    %522 = vector.shape_cast %521 : vector<1x1x32x32xbf16> to vector<32x32xbf16>
    %cst_426 = arith.constant dense<0.000000e+00> : vector<2x32xf32>
    %523 = tpu.matmul %513, %522, %cst_426 {dimension_numbers = #tpu.dot_dimension_numbers<[1], [0], [0], [1], [0, 0, 1, 1], [], []>} : vector<2x32xbf16>, vector<32x32xbf16>, vector<2x32xf32> -> vector<2x32xf32>
    %c0_427 = arith.constant 0 : index
    %c1_428 = arith.constant 1 : index
    %c0_429 = arith.constant 0 : index
    %c0_430 = arith.constant 0 : index
    %524 = vector.load %arg5[%c0_427, %c1_428, %c0_429, %c0_430] : memref<2x3x1x32xf32, #tpu.memory_space<vmem>>, vector<1x1x1x32xf32>
    %525 = vector.shape_cast %524 : vector<1x1x1x32xf32> to vector<1x32xf32>
    %526 = vector.broadcast %525 : vector<1x32xf32> to vector<2x32xf32>
    %527 = arith.addf %523, %526 : vector<2x32xf32>
    %c0_431 = arith.constant 0 : index
    %c2_432 = arith.constant 2 : index
    %c0_433 = arith.constant 0 : index
    %c0_434 = arith.constant 0 : index
    %528 = vector.load %arg3[%c0_431, %c2_432, %c0_433, %c0_434] : memref<2x3x32x32xbf16, #tpu.memory_space<vmem>>, vector<1x1x32x32xbf16>
    %529 = vector.shape_cast %528 : vector<1x1x32x32xbf16> to vector<32x32xbf16>
    %cst_435 = arith.constant dense<0.000000e+00> : vector<2x32xf32>
    %530 = tpu.matmul %513, %529, %cst_435 {dimension_numbers = #tpu.dot_dimension_numbers<[1], [0], [0], [1], [0, 0, 1, 1], [], []>} : vector<2x32xbf16>, vector<32x32xbf16>, vector<2x32xf32> -> vector<2x32xf32>
    %c0_436 = arith.constant 0 : index
    %c2_437 = arith.constant 2 : index
    %c0_438 = arith.constant 0 : index
    %c0_439 = arith.constant 0 : index
    %531 = vector.load %arg5[%c0_436, %c2_437, %c0_438, %c0_439] : memref<2x3x1x32xf32, #tpu.memory_space<vmem>>, vector<1x1x1x32xf32>
    %532 = vector.shape_cast %531 : vector<1x1x1x32xf32> to vector<1x32xf32>
    %533 = vector.broadcast %532 : vector<1x32xf32> to vector<2x32xf32>
    %534 = arith.addf %530, %533 : vector<2x32xf32>
    %535 = arith.addf %506, %520 : vector<2x32xf32>
    %536 = arith.negf %535 : vector<2x32xf32>
    %537 = math.exp %536 : vector<2x32xf32>
    %cst_440 = arith.constant 1.000000e+00 : f32
    %538 = vector.broadcast %cst_440 : f32 to vector<2x32xf32>
    %539 = arith.addf %538, %537 : vector<2x32xf32>
    %540 = arith.divf %538, %539 : vector<2x32xf32>
    %541 = arith.addf %509, %527 : vector<2x32xf32>
    %542 = arith.negf %541 : vector<2x32xf32>
    %543 = math.exp %542 : vector<2x32xf32>
    %cst_441 = arith.constant 1.000000e+00 : f32
    %544 = vector.broadcast %cst_441 : f32 to vector<2x32xf32>
    %545 = arith.addf %544, %543 : vector<2x32xf32>
    %546 = arith.divf %544, %545 : vector<2x32xf32>
    %547 = arith.mulf %540, %534 : vector<2x32xf32>
    %548 = arith.addf %512, %547 : vector<2x32xf32>
    %549 = math.tanh %548 : vector<2x32xf32>
    %cst_442 = arith.constant 1.000000e+00 : f32
    %550 = vector.broadcast %cst_442 : f32 to vector<2x32xf32>
    %551 = arith.subf %550, %546 : vector<2x32xf32>
    %552 = arith.mulf %551, %549 : vector<2x32xf32>
    %553 = arith.mulf %546, %445 : vector<2x32xf32>
    %554 = arith.addf %552, %553 : vector<2x32xf32>
    %555 = arith.maximumf %446, %554 : vector<2x32xf32>
    %c7_i32_443 = arith.constant 7 : i32
    %556 = arith.subi %c7_i32_443, %c4_i32 : i32
    %c2_i32_444 = arith.constant 2 : i32
    %557 = arith.muli %556, %c2_i32_444 : i32
    %558 = tpu.assume_multiple %557, 2 : i32
    %c1_445 = arith.constant 1 : index
    %c0_446 = arith.constant 0 : index
    %559 = arith.index_cast %558 : i32 to index
    %c0_447 = arith.constant 0 : index
    %560 = vector.load %arg9[%c1_445, %c0_446, %559, %c0_447] : memref<2x3x16x32xf32, #tpu.memory_space<vmem>>, vector<1x1x2x32xf32>
    %561 = vector.shape_cast %560 : vector<1x1x2x32xf32> to vector<2x32xf32>
    %c1_448 = arith.constant 1 : index
    %c1_449 = arith.constant 1 : index
    %562 = arith.index_cast %558 : i32 to index
    %c0_450 = arith.constant 0 : index
    %563 = vector.load %arg9[%c1_448, %c1_449, %562, %c0_450] : memref<2x3x16x32xf32, #tpu.memory_space<vmem>>, vector<1x1x2x32xf32>
    %564 = vector.shape_cast %563 : vector<1x1x2x32xf32> to vector<2x32xf32>
    %c1_451 = arith.constant 1 : index
    %c2_452 = arith.constant 2 : index
    %565 = arith.index_cast %558 : i32 to index
    %c0_453 = arith.constant 0 : index
    %566 = vector.load %arg9[%c1_451, %c2_452, %565, %c0_453] : memref<2x3x16x32xf32, #tpu.memory_space<vmem>>, vector<1x1x2x32xf32>
    %567 = vector.shape_cast %566 : vector<1x1x2x32xf32> to vector<2x32xf32>
    %568 = arith.truncf %500 : vector<2x32xf32> to vector<2x32xbf16>
    %c1_454 = arith.constant 1 : index
    %c0_455 = arith.constant 0 : index
    %c0_456 = arith.constant 0 : index
    %c0_457 = arith.constant 0 : index
    %569 = vector.load %arg3[%c1_454, %c0_455, %c0_456, %c0_457] : memref<2x3x32x32xbf16, #tpu.memory_space<vmem>>, vector<1x1x32x32xbf16>
    %570 = vector.shape_cast %569 : vector<1x1x32x32xbf16> to vector<32x32xbf16>
    %cst_458 = arith.constant dense<0.000000e+00> : vector<2x32xf32>
    %571 = tpu.matmul %568, %570, %cst_458 {dimension_numbers = #tpu.dot_dimension_numbers<[1], [0], [0], [1], [0, 0, 1, 1], [], []>} : vector<2x32xbf16>, vector<32x32xbf16>, vector<2x32xf32> -> vector<2x32xf32>
    %c1_459 = arith.constant 1 : index
    %c0_460 = arith.constant 0 : index
    %c0_461 = arith.constant 0 : index
    %c0_462 = arith.constant 0 : index
    %572 = vector.load %arg5[%c1_459, %c0_460, %c0_461, %c0_462] : memref<2x3x1x32xf32, #tpu.memory_space<vmem>>, vector<1x1x1x32xf32>
    %573 = vector.shape_cast %572 : vector<1x1x1x32xf32> to vector<1x32xf32>
    %574 = vector.broadcast %573 : vector<1x32xf32> to vector<2x32xf32>
    %575 = arith.addf %571, %574 : vector<2x32xf32>
    %c1_463 = arith.constant 1 : index
    %c1_464 = arith.constant 1 : index
    %c0_465 = arith.constant 0 : index
    %c0_466 = arith.constant 0 : index
    %576 = vector.load %arg3[%c1_463, %c1_464, %c0_465, %c0_466] : memref<2x3x32x32xbf16, #tpu.memory_space<vmem>>, vector<1x1x32x32xbf16>
    %577 = vector.shape_cast %576 : vector<1x1x32x32xbf16> to vector<32x32xbf16>
    %cst_467 = arith.constant dense<0.000000e+00> : vector<2x32xf32>
    %578 = tpu.matmul %568, %577, %cst_467 {dimension_numbers = #tpu.dot_dimension_numbers<[1], [0], [0], [1], [0, 0, 1, 1], [], []>} : vector<2x32xbf16>, vector<32x32xbf16>, vector<2x32xf32> -> vector<2x32xf32>
    %c1_468 = arith.constant 1 : index
    %c1_469 = arith.constant 1 : index
    %c0_470 = arith.constant 0 : index
    %c0_471 = arith.constant 0 : index
    %579 = vector.load %arg5[%c1_468, %c1_469, %c0_470, %c0_471] : memref<2x3x1x32xf32, #tpu.memory_space<vmem>>, vector<1x1x1x32xf32>
    %580 = vector.shape_cast %579 : vector<1x1x1x32xf32> to vector<1x32xf32>
    %581 = vector.broadcast %580 : vector<1x32xf32> to vector<2x32xf32>
    %582 = arith.addf %578, %581 : vector<2x32xf32>
    %c1_472 = arith.constant 1 : index
    %c2_473 = arith.constant 2 : index
    %c0_474 = arith.constant 0 : index
    %c0_475 = arith.constant 0 : index
    %583 = vector.load %arg3[%c1_472, %c2_473, %c0_474, %c0_475] : memref<2x3x32x32xbf16, #tpu.memory_space<vmem>>, vector<1x1x32x32xbf16>
    %584 = vector.shape_cast %583 : vector<1x1x32x32xbf16> to vector<32x32xbf16>
    %cst_476 = arith.constant dense<0.000000e+00> : vector<2x32xf32>
    %585 = tpu.matmul %568, %584, %cst_476 {dimension_numbers = #tpu.dot_dimension_numbers<[1], [0], [0], [1], [0, 0, 1, 1], [], []>} : vector<2x32xbf16>, vector<32x32xbf16>, vector<2x32xf32> -> vector<2x32xf32>
    %c1_477 = arith.constant 1 : index
    %c2_478 = arith.constant 2 : index
    %c0_479 = arith.constant 0 : index
    %c0_480 = arith.constant 0 : index
    %586 = vector.load %arg5[%c1_477, %c2_478, %c0_479, %c0_480] : memref<2x3x1x32xf32, #tpu.memory_space<vmem>>, vector<1x1x1x32xf32>
    %587 = vector.shape_cast %586 : vector<1x1x1x32xf32> to vector<1x32xf32>
    %588 = vector.broadcast %587 : vector<1x32xf32> to vector<2x32xf32>
    %589 = arith.addf %585, %588 : vector<2x32xf32>
    %590 = arith.addf %561, %575 : vector<2x32xf32>
    %591 = arith.negf %590 : vector<2x32xf32>
    %592 = math.exp %591 : vector<2x32xf32>
    %cst_481 = arith.constant 1.000000e+00 : f32
    %593 = vector.broadcast %cst_481 : f32 to vector<2x32xf32>
    %594 = arith.addf %593, %592 : vector<2x32xf32>
    %595 = arith.divf %593, %594 : vector<2x32xf32>
    %596 = arith.addf %564, %582 : vector<2x32xf32>
    %597 = arith.negf %596 : vector<2x32xf32>
    %598 = math.exp %597 : vector<2x32xf32>
    %cst_482 = arith.constant 1.000000e+00 : f32
    %599 = vector.broadcast %cst_482 : f32 to vector<2x32xf32>
    %600 = arith.addf %599, %598 : vector<2x32xf32>
    %601 = arith.divf %599, %600 : vector<2x32xf32>
    %602 = arith.mulf %595, %589 : vector<2x32xf32>
    %603 = arith.addf %567, %602 : vector<2x32xf32>
    %604 = math.tanh %603 : vector<2x32xf32>
    %cst_483 = arith.constant 1.000000e+00 : f32
    %605 = vector.broadcast %cst_483 : f32 to vector<2x32xf32>
    %606 = arith.subf %605, %601 : vector<2x32xf32>
    %607 = arith.mulf %606, %604 : vector<2x32xf32>
    %608 = arith.mulf %601, %500 : vector<2x32xf32>
    %609 = arith.addf %607, %608 : vector<2x32xf32>
    %610 = arith.maximumf %501, %609 : vector<2x32xf32>
    %c5_i32 = arith.constant 5 : i32
    %c2_i32_484 = arith.constant 2 : i32
    %611 = arith.muli %c5_i32, %c2_i32_484 : i32
    %612 = tpu.assume_multiple %611, 2 : i32
    %c0_485 = arith.constant 0 : index
    %c0_486 = arith.constant 0 : index
    %613 = arith.index_cast %612 : i32 to index
    %c0_487 = arith.constant 0 : index
    %614 = vector.load %arg9[%c0_485, %c0_486, %613, %c0_487] : memref<2x3x16x32xf32, #tpu.memory_space<vmem>>, vector<1x1x2x32xf32>
    %615 = vector.shape_cast %614 : vector<1x1x2x32xf32> to vector<2x32xf32>
    %c0_488 = arith.constant 0 : index
    %c1_489 = arith.constant 1 : index
    %616 = arith.index_cast %612 : i32 to index
    %c0_490 = arith.constant 0 : index
    %617 = vector.load %arg9[%c0_488, %c1_489, %616, %c0_490] : memref<2x3x16x32xf32, #tpu.memory_space<vmem>>, vector<1x1x2x32xf32>
    %618 = vector.shape_cast %617 : vector<1x1x2x32xf32> to vector<2x32xf32>
    %c0_491 = arith.constant 0 : index
    %c2_492 = arith.constant 2 : index
    %619 = arith.index_cast %612 : i32 to index
    %c0_493 = arith.constant 0 : index
    %620 = vector.load %arg9[%c0_491, %c2_492, %619, %c0_493] : memref<2x3x16x32xf32, #tpu.memory_space<vmem>>, vector<1x1x2x32xf32>
    %621 = vector.shape_cast %620 : vector<1x1x2x32xf32> to vector<2x32xf32>
    %622 = arith.truncf %554 : vector<2x32xf32> to vector<2x32xbf16>
    %c0_494 = arith.constant 0 : index
    %c0_495 = arith.constant 0 : index
    %c0_496 = arith.constant 0 : index
    %c0_497 = arith.constant 0 : index
    %623 = vector.load %arg3[%c0_494, %c0_495, %c0_496, %c0_497] : memref<2x3x32x32xbf16, #tpu.memory_space<vmem>>, vector<1x1x32x32xbf16>
    %624 = vector.shape_cast %623 : vector<1x1x32x32xbf16> to vector<32x32xbf16>
    %cst_498 = arith.constant dense<0.000000e+00> : vector<2x32xf32>
    %625 = tpu.matmul %622, %624, %cst_498 {dimension_numbers = #tpu.dot_dimension_numbers<[1], [0], [0], [1], [0, 0, 1, 1], [], []>} : vector<2x32xbf16>, vector<32x32xbf16>, vector<2x32xf32> -> vector<2x32xf32>
    %c0_499 = arith.constant 0 : index
    %c0_500 = arith.constant 0 : index
    %c0_501 = arith.constant 0 : index
    %c0_502 = arith.constant 0 : index
    %626 = vector.load %arg5[%c0_499, %c0_500, %c0_501, %c0_502] : memref<2x3x1x32xf32, #tpu.memory_space<vmem>>, vector<1x1x1x32xf32>
    %627 = vector.shape_cast %626 : vector<1x1x1x32xf32> to vector<1x32xf32>
    %628 = vector.broadcast %627 : vector<1x32xf32> to vector<2x32xf32>
    %629 = arith.addf %625, %628 : vector<2x32xf32>
    %c0_503 = arith.constant 0 : index
    %c1_504 = arith.constant 1 : index
    %c0_505 = arith.constant 0 : index
    %c0_506 = arith.constant 0 : index
    %630 = vector.load %arg3[%c0_503, %c1_504, %c0_505, %c0_506] : memref<2x3x32x32xbf16, #tpu.memory_space<vmem>>, vector<1x1x32x32xbf16>
    %631 = vector.shape_cast %630 : vector<1x1x32x32xbf16> to vector<32x32xbf16>
    %cst_507 = arith.constant dense<0.000000e+00> : vector<2x32xf32>
    %632 = tpu.matmul %622, %631, %cst_507 {dimension_numbers = #tpu.dot_dimension_numbers<[1], [0], [0], [1], [0, 0, 1, 1], [], []>} : vector<2x32xbf16>, vector<32x32xbf16>, vector<2x32xf32> -> vector<2x32xf32>
    %c0_508 = arith.constant 0 : index
    %c1_509 = arith.constant 1 : index
    %c0_510 = arith.constant 0 : index
    %c0_511 = arith.constant 0 : index
    %633 = vector.load %arg5[%c0_508, %c1_509, %c0_510, %c0_511] : memref<2x3x1x32xf32, #tpu.memory_space<vmem>>, vector<1x1x1x32xf32>
    %634 = vector.shape_cast %633 : vector<1x1x1x32xf32> to vector<1x32xf32>
    %635 = vector.broadcast %634 : vector<1x32xf32> to vector<2x32xf32>
    %636 = arith.addf %632, %635 : vector<2x32xf32>
    %c0_512 = arith.constant 0 : index
    %c2_513 = arith.constant 2 : index
    %c0_514 = arith.constant 0 : index
    %c0_515 = arith.constant 0 : index
    %637 = vector.load %arg3[%c0_512, %c2_513, %c0_514, %c0_515] : memref<2x3x32x32xbf16, #tpu.memory_space<vmem>>, vector<1x1x32x32xbf16>
    %638 = vector.shape_cast %637 : vector<1x1x32x32xbf16> to vector<32x32xbf16>
    %cst_516 = arith.constant dense<0.000000e+00> : vector<2x32xf32>
    %639 = tpu.matmul %622, %638, %cst_516 {dimension_numbers = #tpu.dot_dimension_numbers<[1], [0], [0], [1], [0, 0, 1, 1], [], []>} : vector<2x32xbf16>, vector<32x32xbf16>, vector<2x32xf32> -> vector<2x32xf32>
    %c0_517 = arith.constant 0 : index
    %c2_518 = arith.constant 2 : index
    %c0_519 = arith.constant 0 : index
    %c0_520 = arith.constant 0 : index
    %640 = vector.load %arg5[%c0_517, %c2_518, %c0_519, %c0_520] : memref<2x3x1x32xf32, #tpu.memory_space<vmem>>, vector<1x1x1x32xf32>
    %641 = vector.shape_cast %640 : vector<1x1x1x32xf32> to vector<1x32xf32>
    %642 = vector.broadcast %641 : vector<1x32xf32> to vector<2x32xf32>
    %643 = arith.addf %639, %642 : vector<2x32xf32>
    %644 = arith.addf %615, %629 : vector<2x32xf32>
    %645 = arith.negf %644 : vector<2x32xf32>
    %646 = math.exp %645 : vector<2x32xf32>
    %cst_521 = arith.constant 1.000000e+00 : f32
    %647 = vector.broadcast %cst_521 : f32 to vector<2x32xf32>
    %648 = arith.addf %647, %646 : vector<2x32xf32>
    %649 = arith.divf %647, %648 : vector<2x32xf32>
    %650 = arith.addf %618, %636 : vector<2x32xf32>
    %651 = arith.negf %650 : vector<2x32xf32>
    %652 = math.exp %651 : vector<2x32xf32>
    %cst_522 = arith.constant 1.000000e+00 : f32
    %653 = vector.broadcast %cst_522 : f32 to vector<2x32xf32>
    %654 = arith.addf %653, %652 : vector<2x32xf32>
    %655 = arith.divf %653, %654 : vector<2x32xf32>
    %656 = arith.mulf %649, %643 : vector<2x32xf32>
    %657 = arith.addf %621, %656 : vector<2x32xf32>
    %658 = math.tanh %657 : vector<2x32xf32>
    %cst_523 = arith.constant 1.000000e+00 : f32
    %659 = vector.broadcast %cst_523 : f32 to vector<2x32xf32>
    %660 = arith.subf %659, %655 : vector<2x32xf32>
    %661 = arith.mulf %660, %658 : vector<2x32xf32>
    %662 = arith.mulf %655, %554 : vector<2x32xf32>
    %663 = arith.addf %661, %662 : vector<2x32xf32>
    %664 = arith.maximumf %555, %663 : vector<2x32xf32>
    %c7_i32_524 = arith.constant 7 : i32
    %665 = arith.subi %c7_i32_524, %c5_i32 : i32
    %c2_i32_525 = arith.constant 2 : i32
    %666 = arith.muli %665, %c2_i32_525 : i32
    %667 = tpu.assume_multiple %666, 2 : i32
    %c1_526 = arith.constant 1 : index
    %c0_527 = arith.constant 0 : index
    %668 = arith.index_cast %667 : i32 to index
    %c0_528 = arith.constant 0 : index
    %669 = vector.load %arg9[%c1_526, %c0_527, %668, %c0_528] : memref<2x3x16x32xf32, #tpu.memory_space<vmem>>, vector<1x1x2x32xf32>
    %670 = vector.shape_cast %669 : vector<1x1x2x32xf32> to vector<2x32xf32>
    %c1_529 = arith.constant 1 : index
    %c1_530 = arith.constant 1 : index
    %671 = arith.index_cast %667 : i32 to index
    %c0_531 = arith.constant 0 : index
    %672 = vector.load %arg9[%c1_529, %c1_530, %671, %c0_531] : memref<2x3x16x32xf32, #tpu.memory_space<vmem>>, vector<1x1x2x32xf32>
    %673 = vector.shape_cast %672 : vector<1x1x2x32xf32> to vector<2x32xf32>
    %c1_532 = arith.constant 1 : index
    %c2_533 = arith.constant 2 : index
    %674 = arith.index_cast %667 : i32 to index
    %c0_534 = arith.constant 0 : index
    %675 = vector.load %arg9[%c1_532, %c2_533, %674, %c0_534] : memref<2x3x16x32xf32, #tpu.memory_space<vmem>>, vector<1x1x2x32xf32>
    %676 = vector.shape_cast %675 : vector<1x1x2x32xf32> to vector<2x32xf32>
    %677 = arith.truncf %609 : vector<2x32xf32> to vector<2x32xbf16>
    %c1_535 = arith.constant 1 : index
    %c0_536 = arith.constant 0 : index
    %c0_537 = arith.constant 0 : index
    %c0_538 = arith.constant 0 : index
    %678 = vector.load %arg3[%c1_535, %c0_536, %c0_537, %c0_538] : memref<2x3x32x32xbf16, #tpu.memory_space<vmem>>, vector<1x1x32x32xbf16>
    %679 = vector.shape_cast %678 : vector<1x1x32x32xbf16> to vector<32x32xbf16>
    %cst_539 = arith.constant dense<0.000000e+00> : vector<2x32xf32>
    %680 = tpu.matmul %677, %679, %cst_539 {dimension_numbers = #tpu.dot_dimension_numbers<[1], [0], [0], [1], [0, 0, 1, 1], [], []>} : vector<2x32xbf16>, vector<32x32xbf16>, vector<2x32xf32> -> vector<2x32xf32>
    %c1_540 = arith.constant 1 : index
    %c0_541 = arith.constant 0 : index
    %c0_542 = arith.constant 0 : index
    %c0_543 = arith.constant 0 : index
    %681 = vector.load %arg5[%c1_540, %c0_541, %c0_542, %c0_543] : memref<2x3x1x32xf32, #tpu.memory_space<vmem>>, vector<1x1x1x32xf32>
    %682 = vector.shape_cast %681 : vector<1x1x1x32xf32> to vector<1x32xf32>
    %683 = vector.broadcast %682 : vector<1x32xf32> to vector<2x32xf32>
    %684 = arith.addf %680, %683 : vector<2x32xf32>
    %c1_544 = arith.constant 1 : index
    %c1_545 = arith.constant 1 : index
    %c0_546 = arith.constant 0 : index
    %c0_547 = arith.constant 0 : index
    %685 = vector.load %arg3[%c1_544, %c1_545, %c0_546, %c0_547] : memref<2x3x32x32xbf16, #tpu.memory_space<vmem>>, vector<1x1x32x32xbf16>
    %686 = vector.shape_cast %685 : vector<1x1x32x32xbf16> to vector<32x32xbf16>
    %cst_548 = arith.constant dense<0.000000e+00> : vector<2x32xf32>
    %687 = tpu.matmul %677, %686, %cst_548 {dimension_numbers = #tpu.dot_dimension_numbers<[1], [0], [0], [1], [0, 0, 1, 1], [], []>} : vector<2x32xbf16>, vector<32x32xbf16>, vector<2x32xf32> -> vector<2x32xf32>
    %c1_549 = arith.constant 1 : index
    %c1_550 = arith.constant 1 : index
    %c0_551 = arith.constant 0 : index
    %c0_552 = arith.constant 0 : index
    %688 = vector.load %arg5[%c1_549, %c1_550, %c0_551, %c0_552] : memref<2x3x1x32xf32, #tpu.memory_space<vmem>>, vector<1x1x1x32xf32>
    %689 = vector.shape_cast %688 : vector<1x1x1x32xf32> to vector<1x32xf32>
    %690 = vector.broadcast %689 : vector<1x32xf32> to vector<2x32xf32>
    %691 = arith.addf %687, %690 : vector<2x32xf32>
    %c1_553 = arith.constant 1 : index
    %c2_554 = arith.constant 2 : index
    %c0_555 = arith.constant 0 : index
    %c0_556 = arith.constant 0 : index
    %692 = vector.load %arg3[%c1_553, %c2_554, %c0_555, %c0_556] : memref<2x3x32x32xbf16, #tpu.memory_space<vmem>>, vector<1x1x32x32xbf16>
    %693 = vector.shape_cast %692 : vector<1x1x32x32xbf16> to vector<32x32xbf16>
    %cst_557 = arith.constant dense<0.000000e+00> : vector<2x32xf32>
    %694 = tpu.matmul %677, %693, %cst_557 {dimension_numbers = #tpu.dot_dimension_numbers<[1], [0], [0], [1], [0, 0, 1, 1], [], []>} : vector<2x32xbf16>, vector<32x32xbf16>, vector<2x32xf32> -> vector<2x32xf32>
    %c1_558 = arith.constant 1 : index
    %c2_559 = arith.constant 2 : index
    %c0_560 = arith.constant 0 : index
    %c0_561 = arith.constant 0 : index
    %695 = vector.load %arg5[%c1_558, %c2_559, %c0_560, %c0_561] : memref<2x3x1x32xf32, #tpu.memory_space<vmem>>, vector<1x1x1x32xf32>
    %696 = vector.shape_cast %695 : vector<1x1x1x32xf32> to vector<1x32xf32>
    %697 = vector.broadcast %696 : vector<1x32xf32> to vector<2x32xf32>
    %698 = arith.addf %694, %697 : vector<2x32xf32>
    %699 = arith.addf %670, %684 : vector<2x32xf32>
    %700 = arith.negf %699 : vector<2x32xf32>
    %701 = math.exp %700 : vector<2x32xf32>
    %cst_562 = arith.constant 1.000000e+00 : f32
    %702 = vector.broadcast %cst_562 : f32 to vector<2x32xf32>
    %703 = arith.addf %702, %701 : vector<2x32xf32>
    %704 = arith.divf %702, %703 : vector<2x32xf32>
    %705 = arith.addf %673, %691 : vector<2x32xf32>
    %706 = arith.negf %705 : vector<2x32xf32>
    %707 = math.exp %706 : vector<2x32xf32>
    %cst_563 = arith.constant 1.000000e+00 : f32
    %708 = vector.broadcast %cst_563 : f32 to vector<2x32xf32>
    %709 = arith.addf %708, %707 : vector<2x32xf32>
    %710 = arith.divf %708, %709 : vector<2x32xf32>
    %711 = arith.mulf %704, %698 : vector<2x32xf32>
    %712 = arith.addf %676, %711 : vector<2x32xf32>
    %713 = math.tanh %712 : vector<2x32xf32>
    %cst_564 = arith.constant 1.000000e+00 : f32
    %714 = vector.broadcast %cst_564 : f32 to vector<2x32xf32>
    %715 = arith.subf %714, %710 : vector<2x32xf32>
    %716 = arith.mulf %715, %713 : vector<2x32xf32>
    %717 = arith.mulf %710, %609 : vector<2x32xf32>
    %718 = arith.addf %716, %717 : vector<2x32xf32>
    %719 = arith.maximumf %610, %718 : vector<2x32xf32>
    %c6_i32 = arith.constant 6 : i32
    %c2_i32_565 = arith.constant 2 : i32
    %720 = arith.muli %c6_i32, %c2_i32_565 : i32
    %721 = tpu.assume_multiple %720, 2 : i32
    %c0_566 = arith.constant 0 : index
    %c0_567 = arith.constant 0 : index
    %722 = arith.index_cast %721 : i32 to index
    %c0_568 = arith.constant 0 : index
    %723 = vector.load %arg9[%c0_566, %c0_567, %722, %c0_568] : memref<2x3x16x32xf32, #tpu.memory_space<vmem>>, vector<1x1x2x32xf32>
    %724 = vector.shape_cast %723 : vector<1x1x2x32xf32> to vector<2x32xf32>
    %c0_569 = arith.constant 0 : index
    %c1_570 = arith.constant 1 : index
    %725 = arith.index_cast %721 : i32 to index
    %c0_571 = arith.constant 0 : index
    %726 = vector.load %arg9[%c0_569, %c1_570, %725, %c0_571] : memref<2x3x16x32xf32, #tpu.memory_space<vmem>>, vector<1x1x2x32xf32>
    %727 = vector.shape_cast %726 : vector<1x1x2x32xf32> to vector<2x32xf32>
    %c0_572 = arith.constant 0 : index
    %c2_573 = arith.constant 2 : index
    %728 = arith.index_cast %721 : i32 to index
    %c0_574 = arith.constant 0 : index
    %729 = vector.load %arg9[%c0_572, %c2_573, %728, %c0_574] : memref<2x3x16x32xf32, #tpu.memory_space<vmem>>, vector<1x1x2x32xf32>
    %730 = vector.shape_cast %729 : vector<1x1x2x32xf32> to vector<2x32xf32>
    %731 = arith.truncf %663 : vector<2x32xf32> to vector<2x32xbf16>
    %c0_575 = arith.constant 0 : index
    %c0_576 = arith.constant 0 : index
    %c0_577 = arith.constant 0 : index
    %c0_578 = arith.constant 0 : index
    %732 = vector.load %arg3[%c0_575, %c0_576, %c0_577, %c0_578] : memref<2x3x32x32xbf16, #tpu.memory_space<vmem>>, vector<1x1x32x32xbf16>
    %733 = vector.shape_cast %732 : vector<1x1x32x32xbf16> to vector<32x32xbf16>
    %cst_579 = arith.constant dense<0.000000e+00> : vector<2x32xf32>
    %734 = tpu.matmul %731, %733, %cst_579 {dimension_numbers = #tpu.dot_dimension_numbers<[1], [0], [0], [1], [0, 0, 1, 1], [], []>} : vector<2x32xbf16>, vector<32x32xbf16>, vector<2x32xf32> -> vector<2x32xf32>
    %c0_580 = arith.constant 0 : index
    %c0_581 = arith.constant 0 : index
    %c0_582 = arith.constant 0 : index
    %c0_583 = arith.constant 0 : index
    %735 = vector.load %arg5[%c0_580, %c0_581, %c0_582, %c0_583] : memref<2x3x1x32xf32, #tpu.memory_space<vmem>>, vector<1x1x1x32xf32>
    %736 = vector.shape_cast %735 : vector<1x1x1x32xf32> to vector<1x32xf32>
    %737 = vector.broadcast %736 : vector<1x32xf32> to vector<2x32xf32>
    %738 = arith.addf %734, %737 : vector<2x32xf32>
    %c0_584 = arith.constant 0 : index
    %c1_585 = arith.constant 1 : index
    %c0_586 = arith.constant 0 : index
    %c0_587 = arith.constant 0 : index
    %739 = vector.load %arg3[%c0_584, %c1_585, %c0_586, %c0_587] : memref<2x3x32x32xbf16, #tpu.memory_space<vmem>>, vector<1x1x32x32xbf16>
    %740 = vector.shape_cast %739 : vector<1x1x32x32xbf16> to vector<32x32xbf16>
    %cst_588 = arith.constant dense<0.000000e+00> : vector<2x32xf32>
    %741 = tpu.matmul %731, %740, %cst_588 {dimension_numbers = #tpu.dot_dimension_numbers<[1], [0], [0], [1], [0, 0, 1, 1], [], []>} : vector<2x32xbf16>, vector<32x32xbf16>, vector<2x32xf32> -> vector<2x32xf32>
    %c0_589 = arith.constant 0 : index
    %c1_590 = arith.constant 1 : index
    %c0_591 = arith.constant 0 : index
    %c0_592 = arith.constant 0 : index
    %742 = vector.load %arg5[%c0_589, %c1_590, %c0_591, %c0_592] : memref<2x3x1x32xf32, #tpu.memory_space<vmem>>, vector<1x1x1x32xf32>
    %743 = vector.shape_cast %742 : vector<1x1x1x32xf32> to vector<1x32xf32>
    %744 = vector.broadcast %743 : vector<1x32xf32> to vector<2x32xf32>
    %745 = arith.addf %741, %744 : vector<2x32xf32>
    %c0_593 = arith.constant 0 : index
    %c2_594 = arith.constant 2 : index
    %c0_595 = arith.constant 0 : index
    %c0_596 = arith.constant 0 : index
    %746 = vector.load %arg3[%c0_593, %c2_594, %c0_595, %c0_596] : memref<2x3x32x32xbf16, #tpu.memory_space<vmem>>, vector<1x1x32x32xbf16>
    %747 = vector.shape_cast %746 : vector<1x1x32x32xbf16> to vector<32x32xbf16>
    %cst_597 = arith.constant dense<0.000000e+00> : vector<2x32xf32>
    %748 = tpu.matmul %731, %747, %cst_597 {dimension_numbers = #tpu.dot_dimension_numbers<[1], [0], [0], [1], [0, 0, 1, 1], [], []>} : vector<2x32xbf16>, vector<32x32xbf16>, vector<2x32xf32> -> vector<2x32xf32>
    %c0_598 = arith.constant 0 : index
    %c2_599 = arith.constant 2 : index
    %c0_600 = arith.constant 0 : index
    %c0_601 = arith.constant 0 : index
    %749 = vector.load %arg5[%c0_598, %c2_599, %c0_600, %c0_601] : memref<2x3x1x32xf32, #tpu.memory_space<vmem>>, vector<1x1x1x32xf32>
    %750 = vector.shape_cast %749 : vector<1x1x1x32xf32> to vector<1x32xf32>
    %751 = vector.broadcast %750 : vector<1x32xf32> to vector<2x32xf32>
    %752 = arith.addf %748, %751 : vector<2x32xf32>
    %753 = arith.addf %724, %738 : vector<2x32xf32>
    %754 = arith.negf %753 : vector<2x32xf32>
    %755 = math.exp %754 : vector<2x32xf32>
    %cst_602 = arith.constant 1.000000e+00 : f32
    %756 = vector.broadcast %cst_602 : f32 to vector<2x32xf32>
    %757 = arith.addf %756, %755 : vector<2x32xf32>
    %758 = arith.divf %756, %757 : vector<2x32xf32>
    %759 = arith.addf %727, %745 : vector<2x32xf32>
    %760 = arith.negf %759 : vector<2x32xf32>
    %761 = math.exp %760 : vector<2x32xf32>
    %cst_603 = arith.constant 1.000000e+00 : f32
    %762 = vector.broadcast %cst_603 : f32 to vector<2x32xf32>
    %763 = arith.addf %762, %761 : vector<2x32xf32>
    %764 = arith.divf %762, %763 : vector<2x32xf32>
    %765 = arith.mulf %758, %752 : vector<2x32xf32>
    %766 = arith.addf %730, %765 : vector<2x32xf32>
    %767 = math.tanh %766 : vector<2x32xf32>
    %cst_604 = arith.constant 1.000000e+00 : f32
    %768 = vector.broadcast %cst_604 : f32 to vector<2x32xf32>
    %769 = arith.subf %768, %764 : vector<2x32xf32>
    %770 = arith.mulf %769, %767 : vector<2x32xf32>
    %771 = arith.mulf %764, %663 : vector<2x32xf32>
    %772 = arith.addf %770, %771 : vector<2x32xf32>
    %773 = arith.maximumf %664, %772 : vector<2x32xf32>
    %c7_i32_605 = arith.constant 7 : i32
    %774 = arith.subi %c7_i32_605, %c6_i32 : i32
    %c2_i32_606 = arith.constant 2 : i32
    %775 = arith.muli %774, %c2_i32_606 : i32
    %776 = tpu.assume_multiple %775, 2 : i32
    %c1_607 = arith.constant 1 : index
    %c0_608 = arith.constant 0 : index
    %777 = arith.index_cast %776 : i32 to index
    %c0_609 = arith.constant 0 : index
    %778 = vector.load %arg9[%c1_607, %c0_608, %777, %c0_609] : memref<2x3x16x32xf32, #tpu.memory_space<vmem>>, vector<1x1x2x32xf32>
    %779 = vector.shape_cast %778 : vector<1x1x2x32xf32> to vector<2x32xf32>
    %c1_610 = arith.constant 1 : index
    %c1_611 = arith.constant 1 : index
    %780 = arith.index_cast %776 : i32 to index
    %c0_612 = arith.constant 0 : index
    %781 = vector.load %arg9[%c1_610, %c1_611, %780, %c0_612] : memref<2x3x16x32xf32, #tpu.memory_space<vmem>>, vector<1x1x2x32xf32>
    %782 = vector.shape_cast %781 : vector<1x1x2x32xf32> to vector<2x32xf32>
    %c1_613 = arith.constant 1 : index
    %c2_614 = arith.constant 2 : index
    %783 = arith.index_cast %776 : i32 to index
    %c0_615 = arith.constant 0 : index
    %784 = vector.load %arg9[%c1_613, %c2_614, %783, %c0_615] : memref<2x3x16x32xf32, #tpu.memory_space<vmem>>, vector<1x1x2x32xf32>
    %785 = vector.shape_cast %784 : vector<1x1x2x32xf32> to vector<2x32xf32>
    %786 = arith.truncf %718 : vector<2x32xf32> to vector<2x32xbf16>
    %c1_616 = arith.constant 1 : index
    %c0_617 = arith.constant 0 : index
    %c0_618 = arith.constant 0 : index
    %c0_619 = arith.constant 0 : index
    %787 = vector.load %arg3[%c1_616, %c0_617, %c0_618, %c0_619] : memref<2x3x32x32xbf16, #tpu.memory_space<vmem>>, vector<1x1x32x32xbf16>
    %788 = vector.shape_cast %787 : vector<1x1x32x32xbf16> to vector<32x32xbf16>
    %cst_620 = arith.constant dense<0.000000e+00> : vector<2x32xf32>
    %789 = tpu.matmul %786, %788, %cst_620 {dimension_numbers = #tpu.dot_dimension_numbers<[1], [0], [0], [1], [0, 0, 1, 1], [], []>} : vector<2x32xbf16>, vector<32x32xbf16>, vector<2x32xf32> -> vector<2x32xf32>
    %c1_621 = arith.constant 1 : index
    %c0_622 = arith.constant 0 : index
    %c0_623 = arith.constant 0 : index
    %c0_624 = arith.constant 0 : index
    %790 = vector.load %arg5[%c1_621, %c0_622, %c0_623, %c0_624] : memref<2x3x1x32xf32, #tpu.memory_space<vmem>>, vector<1x1x1x32xf32>
    %791 = vector.shape_cast %790 : vector<1x1x1x32xf32> to vector<1x32xf32>
    %792 = vector.broadcast %791 : vector<1x32xf32> to vector<2x32xf32>
    %793 = arith.addf %789, %792 : vector<2x32xf32>
    %c1_625 = arith.constant 1 : index
    %c1_626 = arith.constant 1 : index
    %c0_627 = arith.constant 0 : index
    %c0_628 = arith.constant 0 : index
    %794 = vector.load %arg3[%c1_625, %c1_626, %c0_627, %c0_628] : memref<2x3x32x32xbf16, #tpu.memory_space<vmem>>, vector<1x1x32x32xbf16>
    %795 = vector.shape_cast %794 : vector<1x1x32x32xbf16> to vector<32x32xbf16>
    %cst_629 = arith.constant dense<0.000000e+00> : vector<2x32xf32>
    %796 = tpu.matmul %786, %795, %cst_629 {dimension_numbers = #tpu.dot_dimension_numbers<[1], [0], [0], [1], [0, 0, 1, 1], [], []>} : vector<2x32xbf16>, vector<32x32xbf16>, vector<2x32xf32> -> vector<2x32xf32>
    %c1_630 = arith.constant 1 : index
    %c1_631 = arith.constant 1 : index
    %c0_632 = arith.constant 0 : index
    %c0_633 = arith.constant 0 : index
    %797 = vector.load %arg5[%c1_630, %c1_631, %c0_632, %c0_633] : memref<2x3x1x32xf32, #tpu.memory_space<vmem>>, vector<1x1x1x32xf32>
    %798 = vector.shape_cast %797 : vector<1x1x1x32xf32> to vector<1x32xf32>
    %799 = vector.broadcast %798 : vector<1x32xf32> to vector<2x32xf32>
    %800 = arith.addf %796, %799 : vector<2x32xf32>
    %c1_634 = arith.constant 1 : index
    %c2_635 = arith.constant 2 : index
    %c0_636 = arith.constant 0 : index
    %c0_637 = arith.constant 0 : index
    %801 = vector.load %arg3[%c1_634, %c2_635, %c0_636, %c0_637] : memref<2x3x32x32xbf16, #tpu.memory_space<vmem>>, vector<1x1x32x32xbf16>
    %802 = vector.shape_cast %801 : vector<1x1x32x32xbf16> to vector<32x32xbf16>
    %cst_638 = arith.constant dense<0.000000e+00> : vector<2x32xf32>
    %803 = tpu.matmul %786, %802, %cst_638 {dimension_numbers = #tpu.dot_dimension_numbers<[1], [0], [0], [1], [0, 0, 1, 1], [], []>} : vector<2x32xbf16>, vector<32x32xbf16>, vector<2x32xf32> -> vector<2x32xf32>
    %c1_639 = arith.constant 1 : index
    %c2_640 = arith.constant 2 : index
    %c0_641 = arith.constant 0 : index
    %c0_642 = arith.constant 0 : index
    %804 = vector.load %arg5[%c1_639, %c2_640, %c0_641, %c0_642] : memref<2x3x1x32xf32, #tpu.memory_space<vmem>>, vector<1x1x1x32xf32>
    %805 = vector.shape_cast %804 : vector<1x1x1x32xf32> to vector<1x32xf32>
    %806 = vector.broadcast %805 : vector<1x32xf32> to vector<2x32xf32>
    %807 = arith.addf %803, %806 : vector<2x32xf32>
    %808 = arith.addf %779, %793 : vector<2x32xf32>
    %809 = arith.negf %808 : vector<2x32xf32>
    %810 = math.exp %809 : vector<2x32xf32>
    %cst_643 = arith.constant 1.000000e+00 : f32
    %811 = vector.broadcast %cst_643 : f32 to vector<2x32xf32>
    %812 = arith.addf %811, %810 : vector<2x32xf32>
    %813 = arith.divf %811, %812 : vector<2x32xf32>
    %814 = arith.addf %782, %800 : vector<2x32xf32>
    %815 = arith.negf %814 : vector<2x32xf32>
    %816 = math.exp %815 : vector<2x32xf32>
    %cst_644 = arith.constant 1.000000e+00 : f32
    %817 = vector.broadcast %cst_644 : f32 to vector<2x32xf32>
    %818 = arith.addf %817, %816 : vector<2x32xf32>
    %819 = arith.divf %817, %818 : vector<2x32xf32>
    %820 = arith.mulf %813, %807 : vector<2x32xf32>
    %821 = arith.addf %785, %820 : vector<2x32xf32>
    %822 = math.tanh %821 : vector<2x32xf32>
    %cst_645 = arith.constant 1.000000e+00 : f32
    %823 = vector.broadcast %cst_645 : f32 to vector<2x32xf32>
    %824 = arith.subf %823, %819 : vector<2x32xf32>
    %825 = arith.mulf %824, %822 : vector<2x32xf32>
    %826 = arith.mulf %819, %718 : vector<2x32xf32>
    %827 = arith.addf %825, %826 : vector<2x32xf32>
    %828 = arith.maximumf %719, %827 : vector<2x32xf32>
    %c7_i32_646 = arith.constant 7 : i32
    %c2_i32_647 = arith.constant 2 : i32
    %829 = arith.muli %c7_i32_646, %c2_i32_647 : i32
    %830 = tpu.assume_multiple %829, 2 : i32
    %c0_648 = arith.constant 0 : index
    %c0_649 = arith.constant 0 : index
    %831 = arith.index_cast %830 : i32 to index
    %c0_650 = arith.constant 0 : index
    %832 = vector.load %arg9[%c0_648, %c0_649, %831, %c0_650] : memref<2x3x16x32xf32, #tpu.memory_space<vmem>>, vector<1x1x2x32xf32>
    %833 = vector.shape_cast %832 : vector<1x1x2x32xf32> to vector<2x32xf32>
    %c0_651 = arith.constant 0 : index
    %c1_652 = arith.constant 1 : index
    %834 = arith.index_cast %830 : i32 to index
    %c0_653 = arith.constant 0 : index
    %835 = vector.load %arg9[%c0_651, %c1_652, %834, %c0_653] : memref<2x3x16x32xf32, #tpu.memory_space<vmem>>, vector<1x1x2x32xf32>
    %836 = vector.shape_cast %835 : vector<1x1x2x32xf32> to vector<2x32xf32>
    %c0_654 = arith.constant 0 : index
    %c2_655 = arith.constant 2 : index
    %837 = arith.index_cast %830 : i32 to index
    %c0_656 = arith.constant 0 : index
    %838 = vector.load %arg9[%c0_654, %c2_655, %837, %c0_656] : memref<2x3x16x32xf32, #tpu.memory_space<vmem>>, vector<1x1x2x32xf32>
    %839 = vector.shape_cast %838 : vector<1x1x2x32xf32> to vector<2x32xf32>
    %840 = arith.truncf %772 : vector<2x32xf32> to vector<2x32xbf16>
    %c0_657 = arith.constant 0 : index
    %c0_658 = arith.constant 0 : index
    %c0_659 = arith.constant 0 : index
    %c0_660 = arith.constant 0 : index
    %841 = vector.load %arg3[%c0_657, %c0_658, %c0_659, %c0_660] : memref<2x3x32x32xbf16, #tpu.memory_space<vmem>>, vector<1x1x32x32xbf16>
    %842 = vector.shape_cast %841 : vector<1x1x32x32xbf16> to vector<32x32xbf16>
    %cst_661 = arith.constant dense<0.000000e+00> : vector<2x32xf32>
    %843 = tpu.matmul %840, %842, %cst_661 {dimension_numbers = #tpu.dot_dimension_numbers<[1], [0], [0], [1], [0, 0, 1, 1], [], []>} : vector<2x32xbf16>, vector<32x32xbf16>, vector<2x32xf32> -> vector<2x32xf32>
    %c0_662 = arith.constant 0 : index
    %c0_663 = arith.constant 0 : index
    %c0_664 = arith.constant 0 : index
    %c0_665 = arith.constant 0 : index
    %844 = vector.load %arg5[%c0_662, %c0_663, %c0_664, %c0_665] : memref<2x3x1x32xf32, #tpu.memory_space<vmem>>, vector<1x1x1x32xf32>
    %845 = vector.shape_cast %844 : vector<1x1x1x32xf32> to vector<1x32xf32>
    %846 = vector.broadcast %845 : vector<1x32xf32> to vector<2x32xf32>
    %847 = arith.addf %843, %846 : vector<2x32xf32>
    %c0_666 = arith.constant 0 : index
    %c1_667 = arith.constant 1 : index
    %c0_668 = arith.constant 0 : index
    %c0_669 = arith.constant 0 : index
    %848 = vector.load %arg3[%c0_666, %c1_667, %c0_668, %c0_669] : memref<2x3x32x32xbf16, #tpu.memory_space<vmem>>, vector<1x1x32x32xbf16>
    %849 = vector.shape_cast %848 : vector<1x1x32x32xbf16> to vector<32x32xbf16>
    %cst_670 = arith.constant dense<0.000000e+00> : vector<2x32xf32>
    %850 = tpu.matmul %840, %849, %cst_670 {dimension_numbers = #tpu.dot_dimension_numbers<[1], [0], [0], [1], [0, 0, 1, 1], [], []>} : vector<2x32xbf16>, vector<32x32xbf16>, vector<2x32xf32> -> vector<2x32xf32>
    %c0_671 = arith.constant 0 : index
    %c1_672 = arith.constant 1 : index
    %c0_673 = arith.constant 0 : index
    %c0_674 = arith.constant 0 : index
    %851 = vector.load %arg5[%c0_671, %c1_672, %c0_673, %c0_674] : memref<2x3x1x32xf32, #tpu.memory_space<vmem>>, vector<1x1x1x32xf32>
    %852 = vector.shape_cast %851 : vector<1x1x1x32xf32> to vector<1x32xf32>
    %853 = vector.broadcast %852 : vector<1x32xf32> to vector<2x32xf32>
    %854 = arith.addf %850, %853 : vector<2x32xf32>
    %c0_675 = arith.constant 0 : index
    %c2_676 = arith.constant 2 : index
    %c0_677 = arith.constant 0 : index
    %c0_678 = arith.constant 0 : index
    %855 = vector.load %arg3[%c0_675, %c2_676, %c0_677, %c0_678] : memref<2x3x32x32xbf16, #tpu.memory_space<vmem>>, vector<1x1x32x32xbf16>
    %856 = vector.shape_cast %855 : vector<1x1x32x32xbf16> to vector<32x32xbf16>
    %cst_679 = arith.constant dense<0.000000e+00> : vector<2x32xf32>
    %857 = tpu.matmul %840, %856, %cst_679 {dimension_numbers = #tpu.dot_dimension_numbers<[1], [0], [0], [1], [0, 0, 1, 1], [], []>} : vector<2x32xbf16>, vector<32x32xbf16>, vector<2x32xf32> -> vector<2x32xf32>
    %c0_680 = arith.constant 0 : index
    %c2_681 = arith.constant 2 : index
    %c0_682 = arith.constant 0 : index
    %c0_683 = arith.constant 0 : index
    %858 = vector.load %arg5[%c0_680, %c2_681, %c0_682, %c0_683] : memref<2x3x1x32xf32, #tpu.memory_space<vmem>>, vector<1x1x1x32xf32>
    %859 = vector.shape_cast %858 : vector<1x1x1x32xf32> to vector<1x32xf32>
    %860 = vector.broadcast %859 : vector<1x32xf32> to vector<2x32xf32>
    %861 = arith.addf %857, %860 : vector<2x32xf32>
    %862 = arith.addf %833, %847 : vector<2x32xf32>
    %863 = arith.negf %862 : vector<2x32xf32>
    %864 = math.exp %863 : vector<2x32xf32>
    %cst_684 = arith.constant 1.000000e+00 : f32
    %865 = vector.broadcast %cst_684 : f32 to vector<2x32xf32>
    %866 = arith.addf %865, %864 : vector<2x32xf32>
    %867 = arith.divf %865, %866 : vector<2x32xf32>
    %868 = arith.addf %836, %854 : vector<2x32xf32>
    %869 = arith.negf %868 : vector<2x32xf32>
    %870 = math.exp %869 : vector<2x32xf32>
    %cst_685 = arith.constant 1.000000e+00 : f32
    %871 = vector.broadcast %cst_685 : f32 to vector<2x32xf32>
    %872 = arith.addf %871, %870 : vector<2x32xf32>
    %873 = arith.divf %871, %872 : vector<2x32xf32>
    %874 = arith.mulf %867, %861 : vector<2x32xf32>
    %875 = arith.addf %839, %874 : vector<2x32xf32>
    %876 = math.tanh %875 : vector<2x32xf32>
    %cst_686 = arith.constant 1.000000e+00 : f32
    %877 = vector.broadcast %cst_686 : f32 to vector<2x32xf32>
    %878 = arith.subf %877, %873 : vector<2x32xf32>
    %879 = arith.mulf %878, %876 : vector<2x32xf32>
    %880 = arith.mulf %873, %772 : vector<2x32xf32>
    %881 = arith.addf %879, %880 : vector<2x32xf32>
    %882 = arith.maximumf %773, %881 : vector<2x32xf32>
    %c7_i32_687 = arith.constant 7 : i32
    %883 = arith.subi %c7_i32_687, %c7_i32_646 : i32
    %c2_i32_688 = arith.constant 2 : i32
    %884 = arith.muli %883, %c2_i32_688 : i32
    %885 = tpu.assume_multiple %884, 2 : i32
    %c1_689 = arith.constant 1 : index
    %c0_690 = arith.constant 0 : index
    %886 = arith.index_cast %885 : i32 to index
    %c0_691 = arith.constant 0 : index
    %887 = vector.load %arg9[%c1_689, %c0_690, %886, %c0_691] : memref<2x3x16x32xf32, #tpu.memory_space<vmem>>, vector<1x1x2x32xf32>
    %888 = vector.shape_cast %887 : vector<1x1x2x32xf32> to vector<2x32xf32>
    %c1_692 = arith.constant 1 : index
    %c1_693 = arith.constant 1 : index
    %889 = arith.index_cast %885 : i32 to index
    %c0_694 = arith.constant 0 : index
    %890 = vector.load %arg9[%c1_692, %c1_693, %889, %c0_694] : memref<2x3x16x32xf32, #tpu.memory_space<vmem>>, vector<1x1x2x32xf32>
    %891 = vector.shape_cast %890 : vector<1x1x2x32xf32> to vector<2x32xf32>
    %c1_695 = arith.constant 1 : index
    %c2_696 = arith.constant 2 : index
    %892 = arith.index_cast %885 : i32 to index
    %c0_697 = arith.constant 0 : index
    %893 = vector.load %arg9[%c1_695, %c2_696, %892, %c0_697] : memref<2x3x16x32xf32, #tpu.memory_space<vmem>>, vector<1x1x2x32xf32>
    %894 = vector.shape_cast %893 : vector<1x1x2x32xf32> to vector<2x32xf32>
    %895 = arith.truncf %827 : vector<2x32xf32> to vector<2x32xbf16>
    %c1_698 = arith.constant 1 : index
    %c0_699 = arith.constant 0 : index
    %c0_700 = arith.constant 0 : index
    %c0_701 = arith.constant 0 : index
    %896 = vector.load %arg3[%c1_698, %c0_699, %c0_700, %c0_701] : memref<2x3x32x32xbf16, #tpu.memory_space<vmem>>, vector<1x1x32x32xbf16>
    %897 = vector.shape_cast %896 : vector<1x1x32x32xbf16> to vector<32x32xbf16>
    %cst_702 = arith.constant dense<0.000000e+00> : vector<2x32xf32>
    %898 = tpu.matmul %895, %897, %cst_702 {dimension_numbers = #tpu.dot_dimension_numbers<[1], [0], [0], [1], [0, 0, 1, 1], [], []>} : vector<2x32xbf16>, vector<32x32xbf16>, vector<2x32xf32> -> vector<2x32xf32>
    %c1_703 = arith.constant 1 : index
    %c0_704 = arith.constant 0 : index
    %c0_705 = arith.constant 0 : index
    %c0_706 = arith.constant 0 : index
    %899 = vector.load %arg5[%c1_703, %c0_704, %c0_705, %c0_706] : memref<2x3x1x32xf32, #tpu.memory_space<vmem>>, vector<1x1x1x32xf32>
    %900 = vector.shape_cast %899 : vector<1x1x1x32xf32> to vector<1x32xf32>
    %901 = vector.broadcast %900 : vector<1x32xf32> to vector<2x32xf32>
    %902 = arith.addf %898, %901 : vector<2x32xf32>
    %c1_707 = arith.constant 1 : index
    %c1_708 = arith.constant 1 : index
    %c0_709 = arith.constant 0 : index
    %c0_710 = arith.constant 0 : index
    %903 = vector.load %arg3[%c1_707, %c1_708, %c0_709, %c0_710] : memref<2x3x32x32xbf16, #tpu.memory_space<vmem>>, vector<1x1x32x32xbf16>
    %904 = vector.shape_cast %903 : vector<1x1x32x32xbf16> to vector<32x32xbf16>
    %cst_711 = arith.constant dense<0.000000e+00> : vector<2x32xf32>
    %905 = tpu.matmul %895, %904, %cst_711 {dimension_numbers = #tpu.dot_dimension_numbers<[1], [0], [0], [1], [0, 0, 1, 1], [], []>} : vector<2x32xbf16>, vector<32x32xbf16>, vector<2x32xf32> -> vector<2x32xf32>
    %c1_712 = arith.constant 1 : index
    %c1_713 = arith.constant 1 : index
    %c0_714 = arith.constant 0 : index
    %c0_715 = arith.constant 0 : index
    %906 = vector.load %arg5[%c1_712, %c1_713, %c0_714, %c0_715] : memref<2x3x1x32xf32, #tpu.memory_space<vmem>>, vector<1x1x1x32xf32>
    %907 = vector.shape_cast %906 : vector<1x1x1x32xf32> to vector<1x32xf32>
    %908 = vector.broadcast %907 : vector<1x32xf32> to vector<2x32xf32>
    %909 = arith.addf %905, %908 : vector<2x32xf32>
    %c1_716 = arith.constant 1 : index
    %c2_717 = arith.constant 2 : index
    %c0_718 = arith.constant 0 : index
    %c0_719 = arith.constant 0 : index
    %910 = vector.load %arg3[%c1_716, %c2_717, %c0_718, %c0_719] : memref<2x3x32x32xbf16, #tpu.memory_space<vmem>>, vector<1x1x32x32xbf16>
    %911 = vector.shape_cast %910 : vector<1x1x32x32xbf16> to vector<32x32xbf16>
    %cst_720 = arith.constant dense<0.000000e+00> : vector<2x32xf32>
    %912 = tpu.matmul %895, %911, %cst_720 {dimension_numbers = #tpu.dot_dimension_numbers<[1], [0], [0], [1], [0, 0, 1, 1], [], []>} : vector<2x32xbf16>, vector<32x32xbf16>, vector<2x32xf32> -> vector<2x32xf32>
    %c1_721 = arith.constant 1 : index
    %c2_722 = arith.constant 2 : index
    %c0_723 = arith.constant 0 : index
    %c0_724 = arith.constant 0 : index
    %913 = vector.load %arg5[%c1_721, %c2_722, %c0_723, %c0_724] : memref<2x3x1x32xf32, #tpu.memory_space<vmem>>, vector<1x1x1x32xf32>
    %914 = vector.shape_cast %913 : vector<1x1x1x32xf32> to vector<1x32xf32>
    %915 = vector.broadcast %914 : vector<1x32xf32> to vector<2x32xf32>
    %916 = arith.addf %912, %915 : vector<2x32xf32>
    %917 = arith.addf %888, %902 : vector<2x32xf32>
    %918 = arith.negf %917 : vector<2x32xf32>
    %919 = math.exp %918 : vector<2x32xf32>
    %cst_725 = arith.constant 1.000000e+00 : f32
    %920 = vector.broadcast %cst_725 : f32 to vector<2x32xf32>
    %921 = arith.addf %920, %919 : vector<2x32xf32>
    %922 = arith.divf %920, %921 : vector<2x32xf32>
    %923 = arith.addf %891, %909 : vector<2x32xf32>
    %924 = arith.negf %923 : vector<2x32xf32>
    %925 = math.exp %924 : vector<2x32xf32>
    %cst_726 = arith.constant 1.000000e+00 : f32
    %926 = vector.broadcast %cst_726 : f32 to vector<2x32xf32>
    %927 = arith.addf %926, %925 : vector<2x32xf32>
    %928 = arith.divf %926, %927 : vector<2x32xf32>
    %929 = arith.mulf %922, %916 : vector<2x32xf32>
    %930 = arith.addf %894, %929 : vector<2x32xf32>
    %931 = math.tanh %930 : vector<2x32xf32>
    %cst_727 = arith.constant 1.000000e+00 : f32
    %932 = vector.broadcast %cst_727 : f32 to vector<2x32xf32>
    %933 = arith.subf %932, %928 : vector<2x32xf32>
    %934 = arith.mulf %933, %931 : vector<2x32xf32>
    %935 = arith.mulf %928, %827 : vector<2x32xf32>
    %936 = arith.addf %934, %935 : vector<2x32xf32>
    %937 = arith.maximumf %828, %936 : vector<2x32xf32>
    %c8_i32 = arith.constant 8 : i32
    %cst_728 = arith.constant 0.000000e+00 : f32
    %938 = vector.broadcast %cst_728 : f32 to vector<2x4xf32>
    %939 = arith.truncf %882 : vector<2x32xf32> to vector<2x32xbf16>
    %c0_729 = arith.constant 0 : index
    %c0_730 = arith.constant 0 : index
    %c0_731 = arith.constant 0 : index
    %940 = vector.load %arg6[%c0_729, %c0_730, %c0_731] : memref<2x32x4xbf16, #tpu.memory_space<vmem>>, vector<1x32x4xbf16>
    %941 = vector.shape_cast %940 : vector<1x32x4xbf16> to vector<32x4xbf16>
    %cst_732 = arith.constant dense<0.000000e+00> : vector<2x4xf32>
    %942 = tpu.matmul %939, %941, %cst_732 {dimension_numbers = #tpu.dot_dimension_numbers<[1], [0], [0], [1], [0, 0, 1, 1], [], []>} : vector<2x32xbf16>, vector<32x4xbf16>, vector<2x4xf32> -> vector<2x4xf32>
    %943 = arith.addf %938, %942 : vector<2x4xf32>
    %944 = arith.truncf %937 : vector<2x32xf32> to vector<2x32xbf16>
    %c1_733 = arith.constant 1 : index
    %c0_734 = arith.constant 0 : index
    %c0_735 = arith.constant 0 : index
    %945 = vector.load %arg6[%c1_733, %c0_734, %c0_735] : memref<2x32x4xbf16, #tpu.memory_space<vmem>>, vector<1x32x4xbf16>
    %946 = vector.shape_cast %945 : vector<1x32x4xbf16> to vector<32x4xbf16>
    %cst_736 = arith.constant dense<0.000000e+00> : vector<2x4xf32>
    %947 = tpu.matmul %944, %946, %cst_736 {dimension_numbers = #tpu.dot_dimension_numbers<[1], [0], [0], [1], [0, 0, 1, 1], [], []>} : vector<2x32xbf16>, vector<32x4xbf16>, vector<2x4xf32> -> vector<2x4xf32>
    %948 = arith.addf %943, %947 : vector<2x4xf32>
    %c0_737 = arith.constant 0 : index
    %c0_738 = arith.constant 0 : index
    %949 = vector.load %arg7[%c0_737, %c0_738] : memref<1x4xf32, #tpu.memory_space<vmem>>, vector<1x4xf32>
    %950 = vector.broadcast %949 : vector<1x4xf32> to vector<2x4xf32>
    %951 = arith.addf %948, %950 : vector<2x4xf32>
    %c0_739 = arith.constant 0 : index
    %c0_740 = arith.constant 0 : index
    %952 = vector.load %arg8[%c0_739, %c0_740] : memref<2x4xf32, #tpu.memory_space<vmem>>, vector<2x4xf32>
    tpu.vector_store %arg8[%c0_739, %c0_740], %951 {strides = array<i32>} : memref<2x4xf32, #tpu.memory_space<vmem>>, vector<2x4xf32>,
    return
  }
  func.func @transform_0(%arg0: i32) -> (i32, i32) {
    %c0_i32 = arith.constant 0 : i32
    %c0_i32_0 = arith.constant 0 : i32
    %c0_i32_1 = arith.constant 0 : i32
    return %c0_i32, %c0_i32_0 : i32, i32
  }
  func.func @transform_1(%arg0: i32) -> (i32, i32, i32, i32) {
    %c0_i32 = arith.constant 0 : i32
    %c0_i32_0 = arith.constant 0 : i32
    %c0_i32_1 = arith.constant 0 : i32
    %c0_i32_2 = arith.constant 0 : i32
    %c0_i32_3 = arith.constant 0 : i32
    return %c0_i32, %c0_i32_0, %c0_i32_1, %c0_i32_2 : i32, i32, i32, i32
  }
  func.func @transform_2(%arg0: i32) -> (i32, i32, i32, i32) {
    %c0_i32 = arith.constant 0 : i32
    %c0_i32_0 = arith.constant 0 : i32
    %c0_i32_1 = arith.constant 0 : i32
    %c0_i32_2 = arith.constant 0 : i32
    %c0_i32_3 = arith.constant 0 : i32
    return %c0_i32, %c0_i32_0, %c0_i32_1, %c0_i32_2 : i32, i32, i32, i32
  }
  func.func @transform_3(%arg0: i32) -> (i32, i32, i32, i32) {
    %c0_i32 = arith.constant 0 : i32
    %c0_i32_0 = arith.constant 0 : i32
    %c0_i32_1 = arith.constant 0 : i32
    %c0_i32_2 = arith.constant 0 : i32
    %c0_i32_3 = arith.constant 0 : i32
    return %c0_i32, %c0_i32_0, %c0_i32_1, %c0_i32_2 : i32, i32, i32, i32
  }
  func.func @transform_4(%arg0: i32) -> (i32, i32, i32, i32) {
    %c0_i32 = arith.constant 0 : i32
    %c0_i32_0 = arith.constant 0 : i32
    %c0_i32_1 = arith.constant 0 : i32
    %c0_i32_2 = arith.constant 0 : i32
    %c0_i32_3 = arith.constant 0 : i32
    return %c0_i32, %c0_i32_0, %c0_i32_1, %c0_i32_2 : i32, i32, i32, i32
  }
  func.func @transform_5(%arg0: i32) -> (i32, i32, i32) {
    %c0_i32 = arith.constant 0 : i32
    %c0_i32_0 = arith.constant 0 : i32
    %c0_i32_1 = arith.constant 0 : i32
    %c0_i32_2 = arith.constant 0 : i32
    return %c0_i32, %c0_i32_0, %c0_i32_1 : i32, i32, i32
  }
  func.func @transform_6(%arg0: i32) -> (i32, i32) {
    %c0_i32 = arith.constant 0 : i32
    %c0_i32_0 = arith.constant 0 : i32
    %c0_i32_1 = arith.constant 0 : i32
    return %c0_i32, %c0_i32_0 : i32, i32
  }
  func.func @transform_7(%arg0: i32) -> (i32, i32) {
    %c0_i32 = arith.constant 0 : i32
    %c0_i32_0 = arith.constant 0 : i32
    %c0_i32_1 = arith.constant 0 : i32
    return %c0_i32, %c0_i32_0 : i32, i32
  }
}

module attributes {stable_mosaic.version = 11 : i64} {
  func.func @bigru_layer_kernel(%arg0: i32, %arg1: memref<16x16xf32, #tpu.memory_space<vmem>>, %arg2: memref<2x3x16x32xbf16, #tpu.memory_space<vmem>>, %arg3: memref<2x3x32x32xbf16, #tpu.memory_space<vmem>>, %arg4: memref<2x3x1x32xf32, #tpu.memory_space<vmem>>, %arg5: memref<2x3x1x32xf32, #tpu.memory_space<vmem>>, %arg6: memref<8x2x64xf32, #tpu.memory_space<vmem>>, %arg7: memref<2x3x16x32xf32, #tpu.memory_space<vmem>>) attributes {dimension_semantics = [#tpu.dimension_semantics<arbitrary>], iteration_bounds = array<i64: 1>, scalar_prefetch = 0 : i64, scratch_operands = 1 : i64, tpu.core_type = #tpu.core_type<tc>, window_params = [{pipeline_mode = #tpu.pipeline_mode<synchronous>, transform_indices = @transform_0, window_bounds = array<i64: 16, 16>}, {pipeline_mode = #tpu.pipeline_mode<synchronous>, transform_indices = @transform_1, window_bounds = array<i64: 2, 3, 16, 32>}, {pipeline_mode = #tpu.pipeline_mode<synchronous>, transform_indices = @transform_2, window_bounds = array<i64: 2, 3, 32, 32>}, {pipeline_mode = #tpu.pipeline_mode<synchronous>, transform_indices = @transform_3, window_bounds = array<i64: 2, 3, 1, 32>}, {pipeline_mode = #tpu.pipeline_mode<synchronous>, transform_indices = @transform_4, window_bounds = array<i64: 2, 3, 1, 32>}, {pipeline_mode = #tpu.pipeline_mode<synchronous>, transform_indices = @transform_5, window_bounds = array<i64: 8, 2, 64>}]} {
    %c0 = arith.constant 0 : index
    %c0_0 = arith.constant 0 : index
    %0 = vector.load %arg1[%c0, %c0_0] : memref<16x16xf32, #tpu.memory_space<vmem>>, vector<16x16xf32>
    %1 = arith.truncf %0 : vector<16x16xf32> to vector<16x16xbf16>
    %c0_1 = arith.constant 0 : index
    %c0_2 = arith.constant 0 : index
    %c0_3 = arith.constant 0 : index
    %c0_4 = arith.constant 0 : index
    %2 = vector.load %arg2[%c0_1, %c0_2, %c0_3, %c0_4] : memref<2x3x16x32xbf16, #tpu.memory_space<vmem>>, vector<1x1x16x32xbf16>
    %3 = vector.shape_cast %2 : vector<1x1x16x32xbf16> to vector<16x32xbf16>
    %cst = arith.constant dense<0.000000e+00> : vector<16x32xf32>
    %4 = tpu.matmul %1, %3, %cst {dimension_numbers = #tpu.dot_dimension_numbers<[1], [0], [0], [1], [0, 0, 1, 1], [], []>} : vector<16x16xbf16>, vector<16x32xbf16>, vector<16x32xf32> -> vector<16x32xf32>
    %c0_5 = arith.constant 0 : index
    %c0_6 = arith.constant 0 : index
    %c0_7 = arith.constant 0 : index
    %c0_8 = arith.constant 0 : index
    %5 = vector.load %arg4[%c0_5, %c0_6, %c0_7, %c0_8] : memref<2x3x1x32xf32, #tpu.memory_space<vmem>>, vector<1x1x1x32xf32>
    %6 = vector.shape_cast %5 : vector<1x1x1x32xf32> to vector<1x32xf32>
    %7 = vector.broadcast %6 : vector<1x32xf32> to vector<16x32xf32>
    %8 = arith.addf %4, %7 : vector<16x32xf32>
    %c0_9 = arith.constant 0 : index
    %c0_10 = arith.constant 0 : index
    %c0_11 = arith.constant 0 : index
    %c0_12 = arith.constant 0 : index
    %9 = vector.load %arg7[%c0_9, %c0_10, %c0_11, %c0_12] : memref<2x3x16x32xf32, #tpu.memory_space<vmem>>, vector<1x1x16x32xf32>
    %10 = vector.shape_cast %9 : vector<1x1x16x32xf32> to vector<16x32xf32>
    %11 = vector.shape_cast %8 : vector<16x32xf32> to vector<1x1x16x32xf32>
    tpu.vector_store %arg7[%c0_9, %c0_10, %c0_11, %c0_12], %11 {strides = array<i32>} : memref<2x3x16x32xf32, #tpu.memory_space<vmem>>, vector<1x1x16x32xf32>,
    %c0_13 = arith.constant 0 : index
    %c1 = arith.constant 1 : index
    %c0_14 = arith.constant 0 : index
    %c0_15 = arith.constant 0 : index
    %12 = vector.load %arg2[%c0_13, %c1, %c0_14, %c0_15] : memref<2x3x16x32xbf16, #tpu.memory_space<vmem>>, vector<1x1x16x32xbf16>
    %13 = vector.shape_cast %12 : vector<1x1x16x32xbf16> to vector<16x32xbf16>
    %cst_16 = arith.constant dense<0.000000e+00> : vector<16x32xf32>
    %14 = tpu.matmul %1, %13, %cst_16 {dimension_numbers = #tpu.dot_dimension_numbers<[1], [0], [0], [1], [0, 0, 1, 1], [], []>} : vector<16x16xbf16>, vector<16x32xbf16>, vector<16x32xf32> -> vector<16x32xf32>
    %c0_17 = arith.constant 0 : index
    %c1_18 = arith.constant 1 : index
    %c0_19 = arith.constant 0 : index
    %c0_20 = arith.constant 0 : index
    %15 = vector.load %arg4[%c0_17, %c1_18, %c0_19, %c0_20] : memref<2x3x1x32xf32, #tpu.memory_space<vmem>>, vector<1x1x1x32xf32>
    %16 = vector.shape_cast %15 : vector<1x1x1x32xf32> to vector<1x32xf32>
    %17 = vector.broadcast %16 : vector<1x32xf32> to vector<16x32xf32>
    %18 = arith.addf %14, %17 : vector<16x32xf32>
    %c0_21 = arith.constant 0 : index
    %c1_22 = arith.constant 1 : index
    %c0_23 = arith.constant 0 : index
    %c0_24 = arith.constant 0 : index
    %19 = vector.load %arg7[%c0_21, %c1_22, %c0_23, %c0_24] : memref<2x3x16x32xf32, #tpu.memory_space<vmem>>, vector<1x1x16x32xf32>
    %20 = vector.shape_cast %19 : vector<1x1x16x32xf32> to vector<16x32xf32>
    %21 = vector.shape_cast %18 : vector<16x32xf32> to vector<1x1x16x32xf32>
    tpu.vector_store %arg7[%c0_21, %c1_22, %c0_23, %c0_24], %21 {strides = array<i32>} : memref<2x3x16x32xf32, #tpu.memory_space<vmem>>, vector<1x1x16x32xf32>,
    %c0_25 = arith.constant 0 : index
    %c2 = arith.constant 2 : index
    %c0_26 = arith.constant 0 : index
    %c0_27 = arith.constant 0 : index
    %22 = vector.load %arg2[%c0_25, %c2, %c0_26, %c0_27] : memref<2x3x16x32xbf16, #tpu.memory_space<vmem>>, vector<1x1x16x32xbf16>
    %23 = vector.shape_cast %22 : vector<1x1x16x32xbf16> to vector<16x32xbf16>
    %cst_28 = arith.constant dense<0.000000e+00> : vector<16x32xf32>
    %24 = tpu.matmul %1, %23, %cst_28 {dimension_numbers = #tpu.dot_dimension_numbers<[1], [0], [0], [1], [0, 0, 1, 1], [], []>} : vector<16x16xbf16>, vector<16x32xbf16>, vector<16x32xf32> -> vector<16x32xf32>
    %c0_29 = arith.constant 0 : index
    %c2_30 = arith.constant 2 : index
    %c0_31 = arith.constant 0 : index
    %c0_32 = arith.constant 0 : index
    %25 = vector.load %arg4[%c0_29, %c2_30, %c0_31, %c0_32] : memref<2x3x1x32xf32, #tpu.memory_space<vmem>>, vector<1x1x1x32xf32>
    %26 = vector.shape_cast %25 : vector<1x1x1x32xf32> to vector<1x32xf32>
    %27 = vector.broadcast %26 : vector<1x32xf32> to vector<16x32xf32>
    %28 = arith.addf %24, %27 : vector<16x32xf32>
    %c0_33 = arith.constant 0 : index
    %c2_34 = arith.constant 2 : index
    %c0_35 = arith.constant 0 : index
    %c0_36 = arith.constant 0 : index
    %29 = vector.load %arg7[%c0_33, %c2_34, %c0_35, %c0_36] : memref<2x3x16x32xf32, #tpu.memory_space<vmem>>, vector<1x1x16x32xf32>
    %30 = vector.shape_cast %29 : vector<1x1x16x32xf32> to vector<16x32xf32>
    %31 = vector.shape_cast %28 : vector<16x32xf32> to vector<1x1x16x32xf32>
    tpu.vector_store %arg7[%c0_33, %c2_34, %c0_35, %c0_36], %31 {strides = array<i32>} : memref<2x3x16x32xf32, #tpu.memory_space<vmem>>, vector<1x1x16x32xf32>,
    %c1_37 = arith.constant 1 : index
    %c0_38 = arith.constant 0 : index
    %c0_39 = arith.constant 0 : index
    %c0_40 = arith.constant 0 : index
    %32 = vector.load %arg2[%c1_37, %c0_38, %c0_39, %c0_40] : memref<2x3x16x32xbf16, #tpu.memory_space<vmem>>, vector<1x1x16x32xbf16>
    %33 = vector.shape_cast %32 : vector<1x1x16x32xbf16> to vector<16x32xbf16>
    %cst_41 = arith.constant dense<0.000000e+00> : vector<16x32xf32>
    %34 = tpu.matmul %1, %33, %cst_41 {dimension_numbers = #tpu.dot_dimension_numbers<[1], [0], [0], [1], [0, 0, 1, 1], [], []>} : vector<16x16xbf16>, vector<16x32xbf16>, vector<16x32xf32> -> vector<16x32xf32>
    %c1_42 = arith.constant 1 : index
    %c0_43 = arith.constant 0 : index
    %c0_44 = arith.constant 0 : index
    %c0_45 = arith.constant 0 : index
    %35 = vector.load %arg4[%c1_42, %c0_43, %c0_44, %c0_45] : memref<2x3x1x32xf32, #tpu.memory_space<vmem>>, vector<1x1x1x32xf32>
    %36 = vector.shape_cast %35 : vector<1x1x1x32xf32> to vector<1x32xf32>
    %37 = vector.broadcast %36 : vector<1x32xf32> to vector<16x32xf32>
    %38 = arith.addf %34, %37 : vector<16x32xf32>
    %c1_46 = arith.constant 1 : index
    %c0_47 = arith.constant 0 : index
    %c0_48 = arith.constant 0 : index
    %c0_49 = arith.constant 0 : index
    %39 = vector.load %arg7[%c1_46, %c0_47, %c0_48, %c0_49] : memref<2x3x16x32xf32, #tpu.memory_space<vmem>>, vector<1x1x16x32xf32>
    %40 = vector.shape_cast %39 : vector<1x1x16x32xf32> to vector<16x32xf32>
    %41 = vector.shape_cast %38 : vector<16x32xf32> to vector<1x1x16x32xf32>
    tpu.vector_store %arg7[%c1_46, %c0_47, %c0_48, %c0_49], %41 {strides = array<i32>} : memref<2x3x16x32xf32, #tpu.memory_space<vmem>>, vector<1x1x16x32xf32>,
    %c1_50 = arith.constant 1 : index
    %c1_51 = arith.constant 1 : index
    %c0_52 = arith.constant 0 : index
    %c0_53 = arith.constant 0 : index
    %42 = vector.load %arg2[%c1_50, %c1_51, %c0_52, %c0_53] : memref<2x3x16x32xbf16, #tpu.memory_space<vmem>>, vector<1x1x16x32xbf16>
    %43 = vector.shape_cast %42 : vector<1x1x16x32xbf16> to vector<16x32xbf16>
    %cst_54 = arith.constant dense<0.000000e+00> : vector<16x32xf32>
    %44 = tpu.matmul %1, %43, %cst_54 {dimension_numbers = #tpu.dot_dimension_numbers<[1], [0], [0], [1], [0, 0, 1, 1], [], []>} : vector<16x16xbf16>, vector<16x32xbf16>, vector<16x32xf32> -> vector<16x32xf32>
    %c1_55 = arith.constant 1 : index
    %c1_56 = arith.constant 1 : index
    %c0_57 = arith.constant 0 : index
    %c0_58 = arith.constant 0 : index
    %45 = vector.load %arg4[%c1_55, %c1_56, %c0_57, %c0_58] : memref<2x3x1x32xf32, #tpu.memory_space<vmem>>, vector<1x1x1x32xf32>
    %46 = vector.shape_cast %45 : vector<1x1x1x32xf32> to vector<1x32xf32>
    %47 = vector.broadcast %46 : vector<1x32xf32> to vector<16x32xf32>
    %48 = arith.addf %44, %47 : vector<16x32xf32>
    %c1_59 = arith.constant 1 : index
    %c1_60 = arith.constant 1 : index
    %c0_61 = arith.constant 0 : index
    %c0_62 = arith.constant 0 : index
    %49 = vector.load %arg7[%c1_59, %c1_60, %c0_61, %c0_62] : memref<2x3x16x32xf32, #tpu.memory_space<vmem>>, vector<1x1x16x32xf32>
    %50 = vector.shape_cast %49 : vector<1x1x16x32xf32> to vector<16x32xf32>
    %51 = vector.shape_cast %48 : vector<16x32xf32> to vector<1x1x16x32xf32>
    tpu.vector_store %arg7[%c1_59, %c1_60, %c0_61, %c0_62], %51 {strides = array<i32>} : memref<2x3x16x32xf32, #tpu.memory_space<vmem>>, vector<1x1x16x32xf32>,
    %c1_63 = arith.constant 1 : index
    %c2_64 = arith.constant 2 : index
    %c0_65 = arith.constant 0 : index
    %c0_66 = arith.constant 0 : index
    %52 = vector.load %arg2[%c1_63, %c2_64, %c0_65, %c0_66] : memref<2x3x16x32xbf16, #tpu.memory_space<vmem>>, vector<1x1x16x32xbf16>
    %53 = vector.shape_cast %52 : vector<1x1x16x32xbf16> to vector<16x32xbf16>
    %cst_67 = arith.constant dense<0.000000e+00> : vector<16x32xf32>
    %54 = tpu.matmul %1, %53, %cst_67 {dimension_numbers = #tpu.dot_dimension_numbers<[1], [0], [0], [1], [0, 0, 1, 1], [], []>} : vector<16x16xbf16>, vector<16x32xbf16>, vector<16x32xf32> -> vector<16x32xf32>
    %c1_68 = arith.constant 1 : index
    %c2_69 = arith.constant 2 : index
    %c0_70 = arith.constant 0 : index
    %c0_71 = arith.constant 0 : index
    %55 = vector.load %arg4[%c1_68, %c2_69, %c0_70, %c0_71] : memref<2x3x1x32xf32, #tpu.memory_space<vmem>>, vector<1x1x1x32xf32>
    %56 = vector.shape_cast %55 : vector<1x1x1x32xf32> to vector<1x32xf32>
    %57 = vector.broadcast %56 : vector<1x32xf32> to vector<16x32xf32>
    %58 = arith.addf %54, %57 : vector<16x32xf32>
    %c1_72 = arith.constant 1 : index
    %c2_73 = arith.constant 2 : index
    %c0_74 = arith.constant 0 : index
    %c0_75 = arith.constant 0 : index
    %59 = vector.load %arg7[%c1_72, %c2_73, %c0_74, %c0_75] : memref<2x3x16x32xf32, #tpu.memory_space<vmem>>, vector<1x1x16x32xf32>
    %60 = vector.shape_cast %59 : vector<1x1x16x32xf32> to vector<16x32xf32>
    %61 = vector.shape_cast %58 : vector<16x32xf32> to vector<1x1x16x32xf32>
    tpu.vector_store %arg7[%c1_72, %c2_73, %c0_74, %c0_75], %61 {strides = array<i32>} : memref<2x3x16x32xf32, #tpu.memory_space<vmem>>, vector<1x1x16x32xf32>,
    %cst_76 = arith.constant 0.000000e+00 : f32
    %62 = vector.broadcast %cst_76 : f32 to vector<2x32xf32>
    %cst_77 = arith.constant 0.000000e+00 : f32
    %63 = vector.broadcast %cst_77 : f32 to vector<2x32xf32>
    %c0_i32 = arith.constant 0 : i32
    %c2_i32 = arith.constant 2 : i32
    %64 = arith.muli %c0_i32, %c2_i32 : i32
    %65 = tpu.assume_multiple %64, 2 : i32
    %c0_78 = arith.constant 0 : index
    %c0_79 = arith.constant 0 : index
    %66 = arith.index_cast %65 : i32 to index
    %c0_80 = arith.constant 0 : index
    %67 = vector.load %arg7[%c0_78, %c0_79, %66, %c0_80] : memref<2x3x16x32xf32, #tpu.memory_space<vmem>>, vector<1x1x2x32xf32>
    %68 = vector.shape_cast %67 : vector<1x1x2x32xf32> to vector<2x32xf32>
    %c0_81 = arith.constant 0 : index
    %c1_82 = arith.constant 1 : index
    %69 = arith.index_cast %65 : i32 to index
    %c0_83 = arith.constant 0 : index
    %70 = vector.load %arg7[%c0_81, %c1_82, %69, %c0_83] : memref<2x3x16x32xf32, #tpu.memory_space<vmem>>, vector<1x1x2x32xf32>
    %71 = vector.shape_cast %70 : vector<1x1x2x32xf32> to vector<2x32xf32>
    %c0_84 = arith.constant 0 : index
    %c2_85 = arith.constant 2 : index
    %72 = arith.index_cast %65 : i32 to index
    %c0_86 = arith.constant 0 : index
    %73 = vector.load %arg7[%c0_84, %c2_85, %72, %c0_86] : memref<2x3x16x32xf32, #tpu.memory_space<vmem>>, vector<1x1x2x32xf32>
    %74 = vector.shape_cast %73 : vector<1x1x2x32xf32> to vector<2x32xf32>
    %75 = arith.truncf %62 : vector<2x32xf32> to vector<2x32xbf16>
    %c0_87 = arith.constant 0 : index
    %c0_88 = arith.constant 0 : index
    %c0_89 = arith.constant 0 : index
    %c0_90 = arith.constant 0 : index
    %76 = vector.load %arg3[%c0_87, %c0_88, %c0_89, %c0_90] : memref<2x3x32x32xbf16, #tpu.memory_space<vmem>>, vector<1x1x32x32xbf16>
    %77 = vector.shape_cast %76 : vector<1x1x32x32xbf16> to vector<32x32xbf16>
    %cst_91 = arith.constant dense<0.000000e+00> : vector<2x32xf32>
    %78 = tpu.matmul %75, %77, %cst_91 {dimension_numbers = #tpu.dot_dimension_numbers<[1], [0], [0], [1], [0, 0, 1, 1], [], []>} : vector<2x32xbf16>, vector<32x32xbf16>, vector<2x32xf32> -> vector<2x32xf32>
    %c0_92 = arith.constant 0 : index
    %c0_93 = arith.constant 0 : index
    %c0_94 = arith.constant 0 : index
    %c0_95 = arith.constant 0 : index
    %79 = vector.load %arg5[%c0_92, %c0_93, %c0_94, %c0_95] : memref<2x3x1x32xf32, #tpu.memory_space<vmem>>, vector<1x1x1x32xf32>
    %80 = vector.shape_cast %79 : vector<1x1x1x32xf32> to vector<1x32xf32>
    %81 = vector.broadcast %80 : vector<1x32xf32> to vector<2x32xf32>
    %82 = arith.addf %78, %81 : vector<2x32xf32>
    %c0_96 = arith.constant 0 : index
    %c1_97 = arith.constant 1 : index
    %c0_98 = arith.constant 0 : index
    %c0_99 = arith.constant 0 : index
    %83 = vector.load %arg3[%c0_96, %c1_97, %c0_98, %c0_99] : memref<2x3x32x32xbf16, #tpu.memory_space<vmem>>, vector<1x1x32x32xbf16>
    %84 = vector.shape_cast %83 : vector<1x1x32x32xbf16> to vector<32x32xbf16>
    %cst_100 = arith.constant dense<0.000000e+00> : vector<2x32xf32>
    %85 = tpu.matmul %75, %84, %cst_100 {dimension_numbers = #tpu.dot_dimension_numbers<[1], [0], [0], [1], [0, 0, 1, 1], [], []>} : vector<2x32xbf16>, vector<32x32xbf16>, vector<2x32xf32> -> vector<2x32xf32>
    %c0_101 = arith.constant 0 : index
    %c1_102 = arith.constant 1 : index
    %c0_103 = arith.constant 0 : index
    %c0_104 = arith.constant 0 : index
    %86 = vector.load %arg5[%c0_101, %c1_102, %c0_103, %c0_104] : memref<2x3x1x32xf32, #tpu.memory_space<vmem>>, vector<1x1x1x32xf32>
    %87 = vector.shape_cast %86 : vector<1x1x1x32xf32> to vector<1x32xf32>
    %88 = vector.broadcast %87 : vector<1x32xf32> to vector<2x32xf32>
    %89 = arith.addf %85, %88 : vector<2x32xf32>
    %c0_105 = arith.constant 0 : index
    %c2_106 = arith.constant 2 : index
    %c0_107 = arith.constant 0 : index
    %c0_108 = arith.constant 0 : index
    %90 = vector.load %arg3[%c0_105, %c2_106, %c0_107, %c0_108] : memref<2x3x32x32xbf16, #tpu.memory_space<vmem>>, vector<1x1x32x32xbf16>
    %91 = vector.shape_cast %90 : vector<1x1x32x32xbf16> to vector<32x32xbf16>
    %cst_109 = arith.constant dense<0.000000e+00> : vector<2x32xf32>
    %92 = tpu.matmul %75, %91, %cst_109 {dimension_numbers = #tpu.dot_dimension_numbers<[1], [0], [0], [1], [0, 0, 1, 1], [], []>} : vector<2x32xbf16>, vector<32x32xbf16>, vector<2x32xf32> -> vector<2x32xf32>
    %c0_110 = arith.constant 0 : index
    %c2_111 = arith.constant 2 : index
    %c0_112 = arith.constant 0 : index
    %c0_113 = arith.constant 0 : index
    %93 = vector.load %arg5[%c0_110, %c2_111, %c0_112, %c0_113] : memref<2x3x1x32xf32, #tpu.memory_space<vmem>>, vector<1x1x1x32xf32>
    %94 = vector.shape_cast %93 : vector<1x1x1x32xf32> to vector<1x32xf32>
    %95 = vector.broadcast %94 : vector<1x32xf32> to vector<2x32xf32>
    %96 = arith.addf %92, %95 : vector<2x32xf32>
    %97 = arith.addf %68, %82 : vector<2x32xf32>
    %98 = arith.negf %97 : vector<2x32xf32>
    %99 = math.exp %98 : vector<2x32xf32>
    %cst_114 = arith.constant 1.000000e+00 : f32
    %100 = vector.broadcast %cst_114 : f32 to vector<2x32xf32>
    %101 = arith.addf %100, %99 : vector<2x32xf32>
    %102 = arith.divf %100, %101 : vector<2x32xf32>
    %103 = arith.addf %71, %89 : vector<2x32xf32>
    %104 = arith.negf %103 : vector<2x32xf32>
    %105 = math.exp %104 : vector<2x32xf32>
    %cst_115 = arith.constant 1.000000e+00 : f32
    %106 = vector.broadcast %cst_115 : f32 to vector<2x32xf32>
    %107 = arith.addf %106, %105 : vector<2x32xf32>
    %108 = arith.divf %106, %107 : vector<2x32xf32>
    %109 = arith.mulf %102, %96 : vector<2x32xf32>
    %110 = arith.addf %74, %109 : vector<2x32xf32>
    %111 = math.tanh %110 : vector<2x32xf32>
    %cst_116 = arith.constant 1.000000e+00 : f32
    %112 = vector.broadcast %cst_116 : f32 to vector<2x32xf32>
    %113 = arith.subf %112, %108 : vector<2x32xf32>
    %114 = arith.mulf %113, %111 : vector<2x32xf32>
    %115 = arith.mulf %108, %62 : vector<2x32xf32>
    %116 = arith.addf %114, %115 : vector<2x32xf32>
    %117 = arith.index_cast %c0_i32 : i32 to index
    %c0_117 = arith.constant 0 : index
    %c0_118 = arith.constant 0 : index
    %118 = vector.load %arg6[%117, %c0_117, %c0_118] : memref<8x2x64xf32, #tpu.memory_space<vmem>>, vector<1x2x32xf32>
    %119 = vector.shape_cast %118 : vector<1x2x32xf32> to vector<2x32xf32>
    %120 = vector.shape_cast %116 : vector<2x32xf32> to vector<1x2x32xf32>
    tpu.vector_store %arg6[%117, %c0_117, %c0_118], %120 {strides = array<i32>} : memref<8x2x64xf32, #tpu.memory_space<vmem>>, vector<1x2x32xf32>,
    %c7_i32 = arith.constant 7 : i32
    %121 = arith.subi %c7_i32, %c0_i32 : i32
    %c2_i32_119 = arith.constant 2 : i32
    %122 = arith.muli %121, %c2_i32_119 : i32
    %123 = tpu.assume_multiple %122, 2 : i32
    %c1_120 = arith.constant 1 : index
    %c0_121 = arith.constant 0 : index
    %124 = arith.index_cast %123 : i32 to index
    %c0_122 = arith.constant 0 : index
    %125 = vector.load %arg7[%c1_120, %c0_121, %124, %c0_122] : memref<2x3x16x32xf32, #tpu.memory_space<vmem>>, vector<1x1x2x32xf32>
    %126 = vector.shape_cast %125 : vector<1x1x2x32xf32> to vector<2x32xf32>
    %c1_123 = arith.constant 1 : index
    %c1_124 = arith.constant 1 : index
    %127 = arith.index_cast %123 : i32 to index
    %c0_125 = arith.constant 0 : index
    %128 = vector.load %arg7[%c1_123, %c1_124, %127, %c0_125] : memref<2x3x16x32xf32, #tpu.memory_space<vmem>>, vector<1x1x2x32xf32>
    %129 = vector.shape_cast %128 : vector<1x1x2x32xf32> to vector<2x32xf32>
    %c1_126 = arith.constant 1 : index
    %c2_127 = arith.constant 2 : index
    %130 = arith.index_cast %123 : i32 to index
    %c0_128 = arith.constant 0 : index
    %131 = vector.load %arg7[%c1_126, %c2_127, %130, %c0_128] : memref<2x3x16x32xf32, #tpu.memory_space<vmem>>, vector<1x1x2x32xf32>
    %132 = vector.shape_cast %131 : vector<1x1x2x32xf32> to vector<2x32xf32>
    %133 = arith.truncf %63 : vector<2x32xf32> to vector<2x32xbf16>
    %c1_129 = arith.constant 1 : index
    %c0_130 = arith.constant 0 : index
    %c0_131 = arith.constant 0 : index
    %c0_132 = arith.constant 0 : index
    %134 = vector.load %arg3[%c1_129, %c0_130, %c0_131, %c0_132] : memref<2x3x32x32xbf16, #tpu.memory_space<vmem>>, vector<1x1x32x32xbf16>
    %135 = vector.shape_cast %134 : vector<1x1x32x32xbf16> to vector<32x32xbf16>
    %cst_133 = arith.constant dense<0.000000e+00> : vector<2x32xf32>
    %136 = tpu.matmul %133, %135, %cst_133 {dimension_numbers = #tpu.dot_dimension_numbers<[1], [0], [0], [1], [0, 0, 1, 1], [], []>} : vector<2x32xbf16>, vector<32x32xbf16>, vector<2x32xf32> -> vector<2x32xf32>
    %c1_134 = arith.constant 1 : index
    %c0_135 = arith.constant 0 : index
    %c0_136 = arith.constant 0 : index
    %c0_137 = arith.constant 0 : index
    %137 = vector.load %arg5[%c1_134, %c0_135, %c0_136, %c0_137] : memref<2x3x1x32xf32, #tpu.memory_space<vmem>>, vector<1x1x1x32xf32>
    %138 = vector.shape_cast %137 : vector<1x1x1x32xf32> to vector<1x32xf32>
    %139 = vector.broadcast %138 : vector<1x32xf32> to vector<2x32xf32>
    %140 = arith.addf %136, %139 : vector<2x32xf32>
    %c1_138 = arith.constant 1 : index
    %c1_139 = arith.constant 1 : index
    %c0_140 = arith.constant 0 : index
    %c0_141 = arith.constant 0 : index
    %141 = vector.load %arg3[%c1_138, %c1_139, %c0_140, %c0_141] : memref<2x3x32x32xbf16, #tpu.memory_space<vmem>>, vector<1x1x32x32xbf16>
    %142 = vector.shape_cast %141 : vector<1x1x32x32xbf16> to vector<32x32xbf16>
    %cst_142 = arith.constant dense<0.000000e+00> : vector<2x32xf32>
    %143 = tpu.matmul %133, %142, %cst_142 {dimension_numbers = #tpu.dot_dimension_numbers<[1], [0], [0], [1], [0, 0, 1, 1], [], []>} : vector<2x32xbf16>, vector<32x32xbf16>, vector<2x32xf32> -> vector<2x32xf32>
    %c1_143 = arith.constant 1 : index
    %c1_144 = arith.constant 1 : index
    %c0_145 = arith.constant 0 : index
    %c0_146 = arith.constant 0 : index
    %144 = vector.load %arg5[%c1_143, %c1_144, %c0_145, %c0_146] : memref<2x3x1x32xf32, #tpu.memory_space<vmem>>, vector<1x1x1x32xf32>
    %145 = vector.shape_cast %144 : vector<1x1x1x32xf32> to vector<1x32xf32>
    %146 = vector.broadcast %145 : vector<1x32xf32> to vector<2x32xf32>
    %147 = arith.addf %143, %146 : vector<2x32xf32>
    %c1_147 = arith.constant 1 : index
    %c2_148 = arith.constant 2 : index
    %c0_149 = arith.constant 0 : index
    %c0_150 = arith.constant 0 : index
    %148 = vector.load %arg3[%c1_147, %c2_148, %c0_149, %c0_150] : memref<2x3x32x32xbf16, #tpu.memory_space<vmem>>, vector<1x1x32x32xbf16>
    %149 = vector.shape_cast %148 : vector<1x1x32x32xbf16> to vector<32x32xbf16>
    %cst_151 = arith.constant dense<0.000000e+00> : vector<2x32xf32>
    %150 = tpu.matmul %133, %149, %cst_151 {dimension_numbers = #tpu.dot_dimension_numbers<[1], [0], [0], [1], [0, 0, 1, 1], [], []>} : vector<2x32xbf16>, vector<32x32xbf16>, vector<2x32xf32> -> vector<2x32xf32>
    %c1_152 = arith.constant 1 : index
    %c2_153 = arith.constant 2 : index
    %c0_154 = arith.constant 0 : index
    %c0_155 = arith.constant 0 : index
    %151 = vector.load %arg5[%c1_152, %c2_153, %c0_154, %c0_155] : memref<2x3x1x32xf32, #tpu.memory_space<vmem>>, vector<1x1x1x32xf32>
    %152 = vector.shape_cast %151 : vector<1x1x1x32xf32> to vector<1x32xf32>
    %153 = vector.broadcast %152 : vector<1x32xf32> to vector<2x32xf32>
    %154 = arith.addf %150, %153 : vector<2x32xf32>
    %155 = arith.addf %126, %140 : vector<2x32xf32>
    %156 = arith.negf %155 : vector<2x32xf32>
    %157 = math.exp %156 : vector<2x32xf32>
    %cst_156 = arith.constant 1.000000e+00 : f32
    %158 = vector.broadcast %cst_156 : f32 to vector<2x32xf32>
    %159 = arith.addf %158, %157 : vector<2x32xf32>
    %160 = arith.divf %158, %159 : vector<2x32xf32>
    %161 = arith.addf %129, %147 : vector<2x32xf32>
    %162 = arith.negf %161 : vector<2x32xf32>
    %163 = math.exp %162 : vector<2x32xf32>
    %cst_157 = arith.constant 1.000000e+00 : f32
    %164 = vector.broadcast %cst_157 : f32 to vector<2x32xf32>
    %165 = arith.addf %164, %163 : vector<2x32xf32>
    %166 = arith.divf %164, %165 : vector<2x32xf32>
    %167 = arith.mulf %160, %154 : vector<2x32xf32>
    %168 = arith.addf %132, %167 : vector<2x32xf32>
    %169 = math.tanh %168 : vector<2x32xf32>
    %cst_158 = arith.constant 1.000000e+00 : f32
    %170 = vector.broadcast %cst_158 : f32 to vector<2x32xf32>
    %171 = arith.subf %170, %166 : vector<2x32xf32>
    %172 = arith.mulf %171, %169 : vector<2x32xf32>
    %173 = arith.mulf %166, %63 : vector<2x32xf32>
    %174 = arith.addf %172, %173 : vector<2x32xf32>
    %175 = arith.index_cast %121 : i32 to index
    %c0_159 = arith.constant 0 : index
    %c32 = arith.constant 32 : index
    %176 = vector.load %arg6[%175, %c0_159, %c32] : memref<8x2x64xf32, #tpu.memory_space<vmem>>, vector<1x2x32xf32>
    %177 = vector.shape_cast %176 : vector<1x2x32xf32> to vector<2x32xf32>
    %178 = vector.shape_cast %174 : vector<2x32xf32> to vector<1x2x32xf32>
    tpu.vector_store %arg6[%175, %c0_159, %c32], %178 {strides = array<i32>} : memref<8x2x64xf32, #tpu.memory_space<vmem>>, vector<1x2x32xf32>,
    %c1_i32 = arith.constant 1 : i32
    %c2_i32_160 = arith.constant 2 : i32
    %179 = arith.muli %c1_i32, %c2_i32_160 : i32
    %180 = tpu.assume_multiple %179, 2 : i32
    %c0_161 = arith.constant 0 : index
    %c0_162 = arith.constant 0 : index
    %181 = arith.index_cast %180 : i32 to index
    %c0_163 = arith.constant 0 : index
    %182 = vector.load %arg7[%c0_161, %c0_162, %181, %c0_163] : memref<2x3x16x32xf32, #tpu.memory_space<vmem>>, vector<1x1x2x32xf32>
    %183 = vector.shape_cast %182 : vector<1x1x2x32xf32> to vector<2x32xf32>
    %c0_164 = arith.constant 0 : index
    %c1_165 = arith.constant 1 : index
    %184 = arith.index_cast %180 : i32 to index
    %c0_166 = arith.constant 0 : index
    %185 = vector.load %arg7[%c0_164, %c1_165, %184, %c0_166] : memref<2x3x16x32xf32, #tpu.memory_space<vmem>>, vector<1x1x2x32xf32>
    %186 = vector.shape_cast %185 : vector<1x1x2x32xf32> to vector<2x32xf32>
    %c0_167 = arith.constant 0 : index
    %c2_168 = arith.constant 2 : index
    %187 = arith.index_cast %180 : i32 to index
    %c0_169 = arith.constant 0 : index
    %188 = vector.load %arg7[%c0_167, %c2_168, %187, %c0_169] : memref<2x3x16x32xf32, #tpu.memory_space<vmem>>, vector<1x1x2x32xf32>
    %189 = vector.shape_cast %188 : vector<1x1x2x32xf32> to vector<2x32xf32>
    %190 = arith.truncf %116 : vector<2x32xf32> to vector<2x32xbf16>
    %c0_170 = arith.constant 0 : index
    %c0_171 = arith.constant 0 : index
    %c0_172 = arith.constant 0 : index
    %c0_173 = arith.constant 0 : index
    %191 = vector.load %arg3[%c0_170, %c0_171, %c0_172, %c0_173] : memref<2x3x32x32xbf16, #tpu.memory_space<vmem>>, vector<1x1x32x32xbf16>
    %192 = vector.shape_cast %191 : vector<1x1x32x32xbf16> to vector<32x32xbf16>
    %cst_174 = arith.constant dense<0.000000e+00> : vector<2x32xf32>
    %193 = tpu.matmul %190, %192, %cst_174 {dimension_numbers = #tpu.dot_dimension_numbers<[1], [0], [0], [1], [0, 0, 1, 1], [], []>} : vector<2x32xbf16>, vector<32x32xbf16>, vector<2x32xf32> -> vector<2x32xf32>
    %c0_175 = arith.constant 0 : index
    %c0_176 = arith.constant 0 : index
    %c0_177 = arith.constant 0 : index
    %c0_178 = arith.constant 0 : index
    %194 = vector.load %arg5[%c0_175, %c0_176, %c0_177, %c0_178] : memref<2x3x1x32xf32, #tpu.memory_space<vmem>>, vector<1x1x1x32xf32>
    %195 = vector.shape_cast %194 : vector<1x1x1x32xf32> to vector<1x32xf32>
    %196 = vector.broadcast %195 : vector<1x32xf32> to vector<2x32xf32>
    %197 = arith.addf %193, %196 : vector<2x32xf32>
    %c0_179 = arith.constant 0 : index
    %c1_180 = arith.constant 1 : index
    %c0_181 = arith.constant 0 : index
    %c0_182 = arith.constant 0 : index
    %198 = vector.load %arg3[%c0_179, %c1_180, %c0_181, %c0_182] : memref<2x3x32x32xbf16, #tpu.memory_space<vmem>>, vector<1x1x32x32xbf16>
    %199 = vector.shape_cast %198 : vector<1x1x32x32xbf16> to vector<32x32xbf16>
    %cst_183 = arith.constant dense<0.000000e+00> : vector<2x32xf32>
    %200 = tpu.matmul %190, %199, %cst_183 {dimension_numbers = #tpu.dot_dimension_numbers<[1], [0], [0], [1], [0, 0, 1, 1], [], []>} : vector<2x32xbf16>, vector<32x32xbf16>, vector<2x32xf32> -> vector<2x32xf32>
    %c0_184 = arith.constant 0 : index
    %c1_185 = arith.constant 1 : index
    %c0_186 = arith.constant 0 : index
    %c0_187 = arith.constant 0 : index
    %201 = vector.load %arg5[%c0_184, %c1_185, %c0_186, %c0_187] : memref<2x3x1x32xf32, #tpu.memory_space<vmem>>, vector<1x1x1x32xf32>
    %202 = vector.shape_cast %201 : vector<1x1x1x32xf32> to vector<1x32xf32>
    %203 = vector.broadcast %202 : vector<1x32xf32> to vector<2x32xf32>
    %204 = arith.addf %200, %203 : vector<2x32xf32>
    %c0_188 = arith.constant 0 : index
    %c2_189 = arith.constant 2 : index
    %c0_190 = arith.constant 0 : index
    %c0_191 = arith.constant 0 : index
    %205 = vector.load %arg3[%c0_188, %c2_189, %c0_190, %c0_191] : memref<2x3x32x32xbf16, #tpu.memory_space<vmem>>, vector<1x1x32x32xbf16>
    %206 = vector.shape_cast %205 : vector<1x1x32x32xbf16> to vector<32x32xbf16>
    %cst_192 = arith.constant dense<0.000000e+00> : vector<2x32xf32>
    %207 = tpu.matmul %190, %206, %cst_192 {dimension_numbers = #tpu.dot_dimension_numbers<[1], [0], [0], [1], [0, 0, 1, 1], [], []>} : vector<2x32xbf16>, vector<32x32xbf16>, vector<2x32xf32> -> vector<2x32xf32>
    %c0_193 = arith.constant 0 : index
    %c2_194 = arith.constant 2 : index
    %c0_195 = arith.constant 0 : index
    %c0_196 = arith.constant 0 : index
    %208 = vector.load %arg5[%c0_193, %c2_194, %c0_195, %c0_196] : memref<2x3x1x32xf32, #tpu.memory_space<vmem>>, vector<1x1x1x32xf32>
    %209 = vector.shape_cast %208 : vector<1x1x1x32xf32> to vector<1x32xf32>
    %210 = vector.broadcast %209 : vector<1x32xf32> to vector<2x32xf32>
    %211 = arith.addf %207, %210 : vector<2x32xf32>
    %212 = arith.addf %183, %197 : vector<2x32xf32>
    %213 = arith.negf %212 : vector<2x32xf32>
    %214 = math.exp %213 : vector<2x32xf32>
    %cst_197 = arith.constant 1.000000e+00 : f32
    %215 = vector.broadcast %cst_197 : f32 to vector<2x32xf32>
    %216 = arith.addf %215, %214 : vector<2x32xf32>
    %217 = arith.divf %215, %216 : vector<2x32xf32>
    %218 = arith.addf %186, %204 : vector<2x32xf32>
    %219 = arith.negf %218 : vector<2x32xf32>
    %220 = math.exp %219 : vector<2x32xf32>
    %cst_198 = arith.constant 1.000000e+00 : f32
    %221 = vector.broadcast %cst_198 : f32 to vector<2x32xf32>
    %222 = arith.addf %221, %220 : vector<2x32xf32>
    %223 = arith.divf %221, %222 : vector<2x32xf32>
    %224 = arith.mulf %217, %211 : vector<2x32xf32>
    %225 = arith.addf %189, %224 : vector<2x32xf32>
    %226 = math.tanh %225 : vector<2x32xf32>
    %cst_199 = arith.constant 1.000000e+00 : f32
    %227 = vector.broadcast %cst_199 : f32 to vector<2x32xf32>
    %228 = arith.subf %227, %223 : vector<2x32xf32>
    %229 = arith.mulf %228, %226 : vector<2x32xf32>
    %230 = arith.mulf %223, %116 : vector<2x32xf32>
    %231 = arith.addf %229, %230 : vector<2x32xf32>
    %232 = arith.index_cast %c1_i32 : i32 to index
    %c0_200 = arith.constant 0 : index
    %c0_201 = arith.constant 0 : index
    %233 = vector.load %arg6[%232, %c0_200, %c0_201] : memref<8x2x64xf32, #tpu.memory_space<vmem>>, vector<1x2x32xf32>
    %234 = vector.shape_cast %233 : vector<1x2x32xf32> to vector<2x32xf32>
    %235 = vector.shape_cast %231 : vector<2x32xf32> to vector<1x2x32xf32>
    tpu.vector_store %arg6[%232, %c0_200, %c0_201], %235 {strides = array<i32>} : memref<8x2x64xf32, #tpu.memory_space<vmem>>, vector<1x2x32xf32>,
    %c7_i32_202 = arith.constant 7 : i32
    %236 = arith.subi %c7_i32_202, %c1_i32 : i32
    %c2_i32_203 = arith.constant 2 : i32
    %237 = arith.muli %236, %c2_i32_203 : i32
    %238 = tpu.assume_multiple %237, 2 : i32
    %c1_204 = arith.constant 1 : index
    %c0_205 = arith.constant 0 : index
    %239 = arith.index_cast %238 : i32 to index
    %c0_206 = arith.constant 0 : index
    %240 = vector.load %arg7[%c1_204, %c0_205, %239, %c0_206] : memref<2x3x16x32xf32, #tpu.memory_space<vmem>>, vector<1x1x2x32xf32>
    %241 = vector.shape_cast %240 : vector<1x1x2x32xf32> to vector<2x32xf32>
    %c1_207 = arith.constant 1 : index
    %c1_208 = arith.constant 1 : index
    %242 = arith.index_cast %238 : i32 to index
    %c0_209 = arith.constant 0 : index
    %243 = vector.load %arg7[%c1_207, %c1_208, %242, %c0_209] : memref<2x3x16x32xf32, #tpu.memory_space<vmem>>, vector<1x1x2x32xf32>
    %244 = vector.shape_cast %243 : vector<1x1x2x32xf32> to vector<2x32xf32>
    %c1_210 = arith.constant 1 : index
    %c2_211 = arith.constant 2 : index
    %245 = arith.index_cast %238 : i32 to index
    %c0_212 = arith.constant 0 : index
    %246 = vector.load %arg7[%c1_210, %c2_211, %245, %c0_212] : memref<2x3x16x32xf32, #tpu.memory_space<vmem>>, vector<1x1x2x32xf32>
    %247 = vector.shape_cast %246 : vector<1x1x2x32xf32> to vector<2x32xf32>
    %248 = arith.truncf %174 : vector<2x32xf32> to vector<2x32xbf16>
    %c1_213 = arith.constant 1 : index
    %c0_214 = arith.constant 0 : index
    %c0_215 = arith.constant 0 : index
    %c0_216 = arith.constant 0 : index
    %249 = vector.load %arg3[%c1_213, %c0_214, %c0_215, %c0_216] : memref<2x3x32x32xbf16, #tpu.memory_space<vmem>>, vector<1x1x32x32xbf16>
    %250 = vector.shape_cast %249 : vector<1x1x32x32xbf16> to vector<32x32xbf16>
    %cst_217 = arith.constant dense<0.000000e+00> : vector<2x32xf32>
    %251 = tpu.matmul %248, %250, %cst_217 {dimension_numbers = #tpu.dot_dimension_numbers<[1], [0], [0], [1], [0, 0, 1, 1], [], []>} : vector<2x32xbf16>, vector<32x32xbf16>, vector<2x32xf32> -> vector<2x32xf32>
    %c1_218 = arith.constant 1 : index
    %c0_219 = arith.constant 0 : index
    %c0_220 = arith.constant 0 : index
    %c0_221 = arith.constant 0 : index
    %252 = vector.load %arg5[%c1_218, %c0_219, %c0_220, %c0_221] : memref<2x3x1x32xf32, #tpu.memory_space<vmem>>, vector<1x1x1x32xf32>
    %253 = vector.shape_cast %252 : vector<1x1x1x32xf32> to vector<1x32xf32>
    %254 = vector.broadcast %253 : vector<1x32xf32> to vector<2x32xf32>
    %255 = arith.addf %251, %254 : vector<2x32xf32>
    %c1_222 = arith.constant 1 : index
    %c1_223 = arith.constant 1 : index
    %c0_224 = arith.constant 0 : index
    %c0_225 = arith.constant 0 : index
    %256 = vector.load %arg3[%c1_222, %c1_223, %c0_224, %c0_225] : memref<2x3x32x32xbf16, #tpu.memory_space<vmem>>, vector<1x1x32x32xbf16>
    %257 = vector.shape_cast %256 : vector<1x1x32x32xbf16> to vector<32x32xbf16>
    %cst_226 = arith.constant dense<0.000000e+00> : vector<2x32xf32>
    %258 = tpu.matmul %248, %257, %cst_226 {dimension_numbers = #tpu.dot_dimension_numbers<[1], [0], [0], [1], [0, 0, 1, 1], [], []>} : vector<2x32xbf16>, vector<32x32xbf16>, vector<2x32xf32> -> vector<2x32xf32>
    %c1_227 = arith.constant 1 : index
    %c1_228 = arith.constant 1 : index
    %c0_229 = arith.constant 0 : index
    %c0_230 = arith.constant 0 : index
    %259 = vector.load %arg5[%c1_227, %c1_228, %c0_229, %c0_230] : memref<2x3x1x32xf32, #tpu.memory_space<vmem>>, vector<1x1x1x32xf32>
    %260 = vector.shape_cast %259 : vector<1x1x1x32xf32> to vector<1x32xf32>
    %261 = vector.broadcast %260 : vector<1x32xf32> to vector<2x32xf32>
    %262 = arith.addf %258, %261 : vector<2x32xf32>
    %c1_231 = arith.constant 1 : index
    %c2_232 = arith.constant 2 : index
    %c0_233 = arith.constant 0 : index
    %c0_234 = arith.constant 0 : index
    %263 = vector.load %arg3[%c1_231, %c2_232, %c0_233, %c0_234] : memref<2x3x32x32xbf16, #tpu.memory_space<vmem>>, vector<1x1x32x32xbf16>
    %264 = vector.shape_cast %263 : vector<1x1x32x32xbf16> to vector<32x32xbf16>
    %cst_235 = arith.constant dense<0.000000e+00> : vector<2x32xf32>
    %265 = tpu.matmul %248, %264, %cst_235 {dimension_numbers = #tpu.dot_dimension_numbers<[1], [0], [0], [1], [0, 0, 1, 1], [], []>} : vector<2x32xbf16>, vector<32x32xbf16>, vector<2x32xf32> -> vector<2x32xf32>
    %c1_236 = arith.constant 1 : index
    %c2_237 = arith.constant 2 : index
    %c0_238 = arith.constant 0 : index
    %c0_239 = arith.constant 0 : index
    %266 = vector.load %arg5[%c1_236, %c2_237, %c0_238, %c0_239] : memref<2x3x1x32xf32, #tpu.memory_space<vmem>>, vector<1x1x1x32xf32>
    %267 = vector.shape_cast %266 : vector<1x1x1x32xf32> to vector<1x32xf32>
    %268 = vector.broadcast %267 : vector<1x32xf32> to vector<2x32xf32>
    %269 = arith.addf %265, %268 : vector<2x32xf32>
    %270 = arith.addf %241, %255 : vector<2x32xf32>
    %271 = arith.negf %270 : vector<2x32xf32>
    %272 = math.exp %271 : vector<2x32xf32>
    %cst_240 = arith.constant 1.000000e+00 : f32
    %273 = vector.broadcast %cst_240 : f32 to vector<2x32xf32>
    %274 = arith.addf %273, %272 : vector<2x32xf32>
    %275 = arith.divf %273, %274 : vector<2x32xf32>
    %276 = arith.addf %244, %262 : vector<2x32xf32>
    %277 = arith.negf %276 : vector<2x32xf32>
    %278 = math.exp %277 : vector<2x32xf32>
    %cst_241 = arith.constant 1.000000e+00 : f32
    %279 = vector.broadcast %cst_241 : f32 to vector<2x32xf32>
    %280 = arith.addf %279, %278 : vector<2x32xf32>
    %281 = arith.divf %279, %280 : vector<2x32xf32>
    %282 = arith.mulf %275, %269 : vector<2x32xf32>
    %283 = arith.addf %247, %282 : vector<2x32xf32>
    %284 = math.tanh %283 : vector<2x32xf32>
    %cst_242 = arith.constant 1.000000e+00 : f32
    %285 = vector.broadcast %cst_242 : f32 to vector<2x32xf32>
    %286 = arith.subf %285, %281 : vector<2x32xf32>
    %287 = arith.mulf %286, %284 : vector<2x32xf32>
    %288 = arith.mulf %281, %174 : vector<2x32xf32>
    %289 = arith.addf %287, %288 : vector<2x32xf32>
    %290 = arith.index_cast %236 : i32 to index
    %c0_243 = arith.constant 0 : index
    %c32_244 = arith.constant 32 : index
    %291 = vector.load %arg6[%290, %c0_243, %c32_244] : memref<8x2x64xf32, #tpu.memory_space<vmem>>, vector<1x2x32xf32>
    %292 = vector.shape_cast %291 : vector<1x2x32xf32> to vector<2x32xf32>
    %293 = vector.shape_cast %289 : vector<2x32xf32> to vector<1x2x32xf32>
    tpu.vector_store %arg6[%290, %c0_243, %c32_244], %293 {strides = array<i32>} : memref<8x2x64xf32, #tpu.memory_space<vmem>>, vector<1x2x32xf32>,
    %c2_i32_245 = arith.constant 2 : i32
    %c2_i32_246 = arith.constant 2 : i32
    %294 = arith.muli %c2_i32_245, %c2_i32_246 : i32
    %295 = tpu.assume_multiple %294, 2 : i32
    %c0_247 = arith.constant 0 : index
    %c0_248 = arith.constant 0 : index
    %296 = arith.index_cast %295 : i32 to index
    %c0_249 = arith.constant 0 : index
    %297 = vector.load %arg7[%c0_247, %c0_248, %296, %c0_249] : memref<2x3x16x32xf32, #tpu.memory_space<vmem>>, vector<1x1x2x32xf32>
    %298 = vector.shape_cast %297 : vector<1x1x2x32xf32> to vector<2x32xf32>
    %c0_250 = arith.constant 0 : index
    %c1_251 = arith.constant 1 : index
    %299 = arith.index_cast %295 : i32 to index
    %c0_252 = arith.constant 0 : index
    %300 = vector.load %arg7[%c0_250, %c1_251, %299, %c0_252] : memref<2x3x16x32xf32, #tpu.memory_space<vmem>>, vector<1x1x2x32xf32>
    %301 = vector.shape_cast %300 : vector<1x1x2x32xf32> to vector<2x32xf32>
    %c0_253 = arith.constant 0 : index
    %c2_254 = arith.constant 2 : index
    %302 = arith.index_cast %295 : i32 to index
    %c0_255 = arith.constant 0 : index
    %303 = vector.load %arg7[%c0_253, %c2_254, %302, %c0_255] : memref<2x3x16x32xf32, #tpu.memory_space<vmem>>, vector<1x1x2x32xf32>
    %304 = vector.shape_cast %303 : vector<1x1x2x32xf32> to vector<2x32xf32>
    %305 = arith.truncf %231 : vector<2x32xf32> to vector<2x32xbf16>
    %c0_256 = arith.constant 0 : index
    %c0_257 = arith.constant 0 : index
    %c0_258 = arith.constant 0 : index
    %c0_259 = arith.constant 0 : index
    %306 = vector.load %arg3[%c0_256, %c0_257, %c0_258, %c0_259] : memref<2x3x32x32xbf16, #tpu.memory_space<vmem>>, vector<1x1x32x32xbf16>
    %307 = vector.shape_cast %306 : vector<1x1x32x32xbf16> to vector<32x32xbf16>
    %cst_260 = arith.constant dense<0.000000e+00> : vector<2x32xf32>
    %308 = tpu.matmul %305, %307, %cst_260 {dimension_numbers = #tpu.dot_dimension_numbers<[1], [0], [0], [1], [0, 0, 1, 1], [], []>} : vector<2x32xbf16>, vector<32x32xbf16>, vector<2x32xf32> -> vector<2x32xf32>
    %c0_261 = arith.constant 0 : index
    %c0_262 = arith.constant 0 : index
    %c0_263 = arith.constant 0 : index
    %c0_264 = arith.constant 0 : index
    %309 = vector.load %arg5[%c0_261, %c0_262, %c0_263, %c0_264] : memref<2x3x1x32xf32, #tpu.memory_space<vmem>>, vector<1x1x1x32xf32>
    %310 = vector.shape_cast %309 : vector<1x1x1x32xf32> to vector<1x32xf32>
    %311 = vector.broadcast %310 : vector<1x32xf32> to vector<2x32xf32>
    %312 = arith.addf %308, %311 : vector<2x32xf32>
    %c0_265 = arith.constant 0 : index
    %c1_266 = arith.constant 1 : index
    %c0_267 = arith.constant 0 : index
    %c0_268 = arith.constant 0 : index
    %313 = vector.load %arg3[%c0_265, %c1_266, %c0_267, %c0_268] : memref<2x3x32x32xbf16, #tpu.memory_space<vmem>>, vector<1x1x32x32xbf16>
    %314 = vector.shape_cast %313 : vector<1x1x32x32xbf16> to vector<32x32xbf16>
    %cst_269 = arith.constant dense<0.000000e+00> : vector<2x32xf32>
    %315 = tpu.matmul %305, %314, %cst_269 {dimension_numbers = #tpu.dot_dimension_numbers<[1], [0], [0], [1], [0, 0, 1, 1], [], []>} : vector<2x32xbf16>, vector<32x32xbf16>, vector<2x32xf32> -> vector<2x32xf32>
    %c0_270 = arith.constant 0 : index
    %c1_271 = arith.constant 1 : index
    %c0_272 = arith.constant 0 : index
    %c0_273 = arith.constant 0 : index
    %316 = vector.load %arg5[%c0_270, %c1_271, %c0_272, %c0_273] : memref<2x3x1x32xf32, #tpu.memory_space<vmem>>, vector<1x1x1x32xf32>
    %317 = vector.shape_cast %316 : vector<1x1x1x32xf32> to vector<1x32xf32>
    %318 = vector.broadcast %317 : vector<1x32xf32> to vector<2x32xf32>
    %319 = arith.addf %315, %318 : vector<2x32xf32>
    %c0_274 = arith.constant 0 : index
    %c2_275 = arith.constant 2 : index
    %c0_276 = arith.constant 0 : index
    %c0_277 = arith.constant 0 : index
    %320 = vector.load %arg3[%c0_274, %c2_275, %c0_276, %c0_277] : memref<2x3x32x32xbf16, #tpu.memory_space<vmem>>, vector<1x1x32x32xbf16>
    %321 = vector.shape_cast %320 : vector<1x1x32x32xbf16> to vector<32x32xbf16>
    %cst_278 = arith.constant dense<0.000000e+00> : vector<2x32xf32>
    %322 = tpu.matmul %305, %321, %cst_278 {dimension_numbers = #tpu.dot_dimension_numbers<[1], [0], [0], [1], [0, 0, 1, 1], [], []>} : vector<2x32xbf16>, vector<32x32xbf16>, vector<2x32xf32> -> vector<2x32xf32>
    %c0_279 = arith.constant 0 : index
    %c2_280 = arith.constant 2 : index
    %c0_281 = arith.constant 0 : index
    %c0_282 = arith.constant 0 : index
    %323 = vector.load %arg5[%c0_279, %c2_280, %c0_281, %c0_282] : memref<2x3x1x32xf32, #tpu.memory_space<vmem>>, vector<1x1x1x32xf32>
    %324 = vector.shape_cast %323 : vector<1x1x1x32xf32> to vector<1x32xf32>
    %325 = vector.broadcast %324 : vector<1x32xf32> to vector<2x32xf32>
    %326 = arith.addf %322, %325 : vector<2x32xf32>
    %327 = arith.addf %298, %312 : vector<2x32xf32>
    %328 = arith.negf %327 : vector<2x32xf32>
    %329 = math.exp %328 : vector<2x32xf32>
    %cst_283 = arith.constant 1.000000e+00 : f32
    %330 = vector.broadcast %cst_283 : f32 to vector<2x32xf32>
    %331 = arith.addf %330, %329 : vector<2x32xf32>
    %332 = arith.divf %330, %331 : vector<2x32xf32>
    %333 = arith.addf %301, %319 : vector<2x32xf32>
    %334 = arith.negf %333 : vector<2x32xf32>
    %335 = math.exp %334 : vector<2x32xf32>
    %cst_284 = arith.constant 1.000000e+00 : f32
    %336 = vector.broadcast %cst_284 : f32 to vector<2x32xf32>
    %337 = arith.addf %336, %335 : vector<2x32xf32>
    %338 = arith.divf %336, %337 : vector<2x32xf32>
    %339 = arith.mulf %332, %326 : vector<2x32xf32>
    %340 = arith.addf %304, %339 : vector<2x32xf32>
    %341 = math.tanh %340 : vector<2x32xf32>
    %cst_285 = arith.constant 1.000000e+00 : f32
    %342 = vector.broadcast %cst_285 : f32 to vector<2x32xf32>
    %343 = arith.subf %342, %338 : vector<2x32xf32>
    %344 = arith.mulf %343, %341 : vector<2x32xf32>
    %345 = arith.mulf %338, %231 : vector<2x32xf32>
    %346 = arith.addf %344, %345 : vector<2x32xf32>
    %347 = arith.index_cast %c2_i32_245 : i32 to index
    %c0_286 = arith.constant 0 : index
    %c0_287 = arith.constant 0 : index
    %348 = vector.load %arg6[%347, %c0_286, %c0_287] : memref<8x2x64xf32, #tpu.memory_space<vmem>>, vector<1x2x32xf32>
    %349 = vector.shape_cast %348 : vector<1x2x32xf32> to vector<2x32xf32>
    %350 = vector.shape_cast %346 : vector<2x32xf32> to vector<1x2x32xf32>
    tpu.vector_store %arg6[%347, %c0_286, %c0_287], %350 {strides = array<i32>} : memref<8x2x64xf32, #tpu.memory_space<vmem>>, vector<1x2x32xf32>,
    %c7_i32_288 = arith.constant 7 : i32
    %351 = arith.subi %c7_i32_288, %c2_i32_245 : i32
    %c2_i32_289 = arith.constant 2 : i32
    %352 = arith.muli %351, %c2_i32_289 : i32
    %353 = tpu.assume_multiple %352, 2 : i32
    %c1_290 = arith.constant 1 : index
    %c0_291 = arith.constant 0 : index
    %354 = arith.index_cast %353 : i32 to index
    %c0_292 = arith.constant 0 : index
    %355 = vector.load %arg7[%c1_290, %c0_291, %354, %c0_292] : memref<2x3x16x32xf32, #tpu.memory_space<vmem>>, vector<1x1x2x32xf32>
    %356 = vector.shape_cast %355 : vector<1x1x2x32xf32> to vector<2x32xf32>
    %c1_293 = arith.constant 1 : index
    %c1_294 = arith.constant 1 : index
    %357 = arith.index_cast %353 : i32 to index
    %c0_295 = arith.constant 0 : index
    %358 = vector.load %arg7[%c1_293, %c1_294, %357, %c0_295] : memref<2x3x16x32xf32, #tpu.memory_space<vmem>>, vector<1x1x2x32xf32>
    %359 = vector.shape_cast %358 : vector<1x1x2x32xf32> to vector<2x32xf32>
    %c1_296 = arith.constant 1 : index
    %c2_297 = arith.constant 2 : index
    %360 = arith.index_cast %353 : i32 to index
    %c0_298 = arith.constant 0 : index
    %361 = vector.load %arg7[%c1_296, %c2_297, %360, %c0_298] : memref<2x3x16x32xf32, #tpu.memory_space<vmem>>, vector<1x1x2x32xf32>
    %362 = vector.shape_cast %361 : vector<1x1x2x32xf32> to vector<2x32xf32>
    %363 = arith.truncf %289 : vector<2x32xf32> to vector<2x32xbf16>
    %c1_299 = arith.constant 1 : index
    %c0_300 = arith.constant 0 : index
    %c0_301 = arith.constant 0 : index
    %c0_302 = arith.constant 0 : index
    %364 = vector.load %arg3[%c1_299, %c0_300, %c0_301, %c0_302] : memref<2x3x32x32xbf16, #tpu.memory_space<vmem>>, vector<1x1x32x32xbf16>
    %365 = vector.shape_cast %364 : vector<1x1x32x32xbf16> to vector<32x32xbf16>
    %cst_303 = arith.constant dense<0.000000e+00> : vector<2x32xf32>
    %366 = tpu.matmul %363, %365, %cst_303 {dimension_numbers = #tpu.dot_dimension_numbers<[1], [0], [0], [1], [0, 0, 1, 1], [], []>} : vector<2x32xbf16>, vector<32x32xbf16>, vector<2x32xf32> -> vector<2x32xf32>
    %c1_304 = arith.constant 1 : index
    %c0_305 = arith.constant 0 : index
    %c0_306 = arith.constant 0 : index
    %c0_307 = arith.constant 0 : index
    %367 = vector.load %arg5[%c1_304, %c0_305, %c0_306, %c0_307] : memref<2x3x1x32xf32, #tpu.memory_space<vmem>>, vector<1x1x1x32xf32>
    %368 = vector.shape_cast %367 : vector<1x1x1x32xf32> to vector<1x32xf32>
    %369 = vector.broadcast %368 : vector<1x32xf32> to vector<2x32xf32>
    %370 = arith.addf %366, %369 : vector<2x32xf32>
    %c1_308 = arith.constant 1 : index
    %c1_309 = arith.constant 1 : index
    %c0_310 = arith.constant 0 : index
    %c0_311 = arith.constant 0 : index
    %371 = vector.load %arg3[%c1_308, %c1_309, %c0_310, %c0_311] : memref<2x3x32x32xbf16, #tpu.memory_space<vmem>>, vector<1x1x32x32xbf16>
    %372 = vector.shape_cast %371 : vector<1x1x32x32xbf16> to vector<32x32xbf16>
    %cst_312 = arith.constant dense<0.000000e+00> : vector<2x32xf32>
    %373 = tpu.matmul %363, %372, %cst_312 {dimension_numbers = #tpu.dot_dimension_numbers<[1], [0], [0], [1], [0, 0, 1, 1], [], []>} : vector<2x32xbf16>, vector<32x32xbf16>, vector<2x32xf32> -> vector<2x32xf32>
    %c1_313 = arith.constant 1 : index
    %c1_314 = arith.constant 1 : index
    %c0_315 = arith.constant 0 : index
    %c0_316 = arith.constant 0 : index
    %374 = vector.load %arg5[%c1_313, %c1_314, %c0_315, %c0_316] : memref<2x3x1x32xf32, #tpu.memory_space<vmem>>, vector<1x1x1x32xf32>
    %375 = vector.shape_cast %374 : vector<1x1x1x32xf32> to vector<1x32xf32>
    %376 = vector.broadcast %375 : vector<1x32xf32> to vector<2x32xf32>
    %377 = arith.addf %373, %376 : vector<2x32xf32>
    %c1_317 = arith.constant 1 : index
    %c2_318 = arith.constant 2 : index
    %c0_319 = arith.constant 0 : index
    %c0_320 = arith.constant 0 : index
    %378 = vector.load %arg3[%c1_317, %c2_318, %c0_319, %c0_320] : memref<2x3x32x32xbf16, #tpu.memory_space<vmem>>, vector<1x1x32x32xbf16>
    %379 = vector.shape_cast %378 : vector<1x1x32x32xbf16> to vector<32x32xbf16>
    %cst_321 = arith.constant dense<0.000000e+00> : vector<2x32xf32>
    %380 = tpu.matmul %363, %379, %cst_321 {dimension_numbers = #tpu.dot_dimension_numbers<[1], [0], [0], [1], [0, 0, 1, 1], [], []>} : vector<2x32xbf16>, vector<32x32xbf16>, vector<2x32xf32> -> vector<2x32xf32>
    %c1_322 = arith.constant 1 : index
    %c2_323 = arith.constant 2 : index
    %c0_324 = arith.constant 0 : index
    %c0_325 = arith.constant 0 : index
    %381 = vector.load %arg5[%c1_322, %c2_323, %c0_324, %c0_325] : memref<2x3x1x32xf32, #tpu.memory_space<vmem>>, vector<1x1x1x32xf32>
    %382 = vector.shape_cast %381 : vector<1x1x1x32xf32> to vector<1x32xf32>
    %383 = vector.broadcast %382 : vector<1x32xf32> to vector<2x32xf32>
    %384 = arith.addf %380, %383 : vector<2x32xf32>
    %385 = arith.addf %356, %370 : vector<2x32xf32>
    %386 = arith.negf %385 : vector<2x32xf32>
    %387 = math.exp %386 : vector<2x32xf32>
    %cst_326 = arith.constant 1.000000e+00 : f32
    %388 = vector.broadcast %cst_326 : f32 to vector<2x32xf32>
    %389 = arith.addf %388, %387 : vector<2x32xf32>
    %390 = arith.divf %388, %389 : vector<2x32xf32>
    %391 = arith.addf %359, %377 : vector<2x32xf32>
    %392 = arith.negf %391 : vector<2x32xf32>
    %393 = math.exp %392 : vector<2x32xf32>
    %cst_327 = arith.constant 1.000000e+00 : f32
    %394 = vector.broadcast %cst_327 : f32 to vector<2x32xf32>
    %395 = arith.addf %394, %393 : vector<2x32xf32>
    %396 = arith.divf %394, %395 : vector<2x32xf32>
    %397 = arith.mulf %390, %384 : vector<2x32xf32>
    %398 = arith.addf %362, %397 : vector<2x32xf32>
    %399 = math.tanh %398 : vector<2x32xf32>
    %cst_328 = arith.constant 1.000000e+00 : f32
    %400 = vector.broadcast %cst_328 : f32 to vector<2x32xf32>
    %401 = arith.subf %400, %396 : vector<2x32xf32>
    %402 = arith.mulf %401, %399 : vector<2x32xf32>
    %403 = arith.mulf %396, %289 : vector<2x32xf32>
    %404 = arith.addf %402, %403 : vector<2x32xf32>
    %405 = arith.index_cast %351 : i32 to index
    %c0_329 = arith.constant 0 : index
    %c32_330 = arith.constant 32 : index
    %406 = vector.load %arg6[%405, %c0_329, %c32_330] : memref<8x2x64xf32, #tpu.memory_space<vmem>>, vector<1x2x32xf32>
    %407 = vector.shape_cast %406 : vector<1x2x32xf32> to vector<2x32xf32>
    %408 = vector.shape_cast %404 : vector<2x32xf32> to vector<1x2x32xf32>
    tpu.vector_store %arg6[%405, %c0_329, %c32_330], %408 {strides = array<i32>} : memref<8x2x64xf32, #tpu.memory_space<vmem>>, vector<1x2x32xf32>,
    %c3_i32 = arith.constant 3 : i32
    %c2_i32_331 = arith.constant 2 : i32
    %409 = arith.muli %c3_i32, %c2_i32_331 : i32
    %410 = tpu.assume_multiple %409, 2 : i32
    %c0_332 = arith.constant 0 : index
    %c0_333 = arith.constant 0 : index
    %411 = arith.index_cast %410 : i32 to index
    %c0_334 = arith.constant 0 : index
    %412 = vector.load %arg7[%c0_332, %c0_333, %411, %c0_334] : memref<2x3x16x32xf32, #tpu.memory_space<vmem>>, vector<1x1x2x32xf32>
    %413 = vector.shape_cast %412 : vector<1x1x2x32xf32> to vector<2x32xf32>
    %c0_335 = arith.constant 0 : index
    %c1_336 = arith.constant 1 : index
    %414 = arith.index_cast %410 : i32 to index
    %c0_337 = arith.constant 0 : index
    %415 = vector.load %arg7[%c0_335, %c1_336, %414, %c0_337] : memref<2x3x16x32xf32, #tpu.memory_space<vmem>>, vector<1x1x2x32xf32>
    %416 = vector.shape_cast %415 : vector<1x1x2x32xf32> to vector<2x32xf32>
    %c0_338 = arith.constant 0 : index
    %c2_339 = arith.constant 2 : index
    %417 = arith.index_cast %410 : i32 to index
    %c0_340 = arith.constant 0 : index
    %418 = vector.load %arg7[%c0_338, %c2_339, %417, %c0_340] : memref<2x3x16x32xf32, #tpu.memory_space<vmem>>, vector<1x1x2x32xf32>
    %419 = vector.shape_cast %418 : vector<1x1x2x32xf32> to vector<2x32xf32>
    %420 = arith.truncf %346 : vector<2x32xf32> to vector<2x32xbf16>
    %c0_341 = arith.constant 0 : index
    %c0_342 = arith.constant 0 : index
    %c0_343 = arith.constant 0 : index
    %c0_344 = arith.constant 0 : index
    %421 = vector.load %arg3[%c0_341, %c0_342, %c0_343, %c0_344] : memref<2x3x32x32xbf16, #tpu.memory_space<vmem>>, vector<1x1x32x32xbf16>
    %422 = vector.shape_cast %421 : vector<1x1x32x32xbf16> to vector<32x32xbf16>
    %cst_345 = arith.constant dense<0.000000e+00> : vector<2x32xf32>
    %423 = tpu.matmul %420, %422, %cst_345 {dimension_numbers = #tpu.dot_dimension_numbers<[1], [0], [0], [1], [0, 0, 1, 1], [], []>} : vector<2x32xbf16>, vector<32x32xbf16>, vector<2x32xf32> -> vector<2x32xf32>
    %c0_346 = arith.constant 0 : index
    %c0_347 = arith.constant 0 : index
    %c0_348 = arith.constant 0 : index
    %c0_349 = arith.constant 0 : index
    %424 = vector.load %arg5[%c0_346, %c0_347, %c0_348, %c0_349] : memref<2x3x1x32xf32, #tpu.memory_space<vmem>>, vector<1x1x1x32xf32>
    %425 = vector.shape_cast %424 : vector<1x1x1x32xf32> to vector<1x32xf32>
    %426 = vector.broadcast %425 : vector<1x32xf32> to vector<2x32xf32>
    %427 = arith.addf %423, %426 : vector<2x32xf32>
    %c0_350 = arith.constant 0 : index
    %c1_351 = arith.constant 1 : index
    %c0_352 = arith.constant 0 : index
    %c0_353 = arith.constant 0 : index
    %428 = vector.load %arg3[%c0_350, %c1_351, %c0_352, %c0_353] : memref<2x3x32x32xbf16, #tpu.memory_space<vmem>>, vector<1x1x32x32xbf16>
    %429 = vector.shape_cast %428 : vector<1x1x32x32xbf16> to vector<32x32xbf16>
    %cst_354 = arith.constant dense<0.000000e+00> : vector<2x32xf32>
    %430 = tpu.matmul %420, %429, %cst_354 {dimension_numbers = #tpu.dot_dimension_numbers<[1], [0], [0], [1], [0, 0, 1, 1], [], []>} : vector<2x32xbf16>, vector<32x32xbf16>, vector<2x32xf32> -> vector<2x32xf32>
    %c0_355 = arith.constant 0 : index
    %c1_356 = arith.constant 1 : index
    %c0_357 = arith.constant 0 : index
    %c0_358 = arith.constant 0 : index
    %431 = vector.load %arg5[%c0_355, %c1_356, %c0_357, %c0_358] : memref<2x3x1x32xf32, #tpu.memory_space<vmem>>, vector<1x1x1x32xf32>
    %432 = vector.shape_cast %431 : vector<1x1x1x32xf32> to vector<1x32xf32>
    %433 = vector.broadcast %432 : vector<1x32xf32> to vector<2x32xf32>
    %434 = arith.addf %430, %433 : vector<2x32xf32>
    %c0_359 = arith.constant 0 : index
    %c2_360 = arith.constant 2 : index
    %c0_361 = arith.constant 0 : index
    %c0_362 = arith.constant 0 : index
    %435 = vector.load %arg3[%c0_359, %c2_360, %c0_361, %c0_362] : memref<2x3x32x32xbf16, #tpu.memory_space<vmem>>, vector<1x1x32x32xbf16>
    %436 = vector.shape_cast %435 : vector<1x1x32x32xbf16> to vector<32x32xbf16>
    %cst_363 = arith.constant dense<0.000000e+00> : vector<2x32xf32>
    %437 = tpu.matmul %420, %436, %cst_363 {dimension_numbers = #tpu.dot_dimension_numbers<[1], [0], [0], [1], [0, 0, 1, 1], [], []>} : vector<2x32xbf16>, vector<32x32xbf16>, vector<2x32xf32> -> vector<2x32xf32>
    %c0_364 = arith.constant 0 : index
    %c2_365 = arith.constant 2 : index
    %c0_366 = arith.constant 0 : index
    %c0_367 = arith.constant 0 : index
    %438 = vector.load %arg5[%c0_364, %c2_365, %c0_366, %c0_367] : memref<2x3x1x32xf32, #tpu.memory_space<vmem>>, vector<1x1x1x32xf32>
    %439 = vector.shape_cast %438 : vector<1x1x1x32xf32> to vector<1x32xf32>
    %440 = vector.broadcast %439 : vector<1x32xf32> to vector<2x32xf32>
    %441 = arith.addf %437, %440 : vector<2x32xf32>
    %442 = arith.addf %413, %427 : vector<2x32xf32>
    %443 = arith.negf %442 : vector<2x32xf32>
    %444 = math.exp %443 : vector<2x32xf32>
    %cst_368 = arith.constant 1.000000e+00 : f32
    %445 = vector.broadcast %cst_368 : f32 to vector<2x32xf32>
    %446 = arith.addf %445, %444 : vector<2x32xf32>
    %447 = arith.divf %445, %446 : vector<2x32xf32>
    %448 = arith.addf %416, %434 : vector<2x32xf32>
    %449 = arith.negf %448 : vector<2x32xf32>
    %450 = math.exp %449 : vector<2x32xf32>
    %cst_369 = arith.constant 1.000000e+00 : f32
    %451 = vector.broadcast %cst_369 : f32 to vector<2x32xf32>
    %452 = arith.addf %451, %450 : vector<2x32xf32>
    %453 = arith.divf %451, %452 : vector<2x32xf32>
    %454 = arith.mulf %447, %441 : vector<2x32xf32>
    %455 = arith.addf %419, %454 : vector<2x32xf32>
    %456 = math.tanh %455 : vector<2x32xf32>
    %cst_370 = arith.constant 1.000000e+00 : f32
    %457 = vector.broadcast %cst_370 : f32 to vector<2x32xf32>
    %458 = arith.subf %457, %453 : vector<2x32xf32>
    %459 = arith.mulf %458, %456 : vector<2x32xf32>
    %460 = arith.mulf %453, %346 : vector<2x32xf32>
    %461 = arith.addf %459, %460 : vector<2x32xf32>
    %462 = arith.index_cast %c3_i32 : i32 to index
    %c0_371 = arith.constant 0 : index
    %c0_372 = arith.constant 0 : index
    %463 = vector.load %arg6[%462, %c0_371, %c0_372] : memref<8x2x64xf32, #tpu.memory_space<vmem>>, vector<1x2x32xf32>
    %464 = vector.shape_cast %463 : vector<1x2x32xf32> to vector<2x32xf32>
    %465 = vector.shape_cast %461 : vector<2x32xf32> to vector<1x2x32xf32>
    tpu.vector_store %arg6[%462, %c0_371, %c0_372], %465 {strides = array<i32>} : memref<8x2x64xf32, #tpu.memory_space<vmem>>, vector<1x2x32xf32>,
    %c7_i32_373 = arith.constant 7 : i32
    %466 = arith.subi %c7_i32_373, %c3_i32 : i32
    %c2_i32_374 = arith.constant 2 : i32
    %467 = arith.muli %466, %c2_i32_374 : i32
    %468 = tpu.assume_multiple %467, 2 : i32
    %c1_375 = arith.constant 1 : index
    %c0_376 = arith.constant 0 : index
    %469 = arith.index_cast %468 : i32 to index
    %c0_377 = arith.constant 0 : index
    %470 = vector.load %arg7[%c1_375, %c0_376, %469, %c0_377] : memref<2x3x16x32xf32, #tpu.memory_space<vmem>>, vector<1x1x2x32xf32>
    %471 = vector.shape_cast %470 : vector<1x1x2x32xf32> to vector<2x32xf32>
    %c1_378 = arith.constant 1 : index
    %c1_379 = arith.constant 1 : index
    %472 = arith.index_cast %468 : i32 to index
    %c0_380 = arith.constant 0 : index
    %473 = vector.load %arg7[%c1_378, %c1_379, %472, %c0_380] : memref<2x3x16x32xf32, #tpu.memory_space<vmem>>, vector<1x1x2x32xf32>
    %474 = vector.shape_cast %473 : vector<1x1x2x32xf32> to vector<2x32xf32>
    %c1_381 = arith.constant 1 : index
    %c2_382 = arith.constant 2 : index
    %475 = arith.index_cast %468 : i32 to index
    %c0_383 = arith.constant 0 : index
    %476 = vector.load %arg7[%c1_381, %c2_382, %475, %c0_383] : memref<2x3x16x32xf32, #tpu.memory_space<vmem>>, vector<1x1x2x32xf32>
    %477 = vector.shape_cast %476 : vector<1x1x2x32xf32> to vector<2x32xf32>
    %478 = arith.truncf %404 : vector<2x32xf32> to vector<2x32xbf16>
    %c1_384 = arith.constant 1 : index
    %c0_385 = arith.constant 0 : index
    %c0_386 = arith.constant 0 : index
    %c0_387 = arith.constant 0 : index
    %479 = vector.load %arg3[%c1_384, %c0_385, %c0_386, %c0_387] : memref<2x3x32x32xbf16, #tpu.memory_space<vmem>>, vector<1x1x32x32xbf16>
    %480 = vector.shape_cast %479 : vector<1x1x32x32xbf16> to vector<32x32xbf16>
    %cst_388 = arith.constant dense<0.000000e+00> : vector<2x32xf32>
    %481 = tpu.matmul %478, %480, %cst_388 {dimension_numbers = #tpu.dot_dimension_numbers<[1], [0], [0], [1], [0, 0, 1, 1], [], []>} : vector<2x32xbf16>, vector<32x32xbf16>, vector<2x32xf32> -> vector<2x32xf32>
    %c1_389 = arith.constant 1 : index
    %c0_390 = arith.constant 0 : index
    %c0_391 = arith.constant 0 : index
    %c0_392 = arith.constant 0 : index
    %482 = vector.load %arg5[%c1_389, %c0_390, %c0_391, %c0_392] : memref<2x3x1x32xf32, #tpu.memory_space<vmem>>, vector<1x1x1x32xf32>
    %483 = vector.shape_cast %482 : vector<1x1x1x32xf32> to vector<1x32xf32>
    %484 = vector.broadcast %483 : vector<1x32xf32> to vector<2x32xf32>
    %485 = arith.addf %481, %484 : vector<2x32xf32>
    %c1_393 = arith.constant 1 : index
    %c1_394 = arith.constant 1 : index
    %c0_395 = arith.constant 0 : index
    %c0_396 = arith.constant 0 : index
    %486 = vector.load %arg3[%c1_393, %c1_394, %c0_395, %c0_396] : memref<2x3x32x32xbf16, #tpu.memory_space<vmem>>, vector<1x1x32x32xbf16>
    %487 = vector.shape_cast %486 : vector<1x1x32x32xbf16> to vector<32x32xbf16>
    %cst_397 = arith.constant dense<0.000000e+00> : vector<2x32xf32>
    %488 = tpu.matmul %478, %487, %cst_397 {dimension_numbers = #tpu.dot_dimension_numbers<[1], [0], [0], [1], [0, 0, 1, 1], [], []>} : vector<2x32xbf16>, vector<32x32xbf16>, vector<2x32xf32> -> vector<2x32xf32>
    %c1_398 = arith.constant 1 : index
    %c1_399 = arith.constant 1 : index
    %c0_400 = arith.constant 0 : index
    %c0_401 = arith.constant 0 : index
    %489 = vector.load %arg5[%c1_398, %c1_399, %c0_400, %c0_401] : memref<2x3x1x32xf32, #tpu.memory_space<vmem>>, vector<1x1x1x32xf32>
    %490 = vector.shape_cast %489 : vector<1x1x1x32xf32> to vector<1x32xf32>
    %491 = vector.broadcast %490 : vector<1x32xf32> to vector<2x32xf32>
    %492 = arith.addf %488, %491 : vector<2x32xf32>
    %c1_402 = arith.constant 1 : index
    %c2_403 = arith.constant 2 : index
    %c0_404 = arith.constant 0 : index
    %c0_405 = arith.constant 0 : index
    %493 = vector.load %arg3[%c1_402, %c2_403, %c0_404, %c0_405] : memref<2x3x32x32xbf16, #tpu.memory_space<vmem>>, vector<1x1x32x32xbf16>
    %494 = vector.shape_cast %493 : vector<1x1x32x32xbf16> to vector<32x32xbf16>
    %cst_406 = arith.constant dense<0.000000e+00> : vector<2x32xf32>
    %495 = tpu.matmul %478, %494, %cst_406 {dimension_numbers = #tpu.dot_dimension_numbers<[1], [0], [0], [1], [0, 0, 1, 1], [], []>} : vector<2x32xbf16>, vector<32x32xbf16>, vector<2x32xf32> -> vector<2x32xf32>
    %c1_407 = arith.constant 1 : index
    %c2_408 = arith.constant 2 : index
    %c0_409 = arith.constant 0 : index
    %c0_410 = arith.constant 0 : index
    %496 = vector.load %arg5[%c1_407, %c2_408, %c0_409, %c0_410] : memref<2x3x1x32xf32, #tpu.memory_space<vmem>>, vector<1x1x1x32xf32>
    %497 = vector.shape_cast %496 : vector<1x1x1x32xf32> to vector<1x32xf32>
    %498 = vector.broadcast %497 : vector<1x32xf32> to vector<2x32xf32>
    %499 = arith.addf %495, %498 : vector<2x32xf32>
    %500 = arith.addf %471, %485 : vector<2x32xf32>
    %501 = arith.negf %500 : vector<2x32xf32>
    %502 = math.exp %501 : vector<2x32xf32>
    %cst_411 = arith.constant 1.000000e+00 : f32
    %503 = vector.broadcast %cst_411 : f32 to vector<2x32xf32>
    %504 = arith.addf %503, %502 : vector<2x32xf32>
    %505 = arith.divf %503, %504 : vector<2x32xf32>
    %506 = arith.addf %474, %492 : vector<2x32xf32>
    %507 = arith.negf %506 : vector<2x32xf32>
    %508 = math.exp %507 : vector<2x32xf32>
    %cst_412 = arith.constant 1.000000e+00 : f32
    %509 = vector.broadcast %cst_412 : f32 to vector<2x32xf32>
    %510 = arith.addf %509, %508 : vector<2x32xf32>
    %511 = arith.divf %509, %510 : vector<2x32xf32>
    %512 = arith.mulf %505, %499 : vector<2x32xf32>
    %513 = arith.addf %477, %512 : vector<2x32xf32>
    %514 = math.tanh %513 : vector<2x32xf32>
    %cst_413 = arith.constant 1.000000e+00 : f32
    %515 = vector.broadcast %cst_413 : f32 to vector<2x32xf32>
    %516 = arith.subf %515, %511 : vector<2x32xf32>
    %517 = arith.mulf %516, %514 : vector<2x32xf32>
    %518 = arith.mulf %511, %404 : vector<2x32xf32>
    %519 = arith.addf %517, %518 : vector<2x32xf32>
    %520 = arith.index_cast %466 : i32 to index
    %c0_414 = arith.constant 0 : index
    %c32_415 = arith.constant 32 : index
    %521 = vector.load %arg6[%520, %c0_414, %c32_415] : memref<8x2x64xf32, #tpu.memory_space<vmem>>, vector<1x2x32xf32>
    %522 = vector.shape_cast %521 : vector<1x2x32xf32> to vector<2x32xf32>
    %523 = vector.shape_cast %519 : vector<2x32xf32> to vector<1x2x32xf32>
    tpu.vector_store %arg6[%520, %c0_414, %c32_415], %523 {strides = array<i32>} : memref<8x2x64xf32, #tpu.memory_space<vmem>>, vector<1x2x32xf32>,
    %c4_i32 = arith.constant 4 : i32
    %c2_i32_416 = arith.constant 2 : i32
    %524 = arith.muli %c4_i32, %c2_i32_416 : i32
    %525 = tpu.assume_multiple %524, 2 : i32
    %c0_417 = arith.constant 0 : index
    %c0_418 = arith.constant 0 : index
    %526 = arith.index_cast %525 : i32 to index
    %c0_419 = arith.constant 0 : index
    %527 = vector.load %arg7[%c0_417, %c0_418, %526, %c0_419] : memref<2x3x16x32xf32, #tpu.memory_space<vmem>>, vector<1x1x2x32xf32>
    %528 = vector.shape_cast %527 : vector<1x1x2x32xf32> to vector<2x32xf32>
    %c0_420 = arith.constant 0 : index
    %c1_421 = arith.constant 1 : index
    %529 = arith.index_cast %525 : i32 to index
    %c0_422 = arith.constant 0 : index
    %530 = vector.load %arg7[%c0_420, %c1_421, %529, %c0_422] : memref<2x3x16x32xf32, #tpu.memory_space<vmem>>, vector<1x1x2x32xf32>
    %531 = vector.shape_cast %530 : vector<1x1x2x32xf32> to vector<2x32xf32>
    %c0_423 = arith.constant 0 : index
    %c2_424 = arith.constant 2 : index
    %532 = arith.index_cast %525 : i32 to index
    %c0_425 = arith.constant 0 : index
    %533 = vector.load %arg7[%c0_423, %c2_424, %532, %c0_425] : memref<2x3x16x32xf32, #tpu.memory_space<vmem>>, vector<1x1x2x32xf32>
    %534 = vector.shape_cast %533 : vector<1x1x2x32xf32> to vector<2x32xf32>
    %535 = arith.truncf %461 : vector<2x32xf32> to vector<2x32xbf16>
    %c0_426 = arith.constant 0 : index
    %c0_427 = arith.constant 0 : index
    %c0_428 = arith.constant 0 : index
    %c0_429 = arith.constant 0 : index
    %536 = vector.load %arg3[%c0_426, %c0_427, %c0_428, %c0_429] : memref<2x3x32x32xbf16, #tpu.memory_space<vmem>>, vector<1x1x32x32xbf16>
    %537 = vector.shape_cast %536 : vector<1x1x32x32xbf16> to vector<32x32xbf16>
    %cst_430 = arith.constant dense<0.000000e+00> : vector<2x32xf32>
    %538 = tpu.matmul %535, %537, %cst_430 {dimension_numbers = #tpu.dot_dimension_numbers<[1], [0], [0], [1], [0, 0, 1, 1], [], []>} : vector<2x32xbf16>, vector<32x32xbf16>, vector<2x32xf32> -> vector<2x32xf32>
    %c0_431 = arith.constant 0 : index
    %c0_432 = arith.constant 0 : index
    %c0_433 = arith.constant 0 : index
    %c0_434 = arith.constant 0 : index
    %539 = vector.load %arg5[%c0_431, %c0_432, %c0_433, %c0_434] : memref<2x3x1x32xf32, #tpu.memory_space<vmem>>, vector<1x1x1x32xf32>
    %540 = vector.shape_cast %539 : vector<1x1x1x32xf32> to vector<1x32xf32>
    %541 = vector.broadcast %540 : vector<1x32xf32> to vector<2x32xf32>
    %542 = arith.addf %538, %541 : vector<2x32xf32>
    %c0_435 = arith.constant 0 : index
    %c1_436 = arith.constant 1 : index
    %c0_437 = arith.constant 0 : index
    %c0_438 = arith.constant 0 : index
    %543 = vector.load %arg3[%c0_435, %c1_436, %c0_437, %c0_438] : memref<2x3x32x32xbf16, #tpu.memory_space<vmem>>, vector<1x1x32x32xbf16>
    %544 = vector.shape_cast %543 : vector<1x1x32x32xbf16> to vector<32x32xbf16>
    %cst_439 = arith.constant dense<0.000000e+00> : vector<2x32xf32>
    %545 = tpu.matmul %535, %544, %cst_439 {dimension_numbers = #tpu.dot_dimension_numbers<[1], [0], [0], [1], [0, 0, 1, 1], [], []>} : vector<2x32xbf16>, vector<32x32xbf16>, vector<2x32xf32> -> vector<2x32xf32>
    %c0_440 = arith.constant 0 : index
    %c1_441 = arith.constant 1 : index
    %c0_442 = arith.constant 0 : index
    %c0_443 = arith.constant 0 : index
    %546 = vector.load %arg5[%c0_440, %c1_441, %c0_442, %c0_443] : memref<2x3x1x32xf32, #tpu.memory_space<vmem>>, vector<1x1x1x32xf32>
    %547 = vector.shape_cast %546 : vector<1x1x1x32xf32> to vector<1x32xf32>
    %548 = vector.broadcast %547 : vector<1x32xf32> to vector<2x32xf32>
    %549 = arith.addf %545, %548 : vector<2x32xf32>
    %c0_444 = arith.constant 0 : index
    %c2_445 = arith.constant 2 : index
    %c0_446 = arith.constant 0 : index
    %c0_447 = arith.constant 0 : index
    %550 = vector.load %arg3[%c0_444, %c2_445, %c0_446, %c0_447] : memref<2x3x32x32xbf16, #tpu.memory_space<vmem>>, vector<1x1x32x32xbf16>
    %551 = vector.shape_cast %550 : vector<1x1x32x32xbf16> to vector<32x32xbf16>
    %cst_448 = arith.constant dense<0.000000e+00> : vector<2x32xf32>
    %552 = tpu.matmul %535, %551, %cst_448 {dimension_numbers = #tpu.dot_dimension_numbers<[1], [0], [0], [1], [0, 0, 1, 1], [], []>} : vector<2x32xbf16>, vector<32x32xbf16>, vector<2x32xf32> -> vector<2x32xf32>
    %c0_449 = arith.constant 0 : index
    %c2_450 = arith.constant 2 : index
    %c0_451 = arith.constant 0 : index
    %c0_452 = arith.constant 0 : index
    %553 = vector.load %arg5[%c0_449, %c2_450, %c0_451, %c0_452] : memref<2x3x1x32xf32, #tpu.memory_space<vmem>>, vector<1x1x1x32xf32>
    %554 = vector.shape_cast %553 : vector<1x1x1x32xf32> to vector<1x32xf32>
    %555 = vector.broadcast %554 : vector<1x32xf32> to vector<2x32xf32>
    %556 = arith.addf %552, %555 : vector<2x32xf32>
    %557 = arith.addf %528, %542 : vector<2x32xf32>
    %558 = arith.negf %557 : vector<2x32xf32>
    %559 = math.exp %558 : vector<2x32xf32>
    %cst_453 = arith.constant 1.000000e+00 : f32
    %560 = vector.broadcast %cst_453 : f32 to vector<2x32xf32>
    %561 = arith.addf %560, %559 : vector<2x32xf32>
    %562 = arith.divf %560, %561 : vector<2x32xf32>
    %563 = arith.addf %531, %549 : vector<2x32xf32>
    %564 = arith.negf %563 : vector<2x32xf32>
    %565 = math.exp %564 : vector<2x32xf32>
    %cst_454 = arith.constant 1.000000e+00 : f32
    %566 = vector.broadcast %cst_454 : f32 to vector<2x32xf32>
    %567 = arith.addf %566, %565 : vector<2x32xf32>
    %568 = arith.divf %566, %567 : vector<2x32xf32>
    %569 = arith.mulf %562, %556 : vector<2x32xf32>
    %570 = arith.addf %534, %569 : vector<2x32xf32>
    %571 = math.tanh %570 : vector<2x32xf32>
    %cst_455 = arith.constant 1.000000e+00 : f32
    %572 = vector.broadcast %cst_455 : f32 to vector<2x32xf32>
    %573 = arith.subf %572, %568 : vector<2x32xf32>
    %574 = arith.mulf %573, %571 : vector<2x32xf32>
    %575 = arith.mulf %568, %461 : vector<2x32xf32>
    %576 = arith.addf %574, %575 : vector<2x32xf32>
    %577 = arith.index_cast %c4_i32 : i32 to index
    %c0_456 = arith.constant 0 : index
    %c0_457 = arith.constant 0 : index
    %578 = vector.load %arg6[%577, %c0_456, %c0_457] : memref<8x2x64xf32, #tpu.memory_space<vmem>>, vector<1x2x32xf32>
    %579 = vector.shape_cast %578 : vector<1x2x32xf32> to vector<2x32xf32>
    %580 = vector.shape_cast %576 : vector<2x32xf32> to vector<1x2x32xf32>
    tpu.vector_store %arg6[%577, %c0_456, %c0_457], %580 {strides = array<i32>} : memref<8x2x64xf32, #tpu.memory_space<vmem>>, vector<1x2x32xf32>,
    %c7_i32_458 = arith.constant 7 : i32
    %581 = arith.subi %c7_i32_458, %c4_i32 : i32
    %c2_i32_459 = arith.constant 2 : i32
    %582 = arith.muli %581, %c2_i32_459 : i32
    %583 = tpu.assume_multiple %582, 2 : i32
    %c1_460 = arith.constant 1 : index
    %c0_461 = arith.constant 0 : index
    %584 = arith.index_cast %583 : i32 to index
    %c0_462 = arith.constant 0 : index
    %585 = vector.load %arg7[%c1_460, %c0_461, %584, %c0_462] : memref<2x3x16x32xf32, #tpu.memory_space<vmem>>, vector<1x1x2x32xf32>
    %586 = vector.shape_cast %585 : vector<1x1x2x32xf32> to vector<2x32xf32>
    %c1_463 = arith.constant 1 : index
    %c1_464 = arith.constant 1 : index
    %587 = arith.index_cast %583 : i32 to index
    %c0_465 = arith.constant 0 : index
    %588 = vector.load %arg7[%c1_463, %c1_464, %587, %c0_465] : memref<2x3x16x32xf32, #tpu.memory_space<vmem>>, vector<1x1x2x32xf32>
    %589 = vector.shape_cast %588 : vector<1x1x2x32xf32> to vector<2x32xf32>
    %c1_466 = arith.constant 1 : index
    %c2_467 = arith.constant 2 : index
    %590 = arith.index_cast %583 : i32 to index
    %c0_468 = arith.constant 0 : index
    %591 = vector.load %arg7[%c1_466, %c2_467, %590, %c0_468] : memref<2x3x16x32xf32, #tpu.memory_space<vmem>>, vector<1x1x2x32xf32>
    %592 = vector.shape_cast %591 : vector<1x1x2x32xf32> to vector<2x32xf32>
    %593 = arith.truncf %519 : vector<2x32xf32> to vector<2x32xbf16>
    %c1_469 = arith.constant 1 : index
    %c0_470 = arith.constant 0 : index
    %c0_471 = arith.constant 0 : index
    %c0_472 = arith.constant 0 : index
    %594 = vector.load %arg3[%c1_469, %c0_470, %c0_471, %c0_472] : memref<2x3x32x32xbf16, #tpu.memory_space<vmem>>, vector<1x1x32x32xbf16>
    %595 = vector.shape_cast %594 : vector<1x1x32x32xbf16> to vector<32x32xbf16>
    %cst_473 = arith.constant dense<0.000000e+00> : vector<2x32xf32>
    %596 = tpu.matmul %593, %595, %cst_473 {dimension_numbers = #tpu.dot_dimension_numbers<[1], [0], [0], [1], [0, 0, 1, 1], [], []>} : vector<2x32xbf16>, vector<32x32xbf16>, vector<2x32xf32> -> vector<2x32xf32>
    %c1_474 = arith.constant 1 : index
    %c0_475 = arith.constant 0 : index
    %c0_476 = arith.constant 0 : index
    %c0_477 = arith.constant 0 : index
    %597 = vector.load %arg5[%c1_474, %c0_475, %c0_476, %c0_477] : memref<2x3x1x32xf32, #tpu.memory_space<vmem>>, vector<1x1x1x32xf32>
    %598 = vector.shape_cast %597 : vector<1x1x1x32xf32> to vector<1x32xf32>
    %599 = vector.broadcast %598 : vector<1x32xf32> to vector<2x32xf32>
    %600 = arith.addf %596, %599 : vector<2x32xf32>
    %c1_478 = arith.constant 1 : index
    %c1_479 = arith.constant 1 : index
    %c0_480 = arith.constant 0 : index
    %c0_481 = arith.constant 0 : index
    %601 = vector.load %arg3[%c1_478, %c1_479, %c0_480, %c0_481] : memref<2x3x32x32xbf16, #tpu.memory_space<vmem>>, vector<1x1x32x32xbf16>
    %602 = vector.shape_cast %601 : vector<1x1x32x32xbf16> to vector<32x32xbf16>
    %cst_482 = arith.constant dense<0.000000e+00> : vector<2x32xf32>
    %603 = tpu.matmul %593, %602, %cst_482 {dimension_numbers = #tpu.dot_dimension_numbers<[1], [0], [0], [1], [0, 0, 1, 1], [], []>} : vector<2x32xbf16>, vector<32x32xbf16>, vector<2x32xf32> -> vector<2x32xf32>
    %c1_483 = arith.constant 1 : index
    %c1_484 = arith.constant 1 : index
    %c0_485 = arith.constant 0 : index
    %c0_486 = arith.constant 0 : index
    %604 = vector.load %arg5[%c1_483, %c1_484, %c0_485, %c0_486] : memref<2x3x1x32xf32, #tpu.memory_space<vmem>>, vector<1x1x1x32xf32>
    %605 = vector.shape_cast %604 : vector<1x1x1x32xf32> to vector<1x32xf32>
    %606 = vector.broadcast %605 : vector<1x32xf32> to vector<2x32xf32>
    %607 = arith.addf %603, %606 : vector<2x32xf32>
    %c1_487 = arith.constant 1 : index
    %c2_488 = arith.constant 2 : index
    %c0_489 = arith.constant 0 : index
    %c0_490 = arith.constant 0 : index
    %608 = vector.load %arg3[%c1_487, %c2_488, %c0_489, %c0_490] : memref<2x3x32x32xbf16, #tpu.memory_space<vmem>>, vector<1x1x32x32xbf16>
    %609 = vector.shape_cast %608 : vector<1x1x32x32xbf16> to vector<32x32xbf16>
    %cst_491 = arith.constant dense<0.000000e+00> : vector<2x32xf32>
    %610 = tpu.matmul %593, %609, %cst_491 {dimension_numbers = #tpu.dot_dimension_numbers<[1], [0], [0], [1], [0, 0, 1, 1], [], []>} : vector<2x32xbf16>, vector<32x32xbf16>, vector<2x32xf32> -> vector<2x32xf32>
    %c1_492 = arith.constant 1 : index
    %c2_493 = arith.constant 2 : index
    %c0_494 = arith.constant 0 : index
    %c0_495 = arith.constant 0 : index
    %611 = vector.load %arg5[%c1_492, %c2_493, %c0_494, %c0_495] : memref<2x3x1x32xf32, #tpu.memory_space<vmem>>, vector<1x1x1x32xf32>
    %612 = vector.shape_cast %611 : vector<1x1x1x32xf32> to vector<1x32xf32>
    %613 = vector.broadcast %612 : vector<1x32xf32> to vector<2x32xf32>
    %614 = arith.addf %610, %613 : vector<2x32xf32>
    %615 = arith.addf %586, %600 : vector<2x32xf32>
    %616 = arith.negf %615 : vector<2x32xf32>
    %617 = math.exp %616 : vector<2x32xf32>
    %cst_496 = arith.constant 1.000000e+00 : f32
    %618 = vector.broadcast %cst_496 : f32 to vector<2x32xf32>
    %619 = arith.addf %618, %617 : vector<2x32xf32>
    %620 = arith.divf %618, %619 : vector<2x32xf32>
    %621 = arith.addf %589, %607 : vector<2x32xf32>
    %622 = arith.negf %621 : vector<2x32xf32>
    %623 = math.exp %622 : vector<2x32xf32>
    %cst_497 = arith.constant 1.000000e+00 : f32
    %624 = vector.broadcast %cst_497 : f32 to vector<2x32xf32>
    %625 = arith.addf %624, %623 : vector<2x32xf32>
    %626 = arith.divf %624, %625 : vector<2x32xf32>
    %627 = arith.mulf %620, %614 : vector<2x32xf32>
    %628 = arith.addf %592, %627 : vector<2x32xf32>
    %629 = math.tanh %628 : vector<2x32xf32>
    %cst_498 = arith.constant 1.000000e+00 : f32
    %630 = vector.broadcast %cst_498 : f32 to vector<2x32xf32>
    %631 = arith.subf %630, %626 : vector<2x32xf32>
    %632 = arith.mulf %631, %629 : vector<2x32xf32>
    %633 = arith.mulf %626, %519 : vector<2x32xf32>
    %634 = arith.addf %632, %633 : vector<2x32xf32>
    %635 = arith.index_cast %581 : i32 to index
    %c0_499 = arith.constant 0 : index
    %c32_500 = arith.constant 32 : index
    %636 = vector.load %arg6[%635, %c0_499, %c32_500] : memref<8x2x64xf32, #tpu.memory_space<vmem>>, vector<1x2x32xf32>
    %637 = vector.shape_cast %636 : vector<1x2x32xf32> to vector<2x32xf32>
    %638 = vector.shape_cast %634 : vector<2x32xf32> to vector<1x2x32xf32>
    tpu.vector_store %arg6[%635, %c0_499, %c32_500], %638 {strides = array<i32>} : memref<8x2x64xf32, #tpu.memory_space<vmem>>, vector<1x2x32xf32>,
    %c5_i32 = arith.constant 5 : i32
    %c2_i32_501 = arith.constant 2 : i32
    %639 = arith.muli %c5_i32, %c2_i32_501 : i32
    %640 = tpu.assume_multiple %639, 2 : i32
    %c0_502 = arith.constant 0 : index
    %c0_503 = arith.constant 0 : index
    %641 = arith.index_cast %640 : i32 to index
    %c0_504 = arith.constant 0 : index
    %642 = vector.load %arg7[%c0_502, %c0_503, %641, %c0_504] : memref<2x3x16x32xf32, #tpu.memory_space<vmem>>, vector<1x1x2x32xf32>
    %643 = vector.shape_cast %642 : vector<1x1x2x32xf32> to vector<2x32xf32>
    %c0_505 = arith.constant 0 : index
    %c1_506 = arith.constant 1 : index
    %644 = arith.index_cast %640 : i32 to index
    %c0_507 = arith.constant 0 : index
    %645 = vector.load %arg7[%c0_505, %c1_506, %644, %c0_507] : memref<2x3x16x32xf32, #tpu.memory_space<vmem>>, vector<1x1x2x32xf32>
    %646 = vector.shape_cast %645 : vector<1x1x2x32xf32> to vector<2x32xf32>
    %c0_508 = arith.constant 0 : index
    %c2_509 = arith.constant 2 : index
    %647 = arith.index_cast %640 : i32 to index
    %c0_510 = arith.constant 0 : index
    %648 = vector.load %arg7[%c0_508, %c2_509, %647, %c0_510] : memref<2x3x16x32xf32, #tpu.memory_space<vmem>>, vector<1x1x2x32xf32>
    %649 = vector.shape_cast %648 : vector<1x1x2x32xf32> to vector<2x32xf32>
    %650 = arith.truncf %576 : vector<2x32xf32> to vector<2x32xbf16>
    %c0_511 = arith.constant 0 : index
    %c0_512 = arith.constant 0 : index
    %c0_513 = arith.constant 0 : index
    %c0_514 = arith.constant 0 : index
    %651 = vector.load %arg3[%c0_511, %c0_512, %c0_513, %c0_514] : memref<2x3x32x32xbf16, #tpu.memory_space<vmem>>, vector<1x1x32x32xbf16>
    %652 = vector.shape_cast %651 : vector<1x1x32x32xbf16> to vector<32x32xbf16>
    %cst_515 = arith.constant dense<0.000000e+00> : vector<2x32xf32>
    %653 = tpu.matmul %650, %652, %cst_515 {dimension_numbers = #tpu.dot_dimension_numbers<[1], [0], [0], [1], [0, 0, 1, 1], [], []>} : vector<2x32xbf16>, vector<32x32xbf16>, vector<2x32xf32> -> vector<2x32xf32>
    %c0_516 = arith.constant 0 : index
    %c0_517 = arith.constant 0 : index
    %c0_518 = arith.constant 0 : index
    %c0_519 = arith.constant 0 : index
    %654 = vector.load %arg5[%c0_516, %c0_517, %c0_518, %c0_519] : memref<2x3x1x32xf32, #tpu.memory_space<vmem>>, vector<1x1x1x32xf32>
    %655 = vector.shape_cast %654 : vector<1x1x1x32xf32> to vector<1x32xf32>
    %656 = vector.broadcast %655 : vector<1x32xf32> to vector<2x32xf32>
    %657 = arith.addf %653, %656 : vector<2x32xf32>
    %c0_520 = arith.constant 0 : index
    %c1_521 = arith.constant 1 : index
    %c0_522 = arith.constant 0 : index
    %c0_523 = arith.constant 0 : index
    %658 = vector.load %arg3[%c0_520, %c1_521, %c0_522, %c0_523] : memref<2x3x32x32xbf16, #tpu.memory_space<vmem>>, vector<1x1x32x32xbf16>
    %659 = vector.shape_cast %658 : vector<1x1x32x32xbf16> to vector<32x32xbf16>
    %cst_524 = arith.constant dense<0.000000e+00> : vector<2x32xf32>
    %660 = tpu.matmul %650, %659, %cst_524 {dimension_numbers = #tpu.dot_dimension_numbers<[1], [0], [0], [1], [0, 0, 1, 1], [], []>} : vector<2x32xbf16>, vector<32x32xbf16>, vector<2x32xf32> -> vector<2x32xf32>
    %c0_525 = arith.constant 0 : index
    %c1_526 = arith.constant 1 : index
    %c0_527 = arith.constant 0 : index
    %c0_528 = arith.constant 0 : index
    %661 = vector.load %arg5[%c0_525, %c1_526, %c0_527, %c0_528] : memref<2x3x1x32xf32, #tpu.memory_space<vmem>>, vector<1x1x1x32xf32>
    %662 = vector.shape_cast %661 : vector<1x1x1x32xf32> to vector<1x32xf32>
    %663 = vector.broadcast %662 : vector<1x32xf32> to vector<2x32xf32>
    %664 = arith.addf %660, %663 : vector<2x32xf32>
    %c0_529 = arith.constant 0 : index
    %c2_530 = arith.constant 2 : index
    %c0_531 = arith.constant 0 : index
    %c0_532 = arith.constant 0 : index
    %665 = vector.load %arg3[%c0_529, %c2_530, %c0_531, %c0_532] : memref<2x3x32x32xbf16, #tpu.memory_space<vmem>>, vector<1x1x32x32xbf16>
    %666 = vector.shape_cast %665 : vector<1x1x32x32xbf16> to vector<32x32xbf16>
    %cst_533 = arith.constant dense<0.000000e+00> : vector<2x32xf32>
    %667 = tpu.matmul %650, %666, %cst_533 {dimension_numbers = #tpu.dot_dimension_numbers<[1], [0], [0], [1], [0, 0, 1, 1], [], []>} : vector<2x32xbf16>, vector<32x32xbf16>, vector<2x32xf32> -> vector<2x32xf32>
    %c0_534 = arith.constant 0 : index
    %c2_535 = arith.constant 2 : index
    %c0_536 = arith.constant 0 : index
    %c0_537 = arith.constant 0 : index
    %668 = vector.load %arg5[%c0_534, %c2_535, %c0_536, %c0_537] : memref<2x3x1x32xf32, #tpu.memory_space<vmem>>, vector<1x1x1x32xf32>
    %669 = vector.shape_cast %668 : vector<1x1x1x32xf32> to vector<1x32xf32>
    %670 = vector.broadcast %669 : vector<1x32xf32> to vector<2x32xf32>
    %671 = arith.addf %667, %670 : vector<2x32xf32>
    %672 = arith.addf %643, %657 : vector<2x32xf32>
    %673 = arith.negf %672 : vector<2x32xf32>
    %674 = math.exp %673 : vector<2x32xf32>
    %cst_538 = arith.constant 1.000000e+00 : f32
    %675 = vector.broadcast %cst_538 : f32 to vector<2x32xf32>
    %676 = arith.addf %675, %674 : vector<2x32xf32>
    %677 = arith.divf %675, %676 : vector<2x32xf32>
    %678 = arith.addf %646, %664 : vector<2x32xf32>
    %679 = arith.negf %678 : vector<2x32xf32>
    %680 = math.exp %679 : vector<2x32xf32>
    %cst_539 = arith.constant 1.000000e+00 : f32
    %681 = vector.broadcast %cst_539 : f32 to vector<2x32xf32>
    %682 = arith.addf %681, %680 : vector<2x32xf32>
    %683 = arith.divf %681, %682 : vector<2x32xf32>
    %684 = arith.mulf %677, %671 : vector<2x32xf32>
    %685 = arith.addf %649, %684 : vector<2x32xf32>
    %686 = math.tanh %685 : vector<2x32xf32>
    %cst_540 = arith.constant 1.000000e+00 : f32
    %687 = vector.broadcast %cst_540 : f32 to vector<2x32xf32>
    %688 = arith.subf %687, %683 : vector<2x32xf32>
    %689 = arith.mulf %688, %686 : vector<2x32xf32>
    %690 = arith.mulf %683, %576 : vector<2x32xf32>
    %691 = arith.addf %689, %690 : vector<2x32xf32>
    %692 = arith.index_cast %c5_i32 : i32 to index
    %c0_541 = arith.constant 0 : index
    %c0_542 = arith.constant 0 : index
    %693 = vector.load %arg6[%692, %c0_541, %c0_542] : memref<8x2x64xf32, #tpu.memory_space<vmem>>, vector<1x2x32xf32>
    %694 = vector.shape_cast %693 : vector<1x2x32xf32> to vector<2x32xf32>
    %695 = vector.shape_cast %691 : vector<2x32xf32> to vector<1x2x32xf32>
    tpu.vector_store %arg6[%692, %c0_541, %c0_542], %695 {strides = array<i32>} : memref<8x2x64xf32, #tpu.memory_space<vmem>>, vector<1x2x32xf32>,
    %c7_i32_543 = arith.constant 7 : i32
    %696 = arith.subi %c7_i32_543, %c5_i32 : i32
    %c2_i32_544 = arith.constant 2 : i32
    %697 = arith.muli %696, %c2_i32_544 : i32
    %698 = tpu.assume_multiple %697, 2 : i32
    %c1_545 = arith.constant 1 : index
    %c0_546 = arith.constant 0 : index
    %699 = arith.index_cast %698 : i32 to index
    %c0_547 = arith.constant 0 : index
    %700 = vector.load %arg7[%c1_545, %c0_546, %699, %c0_547] : memref<2x3x16x32xf32, #tpu.memory_space<vmem>>, vector<1x1x2x32xf32>
    %701 = vector.shape_cast %700 : vector<1x1x2x32xf32> to vector<2x32xf32>
    %c1_548 = arith.constant 1 : index
    %c1_549 = arith.constant 1 : index
    %702 = arith.index_cast %698 : i32 to index
    %c0_550 = arith.constant 0 : index
    %703 = vector.load %arg7[%c1_548, %c1_549, %702, %c0_550] : memref<2x3x16x32xf32, #tpu.memory_space<vmem>>, vector<1x1x2x32xf32>
    %704 = vector.shape_cast %703 : vector<1x1x2x32xf32> to vector<2x32xf32>
    %c1_551 = arith.constant 1 : index
    %c2_552 = arith.constant 2 : index
    %705 = arith.index_cast %698 : i32 to index
    %c0_553 = arith.constant 0 : index
    %706 = vector.load %arg7[%c1_551, %c2_552, %705, %c0_553] : memref<2x3x16x32xf32, #tpu.memory_space<vmem>>, vector<1x1x2x32xf32>
    %707 = vector.shape_cast %706 : vector<1x1x2x32xf32> to vector<2x32xf32>
    %708 = arith.truncf %634 : vector<2x32xf32> to vector<2x32xbf16>
    %c1_554 = arith.constant 1 : index
    %c0_555 = arith.constant 0 : index
    %c0_556 = arith.constant 0 : index
    %c0_557 = arith.constant 0 : index
    %709 = vector.load %arg3[%c1_554, %c0_555, %c0_556, %c0_557] : memref<2x3x32x32xbf16, #tpu.memory_space<vmem>>, vector<1x1x32x32xbf16>
    %710 = vector.shape_cast %709 : vector<1x1x32x32xbf16> to vector<32x32xbf16>
    %cst_558 = arith.constant dense<0.000000e+00> : vector<2x32xf32>
    %711 = tpu.matmul %708, %710, %cst_558 {dimension_numbers = #tpu.dot_dimension_numbers<[1], [0], [0], [1], [0, 0, 1, 1], [], []>} : vector<2x32xbf16>, vector<32x32xbf16>, vector<2x32xf32> -> vector<2x32xf32>
    %c1_559 = arith.constant 1 : index
    %c0_560 = arith.constant 0 : index
    %c0_561 = arith.constant 0 : index
    %c0_562 = arith.constant 0 : index
    %712 = vector.load %arg5[%c1_559, %c0_560, %c0_561, %c0_562] : memref<2x3x1x32xf32, #tpu.memory_space<vmem>>, vector<1x1x1x32xf32>
    %713 = vector.shape_cast %712 : vector<1x1x1x32xf32> to vector<1x32xf32>
    %714 = vector.broadcast %713 : vector<1x32xf32> to vector<2x32xf32>
    %715 = arith.addf %711, %714 : vector<2x32xf32>
    %c1_563 = arith.constant 1 : index
    %c1_564 = arith.constant 1 : index
    %c0_565 = arith.constant 0 : index
    %c0_566 = arith.constant 0 : index
    %716 = vector.load %arg3[%c1_563, %c1_564, %c0_565, %c0_566] : memref<2x3x32x32xbf16, #tpu.memory_space<vmem>>, vector<1x1x32x32xbf16>
    %717 = vector.shape_cast %716 : vector<1x1x32x32xbf16> to vector<32x32xbf16>
    %cst_567 = arith.constant dense<0.000000e+00> : vector<2x32xf32>
    %718 = tpu.matmul %708, %717, %cst_567 {dimension_numbers = #tpu.dot_dimension_numbers<[1], [0], [0], [1], [0, 0, 1, 1], [], []>} : vector<2x32xbf16>, vector<32x32xbf16>, vector<2x32xf32> -> vector<2x32xf32>
    %c1_568 = arith.constant 1 : index
    %c1_569 = arith.constant 1 : index
    %c0_570 = arith.constant 0 : index
    %c0_571 = arith.constant 0 : index
    %719 = vector.load %arg5[%c1_568, %c1_569, %c0_570, %c0_571] : memref<2x3x1x32xf32, #tpu.memory_space<vmem>>, vector<1x1x1x32xf32>
    %720 = vector.shape_cast %719 : vector<1x1x1x32xf32> to vector<1x32xf32>
    %721 = vector.broadcast %720 : vector<1x32xf32> to vector<2x32xf32>
    %722 = arith.addf %718, %721 : vector<2x32xf32>
    %c1_572 = arith.constant 1 : index
    %c2_573 = arith.constant 2 : index
    %c0_574 = arith.constant 0 : index
    %c0_575 = arith.constant 0 : index
    %723 = vector.load %arg3[%c1_572, %c2_573, %c0_574, %c0_575] : memref<2x3x32x32xbf16, #tpu.memory_space<vmem>>, vector<1x1x32x32xbf16>
    %724 = vector.shape_cast %723 : vector<1x1x32x32xbf16> to vector<32x32xbf16>
    %cst_576 = arith.constant dense<0.000000e+00> : vector<2x32xf32>
    %725 = tpu.matmul %708, %724, %cst_576 {dimension_numbers = #tpu.dot_dimension_numbers<[1], [0], [0], [1], [0, 0, 1, 1], [], []>} : vector<2x32xbf16>, vector<32x32xbf16>, vector<2x32xf32> -> vector<2x32xf32>
    %c1_577 = arith.constant 1 : index
    %c2_578 = arith.constant 2 : index
    %c0_579 = arith.constant 0 : index
    %c0_580 = arith.constant 0 : index
    %726 = vector.load %arg5[%c1_577, %c2_578, %c0_579, %c0_580] : memref<2x3x1x32xf32, #tpu.memory_space<vmem>>, vector<1x1x1x32xf32>
    %727 = vector.shape_cast %726 : vector<1x1x1x32xf32> to vector<1x32xf32>
    %728 = vector.broadcast %727 : vector<1x32xf32> to vector<2x32xf32>
    %729 = arith.addf %725, %728 : vector<2x32xf32>
    %730 = arith.addf %701, %715 : vector<2x32xf32>
    %731 = arith.negf %730 : vector<2x32xf32>
    %732 = math.exp %731 : vector<2x32xf32>
    %cst_581 = arith.constant 1.000000e+00 : f32
    %733 = vector.broadcast %cst_581 : f32 to vector<2x32xf32>
    %734 = arith.addf %733, %732 : vector<2x32xf32>
    %735 = arith.divf %733, %734 : vector<2x32xf32>
    %736 = arith.addf %704, %722 : vector<2x32xf32>
    %737 = arith.negf %736 : vector<2x32xf32>
    %738 = math.exp %737 : vector<2x32xf32>
    %cst_582 = arith.constant 1.000000e+00 : f32
    %739 = vector.broadcast %cst_582 : f32 to vector<2x32xf32>
    %740 = arith.addf %739, %738 : vector<2x32xf32>
    %741 = arith.divf %739, %740 : vector<2x32xf32>
    %742 = arith.mulf %735, %729 : vector<2x32xf32>
    %743 = arith.addf %707, %742 : vector<2x32xf32>
    %744 = math.tanh %743 : vector<2x32xf32>
    %cst_583 = arith.constant 1.000000e+00 : f32
    %745 = vector.broadcast %cst_583 : f32 to vector<2x32xf32>
    %746 = arith.subf %745, %741 : vector<2x32xf32>
    %747 = arith.mulf %746, %744 : vector<2x32xf32>
    %748 = arith.mulf %741, %634 : vector<2x32xf32>
    %749 = arith.addf %747, %748 : vector<2x32xf32>
    %750 = arith.index_cast %696 : i32 to index
    %c0_584 = arith.constant 0 : index
    %c32_585 = arith.constant 32 : index
    %751 = vector.load %arg6[%750, %c0_584, %c32_585] : memref<8x2x64xf32, #tpu.memory_space<vmem>>, vector<1x2x32xf32>
    %752 = vector.shape_cast %751 : vector<1x2x32xf32> to vector<2x32xf32>
    %753 = vector.shape_cast %749 : vector<2x32xf32> to vector<1x2x32xf32>
    tpu.vector_store %arg6[%750, %c0_584, %c32_585], %753 {strides = array<i32>} : memref<8x2x64xf32, #tpu.memory_space<vmem>>, vector<1x2x32xf32>,
    %c6_i32 = arith.constant 6 : i32
    %c2_i32_586 = arith.constant 2 : i32
    %754 = arith.muli %c6_i32, %c2_i32_586 : i32
    %755 = tpu.assume_multiple %754, 2 : i32
    %c0_587 = arith.constant 0 : index
    %c0_588 = arith.constant 0 : index
    %756 = arith.index_cast %755 : i32 to index
    %c0_589 = arith.constant 0 : index
    %757 = vector.load %arg7[%c0_587, %c0_588, %756, %c0_589] : memref<2x3x16x32xf32, #tpu.memory_space<vmem>>, vector<1x1x2x32xf32>
    %758 = vector.shape_cast %757 : vector<1x1x2x32xf32> to vector<2x32xf32>
    %c0_590 = arith.constant 0 : index
    %c1_591 = arith.constant 1 : index
    %759 = arith.index_cast %755 : i32 to index
    %c0_592 = arith.constant 0 : index
    %760 = vector.load %arg7[%c0_590, %c1_591, %759, %c0_592] : memref<2x3x16x32xf32, #tpu.memory_space<vmem>>, vector<1x1x2x32xf32>
    %761 = vector.shape_cast %760 : vector<1x1x2x32xf32> to vector<2x32xf32>
    %c0_593 = arith.constant 0 : index
    %c2_594 = arith.constant 2 : index
    %762 = arith.index_cast %755 : i32 to index
    %c0_595 = arith.constant 0 : index
    %763 = vector.load %arg7[%c0_593, %c2_594, %762, %c0_595] : memref<2x3x16x32xf32, #tpu.memory_space<vmem>>, vector<1x1x2x32xf32>
    %764 = vector.shape_cast %763 : vector<1x1x2x32xf32> to vector<2x32xf32>
    %765 = arith.truncf %691 : vector<2x32xf32> to vector<2x32xbf16>
    %c0_596 = arith.constant 0 : index
    %c0_597 = arith.constant 0 : index
    %c0_598 = arith.constant 0 : index
    %c0_599 = arith.constant 0 : index
    %766 = vector.load %arg3[%c0_596, %c0_597, %c0_598, %c0_599] : memref<2x3x32x32xbf16, #tpu.memory_space<vmem>>, vector<1x1x32x32xbf16>
    %767 = vector.shape_cast %766 : vector<1x1x32x32xbf16> to vector<32x32xbf16>
    %cst_600 = arith.constant dense<0.000000e+00> : vector<2x32xf32>
    %768 = tpu.matmul %765, %767, %cst_600 {dimension_numbers = #tpu.dot_dimension_numbers<[1], [0], [0], [1], [0, 0, 1, 1], [], []>} : vector<2x32xbf16>, vector<32x32xbf16>, vector<2x32xf32> -> vector<2x32xf32>
    %c0_601 = arith.constant 0 : index
    %c0_602 = arith.constant 0 : index
    %c0_603 = arith.constant 0 : index
    %c0_604 = arith.constant 0 : index
    %769 = vector.load %arg5[%c0_601, %c0_602, %c0_603, %c0_604] : memref<2x3x1x32xf32, #tpu.memory_space<vmem>>, vector<1x1x1x32xf32>
    %770 = vector.shape_cast %769 : vector<1x1x1x32xf32> to vector<1x32xf32>
    %771 = vector.broadcast %770 : vector<1x32xf32> to vector<2x32xf32>
    %772 = arith.addf %768, %771 : vector<2x32xf32>
    %c0_605 = arith.constant 0 : index
    %c1_606 = arith.constant 1 : index
    %c0_607 = arith.constant 0 : index
    %c0_608 = arith.constant 0 : index
    %773 = vector.load %arg3[%c0_605, %c1_606, %c0_607, %c0_608] : memref<2x3x32x32xbf16, #tpu.memory_space<vmem>>, vector<1x1x32x32xbf16>
    %774 = vector.shape_cast %773 : vector<1x1x32x32xbf16> to vector<32x32xbf16>
    %cst_609 = arith.constant dense<0.000000e+00> : vector<2x32xf32>
    %775 = tpu.matmul %765, %774, %cst_609 {dimension_numbers = #tpu.dot_dimension_numbers<[1], [0], [0], [1], [0, 0, 1, 1], [], []>} : vector<2x32xbf16>, vector<32x32xbf16>, vector<2x32xf32> -> vector<2x32xf32>
    %c0_610 = arith.constant 0 : index
    %c1_611 = arith.constant 1 : index
    %c0_612 = arith.constant 0 : index
    %c0_613 = arith.constant 0 : index
    %776 = vector.load %arg5[%c0_610, %c1_611, %c0_612, %c0_613] : memref<2x3x1x32xf32, #tpu.memory_space<vmem>>, vector<1x1x1x32xf32>
    %777 = vector.shape_cast %776 : vector<1x1x1x32xf32> to vector<1x32xf32>
    %778 = vector.broadcast %777 : vector<1x32xf32> to vector<2x32xf32>
    %779 = arith.addf %775, %778 : vector<2x32xf32>
    %c0_614 = arith.constant 0 : index
    %c2_615 = arith.constant 2 : index
    %c0_616 = arith.constant 0 : index
    %c0_617 = arith.constant 0 : index
    %780 = vector.load %arg3[%c0_614, %c2_615, %c0_616, %c0_617] : memref<2x3x32x32xbf16, #tpu.memory_space<vmem>>, vector<1x1x32x32xbf16>
    %781 = vector.shape_cast %780 : vector<1x1x32x32xbf16> to vector<32x32xbf16>
    %cst_618 = arith.constant dense<0.000000e+00> : vector<2x32xf32>
    %782 = tpu.matmul %765, %781, %cst_618 {dimension_numbers = #tpu.dot_dimension_numbers<[1], [0], [0], [1], [0, 0, 1, 1], [], []>} : vector<2x32xbf16>, vector<32x32xbf16>, vector<2x32xf32> -> vector<2x32xf32>
    %c0_619 = arith.constant 0 : index
    %c2_620 = arith.constant 2 : index
    %c0_621 = arith.constant 0 : index
    %c0_622 = arith.constant 0 : index
    %783 = vector.load %arg5[%c0_619, %c2_620, %c0_621, %c0_622] : memref<2x3x1x32xf32, #tpu.memory_space<vmem>>, vector<1x1x1x32xf32>
    %784 = vector.shape_cast %783 : vector<1x1x1x32xf32> to vector<1x32xf32>
    %785 = vector.broadcast %784 : vector<1x32xf32> to vector<2x32xf32>
    %786 = arith.addf %782, %785 : vector<2x32xf32>
    %787 = arith.addf %758, %772 : vector<2x32xf32>
    %788 = arith.negf %787 : vector<2x32xf32>
    %789 = math.exp %788 : vector<2x32xf32>
    %cst_623 = arith.constant 1.000000e+00 : f32
    %790 = vector.broadcast %cst_623 : f32 to vector<2x32xf32>
    %791 = arith.addf %790, %789 : vector<2x32xf32>
    %792 = arith.divf %790, %791 : vector<2x32xf32>
    %793 = arith.addf %761, %779 : vector<2x32xf32>
    %794 = arith.negf %793 : vector<2x32xf32>
    %795 = math.exp %794 : vector<2x32xf32>
    %cst_624 = arith.constant 1.000000e+00 : f32
    %796 = vector.broadcast %cst_624 : f32 to vector<2x32xf32>
    %797 = arith.addf %796, %795 : vector<2x32xf32>
    %798 = arith.divf %796, %797 : vector<2x32xf32>
    %799 = arith.mulf %792, %786 : vector<2x32xf32>
    %800 = arith.addf %764, %799 : vector<2x32xf32>
    %801 = math.tanh %800 : vector<2x32xf32>
    %cst_625 = arith.constant 1.000000e+00 : f32
    %802 = vector.broadcast %cst_625 : f32 to vector<2x32xf32>
    %803 = arith.subf %802, %798 : vector<2x32xf32>
    %804 = arith.mulf %803, %801 : vector<2x32xf32>
    %805 = arith.mulf %798, %691 : vector<2x32xf32>
    %806 = arith.addf %804, %805 : vector<2x32xf32>
    %807 = arith.index_cast %c6_i32 : i32 to index
    %c0_626 = arith.constant 0 : index
    %c0_627 = arith.constant 0 : index
    %808 = vector.load %arg6[%807, %c0_626, %c0_627] : memref<8x2x64xf32, #tpu.memory_space<vmem>>, vector<1x2x32xf32>
    %809 = vector.shape_cast %808 : vector<1x2x32xf32> to vector<2x32xf32>
    %810 = vector.shape_cast %806 : vector<2x32xf32> to vector<1x2x32xf32>
    tpu.vector_store %arg6[%807, %c0_626, %c0_627], %810 {strides = array<i32>} : memref<8x2x64xf32, #tpu.memory_space<vmem>>, vector<1x2x32xf32>,
    %c7_i32_628 = arith.constant 7 : i32
    %811 = arith.subi %c7_i32_628, %c6_i32 : i32
    %c2_i32_629 = arith.constant 2 : i32
    %812 = arith.muli %811, %c2_i32_629 : i32
    %813 = tpu.assume_multiple %812, 2 : i32
    %c1_630 = arith.constant 1 : index
    %c0_631 = arith.constant 0 : index
    %814 = arith.index_cast %813 : i32 to index
    %c0_632 = arith.constant 0 : index
    %815 = vector.load %arg7[%c1_630, %c0_631, %814, %c0_632] : memref<2x3x16x32xf32, #tpu.memory_space<vmem>>, vector<1x1x2x32xf32>
    %816 = vector.shape_cast %815 : vector<1x1x2x32xf32> to vector<2x32xf32>
    %c1_633 = arith.constant 1 : index
    %c1_634 = arith.constant 1 : index
    %817 = arith.index_cast %813 : i32 to index
    %c0_635 = arith.constant 0 : index
    %818 = vector.load %arg7[%c1_633, %c1_634, %817, %c0_635] : memref<2x3x16x32xf32, #tpu.memory_space<vmem>>, vector<1x1x2x32xf32>
    %819 = vector.shape_cast %818 : vector<1x1x2x32xf32> to vector<2x32xf32>
    %c1_636 = arith.constant 1 : index
    %c2_637 = arith.constant 2 : index
    %820 = arith.index_cast %813 : i32 to index
    %c0_638 = arith.constant 0 : index
    %821 = vector.load %arg7[%c1_636, %c2_637, %820, %c0_638] : memref<2x3x16x32xf32, #tpu.memory_space<vmem>>, vector<1x1x2x32xf32>
    %822 = vector.shape_cast %821 : vector<1x1x2x32xf32> to vector<2x32xf32>
    %823 = arith.truncf %749 : vector<2x32xf32> to vector<2x32xbf16>
    %c1_639 = arith.constant 1 : index
    %c0_640 = arith.constant 0 : index
    %c0_641 = arith.constant 0 : index
    %c0_642 = arith.constant 0 : index
    %824 = vector.load %arg3[%c1_639, %c0_640, %c0_641, %c0_642] : memref<2x3x32x32xbf16, #tpu.memory_space<vmem>>, vector<1x1x32x32xbf16>
    %825 = vector.shape_cast %824 : vector<1x1x32x32xbf16> to vector<32x32xbf16>
    %cst_643 = arith.constant dense<0.000000e+00> : vector<2x32xf32>
    %826 = tpu.matmul %823, %825, %cst_643 {dimension_numbers = #tpu.dot_dimension_numbers<[1], [0], [0], [1], [0, 0, 1, 1], [], []>} : vector<2x32xbf16>, vector<32x32xbf16>, vector<2x32xf32> -> vector<2x32xf32>
    %c1_644 = arith.constant 1 : index
    %c0_645 = arith.constant 0 : index
    %c0_646 = arith.constant 0 : index
    %c0_647 = arith.constant 0 : index
    %827 = vector.load %arg5[%c1_644, %c0_645, %c0_646, %c0_647] : memref<2x3x1x32xf32, #tpu.memory_space<vmem>>, vector<1x1x1x32xf32>
    %828 = vector.shape_cast %827 : vector<1x1x1x32xf32> to vector<1x32xf32>
    %829 = vector.broadcast %828 : vector<1x32xf32> to vector<2x32xf32>
    %830 = arith.addf %826, %829 : vector<2x32xf32>
    %c1_648 = arith.constant 1 : index
    %c1_649 = arith.constant 1 : index
    %c0_650 = arith.constant 0 : index
    %c0_651 = arith.constant 0 : index
    %831 = vector.load %arg3[%c1_648, %c1_649, %c0_650, %c0_651] : memref<2x3x32x32xbf16, #tpu.memory_space<vmem>>, vector<1x1x32x32xbf16>
    %832 = vector.shape_cast %831 : vector<1x1x32x32xbf16> to vector<32x32xbf16>
    %cst_652 = arith.constant dense<0.000000e+00> : vector<2x32xf32>
    %833 = tpu.matmul %823, %832, %cst_652 {dimension_numbers = #tpu.dot_dimension_numbers<[1], [0], [0], [1], [0, 0, 1, 1], [], []>} : vector<2x32xbf16>, vector<32x32xbf16>, vector<2x32xf32> -> vector<2x32xf32>
    %c1_653 = arith.constant 1 : index
    %c1_654 = arith.constant 1 : index
    %c0_655 = arith.constant 0 : index
    %c0_656 = arith.constant 0 : index
    %834 = vector.load %arg5[%c1_653, %c1_654, %c0_655, %c0_656] : memref<2x3x1x32xf32, #tpu.memory_space<vmem>>, vector<1x1x1x32xf32>
    %835 = vector.shape_cast %834 : vector<1x1x1x32xf32> to vector<1x32xf32>
    %836 = vector.broadcast %835 : vector<1x32xf32> to vector<2x32xf32>
    %837 = arith.addf %833, %836 : vector<2x32xf32>
    %c1_657 = arith.constant 1 : index
    %c2_658 = arith.constant 2 : index
    %c0_659 = arith.constant 0 : index
    %c0_660 = arith.constant 0 : index
    %838 = vector.load %arg3[%c1_657, %c2_658, %c0_659, %c0_660] : memref<2x3x32x32xbf16, #tpu.memory_space<vmem>>, vector<1x1x32x32xbf16>
    %839 = vector.shape_cast %838 : vector<1x1x32x32xbf16> to vector<32x32xbf16>
    %cst_661 = arith.constant dense<0.000000e+00> : vector<2x32xf32>
    %840 = tpu.matmul %823, %839, %cst_661 {dimension_numbers = #tpu.dot_dimension_numbers<[1], [0], [0], [1], [0, 0, 1, 1], [], []>} : vector<2x32xbf16>, vector<32x32xbf16>, vector<2x32xf32> -> vector<2x32xf32>
    %c1_662 = arith.constant 1 : index
    %c2_663 = arith.constant 2 : index
    %c0_664 = arith.constant 0 : index
    %c0_665 = arith.constant 0 : index
    %841 = vector.load %arg5[%c1_662, %c2_663, %c0_664, %c0_665] : memref<2x3x1x32xf32, #tpu.memory_space<vmem>>, vector<1x1x1x32xf32>
    %842 = vector.shape_cast %841 : vector<1x1x1x32xf32> to vector<1x32xf32>
    %843 = vector.broadcast %842 : vector<1x32xf32> to vector<2x32xf32>
    %844 = arith.addf %840, %843 : vector<2x32xf32>
    %845 = arith.addf %816, %830 : vector<2x32xf32>
    %846 = arith.negf %845 : vector<2x32xf32>
    %847 = math.exp %846 : vector<2x32xf32>
    %cst_666 = arith.constant 1.000000e+00 : f32
    %848 = vector.broadcast %cst_666 : f32 to vector<2x32xf32>
    %849 = arith.addf %848, %847 : vector<2x32xf32>
    %850 = arith.divf %848, %849 : vector<2x32xf32>
    %851 = arith.addf %819, %837 : vector<2x32xf32>
    %852 = arith.negf %851 : vector<2x32xf32>
    %853 = math.exp %852 : vector<2x32xf32>
    %cst_667 = arith.constant 1.000000e+00 : f32
    %854 = vector.broadcast %cst_667 : f32 to vector<2x32xf32>
    %855 = arith.addf %854, %853 : vector<2x32xf32>
    %856 = arith.divf %854, %855 : vector<2x32xf32>
    %857 = arith.mulf %850, %844 : vector<2x32xf32>
    %858 = arith.addf %822, %857 : vector<2x32xf32>
    %859 = math.tanh %858 : vector<2x32xf32>
    %cst_668 = arith.constant 1.000000e+00 : f32
    %860 = vector.broadcast %cst_668 : f32 to vector<2x32xf32>
    %861 = arith.subf %860, %856 : vector<2x32xf32>
    %862 = arith.mulf %861, %859 : vector<2x32xf32>
    %863 = arith.mulf %856, %749 : vector<2x32xf32>
    %864 = arith.addf %862, %863 : vector<2x32xf32>
    %865 = arith.index_cast %811 : i32 to index
    %c0_669 = arith.constant 0 : index
    %c32_670 = arith.constant 32 : index
    %866 = vector.load %arg6[%865, %c0_669, %c32_670] : memref<8x2x64xf32, #tpu.memory_space<vmem>>, vector<1x2x32xf32>
    %867 = vector.shape_cast %866 : vector<1x2x32xf32> to vector<2x32xf32>
    %868 = vector.shape_cast %864 : vector<2x32xf32> to vector<1x2x32xf32>
    tpu.vector_store %arg6[%865, %c0_669, %c32_670], %868 {strides = array<i32>} : memref<8x2x64xf32, #tpu.memory_space<vmem>>, vector<1x2x32xf32>,
    %c7_i32_671 = arith.constant 7 : i32
    %c2_i32_672 = arith.constant 2 : i32
    %869 = arith.muli %c7_i32_671, %c2_i32_672 : i32
    %870 = tpu.assume_multiple %869, 2 : i32
    %c0_673 = arith.constant 0 : index
    %c0_674 = arith.constant 0 : index
    %871 = arith.index_cast %870 : i32 to index
    %c0_675 = arith.constant 0 : index
    %872 = vector.load %arg7[%c0_673, %c0_674, %871, %c0_675] : memref<2x3x16x32xf32, #tpu.memory_space<vmem>>, vector<1x1x2x32xf32>
    %873 = vector.shape_cast %872 : vector<1x1x2x32xf32> to vector<2x32xf32>
    %c0_676 = arith.constant 0 : index
    %c1_677 = arith.constant 1 : index
    %874 = arith.index_cast %870 : i32 to index
    %c0_678 = arith.constant 0 : index
    %875 = vector.load %arg7[%c0_676, %c1_677, %874, %c0_678] : memref<2x3x16x32xf32, #tpu.memory_space<vmem>>, vector<1x1x2x32xf32>
    %876 = vector.shape_cast %875 : vector<1x1x2x32xf32> to vector<2x32xf32>
    %c0_679 = arith.constant 0 : index
    %c2_680 = arith.constant 2 : index
    %877 = arith.index_cast %870 : i32 to index
    %c0_681 = arith.constant 0 : index
    %878 = vector.load %arg7[%c0_679, %c2_680, %877, %c0_681] : memref<2x3x16x32xf32, #tpu.memory_space<vmem>>, vector<1x1x2x32xf32>
    %879 = vector.shape_cast %878 : vector<1x1x2x32xf32> to vector<2x32xf32>
    %880 = arith.truncf %806 : vector<2x32xf32> to vector<2x32xbf16>
    %c0_682 = arith.constant 0 : index
    %c0_683 = arith.constant 0 : index
    %c0_684 = arith.constant 0 : index
    %c0_685 = arith.constant 0 : index
    %881 = vector.load %arg3[%c0_682, %c0_683, %c0_684, %c0_685] : memref<2x3x32x32xbf16, #tpu.memory_space<vmem>>, vector<1x1x32x32xbf16>
    %882 = vector.shape_cast %881 : vector<1x1x32x32xbf16> to vector<32x32xbf16>
    %cst_686 = arith.constant dense<0.000000e+00> : vector<2x32xf32>
    %883 = tpu.matmul %880, %882, %cst_686 {dimension_numbers = #tpu.dot_dimension_numbers<[1], [0], [0], [1], [0, 0, 1, 1], [], []>} : vector<2x32xbf16>, vector<32x32xbf16>, vector<2x32xf32> -> vector<2x32xf32>
    %c0_687 = arith.constant 0 : index
    %c0_688 = arith.constant 0 : index
    %c0_689 = arith.constant 0 : index
    %c0_690 = arith.constant 0 : index
    %884 = vector.load %arg5[%c0_687, %c0_688, %c0_689, %c0_690] : memref<2x3x1x32xf32, #tpu.memory_space<vmem>>, vector<1x1x1x32xf32>
    %885 = vector.shape_cast %884 : vector<1x1x1x32xf32> to vector<1x32xf32>
    %886 = vector.broadcast %885 : vector<1x32xf32> to vector<2x32xf32>
    %887 = arith.addf %883, %886 : vector<2x32xf32>
    %c0_691 = arith.constant 0 : index
    %c1_692 = arith.constant 1 : index
    %c0_693 = arith.constant 0 : index
    %c0_694 = arith.constant 0 : index
    %888 = vector.load %arg3[%c0_691, %c1_692, %c0_693, %c0_694] : memref<2x3x32x32xbf16, #tpu.memory_space<vmem>>, vector<1x1x32x32xbf16>
    %889 = vector.shape_cast %888 : vector<1x1x32x32xbf16> to vector<32x32xbf16>
    %cst_695 = arith.constant dense<0.000000e+00> : vector<2x32xf32>
    %890 = tpu.matmul %880, %889, %cst_695 {dimension_numbers = #tpu.dot_dimension_numbers<[1], [0], [0], [1], [0, 0, 1, 1], [], []>} : vector<2x32xbf16>, vector<32x32xbf16>, vector<2x32xf32> -> vector<2x32xf32>
    %c0_696 = arith.constant 0 : index
    %c1_697 = arith.constant 1 : index
    %c0_698 = arith.constant 0 : index
    %c0_699 = arith.constant 0 : index
    %891 = vector.load %arg5[%c0_696, %c1_697, %c0_698, %c0_699] : memref<2x3x1x32xf32, #tpu.memory_space<vmem>>, vector<1x1x1x32xf32>
    %892 = vector.shape_cast %891 : vector<1x1x1x32xf32> to vector<1x32xf32>
    %893 = vector.broadcast %892 : vector<1x32xf32> to vector<2x32xf32>
    %894 = arith.addf %890, %893 : vector<2x32xf32>
    %c0_700 = arith.constant 0 : index
    %c2_701 = arith.constant 2 : index
    %c0_702 = arith.constant 0 : index
    %c0_703 = arith.constant 0 : index
    %895 = vector.load %arg3[%c0_700, %c2_701, %c0_702, %c0_703] : memref<2x3x32x32xbf16, #tpu.memory_space<vmem>>, vector<1x1x32x32xbf16>
    %896 = vector.shape_cast %895 : vector<1x1x32x32xbf16> to vector<32x32xbf16>
    %cst_704 = arith.constant dense<0.000000e+00> : vector<2x32xf32>
    %897 = tpu.matmul %880, %896, %cst_704 {dimension_numbers = #tpu.dot_dimension_numbers<[1], [0], [0], [1], [0, 0, 1, 1], [], []>} : vector<2x32xbf16>, vector<32x32xbf16>, vector<2x32xf32> -> vector<2x32xf32>
    %c0_705 = arith.constant 0 : index
    %c2_706 = arith.constant 2 : index
    %c0_707 = arith.constant 0 : index
    %c0_708 = arith.constant 0 : index
    %898 = vector.load %arg5[%c0_705, %c2_706, %c0_707, %c0_708] : memref<2x3x1x32xf32, #tpu.memory_space<vmem>>, vector<1x1x1x32xf32>
    %899 = vector.shape_cast %898 : vector<1x1x1x32xf32> to vector<1x32xf32>
    %900 = vector.broadcast %899 : vector<1x32xf32> to vector<2x32xf32>
    %901 = arith.addf %897, %900 : vector<2x32xf32>
    %902 = arith.addf %873, %887 : vector<2x32xf32>
    %903 = arith.negf %902 : vector<2x32xf32>
    %904 = math.exp %903 : vector<2x32xf32>
    %cst_709 = arith.constant 1.000000e+00 : f32
    %905 = vector.broadcast %cst_709 : f32 to vector<2x32xf32>
    %906 = arith.addf %905, %904 : vector<2x32xf32>
    %907 = arith.divf %905, %906 : vector<2x32xf32>
    %908 = arith.addf %876, %894 : vector<2x32xf32>
    %909 = arith.negf %908 : vector<2x32xf32>
    %910 = math.exp %909 : vector<2x32xf32>
    %cst_710 = arith.constant 1.000000e+00 : f32
    %911 = vector.broadcast %cst_710 : f32 to vector<2x32xf32>
    %912 = arith.addf %911, %910 : vector<2x32xf32>
    %913 = arith.divf %911, %912 : vector<2x32xf32>
    %914 = arith.mulf %907, %901 : vector<2x32xf32>
    %915 = arith.addf %879, %914 : vector<2x32xf32>
    %916 = math.tanh %915 : vector<2x32xf32>
    %cst_711 = arith.constant 1.000000e+00 : f32
    %917 = vector.broadcast %cst_711 : f32 to vector<2x32xf32>
    %918 = arith.subf %917, %913 : vector<2x32xf32>
    %919 = arith.mulf %918, %916 : vector<2x32xf32>
    %920 = arith.mulf %913, %806 : vector<2x32xf32>
    %921 = arith.addf %919, %920 : vector<2x32xf32>
    %922 = arith.index_cast %c7_i32_671 : i32 to index
    %c0_712 = arith.constant 0 : index
    %c0_713 = arith.constant 0 : index
    %923 = vector.load %arg6[%922, %c0_712, %c0_713] : memref<8x2x64xf32, #tpu.memory_space<vmem>>, vector<1x2x32xf32>
    %924 = vector.shape_cast %923 : vector<1x2x32xf32> to vector<2x32xf32>
    %925 = vector.shape_cast %921 : vector<2x32xf32> to vector<1x2x32xf32>
    tpu.vector_store %arg6[%922, %c0_712, %c0_713], %925 {strides = array<i32>} : memref<8x2x64xf32, #tpu.memory_space<vmem>>, vector<1x2x32xf32>,
    %c7_i32_714 = arith.constant 7 : i32
    %926 = arith.subi %c7_i32_714, %c7_i32_671 : i32
    %c2_i32_715 = arith.constant 2 : i32
    %927 = arith.muli %926, %c2_i32_715 : i32
    %928 = tpu.assume_multiple %927, 2 : i32
    %c1_716 = arith.constant 1 : index
    %c0_717 = arith.constant 0 : index
    %929 = arith.index_cast %928 : i32 to index
    %c0_718 = arith.constant 0 : index
    %930 = vector.load %arg7[%c1_716, %c0_717, %929, %c0_718] : memref<2x3x16x32xf32, #tpu.memory_space<vmem>>, vector<1x1x2x32xf32>
    %931 = vector.shape_cast %930 : vector<1x1x2x32xf32> to vector<2x32xf32>
    %c1_719 = arith.constant 1 : index
    %c1_720 = arith.constant 1 : index
    %932 = arith.index_cast %928 : i32 to index
    %c0_721 = arith.constant 0 : index
    %933 = vector.load %arg7[%c1_719, %c1_720, %932, %c0_721] : memref<2x3x16x32xf32, #tpu.memory_space<vmem>>, vector<1x1x2x32xf32>
    %934 = vector.shape_cast %933 : vector<1x1x2x32xf32> to vector<2x32xf32>
    %c1_722 = arith.constant 1 : index
    %c2_723 = arith.constant 2 : index
    %935 = arith.index_cast %928 : i32 to index
    %c0_724 = arith.constant 0 : index
    %936 = vector.load %arg7[%c1_722, %c2_723, %935, %c0_724] : memref<2x3x16x32xf32, #tpu.memory_space<vmem>>, vector<1x1x2x32xf32>
    %937 = vector.shape_cast %936 : vector<1x1x2x32xf32> to vector<2x32xf32>
    %938 = arith.truncf %864 : vector<2x32xf32> to vector<2x32xbf16>
    %c1_725 = arith.constant 1 : index
    %c0_726 = arith.constant 0 : index
    %c0_727 = arith.constant 0 : index
    %c0_728 = arith.constant 0 : index
    %939 = vector.load %arg3[%c1_725, %c0_726, %c0_727, %c0_728] : memref<2x3x32x32xbf16, #tpu.memory_space<vmem>>, vector<1x1x32x32xbf16>
    %940 = vector.shape_cast %939 : vector<1x1x32x32xbf16> to vector<32x32xbf16>
    %cst_729 = arith.constant dense<0.000000e+00> : vector<2x32xf32>
    %941 = tpu.matmul %938, %940, %cst_729 {dimension_numbers = #tpu.dot_dimension_numbers<[1], [0], [0], [1], [0, 0, 1, 1], [], []>} : vector<2x32xbf16>, vector<32x32xbf16>, vector<2x32xf32> -> vector<2x32xf32>
    %c1_730 = arith.constant 1 : index
    %c0_731 = arith.constant 0 : index
    %c0_732 = arith.constant 0 : index
    %c0_733 = arith.constant 0 : index
    %942 = vector.load %arg5[%c1_730, %c0_731, %c0_732, %c0_733] : memref<2x3x1x32xf32, #tpu.memory_space<vmem>>, vector<1x1x1x32xf32>
    %943 = vector.shape_cast %942 : vector<1x1x1x32xf32> to vector<1x32xf32>
    %944 = vector.broadcast %943 : vector<1x32xf32> to vector<2x32xf32>
    %945 = arith.addf %941, %944 : vector<2x32xf32>
    %c1_734 = arith.constant 1 : index
    %c1_735 = arith.constant 1 : index
    %c0_736 = arith.constant 0 : index
    %c0_737 = arith.constant 0 : index
    %946 = vector.load %arg3[%c1_734, %c1_735, %c0_736, %c0_737] : memref<2x3x32x32xbf16, #tpu.memory_space<vmem>>, vector<1x1x32x32xbf16>
    %947 = vector.shape_cast %946 : vector<1x1x32x32xbf16> to vector<32x32xbf16>
    %cst_738 = arith.constant dense<0.000000e+00> : vector<2x32xf32>
    %948 = tpu.matmul %938, %947, %cst_738 {dimension_numbers = #tpu.dot_dimension_numbers<[1], [0], [0], [1], [0, 0, 1, 1], [], []>} : vector<2x32xbf16>, vector<32x32xbf16>, vector<2x32xf32> -> vector<2x32xf32>
    %c1_739 = arith.constant 1 : index
    %c1_740 = arith.constant 1 : index
    %c0_741 = arith.constant 0 : index
    %c0_742 = arith.constant 0 : index
    %949 = vector.load %arg5[%c1_739, %c1_740, %c0_741, %c0_742] : memref<2x3x1x32xf32, #tpu.memory_space<vmem>>, vector<1x1x1x32xf32>
    %950 = vector.shape_cast %949 : vector<1x1x1x32xf32> to vector<1x32xf32>
    %951 = vector.broadcast %950 : vector<1x32xf32> to vector<2x32xf32>
    %952 = arith.addf %948, %951 : vector<2x32xf32>
    %c1_743 = arith.constant 1 : index
    %c2_744 = arith.constant 2 : index
    %c0_745 = arith.constant 0 : index
    %c0_746 = arith.constant 0 : index
    %953 = vector.load %arg3[%c1_743, %c2_744, %c0_745, %c0_746] : memref<2x3x32x32xbf16, #tpu.memory_space<vmem>>, vector<1x1x32x32xbf16>
    %954 = vector.shape_cast %953 : vector<1x1x32x32xbf16> to vector<32x32xbf16>
    %cst_747 = arith.constant dense<0.000000e+00> : vector<2x32xf32>
    %955 = tpu.matmul %938, %954, %cst_747 {dimension_numbers = #tpu.dot_dimension_numbers<[1], [0], [0], [1], [0, 0, 1, 1], [], []>} : vector<2x32xbf16>, vector<32x32xbf16>, vector<2x32xf32> -> vector<2x32xf32>
    %c1_748 = arith.constant 1 : index
    %c2_749 = arith.constant 2 : index
    %c0_750 = arith.constant 0 : index
    %c0_751 = arith.constant 0 : index
    %956 = vector.load %arg5[%c1_748, %c2_749, %c0_750, %c0_751] : memref<2x3x1x32xf32, #tpu.memory_space<vmem>>, vector<1x1x1x32xf32>
    %957 = vector.shape_cast %956 : vector<1x1x1x32xf32> to vector<1x32xf32>
    %958 = vector.broadcast %957 : vector<1x32xf32> to vector<2x32xf32>
    %959 = arith.addf %955, %958 : vector<2x32xf32>
    %960 = arith.addf %931, %945 : vector<2x32xf32>
    %961 = arith.negf %960 : vector<2x32xf32>
    %962 = math.exp %961 : vector<2x32xf32>
    %cst_752 = arith.constant 1.000000e+00 : f32
    %963 = vector.broadcast %cst_752 : f32 to vector<2x32xf32>
    %964 = arith.addf %963, %962 : vector<2x32xf32>
    %965 = arith.divf %963, %964 : vector<2x32xf32>
    %966 = arith.addf %934, %952 : vector<2x32xf32>
    %967 = arith.negf %966 : vector<2x32xf32>
    %968 = math.exp %967 : vector<2x32xf32>
    %cst_753 = arith.constant 1.000000e+00 : f32
    %969 = vector.broadcast %cst_753 : f32 to vector<2x32xf32>
    %970 = arith.addf %969, %968 : vector<2x32xf32>
    %971 = arith.divf %969, %970 : vector<2x32xf32>
    %972 = arith.mulf %965, %959 : vector<2x32xf32>
    %973 = arith.addf %937, %972 : vector<2x32xf32>
    %974 = math.tanh %973 : vector<2x32xf32>
    %cst_754 = arith.constant 1.000000e+00 : f32
    %975 = vector.broadcast %cst_754 : f32 to vector<2x32xf32>
    %976 = arith.subf %975, %971 : vector<2x32xf32>
    %977 = arith.mulf %976, %974 : vector<2x32xf32>
    %978 = arith.mulf %971, %864 : vector<2x32xf32>
    %979 = arith.addf %977, %978 : vector<2x32xf32>
    %980 = arith.index_cast %926 : i32 to index
    %c0_755 = arith.constant 0 : index
    %c32_756 = arith.constant 32 : index
    %981 = vector.load %arg6[%980, %c0_755, %c32_756] : memref<8x2x64xf32, #tpu.memory_space<vmem>>, vector<1x2x32xf32>
    %982 = vector.shape_cast %981 : vector<1x2x32xf32> to vector<2x32xf32>
    %983 = vector.shape_cast %979 : vector<2x32xf32> to vector<1x2x32xf32>
    tpu.vector_store %arg6[%980, %c0_755, %c32_756], %983 {strides = array<i32>} : memref<8x2x64xf32, #tpu.memory_space<vmem>>, vector<1x2x32xf32>,
    %c8_i32 = arith.constant 8 : i32
    return
  }
  func.func @transform_0(%arg0: i32) -> (i32, i32) {
    %c0_i32 = arith.constant 0 : i32
    %c0_i32_0 = arith.constant 0 : i32
    %c0_i32_1 = arith.constant 0 : i32
    return %c0_i32, %c0_i32_0 : i32, i32
  }
  func.func @transform_1(%arg0: i32) -> (i32, i32, i32, i32) {
    %c0_i32 = arith.constant 0 : i32
    %c0_i32_0 = arith.constant 0 : i32
    %c0_i32_1 = arith.constant 0 : i32
    %c0_i32_2 = arith.constant 0 : i32
    %c0_i32_3 = arith.constant 0 : i32
    return %c0_i32, %c0_i32_0, %c0_i32_1, %c0_i32_2 : i32, i32, i32, i32
  }
  func.func @transform_2(%arg0: i32) -> (i32, i32, i32, i32) {
    %c0_i32 = arith.constant 0 : i32
    %c0_i32_0 = arith.constant 0 : i32
    %c0_i32_1 = arith.constant 0 : i32
    %c0_i32_2 = arith.constant 0 : i32
    %c0_i32_3 = arith.constant 0 : i32
    return %c0_i32, %c0_i32_0, %c0_i32_1, %c0_i32_2 : i32, i32, i32, i32
  }
  func.func @transform_3(%arg0: i32) -> (i32, i32, i32, i32) {
    %c0_i32 = arith.constant 0 : i32
    %c0_i32_0 = arith.constant 0 : i32
    %c0_i32_1 = arith.constant 0 : i32
    %c0_i32_2 = arith.constant 0 : i32
    %c0_i32_3 = arith.constant 0 : i32
    return %c0_i32, %c0_i32_0, %c0_i32_1, %c0_i32_2 : i32, i32, i32, i32
  }
  func.func @transform_4(%arg0: i32) -> (i32, i32, i32, i32) {
    %c0_i32 = arith.constant 0 : i32
    %c0_i32_0 = arith.constant 0 : i32
    %c0_i32_1 = arith.constant 0 : i32
    %c0_i32_2 = arith.constant 0 : i32
    %c0_i32_3 = arith.constant 0 : i32
    return %c0_i32, %c0_i32_0, %c0_i32_1, %c0_i32_2 : i32, i32, i32, i32
  }
  func.func @transform_5(%arg0: i32) -> (i32, i32, i32) {
    %c0_i32 = arith.constant 0 : i32
    %c0_i32_0 = arith.constant 0 : i32
    %c0_i32_1 = arith.constant 0 : i32
    %c0_i32_2 = arith.constant 0 : i32
    return %c0_i32, %c0_i32_0, %c0_i32_1 : i32, i32, i32
  }
}

</mosaic_0001>

<bundles_post_ra>
// kernel: salary_rnn_forward.3
= control target key start
LH: loop header
LB: loop body
LE: loop exit
PB: predicated region body
PF: predicated region fallthrough
CT: control target
= control target key end

     0   :  { %v4447_v1 = vmov 0.0   ;;  %vm4448_vm0 = vmmov 0   ;;  %vm70_vm1 = vcmask 523264   ;;  %s5328_s0 = inlined_call_operand.vmem [shape: f32[16,64], index: 0, kind: input, shape index: {}]   ;;  %s5329_s1 = inlined_call_operand.vmem [shape: bf16[2,3,64,32], index: 1, kind: input, shape index: {}]   ;;  %s5330_s2 = inlined_call_operand.vmem [shape: bf16[2,3,32,32], index: 2, kind: input, shape index: {}]   ;;  %s5331_s3 = inlined_call_operand.vmem [shape: f32[2,3,1,32], index: 3, kind: input, shape index: {}]   ;;  %s5332_s4 = inlined_call_operand.vmem [shape: f32[2,3,1,32], index: 4, kind: input, shape index: {}]   ;;  %s5333_s5 = inlined_call_operand.vmem [shape: bf16[2,32,4], index: 5, kind: input, shape index: {}]   ;;  %s5334_s6 = inlined_call_operand.vmem [shape: f32[1,4], index: 6, kind: input, shape index: {}]   ;;  %s5335_s7 = inlined_call_operand.hbm [shape: f32[2,4], index: 7, kind: output, shape index: {}]  }
   0x1   :  { %v4205_v0 = vld [vmem:[%s5329_s1] sm:$0xff]   ;;  %3729 = vmatprep.subr.bf16.mxu0 %v4447_v1  ;;  %3741 = vmatprep.subr.bf16.mxu1 %v4447_v1  ;;  %v4207_v3 = vld [vmem:[%s5329_s1 + $0x8] sm:$0xff]   ;;  %v4209_v5 = vld [vmem:[%s5329_s1 + $0x10] sm:$0xff]  }
   0x2   :  { %v4206_v2 = vld [vmem:[%s5329_s1 + $0x20] sm:$0xff]   ;;  %3730 = vmatpush3.bf16.msra.mxu0 %v4205_v0  ;;  %3737 = vmatprep.mubr.msk.bf16.mxu0 %vm4448_vm0, %v4447_v1  ;;  %v4208_v4 = vld [vmem:[%s5329_s1 + $0x28] sm:$0xff]   ;;  %v4210_v6 = vld [vmem:[%s5329_s1 + $0x30] sm:$0xff]  }
   0x3   :  { %3742 = vmatpush3.bf16.msra.mxu1 %v4206_v2  ;;  %3731 = vmatprep.subr.bf16.mxu0 %v4447_v1  ;;  %v4211_v7 = vld [vmem:[%s5329_s1 + $0x18] sm:$0xff]   ;;  %v28_v8 = vld [vmem:[%s5328_s0] sm:$0xff]  ;;  %v29_v9 = vld [vmem:[%s5328_s0 + $0x8] sm:$0xff] }
   0x4   :  { %3743 = vmatprep.subr.bf16.mxu1 %v4447_v1  ;;  %3749 = vmatprep.mubr.msk.bf16.mxu1 %vm4448_vm0, %v4447_v1  ;;  %v4212_v10 = vld [vmem:[%s5329_s1 + $0x38] sm:$0xff]   ;;  %v4533_v11 = vpack.c.bf16 %v29_v9, %v28_v8  ;;  %v4213_v12 = vld [vmem:[%s5329_s1 + $0x40] sm:$0xff]   ;;  %v4215_v14 = vld [vmem:[%s5329_s1 + $0x48] sm:$0xff]  }
   0x5   :  { %v4214_v13 = vld [vmem:[%s5329_s1 + $0x60] sm:$0xff]   ;;  %v4216_v15 = vld [vmem:[%s5329_s1 + $0x68] sm:$0xff]   ;;  %v4217_v16 = vld [vmem:[%s5329_s1 + $0x50] sm:$0xff]  }
   0x6   :  { %3732 = vmatpush3.bf16.msra.mxu0 %v4207_v3  ;;  %v4218_v17 = vld [vmem:[%s5329_s1 + $0x70] sm:$0xff]   ;;  %v4219_v18 = vld [vmem:[%s5329_s1 + $0x58] sm:$0xff]   ;;  %v4221_v20 = vld [vmem:[%s5329_s1 + $0x80] sm:$0xff]  }
   0x7   :  { %3744 = vmatpush3.bf16.msra.mxu1 %v4208_v4  ;;  %3733 = vmatprep.subr.bf16.mxu0 %v4447_v1  ;;  %v4220_v19 = vld [vmem:[%s5329_s1 + $0x78] sm:$0xff]   ;;  %v4222_v21 = vld [vmem:[%s5329_s1 + $0xa0] sm:$0xff]   ;;  %v4223_v22 = vld [vmem:[%s5329_s1 + $0x88] sm:$0xff]  }
   0x8   :  { %3745 = vmatprep.subr.bf16.mxu1 %v4447_v1  ;;  %v4224_v23 = vld [vmem:[%s5329_s1 + $0xa8] sm:$0xff]   ;;  %v4225_v24 = vld [vmem:[%s5329_s1 + $0x90] sm:$0xff]  }
   0x9   :  { %v4226_v25 = vld [vmem:[%s5329_s1 + $0xb0] sm:$0xff]  }
   0xa   :  { %3734 = vmatpush3.bf16.msra.mxu0 %v4209_v5 }
   0xb   :  { %3746 = vmatpush3.bf16.msra.mxu1 %v4210_v6  ;;  %3735 = vmatprep.subr.bf16.mxu0 %v4447_v1 }
   0xc   :  { %3747 = vmatprep.subr.bf16.mxu1 %v4447_v1 }
   0xe   :  { %3736 = vmatpush3.bf16.msra.mxu0 %v4211_v7 }
   0xf   :  { %3748 = vmatpush3.bf16.msra.mxu1 %v4212_v10  ;;  %3753 = vmatprep.subr.bf16.mxu0 %v4447_v1 }
  0x10   :  { %3765 = vmatprep.subr.bf16.mxu1 %v4447_v1 }
  0x11   :  { %3738 = vmatmul.mubr.msk.bf16.vlgmr.msra.gmra.mrb[0].mxu0 %vm70_vm1, %v4533_v11 }
  0x12   :  { %3750 = vmatmul.mubr.msk.bf16.vlgmr.msra.gmra.mrb[0].mxu1 %vm70_vm1, %v4533_v11  ;;  %3754 = vmatpush3.bf16.msra.mxu0 %v4213_v12 }
  0x13   :  { %3766 = vmatpush3.bf16.msra.mxu1 %v4214_v13  ;;  %3755 = vmatprep.subr.bf16.mxu0 %v4447_v1 }
  0x14   :  { %3767 = vmatprep.subr.bf16.mxu1 %v4447_v1  ;;  %3761 = vmatprep.mubr.msk.bf16.mxu0 %vm4448_vm0, %v4447_v1 }
  0x15   :  { %3773 = vmatprep.mubr.msk.bf16.mxu1 %vm4448_vm0, %v4447_v1 }
  0x16   :  { %3756 = vmatpush3.bf16.msra.mxu0 %v4215_v14 }
  0x17   :  { %3768 = vmatpush3.bf16.msra.mxu1 %v4216_v15  ;;  %3757 = vmatprep.subr.bf16.mxu0 %v4447_v1 }
  0x18   :  { %3769 = vmatprep.subr.bf16.mxu1 %v4447_v1 }
  0x1a   :  { %3758 = vmatpush3.bf16.msra.mxu0 %v4217_v16 }
  0x1b   :  { %3770 = vmatpush3.bf16.msra.mxu1 %v4218_v17  ;;  %3759 = vmatprep.subr.bf16.mxu0 %v4447_v1 }
  0x1c   :  { %3771 = vmatprep.subr.bf16.mxu1 %v4447_v1 }
  0x1e   :  { %3760 = vmatpush3.bf16.msra.mxu0 %v4219_v18 }
  0x1f   :  { %3772 = vmatpush3.bf16.msra.mxu1 %v4220_v19  ;;  %3777 = vmatprep.subr.bf16.mxu0 %v4447_v1 }
  0x20   :  { %3789 = vmatprep.subr.bf16.mxu1 %v4447_v1 }
  0x21   :  { %3762 = vmatmul.mubr.msk.bf16.vlgmr.msra.gmra.mrb[4].mxu0 %vm70_vm1, %v4533_v11 }
  0x22   :  { %3774 = vmatmul.mubr.msk.bf16.vlgmr.msra.gmra.mrb[4].mxu1 %vm70_vm1, %v4533_v11  ;;  %3778 = vmatpush3.bf16.msra.mxu0 %v4221_v20 }
  0x23   :  { %3790 = vmatpush3.bf16.msra.mxu1 %v4222_v21  ;;  %3779 = vmatprep.subr.bf16.mxu0 %v4447_v1 }
  0x24   :  { %3791 = vmatprep.subr.bf16.mxu1 %v4447_v1  ;;  %3785 = vmatprep.mubr.msk.bf16.mxu0 %vm4448_vm0, %v4447_v1 }
  0x25   :  { %3797 = vmatprep.mubr.msk.bf16.mxu1 %vm4448_vm0, %v4447_v1 }
  0x26   :  { %3780 = vmatpush3.bf16.msra.mxu0 %v4223_v22 }
  0x27   :  { %3792 = vmatpush3.bf16.msra.mxu1 %v4224_v23  ;;  %3781 = vmatprep.subr.bf16.mxu0 %v4447_v1 }
  0x28   :  { %12 = vsyncpa [#allocation4], 0  ;;  %3793 = vmatprep.subr.bf16.mxu1 %v4447_v1  ;;  %v4227_v26 = vld [vmem:[%s5329_s1 + $0x98] sm:$0xff]   ;;  %v4618_v28 = vld [vmem:[%s5330_s2] sm:$0xff]   ;;  %v4449_v34 = vmov 0   ;;  %vm115_vm2 = vcmask 261120  }
  0x29   :  { %v4228_v27 = vld [vmem:[%s5329_s1 + $0xb8] sm:$0xff]   ;;  %v4624_v29 = vld [vmem:[%s5330_s2 + $0x10] sm:$0xff]   ;;  %v4635_v30 = vld [vmem:[%s5330_s2 + $0x8] sm:$0xff]   ;;  %s4450_s17 = smov [#allocation3]   ;;  %vm3284_vm3 = vcmask 25600  }
  0x2a   :  { %3782 = vmatpush3.bf16.msra.mxu0 %v4225_v24  ;;  %v4642_v31 = vld [vmem:[%s5330_s2 + $0x18] sm:$0xff]   ;;  %v4653_v32 = vld [vmem:[%s5330_s2 + $0x20] sm:$0xff]   ;;  %v4660_v33 = vld [vmem:[%s5330_s2 + $0x30] sm:$0xff]   ;;  %s3292_s18 = sshll.u32 %s4450_s17, 4  ;;  %s3293_s18 = int_to_ptr.vmem [resolvable:$true] %s3292_s18 }
  0x2b   :  { %3794 = vmatpush3.bf16.msra.mxu1 %v4226_v25  ;;  %3783 = vmatprep.subr.bf16.mxu0 %v4447_v1  ;;  %v4667_v35 = vld [vmem:[%s5330_s2 + $0x28] sm:$0xff]   ;;  %v4674_v36 = vld [vmem:[%s5330_s2 + $0x38] sm:$0xff]   ;;  %v4685_v37 = vld [vmem:[%s5330_s2 + $0x40] sm:$0xff]   ;;  %s4423_s19 = scalar_lea.vmem %s3293_s18, 32  ;;  %p4428_p1 = scmp.lt.s32.totalorder %s3293_s18, %s3293_s18 }
  0x2c   :  { %3795 = vmatprep.subr.bf16.mxu1 %v4447_v1  ;;  %v4693_v38 = vld [vmem:[%s5330_s2 + $0x50] sm:$0xff]   ;;  %v4699_v39 = vld [vmem:[%s5330_s2 + $0x48] sm:$0xff]   ;;  %v4708_v40 = vld [vmem:[%s5330_s2 + $0x58] sm:$0xff]   ;;  %p4424_p0 = scmp.ne.s32.totalorder %s3293_s18, %s4423_s19  ;;  %p4429_p2 = scmp.lt.s32.totalorder %s4423_s19, %s4423_s19 }
  0x2d   :  { %v3340_v41 = vld [vmem:[%s5331_s3] ss:$0 sm:$0xff]  ;;  %v3355_v42 = vld [vmem:[%s5331_s3 + $0x1] ss:$0 sm:$0xff]  ;;  %v3370_v55 = vld [vmem:[%s5331_s3 + $0x2] ss:$0 sm:$0xff] }
  0x2e   :  { %3784 = vmatpush3.bf16.msra.mxu0 %v4227_v26  ;;  %v3385_v56 = vld [vmem:[%s5331_s3 + $0x3] ss:$0 sm:$0xff]  ;;  %v3400_v6 = vld [vmem:[%s5331_s3 + $0x4] ss:$0 sm:$0xff]  ;;  %v3415_v7 = vld [vmem:[%s5331_s3 + $0x5] ss:$0 sm:$0xff]  ;;  %p4430_p3 = por %p4429_p2, %p4428_p1 }
  0x2f   :  { %3796 = vmatpush3.bf16.msra.mxu1 %v4228_v27  ;;  %3801 = vmatprep.subr.bf16.mxu0 %v4447_v1  ;;  %v4762_v20 = vld [vmem:[%s5332_s4] ss:$0 sm:$0xff]  ;;  %v4767_v21 = vld [vmem:[%s5332_s4 + $0x1] ss:$0 sm:$0xff] }
  0x30   :  { %3809 = vmatprep.subr.bf16.mxu1 %v4447_v1  ;;  %p4431_p4 = pnand %p4430_p3, %p4424_p0 }
  0x31   :  { %3786 = vmatmul.mubr.msk.bf16.vlgmr.msra.gmra.mrb[8].mxu0 %vm70_vm1, %v4533_v11 }
  0x32   :  { %3798 = vmatmul.mubr.msk.bf16.vlgmr.msra.gmra.mrb[8].mxu1 %vm70_vm1, %v4533_v11  ;;  %3802 = vmatpush3.bf16.msra.mxu0 %v4618_v28 }
  0x33   :  { %3810 = vmatpush3.bf16.msra.mxu1 %v4624_v29  ;;  %3803 = vmatprep.subr.bf16.mxu0 %v4447_v1 }
  0x34   :  { %3811 = vmatprep.subr.bf16.mxu1 %v4447_v1  ;;  %3805 = vmatprep.mubr.msk.bf16.mxu0 %vm4448_vm0, %v4447_v1 }
  0x35   :  { %3813 = vmatprep.mubr.msk.bf16.mxu1 %vm4448_vm0, %v4447_v1 }
  0x36   :  { %3804 = vmatpush3.bf16.msra.mxu0 %v4635_v30 }
  0x37   :  { %3812 = vmatpush3.bf16.msra.mxu1 %v4642_v31  ;;  %3817 = vmatprep.subr.bf16.mxu0 %v4447_v1 }
  0x38   :  { %3825 = vmatprep.subr.bf16.mxu1 %v4447_v1 }
  0x39   :  { %3806 = vmatmul.mubr.bf16.vlgmr.msra.gmra.mrb[12].mxu0 %v4449_v34 }
  0x3a   :  { %3814 = vmatmul.mubr.bf16.vlgmr.msra.gmra.mrb[12].mxu1 %v4449_v34  ;;  %3818 = vmatpush3.bf16.msra.mxu0 %v4653_v32 }
  0x3b   :  { %3826 = vmatpush3.bf16.msra.mxu1 %v4660_v33  ;;  %3819 = vmatprep.subr.bf16.mxu0 %v4447_v1 }
  0x3c   :  { %3827 = vmatprep.subr.bf16.mxu1 %v4447_v1  ;;  %3821 = vmatprep.mubr.msk.bf16.mxu0 %vm4448_vm0, %v4447_v1 }
  0x3d   :  { %3829 = vmatprep.mubr.msk.bf16.mxu1 %vm4448_vm0, %v4447_v1 }
  0x3e   :  { %3820 = vmatpush3.bf16.msra.mxu0 %v4667_v35 }
  0x3f   :  { %3828 = vmatpush3.bf16.msra.mxu1 %v4674_v36  ;;  %3833 = vmatprep.subr.bf16.mxu0 %v4447_v1 }
  0x40   :  { %3841 = vmatprep.subr.bf16.mxu1 %v4447_v1 }
  0x41   :  { %3822 = vmatmul.mubr.bf16.vlgmr.msra.gmra.mrb[16].mxu0 %v4449_v34 }
  0x42   :  { %3830 = vmatmul.mubr.bf16.vlgmr.msra.gmra.mrb[16].mxu1 %v4449_v34  ;;  %3834 = vmatpush3.bf16.msra.mxu0 %v4685_v37 }
  0x43   :  { %3835 = vmatprep.subr.bf16.mxu0 %v4447_v1  ;;  %3837 = vmatprep.mubr.msk.bf16.mxu0 %vm4448_vm0, %v4447_v1 }
  0x44   :  { %3842 = vmatpush3.bf16.msra.mxu1 %v4693_v38  ;;  %3845 = vmatprep.mubr.msk.bf16.mxu1 %vm4448_vm0, %v4447_v1 }
  0x45   :  { %3843 = vmatprep.subr.bf16.mxu1 %v4447_v1 }
  0x46   :  { %3836 = vmatpush3.bf16.msra.mxu0 %v4699_v39 }
  0x47   :  { %3849 = vmatprep.subr.bf16.mxu0 %v4447_v1 }
  0x48   :  { %3844 = vmatpush3.bf16.msra.mxu1 %v4708_v40 }
  0x49   :  { %3838 = vmatmul.mubr.bf16.vlgmr.msra.gmra.mrb[20].mxu0 %v4449_v34  ;;  %3857 = vmatprep.subr.bf16.mxu1 %v4447_v1 }
  0x4a   :  { %3850 = vmatpush3.bf16.msra.mxu0 %v4618_v28  ;;  %3853 = vmatprep.mubr.msk.bf16.mxu0 %vm4448_vm0, %v4447_v1 }
  0x4b   :  { %3846 = vmatmul.mubr.bf16.vlgmr.msra.gmra.mrb[20].mxu1 %v4449_v34  ;;  %3851 = vmatprep.subr.bf16.mxu0 %v4447_v1 }
  0x4c   :  { %3858 = vmatpush3.bf16.msra.mxu1 %v4624_v29  ;;  %3861 = vmatprep.mubr.msk.bf16.mxu1 %vm4448_vm0, %v4447_v1 }
  0x4d   :  { %3859 = vmatprep.subr.bf16.mxu1 %v4447_v1 }
  0x4e   :  { %3852 = vmatpush3.bf16.msra.mxu0 %v4635_v30 }
  0x4f   :  { %3865 = vmatprep.subr.bf16.mxu0 %v4447_v1 }
  0x50   :  { %3860 = vmatpush3.bf16.msra.mxu1 %v4642_v31 }
  0x51   :  { %3873 = vmatprep.subr.bf16.mxu1 %v4447_v1 }
  0xe4   :  { %v108_v43 = vpop.f32.mrb[0].mxu0 }
  0xe5   :  { %v109_v44 = vadd.f32 %v3340_v41, %v108_v43  ;;  %v193_v45 = vpop.f32.mrb[0].mxu1  ;;  %v3739_v46 = vpop.f32.mrb[1].mxu0 }
  0xe6   :  { %v194_v47 = vadd.f32 %v3355_v42, %v193_v45  ;;  %v3751_v48 = vpop.f32.mrb[1].mxu1  ;;  %v111_v49 = vpop.f32.mrb[2].mxu0 }
  0xe7   :  { %116 = vst.msk [vmem:[#allocation2] sm:$0xff] %vm115_vm2, %v109_v44  ;;  %v112_v50 = vadd.f32 %v3340_v41, %v111_v49  ;;  %v196_v51 = vpop.f32.mrb[2].mxu1  ;;  %v3740_v52 = vpop.f32.mrb[3].mxu0  ;;  %v4774_v49 = vld [vmem:[%s5332_s4 + $0x3] ss:$0 sm:$0xff] }
  0xe8   :  { %201 = vst.msk [vmem:[#allocation2 + $0x10] sm:$0xff] %vm115_vm2, %v194_v47  ;;  %v197_v53 = vadd.f32 %v3355_v42, %v196_v51  ;;  %v3752_v54 = vpop.f32.mrb[3].mxu1 }
  0xe9   :  { %117 = vst.msk [vmem:[#allocation2 + $0x8] sm:$0xff] %vm115_vm2, %v112_v50 }
  0xea   :  { %202 = vst.msk [vmem:[#allocation2 + $0x18] sm:$0xff] %vm115_vm2, %v197_v53 }
  0xee   :  { %v543_v26 = vld [vmem:[#allocation2] sm:$0x3] }
  0xef   :  { %v546_v47 = vld [vmem:[#allocation2 + $0x10] sm:$0x3] }
  0xf4   :  { %v278_v57 = vpop.f32.mrb[4].mxu0 }
  0xf5   :  { %v279_v58 = vadd.f32 %v3370_v55, %v278_v57  ;;  %v363_v59 = vpop.f32.mrb[4].mxu1  ;;  %v3763_v60 = vpop.f32.mrb[5].mxu0 }
  0xf6   :  { %v364_v61 = vadd.f32 %v3385_v56, %v363_v59  ;;  %v3775_v62 = vpop.f32.mrb[5].mxu1  ;;  %v281_v63 = vpop.f32.mrb[6].mxu0 }
  0xf7   :  { %286 = vst.msk [vmem:[#allocation2 + $0x20] sm:$0xff] %vm115_vm2, %v279_v58  ;;  %v282_v0 = vadd.f32 %v3370_v55, %v281_v63  ;;  %v366_v2 = vpop.f32.mrb[6].mxu1  ;;  %v3764_v3 = vpop.f32.mrb[7].mxu0  ;;  %v4780_v63 = vld [vmem:[%s5332_s4 + $0x4] ss:$0 sm:$0xff] }
  0xf8   :  { %371 = vst.msk [vmem:[#allocation2 + $0x30] sm:$0xff] %vm115_vm2, %v364_v61  ;;  %v367_v4 = vadd.f32 %v3385_v56, %v366_v2  ;;  %v3776_v5 = vpop.f32.mrb[7].mxu1 }
  0xf9   :  { %287 = vst.msk [vmem:[#allocation2 + $0x28] sm:$0xff] %vm115_vm2, %v282_v0 }
  0xfa   :  { %372 = vst.msk [vmem:[#allocation2 + $0x38] sm:$0xff] %vm115_vm2, %v367_v4 }
 0x101   :  { %v769_v57 = vld [vmem:[#allocation2 + $0x3e] sm:$0x3] }
 0x104   :  { %v448_v8 = vpop.f32.mrb[8].mxu0 }
 0x105   :  { %v449_v9 = vadd.f32 %v3400_v6, %v448_v8  ;;  %v533_v10 = vpop.f32.mrb[8].mxu1  ;;  %v3787_v11 = vpop.f32.mrb[9].mxu0 }
 0x106   :  { %v534_v12 = vadd.f32 %v3415_v7, %v533_v10  ;;  %v3799_v13 = vpop.f32.mrb[9].mxu1  ;;  %v451_v14 = vpop.f32.mrb[10].mxu0 }
 0x107   :  { %456 = vst.msk [vmem:[#allocation2 + $0x40] sm:$0xff] %vm115_vm2, %v449_v9  ;;  %v452_v15 = vadd.f32 %v3400_v6, %v451_v14  ;;  %v536_v16 = vpop.f32.mrb[10].mxu1  ;;  %v3788_v17 = vpop.f32.mrb[11].mxu0 }
 0x108   :  { %541 = vst.msk [vmem:[#allocation2 + $0x50] sm:$0xff] %vm115_vm2, %v534_v12  ;;  %v537_v18 = vadd.f32 %v3415_v7, %v536_v16  ;;  %v3800_v19 = vpop.f32.mrb[11].mxu1  ;;  %v4786_v17 = vld [vmem:[%s5332_s4 + $0x2] ss:$0 sm:$0xff] }
 0x109   :  { %457 = vst.msk [vmem:[#allocation2 + $0x48] sm:$0xff] %vm115_vm2, %v452_v15 }
 0x10a   :  { %542 = vst.msk [vmem:[#allocation2 + $0x58] sm:$0xff] %vm115_vm2, %v537_v18 }
 0x10c   :  { %v610_v22 = vpop.f32.mrb[12].mxu0 }
 0x10d   :  { %v611_v23 = vadd.f32 %v4762_v20, %v610_v22  ;;  %v675_v24 = vpop.f32.mrb[12].mxu1  ;;  %v3807_v25 = vpop.f32.mrb[13].mxu0 }
 0x10e   :  { %v676_v27 = vadd.f32 %v4767_v21, %v675_v24  ;;  %v3815_v34 = vpop.f32.mrb[13].mxu1  ;;  %v613_v41 = vpop.f32.mrb[14].mxu0  ;;  %v549_v25 = vld [vmem:[#allocation2 + $0x20] sm:$0x3] }
 0x10f   :  { %v746_v42 = vadd.f32 %v611_v23, %v543_v26  ;;  %v678_v43 = vpop.f32.mrb[14].mxu1  ;;  %v3808_v44 = vpop.f32.mrb[15].mxu0  ;;  %v4792_v34 = vld [vmem:[%s5332_s4 + $0x5] ss:$0 sm:$0xff] }
 0x110   :  { %v3816_v45 = vpop.f32.mrb[15].mxu1  ;;  %v753_v48 = vadd.f32 %v676_v27, %v546_v47  ;;  %v773_v6 = vld [vmem:[#allocation2 + $0x4e] sm:$0x3] }
 0x111   :  { %v3440_v46 = vmul.f32 -1.442695, %v746_v42 }
 0x112   :  { %v3441_v53 = vmul.f32 -1.442695, %v753_v48 }
 0x113   :  { %4245 = vpow2.f32 %v3440_v46  ;;  %v777_v46 = vld [vmem:[#allocation2 + $0x5e] sm:$0x3] }
 0x114   :  { %v740_v50 = vpop.f32.mrb[16].mxu0  ;;  %4247 = vpow2.f32 %v3441_v53 }
 0x115   :  { %v837_v51 = vpop.f32.mrb[16].mxu1  ;;  %v3823_v52 = vpop.f32.mrb[17].mxu0  ;;  %v741_v22 = vadd.f32 %v4786_v17, %v740_v50 }
 0x116   :  { %v838_v54 = vadd.f32 %v4774_v49, %v837_v51  ;;  %v3831_v55 = vpop.f32.mrb[17].mxu1  ;;  %v743_v56 = vpop.f32.mrb[18].mxu0 }
 0x117   :  { %v840_v58 = vpop.f32.mrb[18].mxu1  ;;  %v3824_v59 = vpop.f32.mrb[19].mxu0 }
 0x118   :  { %v973_v60 = vadd.f32 %v838_v54, %v769_v57  ;;  %v3832_v61 = vpop.f32.mrb[19].mxu1 }
 0x11a   :  { %v3466_v62 = vmul.f32 -1.442695, %v973_v60 }
 0x11c   :  { %4249 = vpow2.f32 %v3466_v62  ;;  %v902_v0 = vpop.f32.mrb[20].mxu0 }
 0x11d   :  { %v4246_v2 = vpop.eup %4245  ;;  %v903_v3 = vadd.f32 %v4780_v63, %v902_v0  ;;  %v3839_v4 = vpop.f32.mrb[21].mxu0 }
 0x11e   :  { %v750_v5 = vadd.f32 1.0, %v4246_v2  ;;  %v905_v7 = vpop.f32.mrb[22].mxu0  ;;  %v967_v8 = vpop.f32.mrb[20].mxu1 }
 0x11f   :  { %v980_v9 = vadd.f32 %v903_v3, %v773_v6  ;;  %v3840_v10 = vpop.f32.mrb[23].mxu0  ;;  %v3847_v11 = vpop.f32.mrb[21].mxu1  ;;  %v968_v42 = vadd.f32 %v4792_v34, %v967_v8 }
 0x120   :  { %4251 = vrcp.f32 %v750_v5  ;;  %v970_v12 = vpop.f32.mrb[22].mxu1  ;;  %v4248_v15 = vpop.eup %4247  ;;  %v995_v5 = vld [vmem:[#allocation2 + $0x2] sm:$0x3] }
 0x121   :  { %v3467_v13 = vmul.f32 -1.442695, %v980_v9  ;;  %v3848_v14 = vpop.f32.mrb[23].mxu1  ;;  %v757_v18 = vadd.f32 1.0, %v4248_v15 }
 0x123   :  { %4253 = vpow2.f32 %v3467_v13  ;;  %v998_v13 = vld [vmem:[#allocation2 + $0x12] sm:$0x3] }
 0x126   :  { %v4250_v16 = vpop.eup %4249 }
 0x127   :  { %v977_v19 = vadd.f32 1.0, %v4250_v16 }
 0x129   :  { %4255 = vrcp.f32 %v977_v19 }
 0x12a   :  { %v4252_v23 = vpop.eup %4251  ;;  %4257 = vrcp.f32 %v757_v18 }
 0x12b   :  { %v760_v24 = vmul.f32 %v4252_v23, %v741_v22 }
 0x12d   :  { %v4254_v26 = vpop.eup %4253  ;;  %v761_v27 = vadd.f32 %v760_v24, %v549_v25  ;;  %v1150_v25 = vld [vmem:[#allocation2 + $0x3c] sm:$0x3] }
 0x12e   :  { %v984_v41 = vadd.f32 1.0, %v4254_v26 }
 0x12f   :  { %4259 = vtanh.f32 %v761_v27 }
 0x130   :  { %4261 = vrcp.f32 %v984_v41 }
 0x133   :  { %v4256_v43 = vpop.eup %4255 }
 0x134   :  { %v987_v44 = vmul.f32 %v4256_v43, %v968_v42  ;;  %v4258_v45 = vpop.eup %4257 }
 0x135   :  { %v763_v48 = vsub.f32 1.0, %v4258_v45  ;;  %v765_v51 = vmul.f32 0.0, %v4258_v45 }
 0x136   :  { %v988_v47 = vadd.f32 %v987_v44, %v777_v46 }
 0x138   :  { %4263 = vtanh.f32 %v988_v47 }
 0x139   :  { %v4260_v50 = vpop.eup %4259 }
 0x13a   :  { %v764_v52 = vmul.f32 %v4260_v50, %v763_v48  ;;  %v4262_v54 = vpop.eup %4261 }
 0x13b   :  { %v990_v56 = vsub.f32 1.0, %v4262_v54  ;;  %v992_v58 = vmul.f32 0.0, %v4262_v54 }
 0x13c   :  { %v4795_v53 = vadd.f32 %v765_v51, %v764_v52  ;;  %v1154_v51 = vld [vmem:[#allocation2 + $0x4c] sm:$0x3] }
 0x13e   :  { %v1002_v55 = vpack.c.bf16 %v4795_v53, %v4795_v53 }
 0x140   :  { %3854 = vmatmul.mubr.msk.bf16.vlgmr.msra.gmra.mrb[24].mxu0 %vm115_vm2, %v1002_v55  ;;  %3862 = vmatmul.mubr.msk.bf16.vlgmr.msra.gmra.mrb[24].mxu1 %vm115_vm2, %v1002_v55 }
 0x141   :  { %3866 = vmatpush3.bf16.msra.mxu0 %v4653_v32  ;;  %3874 = vmatpush3.bf16.msra.mxu1 %v4660_v33 }
 0x142   :  { %v4264_v57 = vpop.eup %4263  ;;  %3867 = vmatprep.subr.bf16.mxu0 %v4447_v1  ;;  %3875 = vmatprep.subr.bf16.mxu1 %v4447_v1 }
 0x143   :  { %v991_v59 = vmul.f32 %v4264_v57, %v990_v56  ;;  %3869 = vmatprep.mubr.msk.bf16.mxu0 %vm4448_vm0, %v4447_v1  ;;  %3877 = vmatprep.mubr.msk.bf16.mxu1 %vm4448_vm0, %v4447_v1 }
 0x145   :  { %3868 = vmatpush3.bf16.msra.mxu0 %v4667_v35  ;;  %3876 = vmatpush3.bf16.msra.mxu1 %v4674_v36  ;;  %v4811_v60 = vadd.f32 %v992_v58, %v991_v59 }
 0x146   :  { %3881 = vmatprep.subr.bf16.mxu0 %v4447_v1  ;;  %3889 = vmatprep.subr.bf16.mxu1 %v4447_v1 }
 0x147   :  { %v1159_v61 = vpack.c.bf16 %v4811_v60, %v4811_v60 }
 0x148   :  { %3870 = vmatmul.mubr.msk.bf16.vlgmr.msra.gmra.mrb[28].mxu0 %vm115_vm2, %v1002_v55 }
 0x149   :  { %3878 = vmatmul.mubr.msk.bf16.vlgmr.msra.gmra.mrb[28].mxu1 %vm115_vm2, %v1159_v61  ;;  %3882 = vmatpush3.bf16.msra.mxu0 %v4685_v37 }
 0x14a   :  { %3890 = vmatpush3.bf16.msra.mxu1 %v4693_v38  ;;  %3883 = vmatprep.subr.bf16.mxu0 %v4447_v1 }
 0x14b   :  { %3891 = vmatprep.subr.bf16.mxu1 %v4447_v1  ;;  %3885 = vmatprep.mubr.msk.bf16.mxu0 %vm4448_vm0, %v4447_v1 }
 0x14c   :  { %3893 = vmatprep.mubr.msk.bf16.mxu1 %vm4448_vm0, %v4447_v1 }
 0x14d   :  { %3884 = vmatpush3.bf16.msra.mxu0 %v4699_v39 }
 0x14e   :  { %3892 = vmatpush3.bf16.msra.mxu1 %v4708_v40  ;;  %3897 = vmatprep.subr.bf16.mxu0 %v4447_v1 }
 0x14f   :  { %3905 = vmatprep.subr.bf16.mxu1 %v4447_v1 }
 0x150   :  { %3886 = vmatmul.mubr.msk.bf16.vlgmr.msra.gmra.mrb[32].mxu0 %vm115_vm2, %v1159_v61 }
 0x151   :  { %3894 = vmatmul.mubr.msk.bf16.vlgmr.msra.gmra.mrb[32].mxu1 %vm115_vm2, %v1159_v61  ;;  %3898 = vmatpush3.bf16.msra.mxu0 %v4618_v28 }
 0x152   :  { %3906 = vmatpush3.bf16.msra.mxu1 %v4624_v29  ;;  %3899 = vmatprep.subr.bf16.mxu0 %v4447_v1 }
 0x153   :  { %3907 = vmatprep.subr.bf16.mxu1 %v4447_v1  ;;  %3901 = vmatprep.mubr.msk.bf16.mxu0 %vm4448_vm0, %v4447_v1 }
 0x154   :  { %3909 = vmatprep.mubr.msk.bf16.mxu1 %vm4448_vm0, %v4447_v1 }
 0x155   :  { %3900 = vmatpush3.bf16.msra.mxu0 %v4635_v30 }
 0x156   :  { %3908 = vmatpush3.bf16.msra.mxu1 %v4642_v31  ;;  %3913 = vmatprep.subr.bf16.mxu0 %v4447_v1 }
 0x157   :  { %3921 = vmatprep.subr.bf16.mxu1 %v4447_v1 }
 0x213   :  { %v1040_v62 = vpop.f32.mrb[24].mxu0  ;;  %v1080_v0 = vpop.f32.mrb[24].mxu1 }
 0x214   :  { %v1041_v2 = vadd.f32 %v4762_v20, %v1040_v62  ;;  %v3855_v3 = vpop.f32.mrb[25].mxu0  ;;  %v3863_v4 = vpop.f32.mrb[25].mxu1  ;;  %v1081_v6 = vadd.f32 %v4767_v21, %v1080_v0 }
 0x215   :  { %v1043_v7 = vpop.f32.mrb[26].mxu0  ;;  %v1083_v8 = vpop.f32.mrb[26].mxu1 }
 0x216   :  { %v1126_v9 = vadd.f32 %v1041_v2, %v995_v5  ;;  %v3856_v10 = vpop.f32.mrb[27].mxu0  ;;  %v3864_v11 = vpop.f32.mrb[27].mxu1  ;;  %v1133_v14 = vadd.f32 %v1081_v6, %v998_v13  ;;  %v1001_v6 = vld [vmem:[#allocation2 + $0x22] sm:$0x3] }
 0x218   :  { %v3471_v12 = vmul.f32 -1.442695, %v1126_v9  ;;  %v3472_v19 = vmul.f32 -1.442695, %v1133_v14  ;;  %v1158_v14 = vld [vmem:[#allocation2 + $0x5c] sm:$0x3] }
 0x21a   :  { %4265 = vpow2.f32 %v3471_v12 }
 0x21b   :  { %v1120_v15 = vpop.f32.mrb[28].mxu0  ;;  %4267 = vpow2.f32 %v3472_v19 }
 0x21c   :  { %v1197_v16 = vpop.f32.mrb[28].mxu1  ;;  %v3871_v18 = vpop.f32.mrb[29].mxu0  ;;  %v1121_v3 = vadd.f32 %v4786_v17, %v1120_v15 }
 0x21d   :  { %v1198_v22 = vadd.f32 %v4774_v49, %v1197_v16  ;;  %v3879_v23 = vpop.f32.mrb[29].mxu1  ;;  %v1123_v24 = vpop.f32.mrb[30].mxu0 }
 0x21e   :  { %v1200_v26 = vpop.f32.mrb[30].mxu1  ;;  %v3872_v27 = vpop.f32.mrb[31].mxu0 }
 0x21f   :  { %v1283_v41 = vadd.f32 %v1198_v22, %v1150_v25  ;;  %v3880_v42 = vpop.f32.mrb[31].mxu1 }
 0x221   :  { %v3476_v43 = vmul.f32 -1.442695, %v1283_v41 }
 0x223   :  { %4269 = vpow2.f32 %v3476_v43  ;;  %v1237_v44 = vpop.f32.mrb[32].mxu0 }
 0x224   :  { %v4266_v45 = vpop.eup %4265  ;;  %v1238_v46 = vadd.f32 %v4780_v63, %v1237_v44  ;;  %v1277_v47 = vpop.f32.mrb[32].mxu1 }
 0x225   :  { %v3887_v48 = vpop.f32.mrb[33].mxu0  ;;  %v1130_v50 = vadd.f32 1.0, %v4266_v45  ;;  %v3895_v52 = vpop.f32.mrb[33].mxu1  ;;  %v1278_v10 = vadd.f32 %v4792_v34, %v1277_v47 }
 0x226   :  { %v1240_v54 = vpop.f32.mrb[34].mxu0  ;;  %v1290_v55 = vadd.f32 %v1238_v46, %v1154_v51  ;;  %v1280_v56 = vpop.f32.mrb[34].mxu1  ;;  %v1306_v51 = vld [vmem:[#allocation2 + $0x4] sm:$0x3] }
 0x227   :  { %v3888_v57 = vpop.f32.mrb[35].mxu0  ;;  %4271 = vrcp.f32 %v1130_v50  ;;  %v3896_v58 = vpop.f32.mrb[35].mxu1 }
 0x228   :  { %v3477_v59 = vmul.f32 -1.442695, %v1290_v55  ;;  %v4268_v61 = vpop.eup %4267 }
 0x229   :  { %v1137_v0 = vadd.f32 1.0, %v4268_v61  ;;  %v1309_v61 = vld [vmem:[#allocation2 + $0x14] sm:$0x3] }
 0x22a   :  { %4273 = vpow2.f32 %v3477_v59 }
 0x22d   :  { %v4270_v62 = vpop.eup %4269 }
 0x22e   :  { %v1287_v2 = vadd.f32 1.0, %v4270_v62 }
 0x230   :  { %4275 = vrcp.f32 %v1287_v2 }
 0x231   :  { %v4272_v4 = vpop.eup %4271  ;;  %4277 = vrcp.f32 %v1137_v0 }
 0x232   :  { %v1140_v5 = vmul.f32 %v4272_v4, %v1121_v3 }
 0x234   :  { %v4274_v7 = vpop.eup %4273  ;;  %v1141_v8 = vadd.f32 %v1140_v5, %v1001_v6 }
 0x235   :  { %v1294_v9 = vadd.f32 1.0, %v4274_v7 }
 0x236   :  { %4279 = vtanh.f32 %v1141_v8  ;;  %v1461_v8 = vld [vmem:[#allocation2 + $0x3a] sm:$0x3] }
 0x237   :  { %4281 = vrcp.f32 %v1294_v9 }
 0x23a   :  { %v4276_v11 = vpop.eup %4275 }
 0x23b   :  { %v1297_v12 = vmul.f32 %v4276_v11, %v1278_v10  ;;  %v4278_v13 = vpop.eup %4277 }
 0x23c   :  { %v1143_v18 = vsub.f32 1.0, %v4278_v13  ;;  %v1145_v19 = vmul.f32 %v4278_v13, %v4795_v53 }
 0x23d   :  { %v1298_v16 = vadd.f32 %v1297_v12, %v1158_v14 }
 0x23f   :  { %4283 = vtanh.f32 %v1298_v16 }
 0x240   :  { %v4280_v15 = vpop.eup %4279 }
 0x241   :  { %v1144_v22 = vmul.f32 %v4280_v15, %v1143_v18  ;;  %v4282_v24 = vpop.eup %4281 }
 0x242   :  { %v1300_v26 = vsub.f32 1.0, %v4282_v24  ;;  %v1302_v41 = vmul.f32 %v4282_v24, %v4811_v60  ;;  %v1465_v24 = vld [vmem:[#allocation2 + $0x4a] sm:$0x3] }
 0x243   :  { %v4852_v23 = vadd.f32 %v1145_v19, %v1144_v22 }
 0x245   :  { %v1313_v25 = vpack.c.bf16 %v4852_v23, %v4852_v23 }
 0x247   :  { %3902 = vmatmul.mubr.msk.bf16.vlgmr.msra.gmra.mrb[36].mxu0 %vm115_vm2, %v1313_v25  ;;  %3910 = vmatmul.mubr.msk.bf16.vlgmr.msra.gmra.mrb[36].mxu1 %vm115_vm2, %v1313_v25 }
 0x248   :  { %3914 = vmatpush3.bf16.msra.mxu0 %v4653_v32  ;;  %3922 = vmatpush3.bf16.msra.mxu1 %v4660_v33 }
 0x249   :  { %v4284_v27 = vpop.eup %4283  ;;  %3915 = vmatprep.subr.bf16.mxu0 %v4447_v1  ;;  %3923 = vmatprep.subr.bf16.mxu1 %v4447_v1 }
 0x24a   :  { %v1301_v42 = vmul.f32 %v4284_v27, %v1300_v26  ;;  %3917 = vmatprep.mubr.msk.bf16.mxu0 %vm4448_vm0, %v4447_v1  ;;  %3925 = vmatprep.mubr.msk.bf16.mxu1 %vm4448_vm0, %v4447_v1 }
 0x24c   :  { %3916 = vmatpush3.bf16.msra.mxu0 %v4667_v35  ;;  %3924 = vmatpush3.bf16.msra.mxu1 %v4674_v36  ;;  %v4869_v43 = vadd.f32 %v1302_v41, %v1301_v42 }
 0x24d   :  { %3929 = vmatprep.subr.bf16.mxu0 %v4447_v1  ;;  %3937 = vmatprep.subr.bf16.mxu1 %v4447_v1 }
 0x24e   :  { %v1470_v44 = vpack.c.bf16 %v4869_v43, %v4869_v43 }
 0x24f   :  { %3918 = vmatmul.mubr.msk.bf16.vlgmr.msra.gmra.mrb[40].mxu0 %vm115_vm2, %v1313_v25 }
 0x250   :  { %3926 = vmatmul.mubr.msk.bf16.vlgmr.msra.gmra.mrb[40].mxu1 %vm115_vm2, %v1470_v44  ;;  %3930 = vmatpush3.bf16.msra.mxu0 %v4685_v37 }
 0x251   :  { %3938 = vmatpush3.bf16.msra.mxu1 %v4693_v38  ;;  %3931 = vmatprep.subr.bf16.mxu0 %v4447_v1 }
 0x252   :  { %3939 = vmatprep.subr.bf16.mxu1 %v4447_v1  ;;  %3933 = vmatprep.mubr.msk.bf16.mxu0 %vm4448_vm0, %v4447_v1 }
 0x253   :  { %3941 = vmatprep.mubr.msk.bf16.mxu1 %vm4448_vm0, %v4447_v1 }
 0x254   :  { %3932 = vmatpush3.bf16.msra.mxu0 %v4699_v39 }
 0x255   :  { %3940 = vmatpush3.bf16.msra.mxu1 %v4708_v40  ;;  %3945 = vmatprep.subr.bf16.mxu0 %v4447_v1 }
 0x256   :  { %3953 = vmatprep.subr.bf16.mxu1 %v4447_v1 }
 0x257   :  { %3934 = vmatmul.mubr.msk.bf16.vlgmr.msra.gmra.mrb[44].mxu0 %vm115_vm2, %v1470_v44 }
 0x258   :  { %3942 = vmatmul.mubr.msk.bf16.vlgmr.msra.gmra.mrb[44].mxu1 %vm115_vm2, %v1470_v44  ;;  %3946 = vmatpush3.bf16.msra.mxu0 %v4618_v28 }
 0x259   :  { %3954 = vmatpush3.bf16.msra.mxu1 %v4624_v29  ;;  %3947 = vmatprep.subr.bf16.mxu0 %v4447_v1 }
 0x25a   :  { %3955 = vmatprep.subr.bf16.mxu1 %v4447_v1  ;;  %3949 = vmatprep.mubr.msk.bf16.mxu0 %vm4448_vm0, %v4447_v1 }
 0x25b   :  { %3957 = vmatprep.mubr.msk.bf16.mxu1 %vm4448_vm0, %v4447_v1 }
 0x25c   :  { %3948 = vmatpush3.bf16.msra.mxu0 %v4635_v30 }
 0x25d   :  { %3956 = vmatpush3.bf16.msra.mxu1 %v4642_v31  ;;  %3961 = vmatprep.subr.bf16.mxu0 %v4447_v1 }
 0x25e   :  { %3969 = vmatprep.subr.bf16.mxu1 %v4447_v1 }
 0x31a   :  { %v1351_v45 = vpop.f32.mrb[36].mxu0  ;;  %v1391_v46 = vpop.f32.mrb[36].mxu1 }
 0x31b   :  { %v1352_v47 = vadd.f32 %v4762_v20, %v1351_v45  ;;  %v3903_v48 = vpop.f32.mrb[37].mxu0  ;;  %v3911_v50 = vpop.f32.mrb[37].mxu1  ;;  %v1392_v52 = vadd.f32 %v4767_v21, %v1391_v46 }
 0x31c   :  { %v1354_v54 = vpop.f32.mrb[38].mxu0  ;;  %v1394_v55 = vpop.f32.mrb[38].mxu1 }
 0x31d   :  { %v1437_v56 = vadd.f32 %v1352_v47, %v1306_v51  ;;  %v3904_v57 = vpop.f32.mrb[39].mxu0  ;;  %v3912_v58 = vpop.f32.mrb[39].mxu1  ;;  %v1444_v62 = vadd.f32 %v1392_v52, %v1309_v61  ;;  %v1312_v55 = vld [vmem:[#allocation2 + $0x24] sm:$0x3] }
 0x31f   :  { %v3481_v59 = vmul.f32 -1.442695, %v1437_v56  ;;  %v3482_v4 = vmul.f32 -1.442695, %v1444_v62 }
 0x321   :  { %4285 = vpow2.f32 %v3481_v59 }
 0x322   :  { %v1431_v0 = vpop.f32.mrb[40].mxu0  ;;  %4287 = vpow2.f32 %v3482_v4 }
 0x323   :  { %v1508_v2 = vpop.f32.mrb[40].mxu1  ;;  %v3919_v3 = vpop.f32.mrb[41].mxu0  ;;  %v1432_v51 = vadd.f32 %v4786_v17, %v1431_v0 }
 0x324   :  { %v1509_v5 = vadd.f32 %v4774_v49, %v1508_v2  ;;  %v3927_v6 = vpop.f32.mrb[41].mxu1  ;;  %v1434_v7 = vpop.f32.mrb[42].mxu0  ;;  %v1469_v3 = vld [vmem:[#allocation2 + $0x5a] sm:$0x3] }
 0x325   :  { %v1511_v9 = vpop.f32.mrb[42].mxu1  ;;  %v3920_v10 = vpop.f32.mrb[43].mxu0 }
 0x326   :  { %v1594_v11 = vadd.f32 %v1509_v5, %v1461_v8  ;;  %v3928_v12 = vpop.f32.mrb[43].mxu1 }
 0x328   :  { %v3486_v13 = vmul.f32 -1.442695, %v1594_v11 }
 0x32a   :  { %4289 = vpow2.f32 %v3486_v13  ;;  %v1548_v14 = vpop.f32.mrb[44].mxu0 }
 0x32b   :  { %v4286_v16 = vpop.eup %4285  ;;  %v1549_v18 = vadd.f32 %v4780_v63, %v1548_v14  ;;  %v1588_v15 = vpop.f32.mrb[44].mxu1 }
 0x32c   :  { %v3935_v19 = vpop.f32.mrb[45].mxu0  ;;  %v1441_v22 = vadd.f32 1.0, %v4286_v16  ;;  %v3943_v25 = vpop.f32.mrb[45].mxu1  ;;  %v1589_v59 = vadd.f32 %v4792_v34, %v1588_v15 }
 0x32d   :  { %v1551_v26 = vpop.f32.mrb[46].mxu0  ;;  %v1601_v27 = vadd.f32 %v1549_v18, %v1465_v24  ;;  %v1591_v41 = vpop.f32.mrb[46].mxu1 }
 0x32e   :  { %v3936_v42 = vpop.f32.mrb[47].mxu0  ;;  %4291 = vrcp.f32 %v1441_v22  ;;  %v3944_v44 = vpop.f32.mrb[47].mxu1 }
 0x32f   :  { %v3487_v45 = vmul.f32 -1.442695, %v1601_v27  ;;  %v4288_v46 = vpop.eup %4287 }
 0x330   :  { %v1448_v48 = vadd.f32 1.0, %v4288_v46 }
 0x331   :  { %4293 = vpow2.f32 %v3487_v45  ;;  %v1772_v45 = vld [vmem:[#allocation2 + $0x38] sm:$0x3] }
 0x334   :  { %v4290_v47 = vpop.eup %4289 }
 0x335   :  { %v1598_v50 = vadd.f32 1.0, %v4290_v47 }
 0x337   :  { %4295 = vrcp.f32 %v1598_v50 }
 0x338   :  { %v4292_v52 = vpop.eup %4291  ;;  %4297 = vrcp.f32 %v1448_v48 }
 0x339   :  { %v1451_v54 = vmul.f32 %v4292_v52, %v1432_v51 }
 0x33b   :  { %v4294_v56 = vpop.eup %4293  ;;  %v1452_v57 = vadd.f32 %v1451_v54, %v1312_v55 }
 0x33c   :  { %v1605_v58 = vadd.f32 1.0, %v4294_v56 }
 0x33d   :  { %4299 = vtanh.f32 %v1452_v57 }
 0x33e   :  { %4301 = vrcp.f32 %v1605_v58 }
 0x341   :  { %v4296_v61 = vpop.eup %4295 }
 0x342   :  { %v1608_v62 = vmul.f32 %v4296_v61, %v1589_v59  ;;  %v4298_v2 = vpop.eup %4297  ;;  %v1776_v59 = vld [vmem:[#allocation2 + $0x48] sm:$0x3] }
 0x343   :  { %v1454_v5 = vsub.f32 1.0, %v4298_v2  ;;  %v1456_v6 = vmul.f32 %v4298_v2, %v4852_v23 }
 0x344   :  { %v1609_v4 = vadd.f32 %v1608_v62, %v1469_v3 }
 0x346   :  { %4303 = vtanh.f32 %v1609_v4 }
 0x347   :  { %v4300_v0 = vpop.eup %4299 }
 0x348   :  { %v1455_v7 = vmul.f32 %v4300_v0, %v1454_v5  ;;  %v4302_v9 = vpop.eup %4301 }
 0x349   :  { %v1611_v11 = vsub.f32 1.0, %v4302_v9  ;;  %v1613_v13 = vmul.f32 %v4302_v9, %v4869_v43 }
 0x34a   :  { %v4910_v8 = vadd.f32 %v1456_v6, %v1455_v7 }
 0x34c   :  { %v1624_v10 = vpack.c.bf16 %v4910_v8, %v4910_v8 }
 0x34e   :  { %3950 = vmatmul.mubr.msk.bf16.vlgmr.msra.gmra.mrb[48].mxu0 %vm115_vm2, %v1624_v10  ;;  %3958 = vmatmul.mubr.msk.bf16.vlgmr.msra.gmra.mrb[48].mxu1 %vm115_vm2, %v1624_v10 }
 0x34f   :  { %3962 = vmatpush3.bf16.msra.mxu0 %v4653_v32  ;;  %3970 = vmatpush3.bf16.msra.mxu1 %v4660_v33 }
 0x350   :  { %v4304_v12 = vpop.eup %4303  ;;  %3963 = vmatprep.subr.bf16.mxu0 %v4447_v1  ;;  %3971 = vmatprep.subr.bf16.mxu1 %v4447_v1 }
 0x351   :  { %v1612_v14 = vmul.f32 %v4304_v12, %v1611_v11  ;;  %3965 = vmatprep.mubr.msk.bf16.mxu0 %vm4448_vm0, %v4447_v1  ;;  %3973 = vmatprep.mubr.msk.bf16.mxu1 %vm4448_vm0, %v4447_v1 }
 0x353   :  { %3964 = vmatpush3.bf16.msra.mxu0 %v4667_v35  ;;  %3972 = vmatpush3.bf16.msra.mxu1 %v4674_v36  ;;  %v4927_v32 = vadd.f32 %v1613_v13, %v1612_v14  ;;  %v1623_v14 = vld [vmem:[#allocation2 + $0x26] sm:$0x3] }
 0x354   :  { %3977 = vmatprep.subr.bf16.mxu0 %v4447_v1  ;;  %3985 = vmatprep.subr.bf16.mxu1 %v4447_v1 }
 0x355   :  { %v1781_v33 = vpack.c.bf16 %v4927_v32, %v4927_v32 }
 0x356   :  { %3966 = vmatmul.mubr.msk.bf16.vlgmr.msra.gmra.mrb[52].mxu0 %vm115_vm2, %v1624_v10 }
 0x357   :  { %3974 = vmatmul.mubr.msk.bf16.vlgmr.msra.gmra.mrb[52].mxu1 %vm115_vm2, %v1781_v33  ;;  %3978 = vmatpush3.bf16.msra.mxu0 %v4685_v37 }
 0x358   :  { %3986 = vmatpush3.bf16.msra.mxu1 %v4693_v38  ;;  %3979 = vmatprep.subr.bf16.mxu0 %v4447_v1  ;;  %v1617_v38 = vld [vmem:[#allocation2 + $0x6] sm:$0x3] }
 0x359   :  { %3987 = vmatprep.subr.bf16.mxu1 %v4447_v1  ;;  %3981 = vmatprep.mubr.msk.bf16.mxu0 %vm4448_vm0, %v4447_v1 }
 0x35a   :  { %3989 = vmatprep.mubr.msk.bf16.mxu1 %vm4448_vm0, %v4447_v1 }
 0x35b   :  { %3980 = vmatpush3.bf16.msra.mxu0 %v4699_v39 }
 0x35c   :  { %3988 = vmatpush3.bf16.msra.mxu1 %v4708_v40  ;;  %3993 = vmatprep.subr.bf16.mxu0 %v4447_v1 }
 0x35d   :  { %4001 = vmatprep.subr.bf16.mxu1 %v4447_v1 }
 0x35e   :  { %3982 = vmatmul.mubr.msk.bf16.vlgmr.msra.gmra.mrb[56].mxu0 %vm115_vm2, %v1781_v33 }
 0x35f   :  { %3990 = vmatmul.mubr.msk.bf16.vlgmr.msra.gmra.mrb[56].mxu1 %vm115_vm2, %v1781_v33  ;;  %3994 = vmatpush3.bf16.msra.mxu0 %v4618_v28 }
 0x360   :  { %4002 = vmatpush3.bf16.msra.mxu1 %v4624_v29  ;;  %3995 = vmatprep.subr.bf16.mxu0 %v4447_v1 }
 0x361   :  { %4003 = vmatprep.subr.bf16.mxu1 %v4447_v1  ;;  %3997 = vmatprep.mubr.msk.bf16.mxu0 %vm4448_vm0, %v4447_v1 }
 0x362   :  { %4005 = vmatprep.mubr.msk.bf16.mxu1 %vm4448_vm0, %v4447_v1 }
 0x363   :  { %3996 = vmatpush3.bf16.msra.mxu0 %v4635_v30 }
 0x364   :  { %4004 = vmatpush3.bf16.msra.mxu1 %v4642_v31  ;;  %4009 = vmatprep.subr.bf16.mxu0 %v4447_v1  ;;  %v1620_v31 = vld [vmem:[#allocation2 + $0x16] sm:$0x3] }
 0x365   :  { %4017 = vmatprep.subr.bf16.mxu1 %v4447_v1 }
 0x421   :  { %v1662_v28 = vpop.f32.mrb[48].mxu0  ;;  %v1702_v29 = vpop.f32.mrb[48].mxu1 }
 0x422   :  { %v1663_v35 = vadd.f32 %v4762_v20, %v1662_v28  ;;  %v3951_v36 = vpop.f32.mrb[49].mxu0  ;;  %v3959_v37 = vpop.f32.mrb[49].mxu1  ;;  %v1703_v39 = vadd.f32 %v4767_v21, %v1702_v29 }
 0x423   :  { %v1665_v40 = vpop.f32.mrb[50].mxu0  ;;  %v1705_v16 = vpop.f32.mrb[50].mxu1 }
 0x424   :  { %v1748_v18 = vadd.f32 %v1663_v35, %v1617_v38  ;;  %v3952_v15 = vpop.f32.mrb[51].mxu0  ;;  %v3960_v30 = vpop.f32.mrb[51].mxu1  ;;  %v1755_v22 = vadd.f32 %v1703_v39, %v1620_v31  ;;  %v1780_v39 = vld [vmem:[#allocation2 + $0x58] sm:$0x3] }
 0x426   :  { %v3491_v19 = vmul.f32 -1.442695, %v1748_v18  ;;  %v3492_v27 = vmul.f32 -1.442695, %v1755_v22 }
 0x428   :  { %4305 = vpow2.f32 %v3491_v19 }
 0x429   :  { %v1742_v24 = vpop.f32.mrb[52].mxu0  ;;  %4307 = vpow2.f32 %v3492_v27 }
 0x42a   :  { %v1819_v25 = vpop.f32.mrb[52].mxu1  ;;  %v3967_v26 = vpop.f32.mrb[53].mxu0  ;;  %v1743_v11 = vadd.f32 %v4786_v17, %v1742_v24 }
 0x42b   :  { %v1820_v41 = vadd.f32 %v4774_v49, %v1819_v25  ;;  %v3975_v42 = vpop.f32.mrb[53].mxu1  ;;  %v1745_v44 = vpop.f32.mrb[54].mxu0  ;;  %v4977_v25 = vld [vmem:[%s5330_s2 + $0x20] sm:$0xff]   ;;  %v4983_v26 = vld [vmem:[%s5330_s2 + $0x30] sm:$0xff]  }
 0x42c   :  { %v1822_v46 = vpop.f32.mrb[54].mxu1  ;;  %v3968_v47 = vpop.f32.mrb[55].mxu0  ;;  %v4996_v44 = vld [vmem:[%s5330_s2 + $0x28] sm:$0xff]  }
 0x42d   :  { %v1905_v48 = vadd.f32 %v1820_v41, %v1772_v45  ;;  %v3976_v50 = vpop.f32.mrb[55].mxu1  ;;  %v5002_v45 = vld [vmem:[%s5330_s2 + $0x38] sm:$0xff]  }
 0x42e   :  { %v5022_v50 = vld [vmem:[%s5330_s2 + $0x50] sm:$0xff]  }
 0x42f   :  { %v3496_v51 = vmul.f32 -1.442695, %v1905_v48  ;;  %v5016_v48 = vld [vmem:[%s5330_s2 + $0x40] sm:$0xff]  }
 0x431   :  { %4309 = vpow2.f32 %v3496_v51  ;;  %v1859_v52 = vpop.f32.mrb[56].mxu0  ;;  %v5034_v51 = vld [vmem:[%s5330_s2 + $0x48] sm:$0xff]  }
 0x432   :  { %v4306_v54 = vpop.eup %4305  ;;  %v1860_v55 = vadd.f32 %v4780_v63, %v1859_v52  ;;  %v1899_v56 = vpop.f32.mrb[56].mxu1  ;;  %v5040_v52 = vld [vmem:[%s5330_s2 + $0x58] sm:$0xff]  }
 0x433   :  { %v3983_v57 = vpop.f32.mrb[57].mxu0  ;;  %v1752_v58 = vadd.f32 1.0, %v4306_v54  ;;  %v3991_v61 = vpop.f32.mrb[57].mxu1  ;;  %v1900_v35 = vadd.f32 %v4792_v34, %v1899_v56  ;;  %v5050_v54 = vld [vmem:[%s5330_s2] sm:$0xff]   ;;  %v5068_v56 = vld [vmem:[%s5330_s2 + $0x8] sm:$0xff]  }
 0x434   :  { %v1862_v62 = vpop.f32.mrb[58].mxu0  ;;  %v1912_v2 = vadd.f32 %v1860_v55, %v1776_v59  ;;  %v1902_v3 = vpop.f32.mrb[58].mxu1  ;;  %v5056_v55 = vld [vmem:[%s5330_s2 + $0x10] sm:$0xff]   ;;  %v5074_v57 = vld [vmem:[%s5330_s2 + $0x18] sm:$0xff]  }
 0x435   :  { %v3984_v4 = vpop.f32.mrb[59].mxu0  ;;  %4311 = vrcp.f32 %v1752_v58  ;;  %v3992_v5 = vpop.f32.mrb[59].mxu1  ;;  %v1928_v3 = vld [vmem:[#allocation2 + $0x8] sm:$0x3] }
 0x436   :  { %v3497_v0 = vmul.f32 -1.442695, %v1912_v2  ;;  %v4308_v6 = vpop.eup %4307 }
 0x437   :  { %v1759_v9 = vadd.f32 1.0, %v4308_v6 }
 0x438   :  { %4313 = vpow2.f32 %v3497_v0 }
 0x43b   :  { %v4310_v7 = vpop.eup %4309 }
 0x43c   :  { %v1909_v10 = vadd.f32 1.0, %v4310_v7 }
 0x43e   :  { %4315 = vrcp.f32 %v1909_v10 }
 0x43f   :  { %v4312_v12 = vpop.eup %4311  ;;  %4317 = vrcp.f32 %v1759_v9 }
 0x440   :  { %v1762_v13 = vmul.f32 %v4312_v12, %v1743_v11  ;;  %v1930_v11 = vld [vmem:[#allocation2 + $0x18] sm:$0x3] }
 0x442   :  { %v4314_v33 = vpop.eup %4313  ;;  %v1763_v28 = vadd.f32 %v1762_v13, %v1623_v14 }
 0x443   :  { %v1916_v29 = vadd.f32 1.0, %v4314_v33 }
 0x444   :  { %4319 = vtanh.f32 %v1763_v28 }
 0x445   :  { %4321 = vrcp.f32 %v1916_v29 }
 0x448   :  { %v4316_v36 = vpop.eup %4315 }
 0x449   :  { %v1919_v37 = vmul.f32 %v4316_v36, %v1900_v35  ;;  %v4318_v38 = vpop.eup %4317  ;;  %v2081_v36 = vld [vmem:[#allocation2 + $0x36] sm:$0x3] }
 0x44a   :  { %v1765_v16 = vsub.f32 1.0, %v4318_v38  ;;  %v1767_v15 = vmul.f32 %v4318_v38, %v4910_v8 }
 0x44b   :  { %v1920_v40 = vadd.f32 %v1919_v37, %v1780_v39 }
 0x44d   :  { %4323 = vtanh.f32 %v1920_v40 }
 0x44e   :  { %v4320_v18 = vpop.eup %4319 }
 0x44f   :  { %v1766_v30 = vmul.f32 %v4320_v18, %v1765_v16  ;;  %v4322_v31 = vpop.eup %4321 }
 0x450   :  { %v1922_v24 = vsub.f32 1.0, %v4322_v31  ;;  %v1924_v41 = vmul.f32 %v4322_v31, %v4927_v32 }
 0x451   :  { %v4968_v19 = vadd.f32 %v1767_v15, %v1766_v30 }
 0x453   :  { %v1933_v22 = vpack.c.bf16 %v4968_v19, %v4968_v19 }
 0x455   :  { %3998 = vmatmul.mubr.msk.bf16.vlgmr.msra.gmra.mrb[60].mxu0 %vm115_vm2, %v1933_v22  ;;  %4006 = vmatmul.mubr.msk.bf16.vlgmr.msra.gmra.mrb[60].mxu1 %vm115_vm2, %v1933_v22 }
 0x456   :  { %4010 = vmatpush3.bf16.msra.mxu0 %v4977_v25  ;;  %4018 = vmatpush3.bf16.msra.mxu1 %v4983_v26 }
 0x457   :  { %v4324_v27 = vpop.eup %4323  ;;  %4011 = vmatprep.subr.bf16.mxu0 %v4447_v1  ;;  %4019 = vmatprep.subr.bf16.mxu1 %v4447_v1 }
 0x458   :  { %v1923_v42 = vmul.f32 %v4324_v27, %v1922_v24  ;;  %4013 = vmatprep.mubr.msk.bf16.mxu0 %vm4448_vm0, %v4447_v1  ;;  %4021 = vmatprep.mubr.msk.bf16.mxu1 %vm4448_vm0, %v4447_v1  ;;  %v2084_v24 = vld [vmem:[#allocation2 + $0x46] sm:$0x3] }
 0x45a   :  { %4012 = vmatpush3.bf16.msra.mxu0 %v4996_v44  ;;  %4020 = vmatpush3.bf16.msra.mxu1 %v5002_v45  ;;  %v5005_v46 = vadd.f32 %v1924_v41, %v1923_v42 }
 0x45b   :  { %4025 = vmatprep.subr.bf16.mxu0 %v4447_v1  ;;  %4033 = vmatprep.subr.bf16.mxu1 %v4447_v1 }
 0x45c   :  { %v2088_v47 = vpack.c.bf16 %v5005_v46, %v5005_v46 }
 0x45d   :  { %4014 = vmatmul.mubr.msk.bf16.vlgmr.msra.gmra.mrb[64].mxu0 %vm115_vm2, %v1933_v22 }
 0x45e   :  { %4022 = vmatmul.mubr.msk.bf16.vlgmr.msra.gmra.mrb[64].mxu1 %vm115_vm2, %v2088_v47  ;;  %4026 = vmatpush3.bf16.msra.mxu0 %v5016_v48 }
 0x45f   :  { %4034 = vmatpush3.bf16.msra.mxu1 %v5022_v50  ;;  %4027 = vmatprep.subr.bf16.mxu0 %v4447_v1 }
 0x460   :  { %4035 = vmatprep.subr.bf16.mxu1 %v4447_v1  ;;  %4029 = vmatprep.mubr.msk.bf16.mxu0 %vm4448_vm0, %v4447_v1 }
 0x461   :  { %4037 = vmatprep.mubr.msk.bf16.mxu1 %vm4448_vm0, %v4447_v1 }
 0x462   :  { %4028 = vmatpush3.bf16.msra.mxu0 %v5034_v51 }
 0x463   :  { %4036 = vmatpush3.bf16.msra.mxu1 %v5040_v52  ;;  %4041 = vmatprep.subr.bf16.mxu0 %v4447_v1 }
 0x464   :  { %4049 = vmatprep.subr.bf16.mxu1 %v4447_v1 }
 0x465   :  { %4030 = vmatmul.mubr.msk.bf16.vlgmr.msra.gmra.mrb[68].mxu0 %vm115_vm2, %v2088_v47 }
 0x466   :  { %4038 = vmatmul.mubr.msk.bf16.vlgmr.msra.gmra.mrb[68].mxu1 %vm115_vm2, %v2088_v47  ;;  %4042 = vmatpush3.bf16.msra.mxu0 %v5050_v54 }
 0x467   :  { %4050 = vmatpush3.bf16.msra.mxu1 %v5056_v55  ;;  %4043 = vmatprep.subr.bf16.mxu0 %v4447_v1 }
 0x468   :  { %4051 = vmatprep.subr.bf16.mxu1 %v4447_v1  ;;  %4045 = vmatprep.mubr.msk.bf16.mxu0 %vm4448_vm0, %v4447_v1 }
 0x469   :  { %4053 = vmatprep.mubr.msk.bf16.mxu1 %vm4448_vm0, %v4447_v1 }
 0x46a   :  { %4044 = vmatpush3.bf16.msra.mxu0 %v5068_v56 }
 0x46b   :  { %4052 = vmatpush3.bf16.msra.mxu1 %v5074_v57  ;;  %4057 = vmatprep.subr.bf16.mxu0 %v4447_v1 }
 0x46c   :  { %4065 = vmatprep.subr.bf16.mxu1 %v4447_v1 }
 0x528   :  { %v1971_v58 = vpop.f32.mrb[60].mxu0  ;;  %v2011_v59 = vpop.f32.mrb[60].mxu1 }
 0x529   :  { %v1972_v61 = vadd.f32 %v4762_v20, %v1971_v58  ;;  %v3999_v62 = vpop.f32.mrb[61].mxu0  ;;  %v4007_v2 = vpop.f32.mrb[61].mxu1  ;;  %v2012_v4 = vadd.f32 %v4767_v21, %v2011_v59 }
 0x52a   :  { %v1974_v5 = vpop.f32.mrb[62].mxu0  ;;  %v2014_v0 = vpop.f32.mrb[62].mxu1 }
 0x52b   :  { %v2057_v6 = vadd.f32 %v1972_v61, %v1928_v3  ;;  %v4000_v7 = vpop.f32.mrb[63].mxu0  ;;  %v4008_v9 = vpop.f32.mrb[63].mxu1  ;;  %v2064_v12 = vadd.f32 %v2012_v4, %v1930_v11  ;;  %v1932_v0 = vld [vmem:[#allocation2 + $0x28] sm:$0x3] }
 0x52d   :  { %v3501_v10 = vmul.f32 -1.442695, %v2057_v6  ;;  %v3502_v28 = vmul.f32 -1.442695, %v2064_v12 }
 0x52f   :  { %4325 = vpow2.f32 %v3501_v10 }
 0x530   :  { %v2051_v13 = vpop.f32.mrb[64].mxu0  ;;  %4327 = vpow2.f32 %v3502_v28 }
 0x531   :  { %v2126_v14 = vpop.f32.mrb[64].mxu1  ;;  %v4015_v33 = vpop.f32.mrb[65].mxu0  ;;  %v2052_v4 = vadd.f32 %v4786_v17, %v2051_v13 }
 0x532   :  { %v2127_v20 = vadd.f32 %v4774_v49, %v2126_v14  ;;  %v4023_v29 = vpop.f32.mrb[65].mxu1  ;;  %v2054_v35 = vpop.f32.mrb[66].mxu0  ;;  %v2087_v33 = vld [vmem:[#allocation2 + $0x56] sm:$0x3] }
 0x533   :  { %v2129_v37 = vpop.f32.mrb[66].mxu1  ;;  %v4016_v21 = vpop.f32.mrb[67].mxu0 }
 0x534   :  { %v2212_v38 = vadd.f32 %v2127_v20, %v2081_v36  ;;  %v4024_v39 = vpop.f32.mrb[67].mxu1 }
 0x536   :  { %v3506_v40 = vmul.f32 -1.442695, %v2212_v38 }
 0x538   :  { %4329 = vpow2.f32 %v3506_v40  ;;  %v2166_v16 = vpop.f32.mrb[68].mxu0 }
 0x539   :  { %v4326_v18 = vpop.eup %4325  ;;  %v2167_v15 = vadd.f32 %v4780_v63, %v2166_v16  ;;  %v2206_v30 = vpop.f32.mrb[68].mxu1 }
 0x53a   :  { %v4031_v31 = vpop.f32.mrb[69].mxu0  ;;  %v2061_v22 = vadd.f32 1.0, %v4326_v18  ;;  %v4039_v27 = vpop.f32.mrb[69].mxu1  ;;  %v2207_v10 = vadd.f32 %v4792_v34, %v2206_v30  ;;  %v5140_v30 = vld [vmem:[%s5332_s4] ss:$0 sm:$0xff] }
 0x53b   :  { %v2169_v49 = vpop.f32.mrb[70].mxu0  ;;  %v2219_v41 = vadd.f32 %v2167_v15, %v2084_v24  ;;  %v2209_v42 = vpop.f32.mrb[70].mxu1  ;;  %v2235_v27 = vld [vmem:[#allocation2 + $0xa] sm:$0x3] }
 0x53c   :  { %v4032_v47 = vpop.f32.mrb[71].mxu0  ;;  %4331 = vrcp.f32 %v2061_v22  ;;  %v4040_v58 = vpop.f32.mrb[71].mxu1  ;;  %v5146_v49 = vld [vmem:[%s5332_s4 + $0x1] ss:$0 sm:$0xff] }
 0x53d   :  { %v3507_v59 = vmul.f32 -1.442695, %v2219_v41  ;;  %v4328_v61 = vpop.eup %4327 }
 0x53e   :  { %v2068_v2 = vadd.f32 1.0, %v4328_v61 }
 0x53f   :  { %4333 = vpow2.f32 %v3507_v59 }
 0x542   :  { %v4330_v62 = vpop.eup %4329 }
 0x543   :  { %v2216_v3 = vadd.f32 1.0, %v4330_v62 }
 0x545   :  { %4335 = vrcp.f32 %v2216_v3 }
 0x546   :  { %v4332_v63 = vpop.eup %4331  ;;  %4337 = vrcp.f32 %v2068_v2  ;;  %v2237_v2 = vld [vmem:[#allocation2 + $0x1a] sm:$0x3] }
 0x547   :  { %v2071_v5 = vmul.f32 %v4332_v63, %v2052_v4 }
 0x549   :  { %v4334_v6 = vpop.eup %4333  ;;  %v2072_v7 = vadd.f32 %v2071_v5, %v1932_v0 }
 0x54a   :  { %v2223_v9 = vadd.f32 1.0, %v4334_v6  ;;  %v5152_v6 = vld [vmem:[%s5332_s4 + $0x3] ss:$0 sm:$0xff] }
 0x54b   :  { %4339 = vtanh.f32 %v2072_v7 }
 0x54c   :  { %4341 = vrcp.f32 %v2223_v9 }
 0x54f   :  { %v4336_v11 = vpop.eup %4335 }
 0x550   :  { %v2226_v12 = vmul.f32 %v4336_v11, %v2207_v10  ;;  %v4338_v14 = vpop.eup %4337  ;;  %v2388_v11 = vld [vmem:[#allocation2 + $0x34] sm:$0x3] }
 0x551   :  { %v2074_v20 = vsub.f32 1.0, %v4338_v14  ;;  %v2076_v13 = vmul.f32 %v4338_v14, %v4968_v19 }
 0x552   :  { %v2227_v28 = vadd.f32 %v2226_v12, %v2087_v33 }
 0x554   :  { %4343 = vtanh.f32 %v2227_v28 }
 0x555   :  { %v4340_v17 = vpop.eup %4339 }
 0x556   :  { %v2075_v29 = vmul.f32 %v4340_v17, %v2074_v20  ;;  %v4342_v36 = vpop.eup %4341 }
 0x557   :  { %v2229_v34 = vsub.f32 1.0, %v4342_v36  ;;  %v2231_v38 = vmul.f32 %v4342_v36, %v5005_v46 }
 0x558   :  { %v5086_v35 = vadd.f32 %v2076_v13, %v2075_v29  ;;  %v5158_v29 = vld [vmem:[%s5332_s4 + $0x4] ss:$0 sm:$0xff] }
 0x55a   :  { %v2240_v37 = vpack.c.bf16 %v5086_v35, %v5086_v35 }
 0x55c   :  { %4046 = vmatmul.mubr.msk.bf16.vlgmr.msra.gmra.mrb[72].mxu0 %vm115_vm2, %v2240_v37  ;;  %4054 = vmatmul.mubr.msk.bf16.vlgmr.msra.gmra.mrb[72].mxu1 %vm115_vm2, %v2240_v37 }
 0x55d   :  { %4058 = vmatpush3.bf16.msra.mxu0 %v4977_v25  ;;  %4066 = vmatpush3.bf16.msra.mxu1 %v4983_v26 }
 0x55e   :  { %v4344_v21 = vpop.eup %4343  ;;  %4059 = vmatprep.subr.bf16.mxu0 %v4447_v1  ;;  %4067 = vmatprep.subr.bf16.mxu1 %v4447_v1 }
 0x55f   :  { %v2230_v39 = vmul.f32 %v4344_v21, %v2229_v34  ;;  %4061 = vmatprep.mubr.msk.bf16.mxu0 %vm4448_vm0, %v4447_v1  ;;  %4069 = vmatprep.mubr.msk.bf16.mxu1 %vm4448_vm0, %v4447_v1 }
 0x561   :  { %4060 = vmatpush3.bf16.msra.mxu0 %v4996_v44  ;;  %4068 = vmatpush3.bf16.msra.mxu1 %v5002_v45  ;;  %v5103_v40 = vadd.f32 %v2231_v38, %v2230_v39  ;;  %v2391_v38 = vld [vmem:[#allocation2 + $0x44] sm:$0x3] }
 0x562   :  { %4073 = vmatprep.subr.bf16.mxu0 %v4447_v1  ;;  %4081 = vmatprep.subr.bf16.mxu1 %v4447_v1 }
 0x563   :  { %v2395_v16 = vpack.c.bf16 %v5103_v40, %v5103_v40 }
 0x564   :  { %4062 = vmatmul.mubr.msk.bf16.vlgmr.msra.gmra.mrb[76].mxu0 %vm115_vm2, %v2240_v37 }
 0x565   :  { %4070 = vmatmul.mubr.msk.bf16.vlgmr.msra.gmra.mrb[76].mxu1 %vm115_vm2, %v2395_v16  ;;  %4074 = vmatpush3.bf16.msra.mxu0 %v5016_v48 }
 0x566   :  { %4082 = vmatpush3.bf16.msra.mxu1 %v5022_v50  ;;  %4075 = vmatprep.subr.bf16.mxu0 %v4447_v1 }
 0x567   :  { %4083 = vmatprep.subr.bf16.mxu1 %v4447_v1  ;;  %4077 = vmatprep.mubr.msk.bf16.mxu0 %vm4448_vm0, %v4447_v1 }
 0x568   :  { %4085 = vmatprep.mubr.msk.bf16.mxu1 %vm4448_vm0, %v4447_v1 }
 0x569   :  { %4076 = vmatpush3.bf16.msra.mxu0 %v5034_v51 }
 0x56a   :  { %4084 = vmatpush3.bf16.msra.mxu1 %v5040_v52  ;;  %4089 = vmatprep.subr.bf16.mxu0 %v4447_v1 }
 0x56b   :  { %4097 = vmatprep.subr.bf16.mxu1 %v4447_v1 }
 0x56c   :  { %4078 = vmatmul.mubr.msk.bf16.vlgmr.msra.gmra.mrb[80].mxu0 %vm115_vm2, %v2395_v16 }
 0x56d   :  { %4086 = vmatmul.mubr.msk.bf16.vlgmr.msra.gmra.mrb[80].mxu1 %vm115_vm2, %v2395_v16  ;;  %4090 = vmatpush3.bf16.msra.mxu0 %v5050_v54 }
 0x56e   :  { %4098 = vmatpush3.bf16.msra.mxu1 %v5056_v55  ;;  %4091 = vmatprep.subr.bf16.mxu0 %v4447_v1 }
 0x56f   :  { %4099 = vmatprep.subr.bf16.mxu1 %v4447_v1  ;;  %4093 = vmatprep.mubr.msk.bf16.mxu0 %vm4448_vm0, %v4447_v1 }
 0x570   :  { %4101 = vmatprep.mubr.msk.bf16.mxu1 %vm4448_vm0, %v4447_v1 }
 0x571   :  { %4092 = vmatpush3.bf16.msra.mxu0 %v5068_v56 }
 0x572   :  { %4100 = vmatpush3.bf16.msra.mxu1 %v5074_v57  ;;  %4105 = vmatprep.subr.bf16.mxu0 %v4447_v1 }
 0x573   :  { %4113 = vmatprep.subr.bf16.mxu1 %v4447_v1 }
 0x62f   :  { %v2278_v18 = vpop.f32.mrb[72].mxu0  ;;  %v2318_v15 = vpop.f32.mrb[72].mxu1 }
 0x630   :  { %v2279_v31 = vadd.f32 %v5140_v30, %v2278_v18  ;;  %v4047_v22 = vpop.f32.mrb[73].mxu0  ;;  %v4055_v24 = vpop.f32.mrb[73].mxu1  ;;  %v2319_v41 = vadd.f32 %v5146_v49, %v2318_v15 }
 0x631   :  { %v2281_v42 = vpop.f32.mrb[74].mxu0  ;;  %v2321_v47 = vpop.f32.mrb[74].mxu1 }
 0x632   :  { %v2364_v58 = vadd.f32 %v2279_v31, %v2235_v27  ;;  %v4048_v59 = vpop.f32.mrb[75].mxu0  ;;  %v4056_v61 = vpop.f32.mrb[75].mxu1  ;;  %v2371_v3 = vadd.f32 %v2319_v41, %v2237_v2  ;;  %v2239_v2 = vld [vmem:[#allocation2 + $0x2a] sm:$0x3] }
 0x634   :  { %v3511_v62 = vmul.f32 -1.442695, %v2364_v58  ;;  %v3512_v0 = vmul.f32 -1.442695, %v2371_v3  ;;  %v5164_v58 = vld [vmem:[%s5332_s4 + $0x2] ss:$0 sm:$0xff] }
 0x636   :  { %4345 = vpow2.f32 %v3511_v62 }
 0x637   :  { %v2358_v4 = vpop.f32.mrb[76].mxu0  ;;  %4347 = vpow2.f32 %v3512_v0  ;;  %v5170_v0 = vld [vmem:[%s5332_s4 + $0x5] ss:$0 sm:$0xff] }
 0x638   :  { %v2433_v63 = vpop.f32.mrb[76].mxu1  ;;  %v4063_v5 = vpop.f32.mrb[77].mxu0  ;;  %v2359_v59 = vadd.f32 %v5164_v58, %v2358_v4 }
 0x639   :  { %v2434_v7 = vadd.f32 %v5152_v6, %v2433_v63  ;;  %v4071_v9 = vpop.f32.mrb[77].mxu1  ;;  %v2361_v10 = vpop.f32.mrb[78].mxu0 }
 0x63a   :  { %v2436_v12 = vpop.f32.mrb[78].mxu1  ;;  %v4064_v14 = vpop.f32.mrb[79].mxu0 }
 0x63b   :  { %v2519_v33 = vadd.f32 %v2434_v7, %v2388_v11  ;;  %v4072_v28 = vpop.f32.mrb[79].mxu1  ;;  %v2394_v11 = vld [vmem:[#allocation2 + $0x54] sm:$0x3] }
 0x63d   :  { %v3516_v20 = vmul.f32 -1.442695, %v2519_v33 }
 0x63f   :  { %4349 = vpow2.f32 %v3516_v20  ;;  %v2473_v17 = vpop.f32.mrb[80].mxu0 }
 0x640   :  { %v4346_v13 = vpop.eup %4345  ;;  %v2474_v36 = vadd.f32 %v5158_v29, %v2473_v17  ;;  %v2513_v37 = vpop.f32.mrb[80].mxu1 }
 0x641   :  { %v4079_v34 = vpop.f32.mrb[81].mxu0  ;;  %v2368_v21 = vadd.f32 1.0, %v4346_v13  ;;  %v4087_v39 = vpop.f32.mrb[81].mxu1  ;;  %v2514_v7 = vadd.f32 %v5170_v0, %v2513_v37 }
 0x642   :  { %v2476_v16 = vpop.f32.mrb[82].mxu0  ;;  %v2526_v18 = vadd.f32 %v2474_v36, %v2391_v38  ;;  %v2516_v15 = vpop.f32.mrb[82].mxu1 }
 0x643   :  { %v4080_v31 = vpop.f32.mrb[83].mxu0  ;;  %4351 = vrcp.f32 %v2368_v21  ;;  %v4088_v22 = vpop.f32.mrb[83].mxu1 }
 0x644   :  { %v3517_v24 = vmul.f32 -1.442695, %v2526_v18  ;;  %v4348_v27 = vpop.eup %4347  ;;  %v2542_v22 = vld [vmem:[#allocation2 + $0xc] sm:$0x3] }
 0x645   :  { %v2375_v42 = vadd.f32 1.0, %v4348_v27 }
 0x646   :  { %4353 = vpow2.f32 %v3517_v24 }
 0x649   :  { %v4350_v41 = vpop.eup %4349 }
 0x64a   :  { %v2523_v47 = vadd.f32 1.0, %v4350_v41 }
 0x64c   :  { %4355 = vrcp.f32 %v2523_v47 }
 0x64d   :  { %v4352_v61 = vpop.eup %4351  ;;  %4357 = vrcp.f32 %v2375_v42 }
 0x64e   :  { %v2378_v62 = vmul.f32 %v4352_v61, %v2359_v59 }
 0x650   :  { %v4354_v3 = vpop.eup %4353  ;;  %v2379_v63 = vadd.f32 %v2378_v62, %v2239_v2 }
 0x651   :  { %v2530_v5 = vadd.f32 1.0, %v4354_v3 }
 0x652   :  { %4359 = vtanh.f32 %v2379_v63 }
 0x653   :  { %4361 = vrcp.f32 %v2530_v5 }
 0x656   :  { %v4356_v9 = vpop.eup %4355 }
 0x657   :  { %v2533_v10 = vmul.f32 %v4356_v9, %v2514_v7  ;;  %v4358_v4 = vpop.eup %4357 }
 0x658   :  { %v2381_v14 = vsub.f32 1.0, %v4358_v4  ;;  %v2383_v28 = vmul.f32 %v4358_v4, %v5086_v35 }
 0x659   :  { %v2534_v12 = vadd.f32 %v2533_v10, %v2394_v11  ;;  %v2695_v10 = vld [vmem:[#allocation2 + $0x32] sm:$0x3] }
 0x65b   :  { %4363 = vtanh.f32 %v2534_v12 }
 0x65c   :  { %v4360_v33 = vpop.eup %4359 }
 0x65d   :  { %v2382_v20 = vmul.f32 %v4360_v33, %v2381_v14  ;;  %v4362_v13 = vpop.eup %4361 }
 0x65e   :  { %v2536_v37 = vsub.f32 1.0, %v4362_v13  ;;  %v2538_v21 = vmul.f32 %v4362_v13, %v5103_v40 }
 0x65f   :  { %v5174_v17 = vadd.f32 %v2383_v28, %v2382_v20 }
 0x661   :  { %v2547_v36 = vpack.c.bf16 %v5174_v17, %v5174_v17 }
 0x663   :  { %4094 = vmatmul.mubr.msk.bf16.vlgmr.msra.gmra.mrb[84].mxu0 %vm115_vm2, %v2547_v36  ;;  %4102 = vmatmul.mubr.msk.bf16.vlgmr.msra.gmra.mrb[84].mxu1 %vm115_vm2, %v2547_v36 }
 0x664   :  { %4106 = vmatpush3.bf16.msra.mxu0 %v4977_v25  ;;  %4114 = vmatpush3.bf16.msra.mxu1 %v4983_v26 }
 0x665   :  { %v4364_v34 = vpop.eup %4363  ;;  %4107 = vmatprep.subr.bf16.mxu0 %v4447_v1  ;;  %4115 = vmatprep.subr.bf16.mxu1 %v4447_v1 }
 0x666   :  { %v2537_v38 = vmul.f32 %v4364_v34, %v2536_v37  ;;  %4109 = vmatprep.mubr.msk.bf16.mxu0 %vm4448_vm0, %v4447_v1  ;;  %4117 = vmatprep.mubr.msk.bf16.mxu1 %vm4448_vm0, %v4447_v1 }
 0x668   :  { %4108 = vmatpush3.bf16.msra.mxu0 %v4996_v44  ;;  %4116 = vmatpush3.bf16.msra.mxu1 %v5002_v45  ;;  %v5191_v39 = vadd.f32 %v2538_v21, %v2537_v38  ;;  %v2698_v21 = vld [vmem:[#allocation2 + $0x42] sm:$0x3] }
 0x669   :  { %4121 = vmatprep.subr.bf16.mxu0 %v4447_v1  ;;  %4129 = vmatprep.subr.bf16.mxu1 %v4447_v1 }
 0x66a   :  { %v2702_v16 = vpack.c.bf16 %v5191_v39, %v5191_v39 }
 0x66b   :  { %4110 = vmatmul.mubr.msk.bf16.vlgmr.msra.gmra.mrb[88].mxu0 %vm115_vm2, %v2547_v36 }
 0x66c   :  { %4118 = vmatmul.mubr.msk.bf16.vlgmr.msra.gmra.mrb[88].mxu1 %vm115_vm2, %v2702_v16  ;;  %4122 = vmatpush3.bf16.msra.mxu0 %v5016_v48 }
 0x66d   :  { %4130 = vmatpush3.bf16.msra.mxu1 %v5022_v50  ;;  %4123 = vmatprep.subr.bf16.mxu0 %v4447_v1 }
 0x66e   :  { %4131 = vmatprep.subr.bf16.mxu1 %v4447_v1  ;;  %4125 = vmatprep.mubr.msk.bf16.mxu0 %vm4448_vm0, %v4447_v1 }
 0x66f   :  { %4133 = vmatprep.mubr.msk.bf16.mxu1 %vm4448_vm0, %v4447_v1 }
 0x670   :  { %4124 = vmatpush3.bf16.msra.mxu0 %v5034_v51 }
 0x671   :  { %4132 = vmatpush3.bf16.msra.mxu1 %v5040_v52  ;;  %4137 = vmatprep.subr.bf16.mxu0 %v4447_v1 }
 0x672   :  { %4145 = vmatprep.subr.bf16.mxu1 %v4447_v1 }
 0x673   :  { %4126 = vmatmul.mubr.msk.bf16.vlgmr.msra.gmra.mrb[92].mxu0 %vm115_vm2, %v2702_v16 }
 0x674   :  { %4134 = vmatmul.mubr.msk.bf16.vlgmr.msra.gmra.mrb[92].mxu1 %vm115_vm2, %v2702_v16  ;;  %4138 = vmatpush3.bf16.msra.mxu0 %v5050_v54 }
 0x675   :  { %4146 = vmatpush3.bf16.msra.mxu1 %v5056_v55  ;;  %4139 = vmatprep.subr.bf16.mxu0 %v4447_v1 }
 0x676   :  { %4147 = vmatprep.subr.bf16.mxu1 %v4447_v1  ;;  %4141 = vmatprep.mubr.msk.bf16.mxu0 %vm4448_vm0, %v4447_v1 }
 0x677   :  { %4149 = vmatprep.mubr.msk.bf16.mxu1 %vm4448_vm0, %v4447_v1 }
 0x678   :  { %4140 = vmatpush3.bf16.msra.mxu0 %v5068_v56 }
 0x679   :  { %4148 = vmatpush3.bf16.msra.mxu1 %v5074_v57  ;;  %4153 = vmatprep.subr.bf16.mxu0 %v4447_v1  ;;  %v2544_v57 = vld [vmem:[#allocation2 + $0x1c] sm:$0x3] }
 0x67a   :  { %4161 = vmatprep.subr.bf16.mxu1 %v4447_v1 }
 0x736   :  { %v2585_v54 = vpop.f32.mrb[84].mxu0  ;;  %v2625_v55 = vpop.f32.mrb[84].mxu1 }
 0x737   :  { %v2586_v18 = vadd.f32 %v5140_v30, %v2585_v54  ;;  %v4095_v15 = vpop.f32.mrb[85].mxu0  ;;  %v4103_v31 = vpop.f32.mrb[85].mxu1  ;;  %v2626_v24 = vadd.f32 %v5146_v49, %v2625_v55 }
 0x738   :  { %v2588_v27 = vpop.f32.mrb[86].mxu0  ;;  %v2628_v41 = vpop.f32.mrb[86].mxu1 }
 0x739   :  { %v2671_v42 = vadd.f32 %v2586_v18, %v2542_v22  ;;  %v4096_v47 = vpop.f32.mrb[87].mxu0  ;;  %v4104_v56 = vpop.f32.mrb[87].mxu1  ;;  %v2678_v61 = vadd.f32 %v2626_v24, %v2544_v57 }
 0x73b   :  { %v3521_v59 = vmul.f32 -1.442695, %v2671_v42  ;;  %v3522_v63 = vmul.f32 -1.442695, %v2678_v61 }
 0x73d   :  { %4365 = vpow2.f32 %v3521_v59  ;;  %v2546_v59 = vld [vmem:[#allocation2 + $0x2c] sm:$0x3] }
 0x73e   :  { %v2665_v62 = vpop.f32.mrb[88].mxu0  ;;  %4367 = vpow2.f32 %v3522_v63 }
 0x73f   :  { %v2740_v2 = vpop.f32.mrb[88].mxu1  ;;  %v4111_v3 = vpop.f32.mrb[89].mxu0  ;;  %v2666_v42 = vadd.f32 %v5164_v58, %v2665_v62 }
 0x740   :  { %v2741_v5 = vadd.f32 %v5152_v6, %v2740_v2  ;;  %v4119_v7 = vpop.f32.mrb[89].mxu1  ;;  %v2668_v9 = vpop.f32.mrb[90].mxu0 }
 0x741   :  { %v2743_v4 = vpop.f32.mrb[90].mxu1  ;;  %v4112_v11 = vpop.f32.mrb[91].mxu0  ;;  %v2701_v9 = vld [vmem:[#allocation2 + $0x52] sm:$0x3] }
 0x742   :  { %v2826_v12 = vadd.f32 %v2741_v5, %v2695_v10  ;;  %v4120_v14 = vpop.f32.mrb[91].mxu1 }
 0x744   :  { %v3526_v33 = vmul.f32 -1.442695, %v2826_v12 }
 0x746   :  { %4369 = vpow2.f32 %v3526_v33  ;;  %v2780_v28 = vpop.f32.mrb[92].mxu0 }
 0x747   :  { %v4366_v20 = vpop.eup %4365  ;;  %v2781_v13 = vadd.f32 %v5158_v29, %v2780_v28  ;;  %v2820_v36 = vpop.f32.mrb[92].mxu1 }
 0x748   :  { %v4127_v37 = vpop.f32.mrb[93].mxu0  ;;  %v2675_v34 = vadd.f32 1.0, %v4366_v20  ;;  %v4135_v38 = vpop.f32.mrb[93].mxu1  ;;  %v2821_v3 = vadd.f32 %v5170_v0, %v2820_v36 }
 0x749   :  { %v2783_v16 = vpop.f32.mrb[94].mxu0  ;;  %v2833_v54 = vadd.f32 %v2781_v13, %v2698_v21  ;;  %v2823_v55 = vpop.f32.mrb[94].mxu1 }
 0x74a   :  { %v4128_v18 = vpop.f32.mrb[95].mxu0  ;;  %4371 = vrcp.f32 %v2675_v34  ;;  %v4136_v15 = vpop.f32.mrb[95].mxu1  ;;  %v2849_v16 = vld [vmem:[#allocation2 + $0xe] sm:$0x3] }
 0x74b   :  { %v3527_v31 = vmul.f32 -1.442695, %v2833_v54  ;;  %v4368_v22 = vpop.eup %4367 }
 0x74c   :  { %v2682_v27 = vadd.f32 1.0, %v4368_v22 }
 0x74d   :  { %4373 = vpow2.f32 %v3527_v31 }
 0x750   :  { %v4370_v24 = vpop.eup %4369 }
 0x751   :  { %v2830_v41 = vadd.f32 1.0, %v4370_v24 }
 0x753   :  { %4375 = vrcp.f32 %v2830_v41 }
 0x754   :  { %v4372_v47 = vpop.eup %4371  ;;  %4377 = vrcp.f32 %v2682_v27  ;;  %v2851_v27 = vld [vmem:[#allocation2 + $0x1e] sm:$0x3] }
 0x755   :  { %v2685_v56 = vmul.f32 %v4372_v47, %v2666_v42 }
 0x757   :  { %v4374_v57 = vpop.eup %4373  ;;  %v2686_v61 = vadd.f32 %v2685_v56, %v2546_v59 }
 0x758   :  { %v2837_v2 = vadd.f32 1.0, %v4374_v57 }
 0x759   :  { %4379 = vtanh.f32 %v2686_v61  ;;  %v3002_v61 = vld [vmem:[#allocation2 + $0x30] sm:$0x3] }
 0x75a   :  { %4381 = vrcp.f32 %v2837_v2 }
 0x75d   :  { %v4376_v63 = vpop.eup %4375 }
 0x75e   :  { %v2840_v5 = vmul.f32 %v4376_v63, %v2821_v3  ;;  %v4378_v7 = vpop.eup %4377 }
 0x75f   :  { %v2688_v4 = vsub.f32 1.0, %v4378_v7  ;;  %v2690_v11 = vmul.f32 %v4378_v7, %v5174_v17 }
 0x760   :  { %v2841_v10 = vadd.f32 %v2840_v5, %v2701_v9 }
 0x762   :  { %4383 = vtanh.f32 %v2841_v10 }
 0x763   :  { %v4380_v62 = vpop.eup %4379 }
 0x764   :  { %v2689_v12 = vmul.f32 %v4380_v62, %v2688_v4  ;;  %v4382_v33 = vpop.eup %4381 }
 0x765   :  { %v2843_v20 = vsub.f32 1.0, %v4382_v33  ;;  %v2845_v36 = vmul.f32 %v4382_v33, %v5191_v39 }
 0x766   :  { %v5232_v14 = vadd.f32 %v2690_v11, %v2689_v12  ;;  %v3005_v12 = vld [vmem:[#allocation2 + $0x40] sm:$0x3] }
 0x768   :  { %v2854_v28 = vpack.c.bf16 %v5232_v14, %v5232_v14 }
 0x76a   :  { %4142 = vmatmul.mubr.msk.bf16.vlgmr.msra.gmra.mrb[96].mxu0 %vm115_vm2, %v2854_v28  ;;  %4150 = vmatmul.mubr.msk.bf16.vlgmr.msra.gmra.mrb[96].mxu1 %vm115_vm2, %v2854_v28 }
 0x76b   :  { %4154 = vmatpush3.bf16.msra.mxu0 %v4977_v25  ;;  %4162 = vmatpush3.bf16.msra.mxu1 %v4983_v26 }
 0x76c   :  { %v4384_v13 = vpop.eup %4383  ;;  %4155 = vmatprep.subr.bf16.mxu0 %v4447_v1  ;;  %4163 = vmatprep.subr.bf16.mxu1 %v4447_v1 }
 0x76d   :  { %v2844_v37 = vmul.f32 %v4384_v13, %v2843_v20  ;;  %4157 = vmatprep.mubr.msk.bf16.mxu0 %vm4448_vm0, %v4447_v1  ;;  %4165 = vmatprep.mubr.msk.bf16.mxu1 %vm4448_vm0, %v4447_v1 }
 0x76f   :  { %4156 = vmatpush3.bf16.msra.mxu0 %v4996_v44  ;;  %4164 = vmatpush3.bf16.msra.mxu1 %v5002_v45  ;;  %v5249_v25 = vadd.f32 %v2845_v36, %v2844_v37  ;;  %v4241_v44 = vld [vmem:[%s5333_s5] sm:$0xff]   ;;  %v4242_v45 = vld [vmem:[%s5333_s5 + $0x8] sm:$0xff]  }
 0x770   :  { %4169 = vmatprep.subr.bf16.mxu0 %v4447_v1  ;;  %4177 = vmatprep.subr.bf16.mxu1 %v4447_v1 }
 0x771   :  { %v3009_v26 = vpack.c.bf16 %v5249_v25, %v5249_v25 }
 0x772   :  { %4158 = vmatmul.mubr.msk.bf16.vlgmr.msra.gmra.mrb[100].mxu0 %vm115_vm2, %v2854_v28 }
 0x773   :  { %4166 = vmatmul.mubr.msk.bf16.vlgmr.msra.gmra.mrb[100].mxu1 %vm115_vm2, %v3009_v26  ;;  %4170 = vmatpush3.bf16.msra.mxu0 %v5016_v48  ;;  %v4243_v48 = vld [vmem:[%s5333_s5 + $0x10] sm:$0xff]  }
 0x774   :  { %4178 = vmatpush3.bf16.msra.mxu1 %v5022_v50  ;;  %4171 = vmatprep.subr.bf16.mxu0 %v4447_v1  ;;  %v4244_v50 = vld [vmem:[%s5333_s5 + $0x18] sm:$0xff]  }
 0x775   :  { %4179 = vmatprep.subr.bf16.mxu1 %v4447_v1  ;;  %4173 = vmatprep.mubr.msk.bf16.mxu0 %vm4448_vm0, %v4447_v1 }
 0x776   :  { %4181 = vmatprep.mubr.msk.bf16.mxu1 %vm4448_vm0, %v4447_v1 }
 0x777   :  { %4172 = vmatpush3.bf16.msra.mxu0 %v5034_v51 }
 0x778   :  { %4180 = vmatpush3.bf16.msra.mxu1 %v5040_v52  ;;  %4185 = vmatprep.subr.bf16.mxu0 %v4447_v1 }
 0x779   :  { %4193 = vmatprep.subr.bf16.mxu1 %v4447_v1 }
 0x77a   :  { %4174 = vmatmul.mubr.msk.bf16.vlgmr.msra.gmra.mrb[104].mxu0 %vm115_vm2, %v3009_v26 }
 0x77b   :  { %4182 = vmatmul.mubr.msk.bf16.vlgmr.msra.gmra.mrb[104].mxu1 %vm115_vm2, %v3009_v26  ;;  %4189 = vmatprep.mubr.msk.bf16.mxu0 %vm4448_vm0, %v4447_v1 }
 0x77c   :  { %4197 = vmatprep.mubr.msk.bf16.mxu1 %vm4448_vm0, %v4447_v1  ;;  %4194 = vmatpush3.bf16.msra.mxu1 %v4241_v44 }
 0x77d   :  { %4195 = vmatprep.subr.bf16.mxu1 %v4447_v1  ;;  %4186 = vmatpush3.bf16.msra.mxu0 %v4243_v48 }
 0x77e   :  { %4187 = vmatprep.subr.bf16.mxu0 %v4447_v1 }
 0x780   :  { %4196 = vmatpush3.bf16.msra.mxu1 %v4242_v45 }
 0x781   :  { %4188 = vmatpush3.bf16.msra.mxu0 %v4244_v50 }
 0x83d   :  { %v2892_v51 = vpop.f32.mrb[96].mxu0  ;;  %v2932_v52 = vpop.f32.mrb[96].mxu1 }
 0x83e   :  { %v2893_v34 = vadd.f32 %v5140_v30, %v2892_v51  ;;  %v4143_v21 = vpop.f32.mrb[97].mxu0  ;;  %v4151_v38 = vpop.f32.mrb[97].mxu1  ;;  %v2933_v54 = vadd.f32 %v5146_v49, %v2932_v52  ;;  %v2853_v52 = vld [vmem:[#allocation2 + $0x2e] sm:$0x3] }
 0x83f   :  { %v2895_v55 = vpop.f32.mrb[98].mxu0  ;;  %v2935_v18 = vpop.f32.mrb[98].mxu1 }
 0x840   :  { %v2978_v15 = vadd.f32 %v2893_v34, %v2849_v16  ;;  %v4144_v31 = vpop.f32.mrb[99].mxu0  ;;  %v4152_v22 = vpop.f32.mrb[99].mxu1  ;;  %v2985_v41 = vadd.f32 %v2933_v54, %v2851_v27  ;;  %v1147_v16 = vmax.f32 %v4795_v53, %v4852_v23 }
 0x841   :  { %v3008_v31 = vld [vmem:[#allocation2 + $0x50] sm:$0x3] }
 0x842   :  { %v3531_v24 = vmul.f32 -1.442695, %v2978_v15  ;;  %v3532_v56 = vmul.f32 -1.442695, %v2985_v41  ;;  %v1458_v18 = vmax.f32 %v1147_v16, %v4910_v8  ;;  %v1304_v8 = vmax.f32 %v4811_v60, %v4869_v43 }
 0x844   :  { %4385 = vpow2.f32 %v3531_v24  ;;  %v1769_v24 = vmax.f32 %v1458_v18, %v4968_v19 }
 0x845   :  { %v2972_v1 = vpop.f32.mrb[100].mxu0  ;;  %4387 = vpow2.f32 %v3532_v56  ;;  %v1615_v56 = vmax.f32 %v1304_v8, %v4927_v32 }
 0x846   :  { %v3047_v42 = vpop.f32.mrb[100].mxu1  ;;  %v4159_v47 = vpop.f32.mrb[101].mxu0  ;;  %v2973_v50 = vadd.f32 %v5164_v58, %v2972_v1  ;;  %v2078_v41 = vmax.f32 %v1769_v24, %v5086_v35 }
 0x847   :  { %v3048_v30 = vadd.f32 %v5152_v6, %v3047_v42  ;;  %v4167_v59 = vpop.f32.mrb[101].mxu1  ;;  %v2975_v57 = vpop.f32.mrb[102].mxu0 }
 0x848   :  { %v3050_v2 = vpop.f32.mrb[102].mxu1  ;;  %v4160_v49 = vpop.f32.mrb[103].mxu0  ;;  %v2385_v53 = vmax.f32 %v2078_v41, %v5174_v17  ;;  %v1926_v59 = vmax.f32 %v1615_v56, %v5005_v46 }
 0x849   :  { %v3133_v3 = vadd.f32 %v3048_v30, %v3002_v61  ;;  %v4168_v63 = vpop.f32.mrb[103].mxu1 }
 0x84a   :  { %v2233_v61 = vmax.f32 %v1926_v59, %v5103_v40 }
 0x84b   :  { %v3536_v5 = vmul.f32 -1.442695, %v3133_v3 }
 0x84c   :  { %v2540_v49 = vmax.f32 %v2233_v61, %v5191_v39 }
 0x84d   :  { %4389 = vpow2.f32 %v3536_v5  ;;  %v3087_v7 = vpop.f32.mrb[104].mxu0 }
 0x84e   :  { %v4386_v9 = vpop.eup %4385  ;;  %v3088_v10 = vadd.f32 %v5158_v29, %v3087_v7  ;;  %v3127_v4 = vpop.f32.mrb[104].mxu1  ;;  %v2847_v43 = vmax.f32 %v2540_v49, %v5249_v25 }
 0x84f   :  { %v4175_v62 = vpop.f32.mrb[105].mxu0  ;;  %v2982_v11 = vadd.f32 1.0, %v4386_v9  ;;  %v4183_v33 = vpop.f32.mrb[105].mxu1  ;;  %v3128_v54 = vadd.f32 %v5170_v0, %v3127_v4  ;;  %v2692_v0 = vmax.f32 %v2385_v53, %v5232_v14  ;;  %v3548_v9 = vld [vmem:[%s5334_s6] ss:$0 sm:$0xff] }
 0x850   :  { %v3090_v6 = vpop.f32.mrb[106].mxu0  ;;  %v3140_v28 = vadd.f32 %v3088_v10, %v3005_v12  ;;  %v3130_v20 = vpop.f32.mrb[106].mxu1 }
 0x851   :  { %v4176_v13 = vpop.f32.mrb[107].mxu0  ;;  %4391 = vrcp.f32 %v2982_v11  ;;  %v4184_v36 = vpop.f32.mrb[107].mxu1 }
 0x852   :  { %v3537_v37 = vmul.f32 -1.442695, %v3140_v28  ;;  %v4388_v26 = vpop.eup %4387 }
 0x853   :  { %v2989_v45 = vadd.f32 1.0, %v4388_v26 }
 0x854   :  { %4393 = vpow2.f32 %v3537_v37 }
 0x857   :  { %v4390_v44 = vpop.eup %4389 }
 0x858   :  { %v3137_v48 = vadd.f32 1.0, %v4390_v44 }
 0x85a   :  { %4395 = vrcp.f32 %v3137_v48 }
 0x85b   :  { %v4392_v29 = vpop.eup %4391  ;;  %4397 = vrcp.f32 %v2989_v45 }
 0x85c   :  { %v2992_v51 = vmul.f32 %v4392_v29, %v2973_v50 }
 0x85e   :  { %v4394_v34 = vpop.eup %4393  ;;  %v2993_v21 = vadd.f32 %v2992_v51, %v2853_v52 }
 0x85f   :  { %v3144_v38 = vadd.f32 1.0, %v4394_v34 }
 0x860   :  { %4399 = vtanh.f32 %v2993_v21 }
 0x861   :  { %4401 = vrcp.f32 %v3144_v38 }
 0x864   :  { %v4396_v55 = vpop.eup %4395 }
 0x865   :  { %v3147_v15 = vmul.f32 %v4396_v55, %v3128_v54  ;;  %v4398_v58 = vpop.eup %4397 }
 0x866   :  { %v2995_v27 = vsub.f32 1.0, %v4398_v58  ;;  %v2997_v23 = vmul.f32 %v4398_v58, %v5232_v14 }
 0x867   :  { %v3148_v22 = vadd.f32 %v3147_v15, %v3008_v31 }
 0x869   :  { %4403 = vtanh.f32 %v3148_v22 }
 0x86a   :  { %v4400_v1 = vpop.eup %4399 }
 0x86b   :  { %v2996_v42 = vmul.f32 %v4400_v1, %v2995_v27  ;;  %v4402_v30 = vpop.eup %4401 }
 0x86c   :  { %v3150_v35 = vsub.f32 1.0, %v4402_v30  ;;  %v3152_v60 = vmul.f32 %v4402_v30, %v5249_v25 }
 0x86d   :  { %v2998_v47 = vadd.f32 %v2997_v23, %v2996_v42 }
 0x86f   :  { %v2999_v19 = vmax.f32 %v2692_v0, %v2998_v47 }
 0x871   :  { %v3155_v57 = vpack.c.bf16 %v2999_v19, %v2999_v19 }
 0x873   :  { %v4404_v2 = vpop.eup %4403  ;;  %4198 = vmatmul.mubr.msk.bf16.vlgmr.msra.gmra.mrb[108].mxu1 %vm115_vm2, %v3155_v57 }
 0x874   :  { %v3151_v17 = vmul.f32 %v4404_v2, %v3150_v35 }
 0x876   :  { %v3153_v14 = vadd.f32 %v3152_v60, %v3151_v17 }
 0x878   :  { %v3154_v32 = vmax.f32 %v2847_v43, %v3153_v14 }
 0x87a   :  { %v3160_v3 = vpack.c.bf16 %v3154_v32, %v3154_v32 }
 0x87c   :  { %4190 = vmatmul.mubr.msk.bf16.vlgmr.msra.gmra.mrb[108].mxu0 %vm115_vm2, %v3160_v3 }
 0x946   :  { %v3270_v46 = vpop.f32.mrb[108].mxu1 }
 0x947   :  { %v4199_v63 = vpop.f32.mrb[109].mxu1 }
 0x948   :  { %v3273_v5 = vpop.f32.mrb[110].mxu1 }
 0x949   :  { %v4200_v7 = vpop.f32.mrb[111].mxu1 }
 0x94f   :  { %v3215_v40 = vpop.f32.mrb[108].mxu0 }
 0x950   :  { %v3271_v39 = vadd.f32 %v3270_v46, %v3215_v40  ;;  %v4191_v10 = vpop.f32.mrb[109].mxu0 }
 0x951   :  { %v3218_v4 = vpop.f32.mrb[110].mxu0 }
 0x952   :  { %v3283_v25 = vadd.f32 %v3548_v9, %v3271_v39  ;;  %v4192_v62 = vpop.f32.mrb[111].mxu0 }
 0x954   :  { %3285 = vst.msk [vmem:[#allocation3] sm:$0x3] %vm3284_vm3, %v3283_v25 }
 0x955   :  { %4434 = shalt.err (!%p4431_p4)
}
 0x956   :  { %s4435_s6 = scalar_lea.hbm %s5335_s7, 32 }
 0x957   :  { %p4436_p5 = scmp.ne.s32.totalorder %s5335_s7, %s4435_s6  ;;  %p4439_p6 = scmp.lt.u32.totalorder %s4435_s6, %s5335_s7 }
 0x959   :  { %p4441_p7 = pnand %p4439_p6, %p4436_p5 }
 0x95b   :  { %4444 = shalt.err (!%p4441_p7)
}
 0x95c   :  { %3295 = dma.vmem_to_hbm [thread:$0]  %s3293_s18, 32, %s5335_s7, [#allocation4]  }
 0x95d   :  { %4445 = dma.done.wait [#allocation4], 32  }
 0x95e   :  { %4446 = vsyncadd [#allocation4], 4294967264 }
 0x95f   :  { %3299 = vsyncpa [#allocation4], 1 }

// kernel: salary_rnn_forward.2
= control target key start
LH: loop header
LB: loop body
LE: loop exit
PB: predicated region body
PF: predicated region fallthrough
CT: control target
= control target key end

     0   :  { %v5364_v0 = vmov 0.0   ;;  %vm5365_vm0 = vmmov 0   ;;  %vm39_vm1 = vcmask 130048   ;;  %v5366_v17 = vmov 0   ;;  %s5367_s22 = smov 32   ;;  %s6262_s1 = inlined_call_operand.vmem [shape: bf16[2,3,16,32], index: 1, kind: input, shape index: {}]   ;;  %s6263_s0 = inlined_call_operand.vmem [shape: f32[16,16], index: 0, kind: input, shape index: {}]   ;;  %s6264_s2 = inlined_call_operand.vmem [shape: bf16[2,3,32,32], index: 2, kind: input, shape index: {}]   ;;  %s6265_s3 = inlined_call_operand.vmem [shape: f32[2,3,1,32], index: 3, kind: input, shape index: {}]   ;;  %s6266_s4 = inlined_call_operand.vmem [shape: f32[2,3,1,32], index: 4, kind: input, shape index: {}]   ;;  %s6267_s5 = inlined_call_operand.vmem [shape: f32[8,2,64], index: 5, kind: output, shape index: {}]  }
   0x1   :  { %4678 = vmatprep.subr.bf16.mxu0 %v5364_v0  ;;  %4684 = vmatprep.subr.bf16.mxu1 %v5364_v0  ;;  %v5102_v1 = vld [vmem:[%s6262_s1] sm:$0xff]   ;;  %v5103_v2 = vld [vmem:[%s6262_s1 + $0x8] sm:$0xff]   ;;  %v5104_v6 = vld [vmem:[%s6262_s1 + $0x10] sm:$0xff]   ;;  %vm84_vm2 = vcmask 261120   ;;  %vm616_vm3 = vcmask 254976   ;;  %vm850_vm4 = vcmask 517376  }
   0x2   :  { %4680 = vmatprep.mubr.msk.bf16.mxu0 %vm5365_vm0, %v5364_v0  ;;  %4686 = vmatprep.mubr.msk.bf16.mxu1 %vm5365_vm0, %v5364_v0  ;;  %v21_v3 = vld [vmem:[%s6263_s0] sm:$0xff]  ;;  %v22_v4 = vld [vmem:[%s6263_s0 + $0x8] sm:$0xff]  ;;  %v5105_v7 = vld [vmem:[%s6262_s1 + $0x18] sm:$0xff]  }
   0x3   :  { %4679 = vmatpush3.bf16.msra.mxu0 %v5102_v1  ;;  %4685 = vmatpush3.bf16.msra.mxu1 %v5103_v2  ;;  %v23_v5 = vpack.c.bf16 %v22_v4, %v21_v3  ;;  %v5106_v8 = vld [vmem:[%s6262_s1 + $0x20] sm:$0xff]   ;;  %v5107_v9 = vld [vmem:[%s6262_s1 + $0x28] sm:$0xff]   ;;  %v5109_v11 = vld [vmem:[%s6264_s2 + $0x10] sm:$0xff]  }
   0x4   :  { %4690 = vmatprep.subr.bf16.mxu0 %v5364_v0  ;;  %4696 = vmatprep.subr.bf16.mxu1 %v5364_v0  ;;  %v5108_v10 = vld [vmem:[%s6264_s2] sm:$0xff]   ;;  %v5110_v12 = vld [vmem:[%s6264_s2 + $0x8] sm:$0xff]   ;;  %v5111_v13 = vld [vmem:[%s6264_s2 + $0x18] sm:$0xff]  }
   0x5   :  { %v5112_v14 = vld [vmem:[%s6264_s2 + $0x20] sm:$0xff]   ;;  %v5113_v15 = vld [vmem:[%s6264_s2 + $0x30] sm:$0xff]   ;;  %v5114_v16 = vld [vmem:[%s6264_s2 + $0x28] sm:$0xff]  }
   0x6   :  { %4681 = vmatmul.mubr.msk.bf16.vlgmr.msra.gmra.mrb[0].mxu0 %vm39_vm1, %v23_v5  ;;  %4687 = vmatmul.mubr.msk.bf16.vlgmr.msra.gmra.mrb[0].mxu1 %vm39_vm1, %v23_v5  ;;  %v5115_v18 = vld [vmem:[%s6264_s2 + $0x38] sm:$0xff]   ;;  %v5116_v19 = vld [vmem:[%s6264_s2 + $0x40] sm:$0xff]   ;;  %v5118_v20 = vld [vmem:[%s6264_s2 + $0x50] sm:$0xff]  }
   0x7   :  { %4691 = vmatpush3.bf16.msra.mxu0 %v5104_v6  ;;  %4697 = vmatpush3.bf16.msra.mxu1 %v5105_v7  ;;  %v5117_v21 = vld [vmem:[%s6264_s2 + $0x48] sm:$0xff]   ;;  %v5119_v22 = vld [vmem:[%s6264_s2 + $0x58] sm:$0xff]   ;;  %v5120_v23 = vld [vmem:[%s6264_s2] sm:$0xff]  }
   0x8   :  { %4692 = vmatprep.mubr.msk.bf16.mxu0 %vm5365_vm0, %v5364_v0  ;;  %4698 = vmatprep.mubr.msk.bf16.mxu1 %vm5365_vm0, %v5364_v0  ;;  %v5121_v24 = vld [vmem:[%s6264_s2 + $0x10] sm:$0xff]   ;;  %v5122_v25 = vld [vmem:[%s6264_s2 + $0x8] sm:$0xff]   ;;  %v5123_v26 = vld [vmem:[%s6264_s2 + $0x18] sm:$0xff]  }
   0x9   :  { %4702 = vmatprep.subr.bf16.mxu0 %v5364_v0  ;;  %4708 = vmatprep.subr.bf16.mxu1 %v5364_v0  ;;  %v4057_v27 = vld [vmem:[%s6265_s3] ss:$0 sm:$0xff]  ;;  %v4063_v28 = vld [vmem:[%s6265_s3 + $0x1] ss:$0 sm:$0xff]  ;;  %v4069_v41 = vld [vmem:[%s6265_s3 + $0x2] ss:$0 sm:$0xff] }
   0xa   :  { %v4075_v42 = vld [vmem:[%s6265_s3 + $0x3] ss:$0 sm:$0xff]  ;;  %v4081_v55 = vld [vmem:[%s6265_s3 + $0x4] ss:$0 sm:$0xff]  ;;  %v4087_v56 = vld [vmem:[%s6265_s3 + $0x5] ss:$0 sm:$0xff] }
   0xb   :  { %v5561_v6 = vld [vmem:[%s6266_s4] ss:$0 sm:$0xff]  ;;  %v5566_v7 = vld [vmem:[%s6266_s4 + $0x1] ss:$0 sm:$0xff] }
   0xe   :  { %4693 = vmatmul.mubr.msk.bf16.vlgmr.msra.gmra.mrb[4].mxu0 %vm39_vm1, %v23_v5  ;;  %4699 = vmatmul.mubr.msk.bf16.vlgmr.msra.gmra.mrb[4].mxu1 %vm39_vm1, %v23_v5 }
   0xf   :  { %4703 = vmatpush3.bf16.msra.mxu0 %v5106_v8  ;;  %4709 = vmatpush3.bf16.msra.mxu1 %v5107_v9 }
  0x10   :  { %4704 = vmatprep.mubr.msk.bf16.mxu0 %vm5365_vm0, %v5364_v0  ;;  %4710 = vmatprep.mubr.msk.bf16.mxu1 %vm5365_vm0, %v5364_v0 }
  0x11   :  { %4714 = vmatprep.subr.bf16.mxu0 %v5364_v0  ;;  %4722 = vmatprep.subr.bf16.mxu1 %v5364_v0 }
  0x16   :  { %4705 = vmatmul.mubr.msk.bf16.vlgmr.msra.gmra.mrb[8].mxu0 %vm39_vm1, %v23_v5  ;;  %4711 = vmatmul.mubr.msk.bf16.vlgmr.msra.gmra.mrb[8].mxu1 %vm39_vm1, %v23_v5 }
  0x17   :  { %4715 = vmatpush3.bf16.msra.mxu0 %v5108_v10  ;;  %4723 = vmatpush3.bf16.msra.mxu1 %v5109_v11 }
  0x18   :  { %4716 = vmatprep.subr.bf16.mxu0 %v5364_v0  ;;  %4724 = vmatprep.subr.bf16.mxu1 %v5364_v0 }
  0x19   :  { %4718 = vmatprep.mubr.msk.bf16.mxu0 %vm5365_vm0, %v5364_v0  ;;  %4726 = vmatprep.mubr.msk.bf16.mxu1 %vm5365_vm0, %v5364_v0 }
  0x1b   :  { %4717 = vmatpush3.bf16.msra.mxu0 %v5110_v12  ;;  %4725 = vmatpush3.bf16.msra.mxu1 %v5111_v13 }
  0x1c   :  { %4730 = vmatprep.subr.bf16.mxu0 %v5364_v0  ;;  %4738 = vmatprep.subr.bf16.mxu1 %v5364_v0 }
  0x1e   :  { %4719 = vmatmul.mubr.bf16.vlgmr.msra.gmra.mrb[12].mxu0 %v5366_v17  ;;  %4727 = vmatmul.mubr.bf16.vlgmr.msra.gmra.mrb[12].mxu1 %v5366_v17 }
  0x1f   :  { %4731 = vmatpush3.bf16.msra.mxu0 %v5112_v14  ;;  %4739 = vmatpush3.bf16.msra.mxu1 %v5113_v15 }
  0x20   :  { %4732 = vmatprep.subr.bf16.mxu0 %v5364_v0  ;;  %4740 = vmatprep.subr.bf16.mxu1 %v5364_v0 }
  0x21   :  { %4734 = vmatprep.mubr.msk.bf16.mxu0 %vm5365_vm0, %v5364_v0  ;;  %4742 = vmatprep.mubr.msk.bf16.mxu1 %vm5365_vm0, %v5364_v0 }
  0x23   :  { %4733 = vmatpush3.bf16.msra.mxu0 %v5114_v16  ;;  %4741 = vmatpush3.bf16.msra.mxu1 %v5115_v18 }
  0x24   :  { %4746 = vmatprep.subr.bf16.mxu0 %v5364_v0  ;;  %4754 = vmatprep.subr.bf16.mxu1 %v5364_v0 }
  0x26   :  { %4735 = vmatmul.mubr.bf16.vlgmr.msra.gmra.mrb[16].mxu0 %v5366_v17  ;;  %4743 = vmatmul.mubr.bf16.vlgmr.msra.gmra.mrb[16].mxu1 %v5366_v17 }
  0x27   :  { %4747 = vmatpush3.bf16.msra.mxu0 %v5116_v19  ;;  %4750 = vmatprep.mubr.msk.bf16.mxu0 %vm5365_vm0, %v5364_v0 }
  0x28   :  { %4748 = vmatprep.subr.bf16.mxu0 %v5364_v0  ;;  %4755 = vmatpush3.bf16.msra.mxu1 %v5118_v20 }
  0x29   :  { %4758 = vmatprep.mubr.msk.bf16.mxu1 %vm5365_vm0, %v5364_v0  ;;  %4756 = vmatprep.subr.bf16.mxu1 %v5364_v0 }
  0x2b   :  { %4749 = vmatpush3.bf16.msra.mxu0 %v5117_v21 }
  0x2c   :  { %4762 = vmatprep.subr.bf16.mxu0 %v5364_v0  ;;  %4757 = vmatpush3.bf16.msra.mxu1 %v5119_v22 }
  0x2d   :  { %4770 = vmatprep.subr.bf16.mxu1 %v5364_v0 }
  0x2e   :  { %4751 = vmatmul.mubr.bf16.vlgmr.msra.gmra.mrb[20].mxu0 %v5366_v17 }
  0x2f   :  { %4766 = vmatprep.mubr.msk.bf16.mxu0 %vm5365_vm0, %v5364_v0  ;;  %4759 = vmatmul.mubr.bf16.vlgmr.msra.gmra.mrb[20].mxu1 %v5366_v17 }
  0x30   :  { %4774 = vmatprep.mubr.msk.bf16.mxu1 %vm5365_vm0, %v5364_v0  ;;  %4763 = vmatpush3.bf16.msra.mxu0 %v5120_v23  ;;  %v5573_v23 = vld [vmem:[%s6266_s4 + $0x3] ss:$0 sm:$0xff] }
  0x31   :  { %4771 = vmatpush3.bf16.msra.mxu1 %v5121_v24  ;;  %4764 = vmatprep.subr.bf16.mxu0 %v5364_v0 }
  0x32   :  { %4772 = vmatprep.subr.bf16.mxu1 %v5364_v0 }
  0x34   :  { %4765 = vmatpush3.bf16.msra.mxu0 %v5122_v25 }
  0x35   :  { %4773 = vmatpush3.bf16.msra.mxu1 %v5123_v26  ;;  %4778 = vmatprep.subr.bf16.mxu0 %v5364_v0 }
  0x36   :  { %4786 = vmatprep.subr.bf16.mxu1 %v5364_v0 }
  0xd9   :  { %v77_v29 = vpop.f32.mrb[0].mxu0  ;;  %v138_v31 = vpop.f32.mrb[0].mxu1 }
  0xda   :  { %v78_v30 = vadd.f32 %v4057_v27, %v77_v29  ;;  %v4682_v32 = vpop.f32.mrb[1].mxu0  ;;  %v139_v33 = vadd.f32 %v4063_v28, %v138_v31  ;;  %v4688_v34 = vpop.f32.mrb[1].mxu1 }
  0xdb   :  { %v80_v35 = vpop.f32.mrb[2].mxu0  ;;  %v141_v37 = vpop.f32.mrb[2].mxu1 }
  0xdc   :  { %85 = vst.msk [vmem:[#allocation2] sm:$0xff] %vm84_vm2, %v78_v30  ;;  %v81_v36 = vadd.f32 %v4057_v27, %v80_v35  ;;  %v4683_v38 = vpop.f32.mrb[3].mxu0  ;;  %146 = vst.msk [vmem:[#allocation2 + $0x10] sm:$0xff] %vm84_vm2, %v139_v33  ;;  %v142_v39 = vadd.f32 %v4063_v28, %v141_v37  ;;  %v4689_v40 = vpop.f32.mrb[3].mxu1  ;;  %v5579_v37 = vld [vmem:[%s6266_s4 + $0x4] ss:$0 sm:$0xff] }
  0xde   :  { %86 = vst.msk [vmem:[#allocation2 + $0x8] sm:$0xff] %vm84_vm2, %v81_v36  ;;  %147 = vst.msk [vmem:[#allocation2 + $0x18] sm:$0xff] %vm84_vm2, %v142_v39 }
  0xe1   :  { %v199_v43 = vpop.f32.mrb[4].mxu0  ;;  %v260_v45 = vpop.f32.mrb[4].mxu1 }
  0xe2   :  { %v200_v44 = vadd.f32 %v4069_v41, %v199_v43  ;;  %v4694_v46 = vpop.f32.mrb[5].mxu0  ;;  %v261_v47 = vadd.f32 %v4075_v42, %v260_v45  ;;  %v4700_v48 = vpop.f32.mrb[5].mxu1 }
  0xe3   :  { %v202_v49 = vpop.f32.mrb[6].mxu0  ;;  %v263_v51 = vpop.f32.mrb[6].mxu1  ;;  %v392_v12 = vld [vmem:[#allocation2] sm:$0x3]  ;;  %v395_v21 = vld [vmem:[#allocation2 + $0x10] sm:$0x3] }
  0xe4   :  { %207 = vst.msk [vmem:[#allocation2 + $0x20] sm:$0xff] %vm84_vm2, %v200_v44  ;;  %v203_v50 = vadd.f32 %v4069_v41, %v202_v49  ;;  %v4695_v52 = vpop.f32.mrb[7].mxu0  ;;  %268 = vst.msk [vmem:[#allocation2 + $0x30] sm:$0xff] %vm84_vm2, %v261_v47  ;;  %v264_v53 = vadd.f32 %v4075_v42, %v263_v51  ;;  %v4701_v54 = vpop.f32.mrb[7].mxu1 }
  0xe5   :  { %v5585_v54 = vld [vmem:[%s6266_s4 + $0x2] ss:$0 sm:$0xff] }
  0xe6   :  { %208 = vst.msk [vmem:[#allocation2 + $0x28] sm:$0xff] %vm84_vm2, %v203_v50  ;;  %269 = vst.msk [vmem:[#allocation2 + $0x38] sm:$0xff] %vm84_vm2, %v264_v53 }
  0xe9   :  { %v321_v57 = vpop.f32.mrb[8].mxu0  ;;  %v382_v59 = vpop.f32.mrb[8].mxu1 }
  0xea   :  { %v322_v58 = vadd.f32 %v4081_v55, %v321_v57  ;;  %v4706_v60 = vpop.f32.mrb[9].mxu0  ;;  %v383_v61 = vadd.f32 %v4087_v56, %v382_v59  ;;  %v4712_v62 = vpop.f32.mrb[9].mxu1 }
  0xeb   :  { %v324_v63 = vpop.f32.mrb[10].mxu0  ;;  %v385_v2 = vpop.f32.mrb[10].mxu1  ;;  %v398_v60 = vld [vmem:[#allocation2 + $0x20] sm:$0x3] }
  0xec   :  { %329 = vst.msk [vmem:[#allocation2 + $0x40] sm:$0xff] %vm84_vm2, %v322_v58  ;;  %v325_v1 = vadd.f32 %v4081_v55, %v324_v63  ;;  %v4707_v3 = vpop.f32.mrb[11].mxu0  ;;  %390 = vst.msk [vmem:[#allocation2 + $0x50] sm:$0xff] %vm84_vm2, %v383_v61  ;;  %v386_v4 = vadd.f32 %v4087_v56, %v385_v2  ;;  %v4713_v5 = vpop.f32.mrb[11].mxu1  ;;  %v5591_v63 = vld [vmem:[%s6266_s4 + $0x5] ss:$0 sm:$0xff] }
  0xed   :  { %v620_v31 = vld [vmem:[#allocation2 + $0x3e] sm:$0x3] }
  0xee   :  { %330 = vst.msk [vmem:[#allocation2 + $0x48] sm:$0xff] %vm84_vm2, %v325_v1  ;;  %391 = vst.msk [vmem:[#allocation2 + $0x58] sm:$0xff] %vm84_vm2, %v386_v4 }
  0xf1   :  { %v459_v8 = vpop.f32.mrb[12].mxu0  ;;  %v524_v10 = vpop.f32.mrb[12].mxu1 }
  0xf2   :  { %v460_v9 = vadd.f32 %v5561_v6, %v459_v8  ;;  %v4720_v11 = vpop.f32.mrb[13].mxu0  ;;  %v525_v13 = vadd.f32 %v5566_v7, %v524_v10  ;;  %v4728_v14 = vpop.f32.mrb[13].mxu1 }
  0xf3   :  { %v462_v15 = vpop.f32.mrb[14].mxu0  ;;  %v527_v17 = vpop.f32.mrb[14].mxu1 }
  0xf4   :  { %v595_v16 = vadd.f32 %v460_v9, %v392_v12  ;;  %v4721_v18 = vpop.f32.mrb[15].mxu0  ;;  %v4729_v19 = vpop.f32.mrb[15].mxu1  ;;  %v602_v22 = vadd.f32 %v525_v13, %v395_v21  ;;  %v5124_v15 = vld [vmem:[%s6264_s2 + $0x20] sm:$0xff]  }
  0xf5   :  { %v624_v43 = vld [vmem:[#allocation2 + $0x4e] sm:$0x3]  ;;  %v628_v8 = vld [vmem:[#allocation2 + $0x5e] sm:$0x3] }
  0xf6   :  { %v4109_v20 = vmul.f32 -1.442695, %v595_v16  ;;  %v4110_v27 = vmul.f32 -1.442695, %v602_v22  ;;  %v5125_v16 = vld [vmem:[%s6264_s2 + $0x30] sm:$0xff]   ;;  %v5126_v19 = vld [vmem:[%s6264_s2 + $0x28] sm:$0xff]  }
  0xf8   :  { %5204 = vpow2.f32 %v4109_v20  ;;  %v5127_v20 = vld [vmem:[%s6264_s2 + $0x38] sm:$0xff]  }
  0xf9   :  { %v589_v24 = vpop.f32.mrb[16].mxu0  ;;  %v688_v25 = vpop.f32.mrb[16].mxu1  ;;  %5206 = vpow2.f32 %v4110_v27  ;;  %v5128_v27 = vld [vmem:[%s6264_s2 + $0x40] sm:$0xff]  }
  0xfa   :  { %v4736_v26 = vpop.f32.mrb[17].mxu0  ;;  %v689_v28 = vadd.f32 %v5573_v23, %v688_v25  ;;  %v4744_v29 = vpop.f32.mrb[17].mxu1  ;;  %v590_v57 = vadd.f32 %v5585_v54, %v589_v24 }
  0xfb   :  { %v592_v30 = vpop.f32.mrb[18].mxu0  ;;  %v691_v32 = vpop.f32.mrb[18].mxu1 }
  0xfc   :  { %v4737_v33 = vpop.f32.mrb[19].mxu0  ;;  %v824_v34 = vadd.f32 %v689_v28, %v620_v31  ;;  %v4745_v35 = vpop.f32.mrb[19].mxu1  ;;  %v5129_v28 = vld [vmem:[%s6264_s2 + $0x50] sm:$0xff]   ;;  %v5130_v30 = vld [vmem:[%s6264_s2 + $0x48] sm:$0xff]   ;;  %v5131_v31 = vld [vmem:[%s6264_s2 + $0x58] sm:$0xff]  }
  0xfd   :  { %v5132_v33 = vld [vmem:[%s6264_s2] sm:$0xff]   ;;  %v5134_v35 = vld [vmem:[%s6264_s2 + $0x8] sm:$0xff]  }
  0xfe   :  { %v4135_v36 = vmul.f32 -1.442695, %v824_v34  ;;  %v5133_v34 = vld [vmem:[%s6264_s2 + $0x10] sm:$0xff]  }
 0x100   :  { %5208 = vpow2.f32 %v4135_v36  ;;  %v5135_v36 = vld [vmem:[%s6264_s2 + $0x18] sm:$0xff]  }
 0x101   :  { %v753_v38 = vpop.f32.mrb[20].mxu0 }
 0x102   :  { %v5205_v39 = vpop.eup %5204  ;;  %v754_v40 = vadd.f32 %v5579_v37, %v753_v38  ;;  %v4752_v41 = vpop.f32.mrb[21].mxu0 }
 0x103   :  { %v599_v42 = vadd.f32 1.0, %v5205_v39  ;;  %v756_v44 = vpop.f32.mrb[22].mxu0  ;;  %v818_v45 = vpop.f32.mrb[20].mxu1 }
 0x104   :  { %v831_v46 = vadd.f32 %v754_v40, %v624_v43  ;;  %v4753_v47 = vpop.f32.mrb[23].mxu0  ;;  %v4760_v48 = vpop.f32.mrb[21].mxu1  ;;  %v819_v2 = vadd.f32 %v5591_v63, %v818_v45  ;;  %v853_v43 = vld [vmem:[#allocation2 + $0x2] sm:$0x3] }
 0x105   :  { %5210 = vrcp.f32 %v599_v42  ;;  %v821_v49 = vpop.f32.mrb[22].mxu1  ;;  %v5207_v52 = vpop.eup %5206 }
 0x106   :  { %v4136_v50 = vmul.f32 -1.442695, %v831_v46  ;;  %v4761_v51 = vpop.f32.mrb[23].mxu1  ;;  %v606_v55 = vadd.f32 1.0, %v5207_v52 }
 0x107   :  { %v856_v51 = vld [vmem:[#allocation2 + $0x12] sm:$0x3] }
 0x108   :  { %5212 = vpow2.f32 %v4136_v50 }
 0x10a   :  { %v5209_v53 = vpop.eup %5208 }
 0x10b   :  { %v828_v56 = vadd.f32 1.0, %v5209_v53 }
 0x10d   :  { %5214 = vrcp.f32 %v828_v56 }
 0x10e   :  { %5216 = vrcp.f32 %v606_v55 }
 0x10f   :  { %v5211_v58 = vpop.eup %5210 }
 0x110   :  { %v609_v59 = vmul.f32 %v5211_v58, %v590_v57 }
 0x112   :  { %v5213_v61 = vpop.eup %5212  ;;  %v610_v62 = vadd.f32 %v609_v59, %v398_v60 }
 0x113   :  { %v835_v1 = vadd.f32 1.0, %v5213_v61  ;;  %v1078_v61 = vld [vmem:[#allocation2 + $0x3c] sm:$0x3] }
 0x114   :  { %5218 = vtanh.f32 %v610_v62 }
 0x115   :  { %5220 = vrcp.f32 %v835_v1 }
 0x117   :  { %v5215_v3 = vpop.eup %5214 }
 0x118   :  { %v838_v4 = vmul.f32 %v5215_v3, %v819_v2  ;;  %v5217_v5 = vpop.eup %5216 }
 0x119   :  { %v612_v10 = vsub.f32 1.0, %v5217_v5  ;;  %v614_v12 = vmul.f32 0.0, %v5217_v5 }
 0x11a   :  { %v839_v9 = vadd.f32 %v838_v4, %v628_v8 }
 0x11c   :  { %5222 = vtanh.f32 %v839_v9 }
 0x11e   :  { %v5219_v11 = vpop.eup %5218 }
 0x11f   :  { %v613_v13 = vmul.f32 %v5219_v11, %v612_v10  ;;  %v5221_v17 = vpop.eup %5220 }
 0x120   :  { %v841_v21 = vsub.f32 1.0, %v5221_v17  ;;  %v843_v25 = vmul.f32 0.0, %v5221_v17 }
 0x121   :  { %v5594_v14 = vadd.f32 %v614_v12, %v613_v13  ;;  %v1082_v13 = vld [vmem:[#allocation2 + $0x4c] sm:$0x3] }
 0x123   :  { %v860_v18 = vpack.c.bf16 %v5594_v14, %v5594_v14  ;;  %617 = vst.msk [vmem:[%s6267_s5] sm:$0x3] %vm616_vm3, %v5594_v14 }
 0x125   :  { %4767 = vmatmul.mubr.msk.bf16.vlgmr.msra.gmra.mrb[24].mxu0 %vm84_vm2, %v860_v18  ;;  %4775 = vmatmul.mubr.msk.bf16.vlgmr.msra.gmra.mrb[24].mxu1 %vm84_vm2, %v860_v18 }
 0x126   :  { %4779 = vmatpush3.bf16.msra.mxu0 %v5124_v15  ;;  %4787 = vmatpush3.bf16.msra.mxu1 %v5125_v16  ;;  %v5223_v22 = vpop.eup %5222 }
 0x127   :  { %4780 = vmatprep.subr.bf16.mxu0 %v5364_v0  ;;  %4788 = vmatprep.subr.bf16.mxu1 %v5364_v0  ;;  %v842_v24 = vmul.f32 %v5223_v22, %v841_v21 }
 0x128   :  { %4782 = vmatprep.mubr.msk.bf16.mxu0 %vm5365_vm0, %v5364_v0  ;;  %4790 = vmatprep.mubr.msk.bf16.mxu1 %vm5365_vm0, %v5364_v0 }
 0x129   :  { %v5623_v26 = vadd.f32 %v843_v25, %v842_v24 }
 0x12a   :  { %4781 = vmatpush3.bf16.msra.mxu0 %v5126_v19  ;;  %4789 = vmatpush3.bf16.msra.mxu1 %v5127_v20 }
 0x12b   :  { %4794 = vmatprep.subr.bf16.mxu0 %v5364_v0  ;;  %4802 = vmatprep.subr.bf16.mxu1 %v5364_v0  ;;  %v1087_v29 = vpack.c.bf16 %v5623_v26, %v5623_v26 }
 0x12c   :  { %846 = vrot.lane.b32.xlu0 %v5623_v26, %s5367_s22 }
 0x12d   :  { %4783 = vmatmul.mubr.msk.bf16.vlgmr.msra.gmra.mrb[28].mxu0 %vm84_vm2, %v860_v18  ;;  %4791 = vmatmul.mubr.msk.bf16.vlgmr.msra.gmra.mrb[28].mxu1 %vm84_vm2, %v1087_v29 }
 0x12e   :  { %4795 = vmatpush3.bf16.msra.mxu0 %v5128_v27  ;;  %4803 = vmatpush3.bf16.msra.mxu1 %v5129_v28 }
 0x12f   :  { %4796 = vmatprep.subr.bf16.mxu0 %v5364_v0  ;;  %4804 = vmatprep.subr.bf16.mxu1 %v5364_v0 }
 0x130   :  { %4798 = vmatprep.mubr.msk.bf16.mxu0 %vm5365_vm0, %v5364_v0  ;;  %4806 = vmatprep.mubr.msk.bf16.mxu1 %vm5365_vm0, %v5364_v0 }
 0x132   :  { %4797 = vmatpush3.bf16.msra.mxu0 %v5130_v30  ;;  %4805 = vmatpush3.bf16.msra.mxu1 %v5131_v31  ;;  %v859_v31 = vld [vmem:[#allocation2 + $0x22] sm:$0x3] }
 0x133   :  { %4810 = vmatprep.subr.bf16.mxu0 %v5364_v0  ;;  %4818 = vmatprep.subr.bf16.mxu1 %v5364_v0 }
 0x135   :  { %4799 = vmatmul.mubr.msk.bf16.vlgmr.msra.gmra.mrb[32].mxu0 %vm84_vm2, %v1087_v29  ;;  %4807 = vmatmul.mubr.msk.bf16.vlgmr.msra.gmra.mrb[32].mxu1 %vm84_vm2, %v1087_v29 }
 0x136   :  { %4814 = vmatprep.mubr.msk.bf16.mxu0 %vm5365_vm0, %v5364_v0  ;;  %4822 = vmatprep.mubr.msk.bf16.mxu1 %vm5365_vm0, %v5364_v0 }
 0x137   :  { %4811 = vmatpush3.bf16.msra.mxu0 %v5132_v33  ;;  %4819 = vmatpush3.bf16.msra.mxu1 %v5133_v34 }
 0x138   :  { %4812 = vmatprep.subr.bf16.mxu0 %v5364_v0  ;;  %4820 = vmatprep.subr.bf16.mxu1 %v5364_v0 }
 0x13b   :  { %4813 = vmatpush3.bf16.msra.mxu0 %v5134_v35  ;;  %4821 = vmatpush3.bf16.msra.mxu1 %v5135_v36 }
 0x13c   :  { %4826 = vmatprep.subr.bf16.mxu0 %v5364_v0  ;;  %4834 = vmatprep.subr.bf16.mxu1 %v5364_v0 }
 0x19e   :  { %v847_v32 = vpop.permute.xlu0 %846 }
 0x19f   :  { %4137 = vst.msk [vmem:[%s6267_s5 + $0xe] sm:$0x3] %vm850_vm4, %v847_v32 }
 0x1f8   :  { %v921_v38 = vpop.f32.mrb[24].mxu0  ;;  %v984_v39 = vpop.f32.mrb[24].mxu1 }
 0x1f9   :  { %v922_v40 = vadd.f32 %v5561_v6, %v921_v38  ;;  %v4768_v41 = vpop.f32.mrb[25].mxu0  ;;  %v4776_v42 = vpop.f32.mrb[25].mxu1  ;;  %v985_v44 = vadd.f32 %v5566_v7, %v984_v39 }
 0x1fa   :  { %v924_v45 = vpop.f32.mrb[26].mxu0  ;;  %v987_v46 = vpop.f32.mrb[26].mxu1 }
 0x1fb   :  { %v1053_v47 = vadd.f32 %v922_v40, %v853_v43  ;;  %v4769_v48 = vpop.f32.mrb[27].mxu0  ;;  %v4777_v49 = vpop.f32.mrb[27].mxu1  ;;  %v1060_v52 = vadd.f32 %v985_v44, %v856_v51  ;;  %v1086_v40 = vld [vmem:[#allocation2 + $0x5c] sm:$0x3] }
 0x1fc   :  { %v5137_v48 = vld [vmem:[%s6264_s2 + $0x30] sm:$0xff]   ;;  %v5139_v51 = vld [vmem:[%s6264_s2 + $0x38] sm:$0xff]  }
 0x1fd   :  { %v4160_v50 = vmul.f32 -1.442695, %v1053_v47  ;;  %v4161_v57 = vmul.f32 -1.442695, %v1060_v52  ;;  %v5136_v47 = vld [vmem:[%s6264_s2 + $0x20] sm:$0xff]  }
 0x1ff   :  { %5224 = vpow2.f32 %v4160_v50 }
 0x200   :  { %v1047_v53 = vpop.f32.mrb[28].mxu0  ;;  %v1148_v55 = vpop.f32.mrb[28].mxu1  ;;  %5226 = vpow2.f32 %v4161_v57 }
 0x201   :  { %v4784_v56 = vpop.f32.mrb[29].mxu0  ;;  %v1149_v58 = vadd.f32 %v5573_v23, %v1148_v55  ;;  %v4792_v59 = vpop.f32.mrb[29].mxu1  ;;  %v1048_v28 = vadd.f32 %v5585_v54, %v1047_v53 }
 0x202   :  { %v1050_v60 = vpop.f32.mrb[30].mxu0  ;;  %v1151_v62 = vpop.f32.mrb[30].mxu1 }
 0x203   :  { %v4785_v1 = vpop.f32.mrb[31].mxu0  ;;  %v1280_v2 = vadd.f32 %v1149_v58, %v1078_v61  ;;  %v4793_v3 = vpop.f32.mrb[31].mxu1  ;;  %v5140_v58 = vld [vmem:[%s6264_s2 + $0x40] sm:$0xff]   ;;  %v5142_v60 = vld [vmem:[%s6264_s2 + $0x48] sm:$0xff]   ;;  %v5143_v61 = vld [vmem:[%s6264_s2 + $0x58] sm:$0xff]  }
 0x204   :  { %v5144_v1 = vld [vmem:[%s6264_s2] sm:$0xff]   ;;  %v5146_v3 = vld [vmem:[%s6264_s2 + $0x8] sm:$0xff]  }
 0x205   :  { %v4190_v4 = vmul.f32 -1.442695, %v1280_v2  ;;  %v5145_v2 = vld [vmem:[%s6264_s2 + $0x10] sm:$0xff]  }
 0x207   :  { %5228 = vpow2.f32 %v4190_v4  ;;  %v5147_v4 = vld [vmem:[%s6264_s2 + $0x18] sm:$0xff]  }
 0x208   :  { %v1211_v5 = vpop.f32.mrb[32].mxu0  ;;  %v1274_v10 = vpop.f32.mrb[32].mxu1 }
 0x209   :  { %v5225_v8 = vpop.eup %5224  ;;  %v1212_v9 = vadd.f32 %v5579_v37, %v1211_v5  ;;  %v4800_v11 = vpop.f32.mrb[33].mxu0  ;;  %v1275_v35 = vadd.f32 %v5591_v63, %v1274_v10 }
 0x20a   :  { %v1057_v12 = vadd.f32 1.0, %v5225_v8  ;;  %v4808_v15 = vpop.f32.mrb[33].mxu1  ;;  %v1214_v16 = vpop.f32.mrb[34].mxu0 }
 0x20b   :  { %v1287_v17 = vadd.f32 %v1212_v9, %v1082_v13  ;;  %v1277_v18 = vpop.f32.mrb[34].mxu1  ;;  %v4801_v19 = vpop.f32.mrb[35].mxu0 }
 0x20c   :  { %5230 = vrcp.f32 %v1057_v12  ;;  %v4809_v20 = vpop.f32.mrb[35].mxu1  ;;  %v5227_v22 = vpop.eup %5226  ;;  %v1308_v12 = vld [vmem:[#allocation2 + $0x4] sm:$0x3] }
 0x20d   :  { %v4191_v21 = vmul.f32 -1.442695, %v1287_v17  ;;  %v1064_v25 = vadd.f32 1.0, %v5227_v22 }
 0x20f   :  { %5232 = vpow2.f32 %v4191_v21  ;;  %v1311_v21 = vld [vmem:[#allocation2 + $0x14] sm:$0x3] }
 0x211   :  { %v5229_v24 = vpop.eup %5228 }
 0x212   :  { %v1284_v27 = vadd.f32 1.0, %v5229_v24 }
 0x214   :  { %5234 = vrcp.f32 %v1284_v27 }
 0x215   :  { %5236 = vrcp.f32 %v1064_v25 }
 0x216   :  { %v5231_v29 = vpop.eup %5230 }
 0x217   :  { %v1067_v30 = vmul.f32 %v5231_v29, %v1048_v28 }
 0x219   :  { %v5233_v32 = vpop.eup %5232  ;;  %v1068_v33 = vadd.f32 %v1067_v30, %v859_v31 }
 0x21a   :  { %v1291_v34 = vadd.f32 1.0, %v5233_v32  ;;  %v1533_v32 = vld [vmem:[#allocation2 + $0x3a] sm:$0x3] }
 0x21b   :  { %5238 = vtanh.f32 %v1068_v33 }
 0x21c   :  { %5240 = vrcp.f32 %v1291_v34 }
 0x21e   :  { %v5235_v36 = vpop.eup %5234 }
 0x21f   :  { %v1294_v38 = vmul.f32 %v5235_v36, %v1275_v35  ;;  %v5237_v39 = vpop.eup %5236 }
 0x220   :  { %v1070_v42 = vsub.f32 1.0, %v5237_v39  ;;  %v1072_v44 = vmul.f32 %v5237_v39, %v5594_v14  ;;  %v5138_v14 = vld [vmem:[%s6264_s2 + $0x28] sm:$0xff]  }
 0x221   :  { %v1295_v41 = vadd.f32 %v1294_v38, %v1086_v40 }
 0x223   :  { %5242 = vtanh.f32 %v1295_v41 }
 0x225   :  { %v5239_v43 = vpop.eup %5238 }
 0x226   :  { %v1071_v45 = vmul.f32 %v5239_v43, %v1070_v42  ;;  %v5241_v49 = vpop.eup %5240 }
 0x227   :  { %v1297_v52 = vsub.f32 1.0, %v5241_v49  ;;  %v1299_v56 = vmul.f32 %v5241_v49, %v5623_v26  ;;  %v5141_v26 = vld [vmem:[%s6264_s2 + $0x50] sm:$0xff]  }
 0x228   :  { %v5686_v46 = vadd.f32 %v1072_v44, %v1071_v45  ;;  %v1537_v45 = vld [vmem:[#allocation2 + $0x4a] sm:$0x3] }
 0x22a   :  { %v1315_v50 = vpack.c.bf16 %v5686_v46, %v5686_v46  ;;  %4162 = vst.msk [vmem:[%s6267_s5 + $0x2] sm:$0x3] %vm616_vm3, %v5686_v46 }
 0x22c   :  { %4815 = vmatmul.mubr.msk.bf16.vlgmr.msra.gmra.mrb[36].mxu0 %vm84_vm2, %v1315_v50  ;;  %4823 = vmatmul.mubr.msk.bf16.vlgmr.msra.gmra.mrb[36].mxu1 %vm84_vm2, %v1315_v50 }
 0x22d   :  { %4827 = vmatpush3.bf16.msra.mxu0 %v5136_v47  ;;  %4835 = vmatpush3.bf16.msra.mxu1 %v5137_v48  ;;  %v5243_v53 = vpop.eup %5242 }
 0x22e   :  { %4828 = vmatprep.subr.bf16.mxu0 %v5364_v0  ;;  %4836 = vmatprep.subr.bf16.mxu1 %v5364_v0  ;;  %v1298_v55 = vmul.f32 %v5243_v53, %v1297_v52 }
 0x22f   :  { %4830 = vmatprep.mubr.msk.bf16.mxu0 %vm5365_vm0, %v5364_v0  ;;  %4838 = vmatprep.mubr.msk.bf16.mxu1 %vm5365_vm0, %v5364_v0 }
 0x230   :  { %v5716_v57 = vadd.f32 %v1299_v56, %v1298_v55 }
 0x231   :  { %4829 = vmatpush3.bf16.msra.mxu0 %v5138_v14  ;;  %4837 = vmatpush3.bf16.msra.mxu1 %v5139_v51 }
 0x232   :  { %4842 = vmatprep.subr.bf16.mxu0 %v5364_v0  ;;  %4850 = vmatprep.subr.bf16.mxu1 %v5364_v0  ;;  %v1542_v59 = vpack.c.bf16 %v5716_v57, %v5716_v57 }
 0x233   :  { %1302 = vrot.lane.b32.xlu0 %v5716_v57, %s5367_s22 }
 0x234   :  { %4831 = vmatmul.mubr.msk.bf16.vlgmr.msra.gmra.mrb[40].mxu0 %vm84_vm2, %v1315_v50  ;;  %4839 = vmatmul.mubr.msk.bf16.vlgmr.msra.gmra.mrb[40].mxu1 %vm84_vm2, %v1542_v59 }
 0x235   :  { %4843 = vmatpush3.bf16.msra.mxu0 %v5140_v58  ;;  %4851 = vmatpush3.bf16.msra.mxu1 %v5141_v26 }
 0x236   :  { %4844 = vmatprep.subr.bf16.mxu0 %v5364_v0  ;;  %4852 = vmatprep.subr.bf16.mxu1 %v5364_v0 }
 0x237   :  { %4846 = vmatprep.mubr.msk.bf16.mxu0 %vm5365_vm0, %v5364_v0  ;;  %4854 = vmatprep.mubr.msk.bf16.mxu1 %vm5365_vm0, %v5364_v0 }
 0x239   :  { %4845 = vmatpush3.bf16.msra.mxu0 %v5142_v60  ;;  %4853 = vmatpush3.bf16.msra.mxu1 %v5143_v61  ;;  %v1314_v61 = vld [vmem:[#allocation2 + $0x24] sm:$0x3] }
 0x23a   :  { %4858 = vmatprep.subr.bf16.mxu0 %v5364_v0  ;;  %4866 = vmatprep.subr.bf16.mxu1 %v5364_v0 }
 0x23c   :  { %4847 = vmatmul.mubr.msk.bf16.vlgmr.msra.gmra.mrb[44].mxu0 %vm84_vm2, %v1542_v59  ;;  %4855 = vmatmul.mubr.msk.bf16.vlgmr.msra.gmra.mrb[44].mxu1 %vm84_vm2, %v1542_v59 }
 0x23d   :  { %4862 = vmatprep.mubr.msk.bf16.mxu0 %vm5365_vm0, %v5364_v0  ;;  %4870 = vmatprep.mubr.msk.bf16.mxu1 %vm5365_vm0, %v5364_v0 }
 0x23e   :  { %4859 = vmatpush3.bf16.msra.mxu0 %v5144_v1  ;;  %4867 = vmatpush3.bf16.msra.mxu1 %v5145_v2 }
 0x23f   :  { %4860 = vmatprep.subr.bf16.mxu0 %v5364_v0  ;;  %4868 = vmatprep.subr.bf16.mxu1 %v5364_v0 }
 0x242   :  { %4861 = vmatpush3.bf16.msra.mxu0 %v5146_v3  ;;  %4869 = vmatpush3.bf16.msra.mxu1 %v5147_v4 }
 0x243   :  { %4874 = vmatprep.subr.bf16.mxu0 %v5364_v0  ;;  %4882 = vmatprep.subr.bf16.mxu1 %v5364_v0 }
 0x2a5   :  { %v1303_v62 = vpop.permute.xlu0 %1302 }
 0x2a6   :  { %4192 = vst.msk [vmem:[%s6267_s5 + $0xc] sm:$0x3] %vm850_vm4, %v1303_v62 }
 0x2ff   :  { %v1376_v5 = vpop.f32.mrb[36].mxu0  ;;  %v1439_v8 = vpop.f32.mrb[36].mxu1 }
 0x300   :  { %v1377_v9 = vadd.f32 %v5561_v6, %v1376_v5  ;;  %v4816_v10 = vpop.f32.mrb[37].mxu0  ;;  %v4824_v11 = vpop.f32.mrb[37].mxu1  ;;  %v1440_v13 = vadd.f32 %v5566_v7, %v1439_v8 }
 0x301   :  { %v1379_v15 = vpop.f32.mrb[38].mxu0  ;;  %v1442_v16 = vpop.f32.mrb[38].mxu1 }
 0x302   :  { %v1508_v17 = vadd.f32 %v1377_v9, %v1308_v12  ;;  %v4817_v18 = vpop.f32.mrb[39].mxu0  ;;  %v4825_v19 = vpop.f32.mrb[39].mxu1  ;;  %v1515_v22 = vadd.f32 %v1440_v13, %v1311_v21  ;;  %v1541_v9 = vld [vmem:[#allocation2 + $0x5a] sm:$0x3] }
 0x303   :  { %v5149_v18 = vld [vmem:[%s6264_s2 + $0x30] sm:$0xff]   ;;  %v5151_v21 = vld [vmem:[%s6264_s2 + $0x38] sm:$0xff]  }
 0x304   :  { %v4215_v20 = vmul.f32 -1.442695, %v1508_v17  ;;  %v4216_v28 = vmul.f32 -1.442695, %v1515_v22  ;;  %v5148_v17 = vld [vmem:[%s6264_s2 + $0x20] sm:$0xff]  }
 0x306   :  { %5244 = vpow2.f32 %v4215_v20 }
 0x307   :  { %v1502_v24 = vpop.f32.mrb[40].mxu0  ;;  %v1603_v25 = vpop.f32.mrb[40].mxu1  ;;  %5246 = vpow2.f32 %v4216_v28 }
 0x308   :  { %v4832_v27 = vpop.f32.mrb[41].mxu0  ;;  %v1604_v29 = vadd.f32 %v5573_v23, %v1603_v25  ;;  %v4840_v30 = vpop.f32.mrb[41].mxu1  ;;  %v1503_v26 = vadd.f32 %v5585_v54, %v1502_v24 }
 0x309   :  { %v1505_v31 = vpop.f32.mrb[42].mxu0  ;;  %v1606_v33 = vpop.f32.mrb[42].mxu1 }
 0x30a   :  { %v4833_v34 = vpop.f32.mrb[43].mxu0  ;;  %v1735_v35 = vadd.f32 %v1604_v29, %v1533_v32  ;;  %v4841_v36 = vpop.f32.mrb[43].mxu1  ;;  %v5152_v29 = vld [vmem:[%s6264_s2 + $0x40] sm:$0xff]   ;;  %v5154_v31 = vld [vmem:[%s6264_s2 + $0x48] sm:$0xff]   ;;  %v5155_v32 = vld [vmem:[%s6264_s2 + $0x58] sm:$0xff]  }
 0x30b   :  { %v5156_v34 = vld [vmem:[%s6264_s2] sm:$0xff]   ;;  %v5158_v36 = vld [vmem:[%s6264_s2 + $0x8] sm:$0xff]  }
 0x30c   :  { %v4245_v38 = vmul.f32 -1.442695, %v1735_v35  ;;  %v5157_v35 = vld [vmem:[%s6264_s2 + $0x10] sm:$0xff]  }
 0x30e   :  { %5248 = vpow2.f32 %v4245_v38  ;;  %v5159_v38 = vld [vmem:[%s6264_s2 + $0x18] sm:$0xff]  }
 0x30f   :  { %v1666_v39 = vpop.f32.mrb[44].mxu0  ;;  %v1729_v42 = vpop.f32.mrb[44].mxu1 }
 0x310   :  { %v5245_v40 = vpop.eup %5244  ;;  %v1667_v41 = vadd.f32 %v5579_v37, %v1666_v39  ;;  %v4848_v43 = vpop.f32.mrb[45].mxu0  ;;  %v1730_v3 = vadd.f32 %v5591_v63, %v1729_v42 }
 0x311   :  { %v1512_v44 = vadd.f32 1.0, %v5245_v40  ;;  %v4856_v47 = vpop.f32.mrb[45].mxu1  ;;  %v1669_v48 = vpop.f32.mrb[46].mxu0 }
 0x312   :  { %v1742_v49 = vadd.f32 %v1667_v41, %v1537_v45  ;;  %v1732_v50 = vpop.f32.mrb[46].mxu1  ;;  %v4849_v14 = vpop.f32.mrb[47].mxu0 }
 0x313   :  { %5250 = vrcp.f32 %v1512_v44  ;;  %v4857_v51 = vpop.f32.mrb[47].mxu1  ;;  %v5247_v53 = vpop.eup %5246  ;;  %v1763_v44 = vld [vmem:[#allocation2 + $0x6] sm:$0x3] }
 0x314   :  { %v4246_v52 = vmul.f32 -1.442695, %v1742_v49  ;;  %v1519_v56 = vadd.f32 1.0, %v5247_v53 }
 0x316   :  { %5252 = vpow2.f32 %v4246_v52  ;;  %v1766_v52 = vld [vmem:[#allocation2 + $0x16] sm:$0x3] }
 0x318   :  { %v5249_v55 = vpop.eup %5248 }
 0x319   :  { %v1739_v58 = vadd.f32 1.0, %v5249_v55 }
 0x31b   :  { %5254 = vrcp.f32 %v1739_v58 }
 0x31c   :  { %5256 = vrcp.f32 %v1519_v56 }
 0x31d   :  { %v5251_v59 = vpop.eup %5250 }
 0x31e   :  { %v1522_v60 = vmul.f32 %v5251_v59, %v1503_v26 }
 0x320   :  { %v5253_v62 = vpop.eup %5252  ;;  %v1523_v1 = vadd.f32 %v1522_v60, %v1314_v61  ;;  %v1988_v61 = vld [vmem:[#allocation2 + $0x38] sm:$0x3] }
 0x321   :  { %v1746_v2 = vadd.f32 1.0, %v5253_v62 }
 0x322   :  { %5258 = vtanh.f32 %v1523_v1 }
 0x323   :  { %5260 = vrcp.f32 %v1746_v2 }
 0x325   :  { %v5255_v4 = vpop.eup %5254 }
 0x326   :  { %v1749_v5 = vmul.f32 %v5255_v4, %v1730_v3  ;;  %v5257_v8 = vpop.eup %5256 }
 0x327   :  { %v1525_v11 = vsub.f32 1.0, %v5257_v8  ;;  %v1527_v13 = vmul.f32 %v5257_v8, %v5686_v46  ;;  %v5150_v46 = vld [vmem:[%s6264_s2 + $0x28] sm:$0xff]  }
 0x328   :  { %v1750_v10 = vadd.f32 %v1749_v5, %v1541_v9 }
 0x32a   :  { %5262 = vtanh.f32 %v1750_v10 }
 0x32c   :  { %v5259_v12 = vpop.eup %5258 }
 0x32d   :  { %v1526_v15 = vmul.f32 %v5259_v12, %v1525_v11  ;;  %v5261_v19 = vpop.eup %5260  ;;  %v1992_v12 = vld [vmem:[#allocation2 + $0x48] sm:$0x3] }
 0x32e   :  { %v1752_v22 = vsub.f32 1.0, %v5261_v19  ;;  %v1754_v27 = vmul.f32 %v5261_v19, %v5716_v57  ;;  %v5153_v57 = vld [vmem:[%s6264_s2 + $0x50] sm:$0xff]  }
 0x32f   :  { %v5779_v16 = vadd.f32 %v1527_v13, %v1526_v15 }
 0x331   :  { %v1770_v20 = vpack.c.bf16 %v5779_v16, %v5779_v16  ;;  %4217 = vst.msk [vmem:[%s6267_s5 + $0x4] sm:$0x3] %vm616_vm3, %v5779_v16 }
 0x333   :  { %4863 = vmatmul.mubr.msk.bf16.vlgmr.msra.gmra.mrb[48].mxu0 %vm84_vm2, %v1770_v20  ;;  %4871 = vmatmul.mubr.msk.bf16.vlgmr.msra.gmra.mrb[48].mxu1 %vm84_vm2, %v1770_v20 }
 0x334   :  { %4875 = vmatpush3.bf16.msra.mxu0 %v5148_v17  ;;  %4883 = vmatpush3.bf16.msra.mxu1 %v5149_v18  ;;  %v5263_v24 = vpop.eup %5262 }
 0x335   :  { %4876 = vmatprep.subr.bf16.mxu0 %v5364_v0  ;;  %4884 = vmatprep.subr.bf16.mxu1 %v5364_v0  ;;  %v1753_v25 = vmul.f32 %v5263_v24, %v1752_v22 }
 0x336   :  { %4878 = vmatprep.mubr.msk.bf16.mxu0 %vm5365_vm0, %v5364_v0  ;;  %4886 = vmatprep.mubr.msk.bf16.mxu1 %vm5365_vm0, %v5364_v0 }
 0x337   :  { %v5809_v28 = vadd.f32 %v1754_v27, %v1753_v25 }
 0x338   :  { %4877 = vmatpush3.bf16.msra.mxu0 %v5150_v46  ;;  %4885 = vmatpush3.bf16.msra.mxu1 %v5151_v21 }
 0x339   :  { %4890 = vmatprep.subr.bf16.mxu0 %v5364_v0  ;;  %4898 = vmatprep.subr.bf16.mxu1 %v5364_v0  ;;  %v1997_v30 = vpack.c.bf16 %v5809_v28, %v5809_v28 }
 0x33a   :  { %1757 = vrot.lane.b32.xlu1 %v5809_v28, %s5367_s22 }
 0x33b   :  { %4879 = vmatmul.mubr.msk.bf16.vlgmr.msra.gmra.mrb[52].mxu0 %vm84_vm2, %v1770_v20  ;;  %4887 = vmatmul.mubr.msk.bf16.vlgmr.msra.gmra.mrb[52].mxu1 %vm84_vm2, %v1997_v30 }
 0x33c   :  { %4891 = vmatpush3.bf16.msra.mxu0 %v5152_v29  ;;  %4899 = vmatpush3.bf16.msra.mxu1 %v5153_v57  ;;  %v1769_v29 = vld [vmem:[#allocation2 + $0x26] sm:$0x3] }
 0x33d   :  { %4892 = vmatprep.subr.bf16.mxu0 %v5364_v0  ;;  %4900 = vmatprep.subr.bf16.mxu1 %v5364_v0 }
 0x33e   :  { %4894 = vmatprep.mubr.msk.bf16.mxu0 %vm5365_vm0, %v5364_v0  ;;  %4902 = vmatprep.mubr.msk.bf16.mxu1 %vm5365_vm0, %v5364_v0 }
 0x340   :  { %4893 = vmatpush3.bf16.msra.mxu0 %v5154_v31  ;;  %4901 = vmatpush3.bf16.msra.mxu1 %v5155_v32 }
 0x341   :  { %4906 = vmatprep.subr.bf16.mxu0 %v5364_v0  ;;  %4914 = vmatprep.subr.bf16.mxu1 %v5364_v0 }
 0x343   :  { %4895 = vmatmul.mubr.msk.bf16.vlgmr.msra.gmra.mrb[56].mxu0 %vm84_vm2, %v1997_v30  ;;  %4903 = vmatmul.mubr.msk.bf16.vlgmr.msra.gmra.mrb[56].mxu1 %vm84_vm2, %v1997_v30 }
 0x344   :  { %4910 = vmatprep.mubr.msk.bf16.mxu0 %vm5365_vm0, %v5364_v0  ;;  %4918 = vmatprep.mubr.msk.bf16.mxu1 %vm5365_vm0, %v5364_v0 }
 0x345   :  { %4907 = vmatpush3.bf16.msra.mxu0 %v5156_v34  ;;  %4915 = vmatpush3.bf16.msra.mxu1 %v5157_v35 }
 0x346   :  { %4908 = vmatprep.subr.bf16.mxu0 %v5364_v0  ;;  %4916 = vmatprep.subr.bf16.mxu1 %v5364_v0 }
 0x349   :  { %4909 = vmatpush3.bf16.msra.mxu0 %v5158_v36  ;;  %4917 = vmatpush3.bf16.msra.mxu1 %v5159_v38  ;;  %v1996_v36 = vld [vmem:[#allocation2 + $0x58] sm:$0x3] }
 0x34a   :  { %4922 = vmatprep.subr.bf16.mxu0 %v5364_v0  ;;  %4930 = vmatprep.subr.bf16.mxu1 %v5364_v0 }
 0x3ac   :  { %v1758_v33 = vpop.permute.xlu1 %1757 }
 0x3ad   :  { %4247 = vst.msk [vmem:[%s6267_s5 + $0xa] sm:$0x3] %vm850_vm4, %v1758_v33 }
 0x406   :  { %v1831_v39 = vpop.f32.mrb[48].mxu0  ;;  %v1894_v40 = vpop.f32.mrb[48].mxu1 }
 0x407   :  { %v1832_v41 = vadd.f32 %v5561_v6, %v1831_v39  ;;  %v4864_v42 = vpop.f32.mrb[49].mxu0  ;;  %v4872_v43 = vpop.f32.mrb[49].mxu1  ;;  %v1895_v45 = vadd.f32 %v5566_v7, %v1894_v40 }
 0x408   :  { %v1834_v47 = vpop.f32.mrb[50].mxu0  ;;  %v1897_v48 = vpop.f32.mrb[50].mxu1  ;;  %v5160_v43 = vld [vmem:[%s6264_s2 + $0x20] sm:$0xff]  }
 0x409   :  { %v1963_v49 = vadd.f32 %v1832_v41, %v1763_v44  ;;  %v4865_v50 = vpop.f32.mrb[51].mxu0  ;;  %v4873_v14 = vpop.f32.mrb[51].mxu1  ;;  %v1970_v53 = vadd.f32 %v1895_v45, %v1766_v52  ;;  %v5163_v47 = vld [vmem:[%s6264_s2 + $0x38] sm:$0xff]   ;;  %v5164_v52 = vld [vmem:[%s6264_s2 + $0x40] sm:$0xff]  }
 0x40b   :  { %v4270_v51 = vmul.f32 -1.442695, %v1963_v49  ;;  %v4271_v26 = vmul.f32 -1.442695, %v1970_v53 }
 0x40d   :  { %5264 = vpow2.f32 %v4270_v51 }
 0x40e   :  { %v1957_v55 = vpop.f32.mrb[52].mxu0  ;;  %v2058_v56 = vpop.f32.mrb[52].mxu1  ;;  %5266 = vpow2.f32 %v4271_v26  ;;  %v5168_v26 = vld [vmem:[%s6264_s2] sm:$0xff]  }
 0x40f   :  { %v4880_v58 = vpop.f32.mrb[53].mxu0  ;;  %v2059_v6 = vadd.f32 %v5573_v23, %v2058_v56  ;;  %v4888_v59 = vpop.f32.mrb[53].mxu1  ;;  %v1958_v25 = vadd.f32 %v5585_v54, %v1957_v55  ;;  %v5166_v55 = vld [vmem:[%s6264_s2 + $0x48] sm:$0xff]   ;;  %v5167_v56 = vld [vmem:[%s6264_s2 + $0x58] sm:$0xff]  }
 0x410   :  { %v1960_v60 = vpop.f32.mrb[54].mxu0  ;;  %v2061_v62 = vpop.f32.mrb[54].mxu1  ;;  %v5170_v59 = vld [vmem:[%s6264_s2 + $0x8] sm:$0xff]  }
 0x411   :  { %v4881_v7 = vpop.f32.mrb[55].mxu0  ;;  %v2190_v1 = vadd.f32 %v2059_v6, %v1988_v61  ;;  %v4889_v2 = vpop.f32.mrb[55].mxu1  ;;  %v5169_v6 = vld [vmem:[%s6264_s2 + $0x10] sm:$0xff]   ;;  %v5171_v60 = vld [vmem:[%s6264_s2 + $0x18] sm:$0xff]   ;;  %v5961_v61 = vld [vmem:[%s6266_s4] ss:$0 sm:$0xff] }
 0x412   :  { %v5966_v62 = vld [vmem:[%s6266_s4 + $0x1] ss:$0 sm:$0xff] }
 0x413   :  { %v4300_v3 = vmul.f32 -1.442695, %v2190_v1 }
 0x415   :  { %5268 = vpow2.f32 %v4300_v3 }
 0x416   :  { %v2121_v4 = vpop.f32.mrb[56].mxu0  ;;  %v2184_v9 = vpop.f32.mrb[56].mxu1 }
 0x417   :  { %v5265_v5 = vpop.eup %5264  ;;  %v2122_v8 = vadd.f32 %v5579_v37, %v2121_v4  ;;  %v4896_v10 = vpop.f32.mrb[57].mxu0  ;;  %v2185_v32 = vadd.f32 %v5591_v63, %v2184_v9  ;;  %v5161_v63 = vld [vmem:[%s6264_s2 + $0x30] sm:$0xff]  }
 0x418   :  { %v1967_v11 = vadd.f32 1.0, %v5265_v5  ;;  %v4904_v13 = vpop.f32.mrb[57].mxu1  ;;  %v2124_v23 = vpop.f32.mrb[58].mxu0  ;;  %v2218_v5 = vld [vmem:[#allocation2 + $0x8] sm:$0x3] }
 0x419   :  { %v2197_v15 = vadd.f32 %v2122_v8, %v1992_v12  ;;  %v2187_v17 = vpop.f32.mrb[58].mxu1  ;;  %v4897_v18 = vpop.f32.mrb[59].mxu0 }
 0x41a   :  { %5270 = vrcp.f32 %v1967_v11  ;;  %v4905_v19 = vpop.f32.mrb[59].mxu1  ;;  %v5267_v46 = vpop.eup %5266  ;;  %v5973_v18 = vld [vmem:[%s6266_s4 + $0x3] ss:$0 sm:$0xff] }
 0x41b   :  { %v4301_v20 = vmul.f32 -1.442695, %v2197_v15  ;;  %v1974_v22 = vadd.f32 1.0, %v5267_v46  ;;  %v2220_v15 = vld [vmem:[#allocation2 + $0x18] sm:$0x3] }
 0x41d   :  { %5272 = vpow2.f32 %v4301_v20 }
 0x41f   :  { %v5269_v21 = vpop.eup %5268 }
 0x420   :  { %v2194_v24 = vadd.f32 1.0, %v5269_v21 }
 0x422   :  { %5274 = vrcp.f32 %v2194_v24 }
 0x423   :  { %5276 = vrcp.f32 %v1974_v22 }
 0x424   :  { %v5271_v37 = vpop.eup %5270 }
 0x425   :  { %v1977_v27 = vmul.f32 %v5271_v37, %v1958_v25  ;;  %v2440_v37 = vld [vmem:[#allocation2 + $0x36] sm:$0x3] }
 0x427   :  { %v5273_v57 = vpop.eup %5272  ;;  %v1978_v30 = vadd.f32 %v1977_v27, %v1769_v29 }
 0x428   :  { %v2201_v31 = vadd.f32 1.0, %v5273_v57 }
 0x429   :  { %5278 = vtanh.f32 %v1978_v30 }
 0x42a   :  { %5280 = vrcp.f32 %v2201_v31 }
 0x42c   :  { %v5275_v33 = vpop.eup %5274 }
 0x42d   :  { %v2204_v34 = vmul.f32 %v5275_v33, %v2185_v32  ;;  %v5277_v35 = vpop.eup %5276  ;;  %v5979_v32 = vld [vmem:[%s6266_s4 + $0x4] ss:$0 sm:$0xff] }
 0x42e   :  { %v1980_v39 = vsub.f32 1.0, %v5277_v35  ;;  %v1982_v40 = vmul.f32 %v5277_v35, %v5779_v16  ;;  %v5162_v16 = vld [vmem:[%s6264_s2 + $0x28] sm:$0xff]  }
 0x42f   :  { %v2205_v38 = vadd.f32 %v2204_v34, %v1996_v36 }
 0x431   :  { %5282 = vtanh.f32 %v2205_v38 }
 0x433   :  { %v5279_v54 = vpop.eup %5278 }
 0x434   :  { %v1981_v41 = vmul.f32 %v5279_v54, %v1980_v39  ;;  %v5281_v44 = vpop.eup %5280  ;;  %v2443_v54 = vld [vmem:[#allocation2 + $0x46] sm:$0x3] }
 0x435   :  { %v2207_v48 = vsub.f32 1.0, %v5281_v44  ;;  %v2209_v14 = vmul.f32 %v5281_v44, %v5809_v28  ;;  %v5165_v28 = vld [vmem:[%s6264_s2 + $0x50] sm:$0xff]  }
 0x436   :  { %v5872_v42 = vadd.f32 %v1982_v40, %v1981_v41 }
 0x438   :  { %v2223_v45 = vpack.c.bf16 %v5872_v42, %v5872_v42  ;;  %4272 = vst.msk [vmem:[%s6267_s5 + $0x6] sm:$0x3] %vm616_vm3, %v5872_v42 }
 0x43a   :  { %4911 = vmatmul.mubr.msk.bf16.vlgmr.msra.gmra.mrb[60].mxu0 %vm84_vm2, %v2223_v45  ;;  %4919 = vmatmul.mubr.msk.bf16.vlgmr.msra.gmra.mrb[60].mxu1 %vm84_vm2, %v2223_v45 }
 0x43b   :  { %4923 = vmatpush3.bf16.msra.mxu0 %v5160_v43  ;;  %4931 = vmatpush3.bf16.msra.mxu1 %v5161_v63  ;;  %v5283_v49 = vpop.eup %5282 }
 0x43c   :  { %4924 = vmatprep.subr.bf16.mxu0 %v5364_v0  ;;  %4932 = vmatprep.subr.bf16.mxu1 %v5364_v0  ;;  %v2208_v50 = vmul.f32 %v5283_v49, %v2207_v48  ;;  %v5985_v49 = vld [vmem:[%s6266_s4 + $0x2] ss:$0 sm:$0xff] }
 0x43d   :  { %4926 = vmatprep.mubr.msk.bf16.mxu0 %vm5365_vm0, %v5364_v0  ;;  %4934 = vmatprep.mubr.msk.bf16.mxu1 %vm5365_vm0, %v5364_v0 }
 0x43e   :  { %v5902_v51 = vadd.f32 %v2209_v14, %v2208_v50 }
 0x43f   :  { %4925 = vmatpush3.bf16.msra.mxu0 %v5162_v16  ;;  %4933 = vmatpush3.bf16.msra.mxu1 %v5163_v47 }
 0x440   :  { %4938 = vmatprep.subr.bf16.mxu0 %v5364_v0  ;;  %4946 = vmatprep.subr.bf16.mxu1 %v5364_v0  ;;  %v2447_v53 = vpack.c.bf16 %v5902_v51, %v5902_v51 }
 0x441   :  { %2212 = vrot.lane.b32.xlu1 %v5902_v51, %s5367_s22 }
 0x442   :  { %4927 = vmatmul.mubr.msk.bf16.vlgmr.msra.gmra.mrb[64].mxu0 %vm84_vm2, %v2223_v45  ;;  %4935 = vmatmul.mubr.msk.bf16.vlgmr.msra.gmra.mrb[64].mxu1 %vm84_vm2, %v2447_v53 }
 0x443   :  { %4939 = vmatpush3.bf16.msra.mxu0 %v5164_v52  ;;  %4947 = vmatpush3.bf16.msra.mxu1 %v5165_v28 }
 0x444   :  { %4940 = vmatprep.subr.bf16.mxu0 %v5364_v0  ;;  %4948 = vmatprep.subr.bf16.mxu1 %v5364_v0 }
 0x445   :  { %4942 = vmatprep.mubr.msk.bf16.mxu0 %vm5365_vm0, %v5364_v0  ;;  %4950 = vmatprep.mubr.msk.bf16.mxu1 %vm5365_vm0, %v5364_v0 }
 0x447   :  { %4941 = vmatpush3.bf16.msra.mxu0 %v5166_v55  ;;  %4949 = vmatpush3.bf16.msra.mxu1 %v5167_v56  ;;  %v2222_v55 = vld [vmem:[#allocation2 + $0x28] sm:$0x3] }
 0x448   :  { %4954 = vmatprep.subr.bf16.mxu0 %v5364_v0  ;;  %4962 = vmatprep.subr.bf16.mxu1 %v5364_v0 }
 0x44a   :  { %4943 = vmatmul.mubr.msk.bf16.vlgmr.msra.gmra.mrb[68].mxu0 %vm84_vm2, %v2447_v53  ;;  %4951 = vmatmul.mubr.msk.bf16.vlgmr.msra.gmra.mrb[68].mxu1 %vm84_vm2, %v2447_v53 }
 0x44b   :  { %4958 = vmatprep.mubr.msk.bf16.mxu0 %vm5365_vm0, %v5364_v0  ;;  %4966 = vmatprep.mubr.msk.bf16.mxu1 %vm5365_vm0, %v5364_v0 }
 0x44c   :  { %4955 = vmatpush3.bf16.msra.mxu0 %v5168_v26  ;;  %4963 = vmatpush3.bf16.msra.mxu1 %v5169_v6  ;;  %v5991_v26 = vld [vmem:[%s6266_s4 + $0x5] ss:$0 sm:$0xff] }
 0x44d   :  { %4956 = vmatprep.subr.bf16.mxu0 %v5364_v0  ;;  %4964 = vmatprep.subr.bf16.mxu1 %v5364_v0 }
 0x450   :  { %4957 = vmatpush3.bf16.msra.mxu0 %v5170_v59  ;;  %4965 = vmatpush3.bf16.msra.mxu1 %v5171_v60 }
 0x451   :  { %4970 = vmatprep.subr.bf16.mxu0 %v5364_v0  ;;  %4978 = vmatprep.subr.bf16.mxu1 %v5364_v0 }
 0x4b3   :  { %v2213_v58 = vpop.permute.xlu1 %2212 }
 0x4b4   :  { %4302 = vst.msk [vmem:[%s6267_s5 + $0x8] sm:$0x3] %vm850_vm4, %v2213_v58 }
 0x50d   :  { %v2284_v7 = vpop.f32.mrb[60].mxu0  ;;  %v2347_v1 = vpop.f32.mrb[60].mxu1 }
 0x50e   :  { %v2285_v2 = vadd.f32 %v5961_v61, %v2284_v7  ;;  %v4912_v3 = vpop.f32.mrb[61].mxu0  ;;  %v4920_v4 = vpop.f32.mrb[61].mxu1  ;;  %v2348_v8 = vadd.f32 %v5966_v62, %v2347_v1 }
 0x50f   :  { %v2287_v9 = vpop.f32.mrb[62].mxu0  ;;  %v2350_v10 = vpop.f32.mrb[62].mxu1 }
 0x510   :  { %v2416_v11 = vadd.f32 %v2285_v2, %v2218_v5  ;;  %v4913_v12 = vpop.f32.mrb[63].mxu0  ;;  %v4921_v13 = vpop.f32.mrb[63].mxu1  ;;  %v2423_v17 = vadd.f32 %v2348_v8, %v2220_v15  ;;  %v2446_v2 = vld [vmem:[#allocation2 + $0x56] sm:$0x3]  ;;  %v5175_v15 = vld [vmem:[%s6264_s2 + $0x38] sm:$0xff]  }
 0x511   :  { %v5173_v12 = vld [vmem:[%s6264_s2 + $0x30] sm:$0xff]  }
 0x512   :  { %v4325_v23 = vmul.f32 -1.442695, %v2416_v11  ;;  %v4326_v21 = vmul.f32 -1.442695, %v2423_v17  ;;  %v5172_v11 = vld [vmem:[%s6264_s2 + $0x20] sm:$0xff]  }
 0x514   :  { %5284 = vpow2.f32 %v4325_v23 }
 0x515   :  { %v2410_v19 = vpop.f32.mrb[64].mxu0  ;;  %v2508_v20 = vpop.f32.mrb[64].mxu1  ;;  %5286 = vpow2.f32 %v4326_v21 }
 0x516   :  { %v4928_v46 = vpop.f32.mrb[65].mxu0  ;;  %v2509_v22 = vadd.f32 %v5973_v18, %v2508_v20  ;;  %v4936_v24 = vpop.f32.mrb[65].mxu1  ;;  %v2411_v52 = vadd.f32 %v5985_v49, %v2410_v19 }
 0x517   :  { %v2413_v25 = vpop.f32.mrb[66].mxu0  ;;  %v2511_v27 = vpop.f32.mrb[66].mxu1 }
 0x518   :  { %v4929_v29 = vpop.f32.mrb[67].mxu0  ;;  %v2640_v57 = vadd.f32 %v2509_v22, %v2440_v37  ;;  %v4937_v30 = vpop.f32.mrb[67].mxu1  ;;  %v5176_v22 = vld [vmem:[%s6264_s2 + $0x40] sm:$0xff]   ;;  %v5178_v25 = vld [vmem:[%s6264_s2 + $0x48] sm:$0xff]   ;;  %v5179_v37 = vld [vmem:[%s6264_s2 + $0x58] sm:$0xff]  }
 0x519   :  { %v5180_v29 = vld [vmem:[%s6264_s2] sm:$0xff]   ;;  %v5182_v30 = vld [vmem:[%s6264_s2 + $0x8] sm:$0xff]  }
 0x51a   :  { %v4355_v31 = vmul.f32 -1.442695, %v2640_v57  ;;  %v5181_v57 = vld [vmem:[%s6264_s2 + $0x10] sm:$0xff]  }
 0x51c   :  { %5288 = vpow2.f32 %v4355_v31  ;;  %v5183_v31 = vld [vmem:[%s6264_s2 + $0x18] sm:$0xff]  }
 0x51d   :  { %v2571_v33 = vpop.f32.mrb[68].mxu0  ;;  %v2634_v36 = vpop.f32.mrb[68].mxu1 }
 0x51e   :  { %v5285_v34 = vpop.eup %5284  ;;  %v2572_v35 = vadd.f32 %v5979_v32, %v2571_v33  ;;  %v4944_v38 = vpop.f32.mrb[69].mxu0  ;;  %v2635_v59 = vadd.f32 %v5991_v26, %v2634_v36 }
 0x51f   :  { %v2420_v39 = vadd.f32 1.0, %v5285_v34  ;;  %v4952_v40 = vpop.f32.mrb[69].mxu1  ;;  %v2574_v41 = vpop.f32.mrb[70].mxu0 }
 0x520   :  { %v2647_v43 = vadd.f32 %v2572_v35, %v2443_v54  ;;  %v2637_v63 = vpop.f32.mrb[70].mxu1  ;;  %v4945_v44 = vpop.f32.mrb[71].mxu0 }
 0x521   :  { %5290 = vrcp.f32 %v2420_v39  ;;  %v4953_v45 = vpop.f32.mrb[71].mxu1  ;;  %v5287_v47 = vpop.eup %5286  ;;  %v2667_v39 = vld [vmem:[#allocation2 + $0xa] sm:$0x3] }
 0x522   :  { %v4356_v16 = vmul.f32 -1.442695, %v2647_v43  ;;  %v2427_v50 = vadd.f32 1.0, %v5287_v47 }
 0x524   :  { %5292 = vpow2.f32 %v4356_v16  ;;  %v2669_v16 = vld [vmem:[#allocation2 + $0x1a] sm:$0x3] }
 0x526   :  { %v5289_v48 = vpop.eup %5288 }
 0x527   :  { %v2644_v14 = vadd.f32 1.0, %v5289_v48 }
 0x529   :  { %5294 = vrcp.f32 %v2644_v14 }
 0x52a   :  { %5296 = vrcp.f32 %v2427_v50 }
 0x52b   :  { %v5291_v28 = vpop.eup %5290 }
 0x52c   :  { %v2430_v53 = vmul.f32 %v5291_v28, %v2411_v52 }
 0x52e   :  { %v5293_v56 = vpop.eup %5292  ;;  %v2431_v58 = vadd.f32 %v2430_v53, %v2222_v55 }
 0x52f   :  { %v2651_v6 = vadd.f32 1.0, %v5293_v56  ;;  %v2889_v56 = vld [vmem:[#allocation2 + $0x34] sm:$0x3] }
 0x530   :  { %5298 = vtanh.f32 %v2431_v58 }
 0x531   :  { %5300 = vrcp.f32 %v2651_v6 }
 0x533   :  { %v5295_v60 = vpop.eup %5294 }
 0x534   :  { %v2654_v7 = vmul.f32 %v5295_v60, %v2635_v59  ;;  %v5297_v1 = vpop.eup %5296 }
 0x535   :  { %v2433_v4 = vsub.f32 1.0, %v5297_v1  ;;  %v2435_v8 = vmul.f32 %v5297_v1, %v5872_v42  ;;  %v5174_v42 = vld [vmem:[%s6264_s2 + $0x28] sm:$0xff]  }
 0x536   :  { %v2655_v3 = vadd.f32 %v2654_v7, %v2446_v2 }
 0x538   :  { %5302 = vtanh.f32 %v2655_v3 }
 0x53a   :  { %v5299_v5 = vpop.eup %5298 }
 0x53b   :  { %v2434_v9 = vmul.f32 %v5299_v5, %v2433_v4  ;;  %v5301_v13 = vpop.eup %5300 }
 0x53c   :  { %v2657_v17 = vsub.f32 1.0, %v5301_v13  ;;  %v2659_v46 = vmul.f32 %v5301_v13, %v5902_v51  ;;  %v5177_v51 = vld [vmem:[%s6264_s2 + $0x50] sm:$0xff]  }
 0x53d   :  { %v5995_v10 = vadd.f32 %v2435_v8, %v2434_v9  ;;  %v2892_v9 = vld [vmem:[#allocation2 + $0x44] sm:$0x3] }
 0x53f   :  { %v2672_v23 = vpack.c.bf16 %v5995_v10, %v5995_v10  ;;  %4327 = vst.msk [vmem:[%s6267_s5 + $0x8] sm:$0x3] %vm616_vm3, %v5995_v10 }
 0x541   :  { %4959 = vmatmul.mubr.msk.bf16.vlgmr.msra.gmra.mrb[72].mxu0 %vm84_vm2, %v2672_v23  ;;  %4967 = vmatmul.mubr.msk.bf16.vlgmr.msra.gmra.mrb[72].mxu1 %vm84_vm2, %v2672_v23 }
 0x542   :  { %4971 = vmatpush3.bf16.msra.mxu0 %v5172_v11  ;;  %4979 = vmatpush3.bf16.msra.mxu1 %v5173_v12  ;;  %v5303_v19 = vpop.eup %5302 }
 0x543   :  { %4972 = vmatprep.subr.bf16.mxu0 %v5364_v0  ;;  %4980 = vmatprep.subr.bf16.mxu1 %v5364_v0  ;;  %v2658_v20 = vmul.f32 %v5303_v19, %v2657_v17 }
 0x544   :  { %4974 = vmatprep.mubr.msk.bf16.mxu0 %vm5365_vm0, %v5364_v0  ;;  %4982 = vmatprep.mubr.msk.bf16.mxu1 %vm5365_vm0, %v5364_v0 }
 0x545   :  { %v6025_v21 = vadd.f32 %v2659_v46, %v2658_v20 }
 0x546   :  { %4973 = vmatpush3.bf16.msra.mxu0 %v5174_v42  ;;  %4981 = vmatpush3.bf16.msra.mxu1 %v5175_v15 }
 0x547   :  { %4986 = vmatprep.subr.bf16.mxu0 %v5364_v0  ;;  %4994 = vmatprep.subr.bf16.mxu1 %v5364_v0  ;;  %v2896_v24 = vpack.c.bf16 %v6025_v21, %v6025_v21 }
 0x548   :  { %2662 = vrot.lane.b32.xlu0 %v6025_v21, %s5367_s22 }
 0x549   :  { %4975 = vmatmul.mubr.msk.bf16.vlgmr.msra.gmra.mrb[76].mxu0 %vm84_vm2, %v2672_v23  ;;  %4983 = vmatmul.mubr.msk.bf16.vlgmr.msra.gmra.mrb[76].mxu1 %vm84_vm2, %v2896_v24 }
 0x54a   :  { %4987 = vmatpush3.bf16.msra.mxu0 %v5176_v22  ;;  %4995 = vmatpush3.bf16.msra.mxu1 %v5177_v51 }
 0x54b   :  { %4988 = vmatprep.subr.bf16.mxu0 %v5364_v0  ;;  %4996 = vmatprep.subr.bf16.mxu1 %v5364_v0 }
 0x54c   :  { %4990 = vmatprep.mubr.msk.bf16.mxu0 %vm5365_vm0, %v5364_v0  ;;  %4998 = vmatprep.mubr.msk.bf16.mxu1 %vm5365_vm0, %v5364_v0 }
 0x54e   :  { %4989 = vmatpush3.bf16.msra.mxu0 %v5178_v25  ;;  %4997 = vmatpush3.bf16.msra.mxu1 %v5179_v37  ;;  %v2671_v37 = vld [vmem:[#allocation2 + $0x2a] sm:$0x3] }
 0x54f   :  { %5002 = vmatprep.subr.bf16.mxu0 %v5364_v0  ;;  %5010 = vmatprep.subr.bf16.mxu1 %v5364_v0 }
 0x551   :  { %4991 = vmatmul.mubr.msk.bf16.vlgmr.msra.gmra.mrb[80].mxu0 %vm84_vm2, %v2896_v24  ;;  %4999 = vmatmul.mubr.msk.bf16.vlgmr.msra.gmra.mrb[80].mxu1 %vm84_vm2, %v2896_v24 }
 0x552   :  { %5006 = vmatprep.mubr.msk.bf16.mxu0 %vm5365_vm0, %v5364_v0  ;;  %5014 = vmatprep.mubr.msk.bf16.mxu1 %vm5365_vm0, %v5364_v0 }
 0x553   :  { %5003 = vmatpush3.bf16.msra.mxu0 %v5180_v29  ;;  %5011 = vmatpush3.bf16.msra.mxu1 %v5181_v57 }
 0x554   :  { %5004 = vmatprep.subr.bf16.mxu0 %v5364_v0  ;;  %5012 = vmatprep.subr.bf16.mxu1 %v5364_v0 }
 0x557   :  { %5005 = vmatpush3.bf16.msra.mxu0 %v5182_v30  ;;  %5013 = vmatpush3.bf16.msra.mxu1 %v5183_v31 }
 0x558   :  { %5018 = vmatprep.subr.bf16.mxu0 %v5364_v0  ;;  %5026 = vmatprep.subr.bf16.mxu1 %v5364_v0 }
 0x5ba   :  { %v2663_v27 = vpop.permute.xlu0 %2662 }
 0x5bb   :  { %4357 = vst.msk [vmem:[%s6267_s5 + $0x6] sm:$0x3] %vm850_vm4, %v2663_v27 }
 0x614   :  { %v2733_v33 = vpop.f32.mrb[72].mxu0  ;;  %v2796_v34 = vpop.f32.mrb[72].mxu1 }
 0x615   :  { %v2734_v35 = vadd.f32 %v5961_v61, %v2733_v33  ;;  %v4960_v36 = vpop.f32.mrb[73].mxu0  ;;  %v4968_v38 = vpop.f32.mrb[73].mxu1  ;;  %v2797_v54 = vadd.f32 %v5966_v62, %v2796_v34 }
 0x616   :  { %v2736_v40 = vpop.f32.mrb[74].mxu0  ;;  %v2799_v41 = vpop.f32.mrb[74].mxu1 }
 0x617   :  { %v2865_v43 = vadd.f32 %v2734_v35, %v2667_v39  ;;  %v4961_v63 = vpop.f32.mrb[75].mxu0  ;;  %v4969_v44 = vpop.f32.mrb[75].mxu1  ;;  %v2872_v47 = vadd.f32 %v2797_v54, %v2669_v16  ;;  %v2895_v35 = vld [vmem:[#allocation2 + $0x54] sm:$0x3]  ;;  %v5187_v16 = vld [vmem:[%s6264_s2 + $0x38] sm:$0xff]  }
 0x618   :  { %v5185_v63 = vld [vmem:[%s6264_s2 + $0x30] sm:$0xff]  }
 0x619   :  { %v4380_v45 = vmul.f32 -1.442695, %v2865_v43  ;;  %v4381_v52 = vmul.f32 -1.442695, %v2872_v47  ;;  %v5184_v43 = vld [vmem:[%s6264_s2 + $0x20] sm:$0xff]  }
 0x61b   :  { %5304 = vpow2.f32 %v4380_v45  ;;  %v5186_v45 = vld [vmem:[%s6264_s2 + $0x28] sm:$0xff]  }
 0x61c   :  { %v2859_v48 = vpop.f32.mrb[76].mxu0  ;;  %v2957_v50 = vpop.f32.mrb[76].mxu1  ;;  %5306 = vpow2.f32 %v4381_v52 }
 0x61d   :  { %v4976_v14 = vpop.f32.mrb[77].mxu0  ;;  %v2958_v28 = vadd.f32 %v5973_v18, %v2957_v50  ;;  %v4984_v53 = vpop.f32.mrb[77].mxu1  ;;  %v2860_v51 = vadd.f32 %v5985_v49, %v2859_v48 }
 0x61e   :  { %v2862_v55 = vpop.f32.mrb[78].mxu0  ;;  %v2960_v58 = vpop.f32.mrb[78].mxu1 }
 0x61f   :  { %v4977_v6 = vpop.f32.mrb[79].mxu0  ;;  %v3089_v59 = vadd.f32 %v2958_v28, %v2889_v56  ;;  %v4985_v60 = vpop.f32.mrb[79].mxu1  ;;  %v5188_v28 = vld [vmem:[%s6264_s2 + $0x40] sm:$0xff]   ;;  %v5190_v55 = vld [vmem:[%s6264_s2 + $0x48] sm:$0xff]   ;;  %v5191_v56 = vld [vmem:[%s6264_s2 + $0x58] sm:$0xff]  }
 0x620   :  { %v5192_v6 = vld [vmem:[%s6264_s2] sm:$0xff]   ;;  %v5194_v60 = vld [vmem:[%s6264_s2 + $0x8] sm:$0xff]  }
 0x621   :  { %v4410_v7 = vmul.f32 -1.442695, %v3089_v59  ;;  %v5193_v59 = vld [vmem:[%s6264_s2 + $0x10] sm:$0xff]  }
 0x623   :  { %5308 = vpow2.f32 %v4410_v7  ;;  %v5195_v7 = vld [vmem:[%s6264_s2 + $0x18] sm:$0xff]  }
 0x624   :  { %v3020_v1 = vpop.f32.mrb[80].mxu0  ;;  %v3083_v4 = vpop.f32.mrb[80].mxu1 }
 0x625   :  { %v5305_v2 = vpop.eup %5304  ;;  %v3021_v3 = vadd.f32 %v5979_v32, %v3020_v1  ;;  %v4992_v5 = vpop.f32.mrb[81].mxu0  ;;  %v3084_v30 = vadd.f32 %v5991_v26, %v3083_v4 }
 0x626   :  { %v2869_v8 = vadd.f32 1.0, %v5305_v2  ;;  %v5000_v11 = vpop.f32.mrb[81].mxu1  ;;  %v3023_v12 = vpop.f32.mrb[82].mxu0 }
 0x627   :  { %v3096_v13 = vadd.f32 %v3021_v3, %v2892_v9  ;;  %v3086_v23 = vpop.f32.mrb[82].mxu1  ;;  %v4993_v42 = vpop.f32.mrb[83].mxu0 }
 0x628   :  { %5310 = vrcp.f32 %v2869_v8  ;;  %v5001_v15 = vpop.f32.mrb[83].mxu1  ;;  %v5307_v19 = vpop.eup %5306  ;;  %v3116_v8 = vld [vmem:[#allocation2 + $0xc] sm:$0x3] }
 0x629   :  { %v4411_v17 = vmul.f32 -1.442695, %v3096_v13  ;;  %v2876_v46 = vadd.f32 1.0, %v5307_v19 }
 0x62b   :  { %5312 = vpow2.f32 %v4411_v17  ;;  %v3118_v17 = vld [vmem:[#allocation2 + $0x1c] sm:$0x3] }
 0x62d   :  { %v5309_v20 = vpop.eup %5308 }
 0x62e   :  { %v3093_v22 = vadd.f32 1.0, %v5309_v20 }
 0x630   :  { %5314 = vrcp.f32 %v3093_v22 }
 0x631   :  { %5316 = vrcp.f32 %v2876_v46 }
 0x632   :  { %v5311_v24 = vpop.eup %5310 }
 0x633   :  { %v2879_v25 = vmul.f32 %v5311_v24, %v2860_v51 }
 0x635   :  { %v5313_v27 = vpop.eup %5312  ;;  %v2880_v29 = vadd.f32 %v2879_v25, %v2671_v37 }
 0x636   :  { %v3100_v57 = vadd.f32 1.0, %v5313_v27  ;;  %v3338_v27 = vld [vmem:[#allocation2 + $0x32] sm:$0x3] }
 0x637   :  { %5318 = vtanh.f32 %v2880_v29 }
 0x638   :  { %5320 = vrcp.f32 %v3100_v57 }
 0x63a   :  { %v5315_v31 = vpop.eup %5314 }
 0x63b   :  { %v3103_v33 = vmul.f32 %v5315_v31, %v3084_v30  ;;  %v5317_v34 = vpop.eup %5316 }
 0x63c   :  { %v2882_v38 = vsub.f32 1.0, %v5317_v34  ;;  %v2884_v54 = vmul.f32 %v5317_v34, %v5995_v10 }
 0x63d   :  { %v3104_v36 = vadd.f32 %v3103_v33, %v2895_v35 }
 0x63f   :  { %5322 = vtanh.f32 %v3104_v36 }
 0x641   :  { %v5319_v39 = vpop.eup %5318 }
 0x642   :  { %v2883_v40 = vmul.f32 %v5319_v39, %v2882_v38  ;;  %v5321_v44 = vpop.eup %5320 }
 0x643   :  { %v3106_v47 = vsub.f32 1.0, %v5321_v44  ;;  %v3108_v14 = vmul.f32 %v5321_v44, %v6025_v21  ;;  %v5189_v21 = vld [vmem:[%s6264_s2 + $0x50] sm:$0xff]  }
 0x644   :  { %v6088_v41 = vadd.f32 %v2884_v54, %v2883_v40  ;;  %v3341_v40 = vld [vmem:[#allocation2 + $0x42] sm:$0x3] }
 0x646   :  { %4382 = vst.msk [vmem:[%s6267_s5 + $0xa] sm:$0x3] %vm616_vm3, %v6088_v41  ;;  %v3121_v10 = vpack.c.bf16 %v6088_v41, %v6088_v41 }
 0x648   :  { %5007 = vmatmul.mubr.msk.bf16.vlgmr.msra.gmra.mrb[84].mxu0 %vm84_vm2, %v3121_v10  ;;  %5015 = vmatmul.mubr.msk.bf16.vlgmr.msra.gmra.mrb[84].mxu1 %vm84_vm2, %v3121_v10 }
 0x649   :  { %5019 = vmatpush3.bf16.msra.mxu0 %v5184_v43  ;;  %5027 = vmatpush3.bf16.msra.mxu1 %v5185_v63  ;;  %v5323_v48 = vpop.eup %5322 }
 0x64a   :  { %5020 = vmatprep.subr.bf16.mxu0 %v5364_v0  ;;  %5028 = vmatprep.subr.bf16.mxu1 %v5364_v0  ;;  %v3107_v50 = vmul.f32 %v5323_v48, %v3106_v47 }
 0x64b   :  { %5022 = vmatprep.mubr.msk.bf16.mxu0 %vm5365_vm0, %v5364_v0  ;;  %5030 = vmatprep.mubr.msk.bf16.mxu1 %vm5365_vm0, %v5364_v0 }
 0x64c   :  { %v6118_v52 = vadd.f32 %v3108_v14, %v3107_v50 }
 0x64d   :  { %5021 = vmatpush3.bf16.msra.mxu0 %v5186_v45  ;;  %5029 = vmatpush3.bf16.msra.mxu1 %v5187_v16 }
 0x64e   :  { %5034 = vmatprep.subr.bf16.mxu0 %v5364_v0  ;;  %5042 = vmatprep.subr.bf16.mxu1 %v5364_v0  ;;  %v3345_v53 = vpack.c.bf16 %v6118_v52, %v6118_v52 }
 0x64f   :  { %3111 = vrot.lane.b32.xlu1 %v6118_v52, %s5367_s22 }
 0x650   :  { %5023 = vmatmul.mubr.msk.bf16.vlgmr.msra.gmra.mrb[88].mxu0 %vm84_vm2, %v3121_v10  ;;  %5031 = vmatmul.mubr.msk.bf16.vlgmr.msra.gmra.mrb[88].mxu1 %vm84_vm2, %v3345_v53 }
 0x651   :  { %5035 = vmatpush3.bf16.msra.mxu0 %v5188_v28  ;;  %5043 = vmatpush3.bf16.msra.mxu1 %v5189_v21 }
 0x652   :  { %5036 = vmatprep.subr.bf16.mxu0 %v5364_v0  ;;  %5044 = vmatprep.subr.bf16.mxu1 %v5364_v0 }
 0x653   :  { %5038 = vmatprep.mubr.msk.bf16.mxu0 %vm5365_vm0, %v5364_v0  ;;  %5046 = vmatprep.mubr.msk.bf16.mxu1 %vm5365_vm0, %v5364_v0 }
 0x655   :  { %5037 = vmatpush3.bf16.msra.mxu0 %v5190_v55  ;;  %5045 = vmatpush3.bf16.msra.mxu1 %v5191_v56  ;;  %v3120_v56 = vld [vmem:[#allocation2 + $0x2c] sm:$0x3] }
 0x656   :  { %5050 = vmatprep.subr.bf16.mxu0 %v5364_v0  ;;  %5058 = vmatprep.subr.bf16.mxu1 %v5364_v0 }
 0x658   :  { %5039 = vmatmul.mubr.msk.bf16.vlgmr.msra.gmra.mrb[92].mxu0 %vm84_vm2, %v3345_v53  ;;  %5047 = vmatmul.mubr.msk.bf16.vlgmr.msra.gmra.mrb[92].mxu1 %vm84_vm2, %v3345_v53 }
 0x659   :  { %5054 = vmatprep.mubr.msk.bf16.mxu0 %vm5365_vm0, %v5364_v0  ;;  %5062 = vmatprep.mubr.msk.bf16.mxu1 %vm5365_vm0, %v5364_v0 }
 0x65a   :  { %5051 = vmatpush3.bf16.msra.mxu0 %v5192_v6  ;;  %5059 = vmatpush3.bf16.msra.mxu1 %v5193_v59 }
 0x65b   :  { %5052 = vmatprep.subr.bf16.mxu0 %v5364_v0  ;;  %5060 = vmatprep.subr.bf16.mxu1 %v5364_v0 }
 0x65e   :  { %5053 = vmatpush3.bf16.msra.mxu0 %v5194_v60  ;;  %5061 = vmatpush3.bf16.msra.mxu1 %v5195_v7 }
 0x65f   :  { %5066 = vmatprep.subr.bf16.mxu0 %v5364_v0  ;;  %5074 = vmatprep.subr.bf16.mxu1 %v5364_v0 }
 0x6c1   :  { %v3112_v58 = vpop.permute.xlu1 %3111 }
 0x6c2   :  { %4412 = vst.msk [vmem:[%s6267_s5 + $0x4] sm:$0x3] %vm850_vm4, %v3112_v58 }
 0x71b   :  { %v3182_v1 = vpop.f32.mrb[84].mxu0  ;;  %v3245_v2 = vpop.f32.mrb[84].mxu1 }
 0x71c   :  { %v3183_v3 = vadd.f32 %v5961_v61, %v3182_v1  ;;  %v5008_v4 = vpop.f32.mrb[85].mxu0  ;;  %v5016_v5 = vpop.f32.mrb[85].mxu1  ;;  %v3246_v9 = vadd.f32 %v5966_v62, %v3245_v2 }
 0x71d   :  { %v3185_v11 = vpop.f32.mrb[86].mxu0  ;;  %v3248_v12 = vpop.f32.mrb[86].mxu1 }
 0x71e   :  { %v3314_v13 = vadd.f32 %v3183_v3, %v3116_v8  ;;  %v5009_v23 = vpop.f32.mrb[87].mxu0  ;;  %v5017_v42 = vpop.f32.mrb[87].mxu1  ;;  %v3321_v19 = vadd.f32 %v3246_v9, %v3118_v17  ;;  %v3344_v3 = vld [vmem:[#allocation2 + $0x52] sm:$0x3]  ;;  %v5199_v17 = vld [vmem:[%s6264_s2 + $0x38] sm:$0xff]  }
 0x71f   :  { %v5197_v23 = vld [vmem:[%s6264_s2 + $0x30] sm:$0xff]  }
 0x720   :  { %v4435_v15 = vmul.f32 -1.442695, %v3314_v13  ;;  %v4436_v51 = vmul.f32 -1.442695, %v3321_v19  ;;  %v5196_v13 = vld [vmem:[%s6264_s2 + $0x20] sm:$0xff]  }
 0x722   :  { %5324 = vpow2.f32 %v4435_v15  ;;  %v5198_v15 = vld [vmem:[%s6264_s2 + $0x28] sm:$0xff]  }
 0x723   :  { %v3308_v20 = vpop.f32.mrb[88].mxu0  ;;  %v3406_v46 = vpop.f32.mrb[88].mxu1  ;;  %5326 = vpow2.f32 %v4436_v51 }
 0x724   :  { %v5024_v22 = vpop.f32.mrb[89].mxu0  ;;  %v3407_v24 = vadd.f32 %v5973_v18, %v3406_v46  ;;  %v5032_v25 = vpop.f32.mrb[89].mxu1  ;;  %v3309_v21 = vadd.f32 %v5985_v49, %v3308_v20 }
 0x725   :  { %v3311_v37 = vpop.f32.mrb[90].mxu0  ;;  %v3409_v29 = vpop.f32.mrb[90].mxu1 }
 0x726   :  { %v5025_v57 = vpop.f32.mrb[91].mxu0  ;;  %v3538_v30 = vadd.f32 %v3407_v24, %v3338_v27  ;;  %v5033_v31 = vpop.f32.mrb[91].mxu1  ;;  %v5200_v24 = vld [vmem:[%s6264_s2 + $0x40] sm:$0xff]   ;;  %v5202_v37 = vld [vmem:[%s6264_s2 + $0x48] sm:$0xff]   ;;  %v5203_v27 = vld [vmem:[%s6264_s2 + $0x58] sm:$0xff]  }
 0x728   :  { %v4465_v33 = vmul.f32 -1.442695, %v3538_v30 }
 0x72a   :  { %5328 = vpow2.f32 %v4465_v33 }
 0x72b   :  { %v3469_v34 = vpop.f32.mrb[92].mxu0  ;;  %v3532_v38 = vpop.f32.mrb[92].mxu1 }
 0x72c   :  { %v5325_v35 = vpop.eup %5324  ;;  %v3470_v36 = vadd.f32 %v5979_v32, %v3469_v34  ;;  %v5040_v39 = vpop.f32.mrb[93].mxu0  ;;  %v3533_v60 = vadd.f32 %v5991_v26, %v3532_v38 }
 0x72d   :  { %v3318_v54 = vadd.f32 1.0, %v5325_v35  ;;  %v5048_v43 = vpop.f32.mrb[93].mxu1  ;;  %v3472_v63 = vpop.f32.mrb[94].mxu0  ;;  %v3565_v35 = vld [vmem:[#allocation2 + $0xe] sm:$0x3] }
 0x72e   :  { %v3545_v44 = vadd.f32 %v3470_v36, %v3341_v40  ;;  %v3535_v10 = vpop.f32.mrb[94].mxu1  ;;  %v5041_v45 = vpop.f32.mrb[95].mxu0  ;;  %v3567_v63 = vld [vmem:[#allocation2 + $0x1e] sm:$0x3] }
 0x72f   :  { %5330 = vrcp.f32 %v3318_v54  ;;  %v5049_v16 = vpop.f32.mrb[95].mxu1  ;;  %v5327_v48 = vpop.eup %5326 }
 0x730   :  { %v4466_v47 = vmul.f32 -1.442695, %v3545_v44  ;;  %v3325_v14 = vadd.f32 1.0, %v5327_v48 }
 0x732   :  { %5332 = vpow2.f32 %v4466_v47 }
 0x734   :  { %v5329_v50 = vpop.eup %5328 }
 0x735   :  { %v3542_v28 = vadd.f32 1.0, %v5329_v50 }
 0x737   :  { %5334 = vrcp.f32 %v3542_v28 }
 0x738   :  { %5336 = vrcp.f32 %v3325_v14  ;;  %v3787_v14 = vld [vmem:[#allocation2 + $0x30] sm:$0x3] }
 0x739   :  { %v5331_v53 = vpop.eup %5330 }
 0x73a   :  { %v3328_v55 = vmul.f32 %v5331_v53, %v3309_v21 }
 0x73c   :  { %v5333_v58 = vpop.eup %5332  ;;  %v3329_v6 = vadd.f32 %v3328_v55, %v3120_v56 }
 0x73d   :  { %v3549_v59 = vadd.f32 1.0, %v5333_v58 }
 0x73e   :  { %5338 = vtanh.f32 %v3329_v6 }
 0x73f   :  { %5340 = vrcp.f32 %v3549_v59 }
 0x741   :  { %v5335_v7 = vpop.eup %5334 }
 0x742   :  { %v3552_v1 = vmul.f32 %v5335_v7, %v3533_v60  ;;  %v5337_v2 = vpop.eup %5336 }
 0x743   :  { %v3331_v5 = vsub.f32 1.0, %v5337_v2  ;;  %v3333_v9 = vmul.f32 %v5337_v2, %v6088_v41 }
 0x744   :  { %v3553_v4 = vadd.f32 %v3552_v1, %v3344_v3  ;;  %v3790_v1 = vld [vmem:[#allocation2 + $0x40] sm:$0x3] }
 0x746   :  { %5342 = vtanh.f32 %v3553_v4 }
 0x748   :  { %v5339_v8 = vpop.eup %5338 }
 0x749   :  { %v3332_v11 = vmul.f32 %v5339_v8, %v3331_v5  ;;  %v5341_v42 = vpop.eup %5340 }
 0x74a   :  { %v3555_v19 = vsub.f32 1.0, %v5341_v42  ;;  %v3557_v22 = vmul.f32 %v5341_v42, %v6118_v52  ;;  %v5201_v52 = vld [vmem:[%s6264_s2 + $0x50] sm:$0xff]  }
 0x74b   :  { %v6181_v12 = vadd.f32 %v3333_v9, %v3332_v11 }
 0x74d   :  { %4437 = vst.msk [vmem:[%s6267_s5 + $0xc] sm:$0x3] %vm616_vm3, %v6181_v12  ;;  %v3570_v41 = vpack.c.bf16 %v6181_v12, %v6181_v12 }
 0x74f   :  { %5055 = vmatmul.mubr.msk.bf16.vlgmr.msra.gmra.mrb[96].mxu0 %vm84_vm2, %v3570_v41  ;;  %5063 = vmatmul.mubr.msk.bf16.vlgmr.msra.gmra.mrb[96].mxu1 %vm84_vm2, %v3570_v41 }
 0x750   :  { %5067 = vmatpush3.bf16.msra.mxu0 %v5196_v13  ;;  %5075 = vmatpush3.bf16.msra.mxu1 %v5197_v23  ;;  %v5343_v20 = vpop.eup %5342 }
 0x751   :  { %5068 = vmatprep.subr.bf16.mxu0 %v5364_v0  ;;  %5076 = vmatprep.subr.bf16.mxu1 %v5364_v0  ;;  %v3556_v46 = vmul.f32 %v5343_v20, %v3555_v19 }
 0x752   :  { %5070 = vmatprep.mubr.msk.bf16.mxu0 %vm5365_vm0, %v5364_v0  ;;  %5078 = vmatprep.mubr.msk.bf16.mxu1 %vm5365_vm0, %v5364_v0 }
 0x753   :  { %v6211_v51 = vadd.f32 %v3557_v22, %v3556_v46 }
 0x754   :  { %5069 = vmatpush3.bf16.msra.mxu0 %v5198_v15  ;;  %5077 = vmatpush3.bf16.msra.mxu1 %v5199_v17  ;;  %v3569_v17 = vld [vmem:[#allocation2 + $0x2e] sm:$0x3] }
 0x755   :  { %5082 = vmatprep.subr.bf16.mxu0 %v5364_v0  ;;  %5090 = vmatprep.subr.bf16.mxu1 %v5364_v0  ;;  %v3794_v25 = vpack.c.bf16 %v6211_v51, %v6211_v51 }
 0x756   :  { %3560 = vrot.lane.b32.xlu0 %v6211_v51, %s5367_s22 }
 0x757   :  { %5071 = vmatmul.mubr.msk.bf16.vlgmr.msra.gmra.mrb[100].mxu0 %vm84_vm2, %v3570_v41  ;;  %5079 = vmatmul.mubr.msk.bf16.vlgmr.msra.gmra.mrb[100].mxu1 %vm84_vm2, %v3794_v25 }
 0x758   :  { %5083 = vmatpush3.bf16.msra.mxu0 %v5200_v24  ;;  %5091 = vmatpush3.bf16.msra.mxu1 %v5201_v52 }
 0x759   :  { %5084 = vmatprep.subr.bf16.mxu0 %v5364_v0  ;;  %5092 = vmatprep.subr.bf16.mxu1 %v5364_v0 }
 0x75a   :  { %5086 = vmatprep.mubr.msk.bf16.mxu0 %vm5365_vm0, %v5364_v0  ;;  %5094 = vmatprep.mubr.msk.bf16.mxu1 %vm5365_vm0, %v5364_v0 }
 0x75c   :  { %5085 = vmatpush3.bf16.msra.mxu0 %v5202_v37  ;;  %5093 = vmatpush3.bf16.msra.mxu1 %v5203_v27  ;;  %v3793_v37 = vld [vmem:[#allocation2 + $0x50] sm:$0x3] }
 0x75f   :  { %5087 = vmatmul.mubr.msk.bf16.vlgmr.msra.gmra.mrb[104].mxu0 %vm84_vm2, %v3794_v25  ;;  %5095 = vmatmul.mubr.msk.bf16.vlgmr.msra.gmra.mrb[104].mxu1 %vm84_vm2, %v3794_v25 }
 0x7c8   :  { %v3561_v29 = vpop.permute.xlu0 %3560 }
 0x7c9   :  { %4467 = vst.msk [vmem:[%s6267_s5 + $0x2] sm:$0x3] %vm850_vm4, %v3561_v29 }
 0x822   :  { %v3631_v57 = vpop.f32.mrb[96].mxu0  ;;  %v3694_v30 = vpop.f32.mrb[96].mxu1 }
 0x823   :  { %v3632_v31 = vadd.f32 %v5961_v61, %v3631_v57  ;;  %v5056_v33 = vpop.f32.mrb[97].mxu0  ;;  %v5064_v34 = vpop.f32.mrb[97].mxu1  ;;  %v3695_v0 = vadd.f32 %v5966_v62, %v3694_v30 }
 0x824   :  { %v3634_v36 = vpop.f32.mrb[98].mxu0  ;;  %v3697_v38 = vpop.f32.mrb[98].mxu1 }
 0x825   :  { %v3763_v39 = vadd.f32 %v3632_v31, %v3565_v35  ;;  %v5057_v54 = vpop.f32.mrb[99].mxu0  ;;  %v5065_v40 = vpop.f32.mrb[99].mxu1  ;;  %v3770_v44 = vadd.f32 %v3695_v0, %v3567_v63 }
 0x827   :  { %v4490_v43 = vmul.f32 -1.442695, %v3763_v39  ;;  %v4491_v47 = vmul.f32 -1.442695, %v3770_v44 }
 0x829   :  { %5344 = vpow2.f32 %v4490_v43 }
 0x82a   :  { %v3757_v10 = vpop.f32.mrb[100].mxu0  ;;  %v3855_v45 = vpop.f32.mrb[100].mxu1  ;;  %5346 = vpow2.f32 %v4491_v47 }
 0x82b   :  { %v5072_v16 = vpop.f32.mrb[101].mxu0  ;;  %v3856_v61 = vadd.f32 %v5973_v18, %v3855_v45  ;;  %v5080_v48 = vpop.f32.mrb[101].mxu1  ;;  %v3758_v41 = vadd.f32 %v5985_v49, %v3757_v10 }
 0x82c   :  { %v3760_v50 = vpop.f32.mrb[102].mxu0  ;;  %v3858_v28 = vpop.f32.mrb[102].mxu1 }
 0x82d   :  { %v5073_v62 = vpop.f32.mrb[103].mxu0  ;;  %v3987_v21 = vadd.f32 %v3856_v61, %v3787_v14  ;;  %v5081_v53 = vpop.f32.mrb[103].mxu1 }
 0x82f   :  { %v4520_v55 = vmul.f32 -1.442695, %v3987_v21 }
 0x831   :  { %5348 = vpow2.f32 %v4520_v55 }
 0x832   :  { %v3918_v56 = vpop.f32.mrb[104].mxu0  ;;  %v3981_v59 = vpop.f32.mrb[104].mxu1 }
 0x833   :  { %v5345_v58 = vpop.eup %5344  ;;  %v3919_v6 = vadd.f32 %v5979_v32, %v3918_v56  ;;  %v5088_v60 = vpop.f32.mrb[105].mxu0  ;;  %v3982_v22 = vadd.f32 %v5991_v26, %v3981_v59 }
 0x834   :  { %v3767_v7 = vadd.f32 1.0, %v5345_v58  ;;  %v5096_v2 = vpop.f32.mrb[105].mxu1  ;;  %v3921_v18 = vpop.f32.mrb[106].mxu0 }
 0x835   :  { %v3994_v3 = vadd.f32 %v3919_v6, %v3790_v1  ;;  %v3984_v4 = vpop.f32.mrb[106].mxu1  ;;  %v5089_v5 = vpop.f32.mrb[107].mxu0 }
 0x836   :  { %5350 = vrcp.f32 %v3767_v7  ;;  %v5097_v8 = vpop.f32.mrb[107].mxu1  ;;  %v5347_v11 = vpop.eup %5346 }
 0x837   :  { %v4521_v9 = vmul.f32 -1.442695, %v3994_v3  ;;  %v3774_v23 = vadd.f32 1.0, %v5347_v11 }
 0x839   :  { %5352 = vpow2.f32 %v4521_v9 }
 0x83b   :  { %v5349_v13 = vpop.eup %5348 }
 0x83c   :  { %v3991_v42 = vadd.f32 1.0, %v5349_v13 }
 0x83e   :  { %5354 = vrcp.f32 %v3991_v42 }
 0x83f   :  { %5356 = vrcp.f32 %v3774_v23 }
 0x840   :  { %v5351_v32 = vpop.eup %5350 }
 0x841   :  { %v3777_v15 = vmul.f32 %v5351_v32, %v3758_v41 }
 0x843   :  { %v5353_v19 = vpop.eup %5352  ;;  %v3778_v20 = vadd.f32 %v3777_v15, %v3569_v17 }
 0x844   :  { %v3998_v46 = vadd.f32 1.0, %v5353_v19 }
 0x845   :  { %5358 = vtanh.f32 %v3778_v20 }
 0x846   :  { %5360 = vrcp.f32 %v3998_v46 }
 0x848   :  { %v5355_v24 = vpop.eup %5354 }
 0x849   :  { %v4001_v52 = vmul.f32 %v5355_v24, %v3982_v22  ;;  %v5357_v25 = vpop.eup %5356 }
 0x84a   :  { %v3780_v29 = vsub.f32 1.0, %v5357_v25  ;;  %v3782_v57 = vmul.f32 %v5357_v25, %v6181_v12 }
 0x84b   :  { %v4002_v27 = vadd.f32 %v4001_v52, %v3793_v37 }
 0x84d   :  { %5362 = vtanh.f32 %v4002_v27 }
 0x84f   :  { %v5359_v49 = vpop.eup %5358 }
 0x850   :  { %v3781_v30 = vmul.f32 %v5359_v49, %v3780_v29  ;;  %v5361_v33 = vpop.eup %5360 }
 0x851   :  { %v4004_v26 = vsub.f32 1.0, %v5361_v33  ;;  %v4006_v0 = vmul.f32 %v5361_v33, %v6211_v51 }
 0x852   :  { %v3783_v31 = vadd.f32 %v3782_v57, %v3781_v30 }
 0x854   :  { %4492 = vst.msk [vmem:[%s6267_s5 + $0xe] sm:$0x3] %vm616_vm3, %v3783_v31 }
 0x857   :  { %v5363_v34 = vpop.eup %5362 }
 0x858   :  { %v4005_v35 = vmul.f32 %v5363_v34, %v4004_v26 }
 0x85a   :  { %v4007_v36 = vadd.f32 %v4006_v0, %v4005_v35 }
 0x85c   :  { %4009 = vrot.lane.b32.xlu1 %v4007_v36, %s5367_s22 }
 0x8ce   :  { %v4010_v38 = vpop.permute.xlu1 %4009 }
 0x8cf   :  { %4012 = vst.msk [vmem:[%s6267_s5] sm:$0x3] %vm850_vm4, %v4010_v38 }

</bundles_post_ra>
